<compile_context>
chip_gen: v6e
topology: v6e:2x2x1
jax: 0.10.0
libtpu: 0.0.40
codegen_flags: <defaults>
</compile_context>

<pallas_src>
import math

import numpy as np
import jax
import jax.numpy as jnp
from jax.experimental import pallas as pl
from jax.experimental.pallas import tpu as pltpu


# Safe on every chip (v5e/v6e 128 MiB, v7x 64 MiB physical).  Can be raised on
# v5e/v6e for larger-than-toy shapes.
_VMEM_LIMIT = 32 * 1024 * 1024


def _round_up(a, b):
    return ((a + b - 1) // b) * b


def _cparams(*dims):
    if dims:
        return pltpu.CompilerParams(dimension_semantics=dims,
                                    vmem_limit_bytes=_VMEM_LIMIT)
    return pltpu.CompilerParams(vmem_limit_bytes=_VMEM_LIMIT)


def _default_tk():
    # v6e/v7x MXUs are 256 deep; v5e is 128 deep.
    try:
        kind = jax.devices()[0].device_kind.lower()
    except Exception:
        kind = ""
    return 128 if "v5" in kind else 256


def _pick_col_tiling(ncols, cap=2048, min_blocks=2):
    """Pick a lane tile (multiple of 128) and padded width for a column axis.

    Prefers a tile that divides the 128-rounded width exactly (no padding) with
    between `min_blocks` and 8 grid steps, so v7x's two TensorCores both get
    work without exploding per-grid-step overhead.
    """
    n128 = _round_up(max(ncols, 1), 128)
    if n128 // 128 < min_blocks:
        return min(n128, cap), n128
    max_blocks = max(8, min_blocks)
    limit = min(cap, n128)
    divisors = [t for t in range(128, limit + 1, 128) if n128 % t == 0]
    good = [t for t in divisors if min_blocks <= n128 // t <= max_blocks]
    if good:
        return max(good), n128
    nblocks = max(min_blocks, -(-n128 // cap))
    t = min(cap, _round_up(-(-ncols // nblocks), 128))
    return t, t * nblocks


# ---------------------------------------------------------------------------
# Adaptive average pooling: one lane-dense matmul over all (n, c) slices
# ---------------------------------------------------------------------------

def _adaptive_pool_matrix(out_size, in_size):
    P = np.zeros((out_size, in_size), dtype=np.float32)
    for i in range(out_size):
        s = (i * in_size) // out_size
        e = math.ceil((i + 1) * in_size / out_size)
        P[i, s:e] = 1.0 / (e - s)
    return P


def _pool_matmul_kernel(x_ref, b_ref, o_ref):
    o_ref[...] = jnp.dot(x_ref[...], b_ref[...],
                         preferred_element_type=jnp.float32)


def adaptive_avg_pool2d_cnhw(x, out_hw):
    """AdaptiveAvgPool2d: (N,C,H,W) -> (C,N,Ho,Wo) channel-major output."""
    N, C, H, W = x.shape
    Ho, Wo = out_hw
    ph = _adaptive_pool_matrix(Ho, H)                    # (Ho, H)
    pw = _adaptive_pool_matrix(Wo, W)                    # (Wo, W)
    B = np.kron(ph, pw).T                                # (H*W, Ho*Wo)
    Kp = H * W
    Nout = Ho * Wo
    M = C * N

    m_pad = _round_up(M, 8)
    tn, n_pad = _pick_col_tiling(Nout, cap=2048, min_blocks=2)

    xm = x.transpose(1, 0, 2, 3).reshape(M, Kp).astype(jnp.bfloat16)
    xm = jnp.pad(xm, ((0, m_pad - M), (0, 0)))
    Bm = jnp.pad(jnp.asarray(B, jnp.bfloat16), ((0, 0), (0, n_pad - Nout)))

    out = pl.pallas_call(
        _pool_matmul_kernel,
        out_shape=jax.ShapeDtypeStruct((m_pad, n_pad), jnp.float32),
        grid=(n_pad // tn,),
        in_specs=[pl.BlockSpec((m_pad, Kp), lambda j: (0, 0)),
                  pl.BlockSpec((Kp, tn), lambda j: (0, j))],
        out_specs=pl.BlockSpec((m_pad, tn), lambda j: (0, j)),
        compiler_params=_cparams("parallel"),
    )(xm, Bm)
    return out[:M, :Nout].reshape(C, N, Ho, Wo)


# ---------------------------------------------------------------------------
# Fused conv (valid, stride 1) + 2x2/2 maxpool + ReLU  (channel-major layout)
# ---------------------------------------------------------------------------

def _conv_pool_relu_kernel(w_ref, b_ref, p_ref, o_ref, acc_ref):
    k = pl.program_id(1)

    @pl.when(k == 0)
    def _init():
        acc_ref[...] = jnp.zeros_like(acc_ref)

    # ONE wide matmul per k-step covering all 4 pooling phases.
    acc_ref[...] = acc_ref[...] + jnp.dot(
        w_ref[...], p_ref[...], preferred_element_type=jnp.float32)

    @pl.when(k == pl.num_programs(1) - 1)
    def _finalize():
        tn = o_ref.shape[1]
        a = acc_ref[...]
        m = jnp.maximum(jnp.maximum(a[:, 0 * tn:1 * tn], a[:, 1 * tn:2 * tn]),
                        jnp.maximum(a[:, 2 * tn:3 * tn], a[:, 3 * tn:4 * tn]))
        o_ref[...] = jnp.maximum(m + b_ref[...], 0.0)


def conv2d_maxpool_relu(x_cnhw, w, b, *, tk=None, tn_cap=2048):
    """relu(maxpool2x2(conv2d(x, w) + b)).

    x_cnhw: (Cin, N, H, W)   w: (Cout, Cin, kh, kw)   ->   (Cout, N, Hp, Wp)
    """
    Cin, N, Hin, Win = x_cnhw.shape
    Cout, Cin2, kh, kw = w.shape
    assert Cin == Cin2
    Ho, Wo = Hin - kh + 1, Win - kw + 1
    assert Ho % 2 == 0 and Wo % 2 == 0, "2x2 maxpool needs even conv output"
    Hp, Wp = Ho // 2, Wo // 2
    K = Cin * kh * kw
    ncols = N * Hp * Wp
    if tk is None:
        tk = _default_tk()

    tn, n_pad = _pick_col_tiling(ncols, cap=tn_cap, min_blocks=2)
    n_blocks = n_pad // tn
    k_pad = _round_up(K, tk)

    # 4-phase im2col (one phase per 2x2 pooling offset), built in XLA.
    # TODO(synk): build patches per k-tile inside the kernel (shifted pl.ds
    #             loads from a VMEM-resident input tile) to avoid the ~kh*kw x
    #             HBM inflation at production image sizes.
    phases = []
    for qy in (0, 1):
        for qx in (0, 1):
            views = []
            for dy in range(kh):
                for dx in range(kw):
                    views.append(
                        x_cnhw[:, :,
                               qy + dy: qy + dy + 2 * Hp: 2,
                               qx + dx: qx + dx + 2 * Wp: 2])  # (Cin,N,Hp,Wp)
            # rows ordered (dy, dx, ci); cols ordered (n, hp, wp)
            phases.append(jnp.stack(views, axis=0).reshape(K, ncols))
    patches = jnp.stack(phases, axis=0)                        # (4, K, ncols)
    patches = jnp.pad(patches, ((0, 0), (0, k_pad - K), (0, n_pad - ncols)))
    # Interleave the 4 phases at lane-tile granularity: column block j of width
    # 4*tn holds the SAME pooled columns of all 4 phases, so the 2x2 max is 4
    # static, 128-aligned lane slices of the accumulator in the finalize.
    patches = patches.reshape(4, k_pad, n_blocks, tn)
    patches = patches.transpose(1, 2, 0, 3).reshape(k_pad, n_blocks * 4 * tn)
    patches = patches.astype(jnp.bfloat16)

    wmat = w.transpose(0, 2, 3, 1).reshape(Cout, K).astype(jnp.bfloat16)
    wmat = jnp.pad(wmat, ((0, 0), (0, k_pad - K)))
    bias = b.reshape(Cout, 1).astype(jnp.float32)

    grid = (n_blocks, k_pad // tk)
    out = pl.pallas_call(
        _conv_pool_relu_kernel,
        out_shape=jax.ShapeDtypeStruct((Cout, n_pad), jnp.float32),
        grid=grid,
        in_specs=[pl.BlockSpec((Cout, tk), lambda j, k: (0, k)),
                  pl.BlockSpec((Cout, 1), lambda j, k: (0, 0)),
                  pl.BlockSpec((tk, 4 * tn), lambda j, k: (k, j))],
        out_specs=pl.BlockSpec((Cout, tn), lambda j, k: (0, j)),
        scratch_shapes=[pltpu.VMEM((Cout, 4 * tn), jnp.float32)],
        compiler_params=_cparams("parallel", "arbitrary"),
    )(wmat, bias, patches)

    return out[:, :ncols].reshape(Cout, N, Hp, Wp)


# ---------------------------------------------------------------------------
# Fused spatial-pyramid max pooling + fc_loc MLP  ->  theta (N, 6)
# ---------------------------------------------------------------------------

def _spp_bins(levels, H, W):
    bins = []
    for lvl in levels:
        for i in range(lvl):
            ys = (i * H) // lvl
            ye = math.ceil((i + 1) * H / lvl)
            for j in range(lvl):
                xs = (j * W) // lvl
                xe = math.ceil((j + 1) * W / lvl)
                bins.append((ys, ye, xs, xe))
    return bins


def _make_spp_fc_kernel(bins):
    def kernel(x_ref, w1t_ref, b1_ref, w2t_ref, b2_ref, o_ref):
        x = x_ref[...]                                    # (N, C, H, W) f32
        cols = []
        for (ys, ye, xs, xe) in bins:
            m = jnp.max(x[:, :, ys:ye, xs:xe], axis=3)    # (N, C, hh)
            cols.append(jnp.max(m, axis=2))               # (N, C)
        feats = jnp.concatenate(cols, axis=1)             # (N, n_bins*C)
        h = jnp.dot(feats, w1t_ref[...],
                    preferred_element_type=jnp.float32) + b1_ref[...]
        h = jnp.maximum(h, 0.0)
        o_ref[...] = jnp.dot(h, w2t_ref[...],
                             preferred_element_type=jnp.float32) + b2_ref[...]
    return kernel


def spp_fc_loc(xs_cnhw, params, levels):
    """SPP (adaptive max pyramid) + Linear(F,32) + ReLU + Linear(32,6)."""
    C, N, H, W = xs_cnhw.shape
    bins = _spp_bins(levels, H, W)
    F = len(bins) * C
    assert F == params["fc1_w"].shape[1]

    # Permute fc1's input columns from PyTorch's (level, channel, bin) flatten
    # order to the kernel's (bin-major, channel-minor) feature order.
    perm = np.zeros((F,), dtype=np.int64)
    off, bb = 0, 0
    for lvl in levels:
        nb = lvl * lvl
        for bwithin in range(nb):
            for c in range(C):
                perm[bb * C + c] = off + c * nb + bwithin
            bb += 1
        off += C * nb

    w1t = params["fc1_w"][:, perm].T                      # (F, 32)
    b1 = params["fc1_b"].reshape(1, -1)
    w2t = params["fc2_w"].T                               # (32, 6)
    b2 = params["fc2_b"].reshape(1, -1)

    x_nchw = xs_cnhw.transpose(1, 0, 2, 3)                # tiny (N, C, H, W)
    return pl.pallas_call(
        _make_spp_fc_kernel(bins),
        out_shape=jax.ShapeDtypeStruct((N, 6), jnp.float32),
        compiler_params=_cparams(),
    )(x_nchw, w1t, b1, w2t, b2)


# ---------------------------------------------------------------------------
# affine_grid + grid_sample (align_corners=True, zeros padding)
# ---------------------------------------------------------------------------

def _bilerp_kernel(g_ref, w_ref, o_ref):
    acc = g_ref[0, 0] * w_ref[0, 0]
    for q in range(1, 4):
        acc = acc + g_ref[q, 0] * w_ref[q, 0]
    o_ref[0] = acc


def _bilinear_corners(theta, H, W):
    xs = jnp.linspace(-1.0, 1.0, W)
    ys = jnp.linspace(-1.0, 1.0, H)
    yy, xx = jnp.meshgrid(ys, xs, indexing="ij")
    base = jnp.stack([xx, yy, jnp.ones_like(xx)], axis=-1).reshape(-1, 3)  # (P,3)
    g = jnp.einsum("pk,njk->npj", base, theta)                             # (N,P,2)
    ix = (g[..., 0] + 1.0) * 0.5 * (W - 1)
    iy = (g[..., 1] + 1.0) * 0.5 * (H - 1)
    x0 = jnp.floor(ix)
    y0 = jnp.floor(iy)
    x1, y1 = x0 + 1.0, y0 + 1.0
    wx1, wy1 = ix - x0, iy - y0
    wx0, wy0 = 1.0 - wx1, 1.0 - wy1

    idxs, wts = [], []
    for xc, yc, wgt in ((x0, y0, wx0 * wy0), (x1, y0, wx1 * wy0),
                        (x0, y1, wx0 * wy1), (x1, y1, wx1 * wy1)):
        valid = ((xc >= 0) & (xc <= W - 1) &
                 (yc >= 0) & (yc <= H - 1)).astype(jnp.float32)
        xi = jnp.clip(xc, 0, W - 1).astype(jnp.int32)
        yi = jnp.clip(yc, 0, H - 1).astype(jnp.int32)
        idxs.append(yi * W + xi)
        wts.append(wgt * valid)
    return jnp.stack(idxs, axis=0), jnp.stack(wts, axis=0)   # (4, N, P) each


def grid_sample_bilinear(x, theta):
    N, C, H, W = x.shape
    P = H * W
    idx, wts = _bilinear_corners(theta, H, W)
    x_flat = x.reshape(N, C, P)

    # TODO(synk): 4 corner gathers stay in XLA (per-lane dynamic gather is not
    #             expressible as a BlockSpec); only the combine runs in Pallas.
    gathered = []
    for q in range(4):
        iq = jnp.broadcast_to(idx[q][:, None, :], (N, C, P))
        gathered.append(jnp.take_along_axis(x_flat, iq, axis=2))
    g = jnp.stack(gathered, axis=0)                       # (4, N, C, P)
    w4 = wts[:, :, None, :]                               # (4, N, 1, P)  (no C bcast)

    min_blocks = 1 if N >= 2 else 2
    tp, p_pad = _pick_col_tiling(P, cap=512, min_blocks=min_blocks)
    g = jnp.pad(g, ((0, 0), (0, 0), (0, 0), (0, p_pad - P)))
    w4 = jnp.pad(w4, ((0, 0), (0, 0), (0, 0), (0, p_pad - P)))

    out = pl.pallas_call(
        _bilerp_kernel,
        out_shape=jax.ShapeDtypeStruct((N, C, p_pad), jnp.float32),
        grid=(N, p_pad // tp),
        in_specs=[pl.BlockSpec((4, 1, C, tp), lambda n, j: (0, n, 0, j)),
                  pl.BlockSpec((4, 1, 1, tp), lambda n, j: (0, n, 0, j))],
        out_specs=pl.BlockSpec((1, C, tp), lambda n, j: (n, 0, j)),
        compiler_params=_cparams("parallel", "parallel"),
    )(g, w4)
    return out[:, :, :P].reshape(N, C, H, W)


# ---------------------------------------------------------------------------
# STNLayer parameters + forward
# ---------------------------------------------------------------------------

def init_params(key):
    k1, k2, k3 = jax.random.split(key, 3)
    linear_input_size = sum(4 ** i * 10 for i in range(3))   # = 210
    return {
        "conv1_w": 0.05 * jax.random.normal(k1, (24, 3, 7, 7), jnp.float32),
        "conv1_b": jnp.zeros((24,), jnp.float32),
        "conv2_w": 0.05 * jax.random.normal(k2, (10, 24, 5, 5), jnp.float32),
        "conv2_b": jnp.zeros((10,), jnp.float32),
        "fc1_w": 0.05 * jax.random.normal(k3, (32, linear_input_size), jnp.float32),
        "fc1_b": jnp.zeros((32,), jnp.float32),
        # torch: fc_loc[2].weight zeroed, bias set to identity affine transform
        "fc2_w": jnp.zeros((6, 32), jnp.float32),
        "fc2_b": jnp.array([1.0, 0.0, 0.0, 0.0, 1.0, 0.0], jnp.float32),
    }


def stn_forward(params, x, spp_num_levels=3, adaptive_pooling_shape=(54, 54)):
    N = x.shape[0]
    # localization network, kept in channel-major (C, N, H, W) layout end-to-end
    xs = adaptive_avg_pool2d_cnhw(x, adaptive_pooling_shape)             # (3,N,54,54)
    xs = conv2d_maxpool_relu(xs, params["conv1_w"], params["conv1_b"])   # (24,N,24,24)
    xs = conv2d_maxpool_relu(xs, params["conv2_w"], params["conv2_b"])   # (10,N,10,10)
    # SPP + fc_loc fused
    levels = tuple(2 ** i for i in range(spp_num_levels))
    theta = spp_fc_loc(xs, params, levels).reshape(N, 2, 3)
    # affine_grid + bilinear grid_sample on the original input
    return grid_sample_bilinear(x, theta)


if __name__ == "__main__":
    key = jax.random.PRNGKey(0)
    pkey, xkey = jax.random.split(key)
    params = init_params(pkey)
    x = jax.random.normal(xkey, (2, 3, 16, 16), jnp.float32)

    fwd = jax.jit(stn_forward)
    out = jax.block_until_ready(fwd(params, x))

    assert out.shape == x.shape and out.dtype == jnp.float32
    assert bool(jnp.isfinite(out).all())
    # fc_loc's last layer is initialized to the identity affine transform, so
    # the STN output must (numerically) reproduce its input.
    assert float(jnp.max(jnp.abs(out - x))) < 1e-2
    print("KERNEL_OK")
</pallas_src>

<mosaic_0001>
module attributes {stable_mosaic.version = 11 : i64} {
  func.func @_pool_matmul_kernel(%arg0: i32, %arg1: memref<8x256xbf16, #tpu.memory_space<vmem>>, %arg2: memref<256x1536xbf16, #tpu.memory_space<vmem>>, %arg3: memref<8x1536xf32, #tpu.memory_space<vmem>>) attributes {dimension_semantics = [#tpu.dimension_semantics<parallel>], iteration_bounds = array<i64: 2>, scalar_prefetch = 0 : i64, scratch_operands = 0 : i64, tpu.core_type = #tpu.core_type<tc>, window_params = [{pipeline_mode = #tpu.pipeline_mode<synchronous>, transform_indices = @transform_0, window_bounds = array<i64: 8, 256>}, {transform_indices = @transform_1, window_bounds = array<i64: 256, 1536>}, {transform_indices = @transform_2, window_bounds = array<i64: 8, 1536>}]} {
    %c0 = arith.constant 0 : index
    %c0_0 = arith.constant 0 : index
    %0 = vector.load %arg1[%c0, %c0_0] : memref<8x256xbf16, #tpu.memory_space<vmem>>, vector<8x256xbf16>
    %c0_1 = arith.constant 0 : index
    %c0_2 = arith.constant 0 : index
    %1 = vector.load %arg2[%c0_1, %c0_2] : memref<256x1536xbf16, #tpu.memory_space<vmem>>, vector<256x1536xbf16>
    %cst = arith.constant dense<0.000000e+00> : vector<8x1536xf32>
    %2 = tpu.matmul %0, %1, %cst {dimension_numbers = #tpu.dot_dimension_numbers<[1], [0], [0], [1], [0, 0, 1, 1], [], []>} : vector<8x256xbf16>, vector<256x1536xbf16>, vector<8x1536xf32> -> vector<8x1536xf32>
    %c0_3 = arith.constant 0 : index
    %c0_4 = arith.constant 0 : index
    %3 = vector.load %arg3[%c0_3, %c0_4] : memref<8x1536xf32, #tpu.memory_space<vmem>>, vector<8x1536xf32>
    tpu.vector_store %arg3[%c0_3, %c0_4], %2 {strides = array<i32>} : memref<8x1536xf32, #tpu.memory_space<vmem>>, vector<8x1536xf32>,
    return
  }
  func.func @transform_0(%arg0: i32) -> (i32, i32) {
    %c0_i32 = arith.constant 0 : i32
    %c0_i32_0 = arith.constant 0 : i32
    %c0_i32_1 = arith.constant 0 : i32
    return %c0_i32, %c0_i32_0 : i32, i32
  }
  func.func @transform_1(%arg0: i32) -> (i32, i32) {
    %c0_i32 = arith.constant 0 : i32
    %c0_i32_0 = arith.constant 0 : i32
    return %c0_i32, %arg0 : i32, i32
  }
  func.func @transform_2(%arg0: i32) -> (i32, i32) {
    %c0_i32 = arith.constant 0 : i32
    %c0_i32_0 = arith.constant 0 : i32
    return %c0_i32, %arg0 : i32, i32
  }
}

module attributes {stable_mosaic.version = 11 : i64} {
  func.func @_conv_pool_relu_kernel(%arg0: i32, %arg1: i32, %arg2: memref<24x256xbf16, #tpu.memory_space<vmem>>, %arg3: memref<24x1xf32, #tpu.memory_space<vmem>>, %arg4: memref<256x1536xbf16, #tpu.memory_space<vmem>>, %arg5: memref<24x384xf32, #tpu.memory_space<vmem>>, %arg6: memref<24x1536xf32, #tpu.memory_space<vmem>>) attributes {dimension_semantics = [#tpu.dimension_semantics<parallel>, #tpu.dimension_semantics<arbitrary>], iteration_bounds = array<i64: 3, 1>, scalar_prefetch = 0 : i64, scratch_operands = 1 : i64, tpu.core_type = #tpu.core_type<tc>, window_params = [{transform_indices = @transform_0, window_bounds = array<i64: 24, 256>}, {pipeline_mode = #tpu.pipeline_mode<synchronous>, transform_indices = @transform_1, window_bounds = array<i64: 24, 1>}, {transform_indices = @transform_2, window_bounds = array<i64: 256, 1536>}, {transform_indices = @transform_3, window_bounds = array<i64: 24, 384>}]} {
    %c0_i32 = arith.constant 0 : i32
    %0 = arith.cmpi eq, %arg1, %c0_i32 : i32
    %1 = arith.extui %0 : i1 to i32
    %c0_i32_0 = arith.constant 0 : i32
    %2 = arith.cmpi ne, %1, %c0_i32_0 : i32
    scf.if %2 {
      %cst_10 = arith.constant 0.000000e+00 : f32
      %12 = vector.broadcast %cst_10 : f32 to vector<24x1536xf32>
      %c0_11 = arith.constant 0 : index
      %c0_12 = arith.constant 0 : index
      %13 = vector.load %arg6[%c0_11, %c0_12] : memref<24x1536xf32, #tpu.memory_space<vmem>>, vector<24x1536xf32>
      tpu.vector_store %arg6[%c0_11, %c0_12], %12 {strides = array<i32>} : memref<24x1536xf32, #tpu.memory_space<vmem>>, vector<24x1536xf32>,
    } else {
    }
    %c0 = arith.constant 0 : index
    %c0_1 = arith.constant 0 : index
    %3 = vector.load %arg6[%c0, %c0_1] : memref<24x1536xf32, #tpu.memory_space<vmem>>, vector<24x1536xf32>
    %c0_2 = arith.constant 0 : index
    %c0_3 = arith.constant 0 : index
    %4 = vector.load %arg2[%c0_2, %c0_3] : memref<24x256xbf16, #tpu.memory_space<vmem>>, vector<24x256xbf16>
    %c0_4 = arith.constant 0 : index
    %c0_5 = arith.constant 0 : index
    %5 = vector.load %arg4[%c0_4, %c0_5] : memref<256x1536xbf16, #tpu.memory_space<vmem>>, vector<256x1536xbf16>
    %cst = arith.constant dense<0.000000e+00> : vector<24x1536xf32>
    %6 = tpu.matmul %4, %5, %cst {dimension_numbers = #tpu.dot_dimension_numbers<[1], [0], [0], [1], [0, 0, 1, 1], [], []>} : vector<24x256xbf16>, vector<256x1536xbf16>, vector<24x1536xf32> -> vector<24x1536xf32>
    %7 = arith.addf %3, %6 : vector<24x1536xf32>
    %c0_6 = arith.constant 0 : index
    %c0_7 = arith.constant 0 : index
    %8 = vector.load %arg6[%c0_6, %c0_7] : memref<24x1536xf32, #tpu.memory_space<vmem>>, vector<24x1536xf32>
    tpu.vector_store %arg6[%c0_6, %c0_7], %7 {strides = array<i32>} : memref<24x1536xf32, #tpu.memory_space<vmem>>, vector<24x1536xf32>,
    %c0_i32_8 = arith.constant 0 : i32
    %9 = arith.cmpi eq, %arg1, %c0_i32_8 : i32
    %10 = arith.extui %9 : i1 to i32
    %c0_i32_9 = arith.constant 0 : i32
    %11 = arith.cmpi ne, %10, %c0_i32_9 : i32
    scf.if %11 {
      %c0_10 = arith.constant 0 : index
      %c0_11 = arith.constant 0 : index
      %12 = vector.load %arg6[%c0_10, %c0_11] : memref<24x1536xf32, #tpu.memory_space<vmem>>, vector<24x1536xf32>
      %13 = vector.extract_strided_slice %12 {offsets = [0, 0], sizes = [24, 384], strides = [1, 1]} : vector<24x1536xf32> to vector<24x384xf32>
      %14 = vector.extract_strided_slice %12 {offsets = [0, 384], sizes = [24, 384], strides = [1, 1]} : vector<24x1536xf32> to vector<24x384xf32>
      %15 = arith.maximumf %13, %14 : vector<24x384xf32>
      %16 = vector.extract_strided_slice %12 {offsets = [0, 768], sizes = [24, 384], strides = [1, 1]} : vector<24x1536xf32> to vector<24x384xf32>
      %17 = vector.extract_strided_slice %12 {offsets = [0, 1152], sizes = [24, 384], strides = [1, 1]} : vector<24x1536xf32> to vector<24x384xf32>
      %18 = arith.maximumf %16, %17 : vector<24x384xf32>
      %19 = arith.maximumf %15, %18 : vector<24x384xf32>
      %c0_12 = arith.constant 0 : index
      %c0_13 = arith.constant 0 : index
      %20 = vector.load %arg3[%c0_12, %c0_13] : memref<24x1xf32, #tpu.memory_space<vmem>>, vector<24x1xf32>
      %21 = vector.broadcast %20 : vector<24x1xf32> to vector<24x384xf32>
      %22 = arith.addf %19, %21 : vector<24x384xf32>
      %cst_14 = arith.constant 0.000000e+00 : f32
      %23 = vector.broadcast %cst_14 : f32 to vector<24x384xf32>
      %24 = arith.maximumf %22, %23 : vector<24x384xf32>
      %c0_15 = arith.constant 0 : index
      %c0_16 = arith.constant 0 : index
      %25 = vector.load %arg5[%c0_15, %c0_16] : memref<24x384xf32, #tpu.memory_space<vmem>>, vector<24x384xf32>
      tpu.vector_store %arg5[%c0_15, %c0_16], %24 {strides = array<i32>} : memref<24x384xf32, #tpu.memory_space<vmem>>, vector<24x384xf32>,
    } else {
    }
    return
  }
  func.func @transform_0(%arg0: i32, %arg1: i32) -> (i32, i32) {
    %c0_i32 = arith.constant 0 : i32
    %c0_i32_0 = arith.constant 0 : i32
    return %c0_i32, %arg1 : i32, i32
  }
  func.func @transform_1(%arg0: i32, %arg1: i32) -> (i32, i32) {
    %c0_i32 = arith.constant 0 : i32
    %c0_i32_0 = arith.constant 0 : i32
    %c0_i32_1 = arith.constant 0 : i32
    return %c0_i32, %c0_i32_0 : i32, i32
  }
  func.func @transform_2(%arg0: i32, %arg1: i32) -> (i32, i32) {
    %c0_i32 = arith.constant 0 : i32
    return %arg1, %arg0 : i32, i32
  }
  func.func @transform_3(%arg0: i32, %arg1: i32) -> (i32, i32) {
    %c0_i32 = arith.constant 0 : i32
    %c0_i32_0 = arith.constant 0 : i32
    return %c0_i32, %arg0 : i32, i32
  }
}

module attributes {stable_mosaic.version = 11 : i64} {
  func.func @_conv_pool_relu_kernel(%arg0: i32, %arg1: i32, %arg2: memref<10x256xbf16, #tpu.memory_space<vmem>>, %arg3: memref<10x1xf32, #tpu.memory_space<vmem>>, %arg4: memref<256x512xbf16, #tpu.memory_space<vmem>>, %arg5: memref<10x128xf32, #tpu.memory_space<vmem>>, %arg6: memref<10x512xf32, #tpu.memory_space<vmem>>) attributes {dimension_semantics = [#tpu.dimension_semantics<parallel>, #tpu.dimension_semantics<arbitrary>], iteration_bounds = array<i64: 2, 3>, scalar_prefetch = 0 : i64, scratch_operands = 1 : i64, tpu.core_type = #tpu.core_type<tc>, window_params = [{transform_indices = @transform_0, window_bounds = array<i64: 10, 256>}, {pipeline_mode = #tpu.pipeline_mode<synchronous>, transform_indices = @transform_1, window_bounds = array<i64: 10, 1>}, {transform_indices = @transform_2, window_bounds = array<i64: 256, 512>}, {transform_indices = @transform_3, window_bounds = array<i64: 10, 128>}]} {
    %c0_i32 = arith.constant 0 : i32
    %0 = arith.cmpi eq, %arg1, %c0_i32 : i32
    %1 = arith.extui %0 : i1 to i32
    %c0_i32_0 = arith.constant 0 : i32
    %2 = arith.cmpi ne, %1, %c0_i32_0 : i32
    scf.if %2 {
      %cst_9 = arith.constant 0.000000e+00 : f32
      %12 = vector.broadcast %cst_9 : f32 to vector<10x512xf32>
      %c0_10 = arith.constant 0 : index
      %c0_11 = arith.constant 0 : index
      %13 = vector.load %arg6[%c0_10, %c0_11] : memref<10x512xf32, #tpu.memory_space<vmem>>, vector<10x512xf32>
      tpu.vector_store %arg6[%c0_10, %c0_11], %12 {strides = array<i32>} : memref<10x512xf32, #tpu.memory_space<vmem>>, vector<10x512xf32>,
    } else {
    }
    %c0 = arith.constant 0 : index
    %c0_1 = arith.constant 0 : index
    %3 = vector.load %arg6[%c0, %c0_1] : memref<10x512xf32, #tpu.memory_space<vmem>>, vector<10x512xf32>
    %c0_2 = arith.constant 0 : index
    %c0_3 = arith.constant 0 : index
    %4 = vector.load %arg2[%c0_2, %c0_3] : memref<10x256xbf16, #tpu.memory_space<vmem>>, vector<10x256xbf16>
    %c0_4 = arith.constant 0 : index
    %c0_5 = arith.constant 0 : index
    %5 = vector.load %arg4[%c0_4, %c0_5] : memref<256x512xbf16, #tpu.memory_space<vmem>>, vector<256x512xbf16>
    %cst = arith.constant dense<0.000000e+00> : vector<10x512xf32>
    %6 = tpu.matmul %4, %5, %cst {dimension_numbers = #tpu.dot_dimension_numbers<[1], [0], [0], [1], [0, 0, 1, 1], [], []>} : vector<10x256xbf16>, vector<256x512xbf16>, vector<10x512xf32> -> vector<10x512xf32>
    %7 = arith.addf %3, %6 : vector<10x512xf32>
    %c0_6 = arith.constant 0 : index
    %c0_7 = arith.constant 0 : index
    %8 = vector.load %arg6[%c0_6, %c0_7] : memref<10x512xf32, #tpu.memory_space<vmem>>, vector<10x512xf32>
    tpu.vector_store %arg6[%c0_6, %c0_7], %7 {strides = array<i32>} : memref<10x512xf32, #tpu.memory_space<vmem>>, vector<10x512xf32>,
    %c2_i32 = arith.constant 2 : i32
    %9 = arith.cmpi eq, %arg1, %c2_i32 : i32
    %10 = arith.extui %9 : i1 to i32
    %c0_i32_8 = arith.constant 0 : i32
    %11 = arith.cmpi ne, %10, %c0_i32_8 : i32
    scf.if %11 {
      %c0_9 = arith.constant 0 : index
      %c0_10 = arith.constant 0 : index
      %12 = vector.load %arg6[%c0_9, %c0_10] : memref<10x512xf32, #tpu.memory_space<vmem>>, vector<10x512xf32>
      %13 = vector.extract_strided_slice %12 {offsets = [0, 0], sizes = [10, 128], strides = [1, 1]} : vector<10x512xf32> to vector<10x128xf32>
      %14 = vector.extract_strided_slice %12 {offsets = [0, 128], sizes = [10, 128], strides = [1, 1]} : vector<10x512xf32> to vector<10x128xf32>
      %15 = arith.maximumf %13, %14 : vector<10x128xf32>
      %16 = vector.extract_strided_slice %12 {offsets = [0, 256], sizes = [10, 128], strides = [1, 1]} : vector<10x512xf32> to vector<10x128xf32>
      %17 = vector.extract_strided_slice %12 {offsets = [0, 384], sizes = [10, 128], strides = [1, 1]} : vector<10x512xf32> to vector<10x128xf32>
      %18 = arith.maximumf %16, %17 : vector<10x128xf32>
      %19 = arith.maximumf %15, %18 : vector<10x128xf32>
      %c0_11 = arith.constant 0 : index
      %c0_12 = arith.constant 0 : index
      %20 = vector.load %arg3[%c0_11, %c0_12] : memref<10x1xf32, #tpu.memory_space<vmem>>, vector<10x1xf32>
      %21 = vector.broadcast %20 : vector<10x1xf32> to vector<10x128xf32>
      %22 = arith.addf %19, %21 : vector<10x128xf32>
      %cst_13 = arith.constant 0.000000e+00 : f32
      %23 = vector.broadcast %cst_13 : f32 to vector<10x128xf32>
      %24 = arith.maximumf %22, %23 : vector<10x128xf32>
      %c0_14 = arith.constant 0 : index
      %c0_15 = arith.constant 0 : index
      %25 = vector.load %arg5[%c0_14, %c0_15] : memref<10x128xf32, #tpu.memory_space<vmem>>, vector<10x128xf32>
      tpu.vector_store %arg5[%c0_14, %c0_15], %24 {strides = array<i32>} : memref<10x128xf32, #tpu.memory_space<vmem>>, vector<10x128xf32>,
    } else {
    }
    return
  }
  func.func @transform_0(%arg0: i32, %arg1: i32) -> (i32, i32) {
    %c0_i32 = arith.constant 0 : i32
    %c0_i32_0 = arith.constant 0 : i32
    return %c0_i32, %arg1 : i32, i32
  }
  func.func @transform_1(%arg0: i32, %arg1: i32) -> (i32, i32) {
    %c0_i32 = arith.constant 0 : i32
    %c0_i32_0 = arith.constant 0 : i32
    %c0_i32_1 = arith.constant 0 : i32
    return %c0_i32, %c0_i32_0 : i32, i32
  }
  func.func @transform_2(%arg0: i32, %arg1: i32) -> (i32, i32) {
    %c0_i32 = arith.constant 0 : i32
    return %arg1, %arg0 : i32, i32
  }
  func.func @transform_3(%arg0: i32, %arg1: i32) -> (i32, i32) {
    %c0_i32 = arith.constant 0 : i32
    %c0_i32_0 = arith.constant 0 : i32
    return %c0_i32, %arg0 : i32, i32
  }
}

module attributes {stable_mosaic.version = 11 : i64} {
  func.func @kernel(%arg0: memref<2x10x10x10xf32, #tpu.memory_space<vmem>>, %arg1: memref<210x32xf32, #tpu.memory_space<vmem>>, %arg2: memref<1x32xf32, #tpu.memory_space<vmem>>, %arg3: memref<32x6xf32, #tpu.memory_space<vmem>>, %arg4: memref<1x6xf32, #tpu.memory_space<vmem>>, %arg5: memref<2x6xf32, #tpu.memory_space<vmem>>) attributes {dimension_semantics = [], scalar_prefetch = 0 : i64, scratch_operands = 0 : i64, tpu.core_type = #tpu.core_type<tc>} {
    %c0 = arith.constant 0 : index
    %c0_0 = arith.constant 0 : index
    %c0_1 = arith.constant 0 : index
    %c0_2 = arith.constant 0 : index
    %0 = vector.load %arg0[%c0, %c0_0, %c0_1, %c0_2] : memref<2x10x10x10xf32, #tpu.memory_space<vmem>>, vector<2x10x10x10xf32>
    %cst = arith.constant dense<0xFF800000> : vector<2x10x10xf32>
    %1 = vector.multi_reduction <maximumf>, %0, %cst [3] : vector<2x10x10x10xf32> to vector<2x10x10xf32>
    %cst_3 = arith.constant dense<0xFF800000> : vector<2x10xf32>
    %2 = vector.multi_reduction <maximumf>, %1, %cst_3 [2] : vector<2x10x10xf32> to vector<2x10xf32>
    %3 = vector.extract_strided_slice %0 {offsets = [0, 0, 0, 0], sizes = [2, 10, 5, 5], strides = [1, 1, 1, 1]} : vector<2x10x10x10xf32> to vector<2x10x5x5xf32>
    %cst_4 = arith.constant dense<0xFF800000> : vector<2x10x5xf32>
    %4 = vector.multi_reduction <maximumf>, %3, %cst_4 [3] : vector<2x10x5x5xf32> to vector<2x10x5xf32>
    %cst_5 = arith.constant dense<0xFF800000> : vector<2x10xf32>
    %5 = vector.multi_reduction <maximumf>, %4, %cst_5 [2] : vector<2x10x5xf32> to vector<2x10xf32>
    %6 = vector.extract_strided_slice %0 {offsets = [0, 0, 0, 5], sizes = [2, 10, 5, 5], strides = [1, 1, 1, 1]} : vector<2x10x10x10xf32> to vector<2x10x5x5xf32>
    %cst_6 = arith.constant dense<0xFF800000> : vector<2x10x5xf32>
    %7 = vector.multi_reduction <maximumf>, %6, %cst_6 [3] : vector<2x10x5x5xf32> to vector<2x10x5xf32>
    %cst_7 = arith.constant dense<0xFF800000> : vector<2x10xf32>
    %8 = vector.multi_reduction <maximumf>, %7, %cst_7 [2] : vector<2x10x5xf32> to vector<2x10xf32>
    %9 = vector.extract_strided_slice %0 {offsets = [0, 0, 5, 0], sizes = [2, 10, 5, 5], strides = [1, 1, 1, 1]} : vector<2x10x10x10xf32> to vector<2x10x5x5xf32>
    %cst_8 = arith.constant dense<0xFF800000> : vector<2x10x5xf32>
    %10 = vector.multi_reduction <maximumf>, %9, %cst_8 [3] : vector<2x10x5x5xf32> to vector<2x10x5xf32>
    %cst_9 = arith.constant dense<0xFF800000> : vector<2x10xf32>
    %11 = vector.multi_reduction <maximumf>, %10, %cst_9 [2] : vector<2x10x5xf32> to vector<2x10xf32>
    %12 = vector.extract_strided_slice %0 {offsets = [0, 0, 5, 5], sizes = [2, 10, 5, 5], strides = [1, 1, 1, 1]} : vector<2x10x10x10xf32> to vector<2x10x5x5xf32>
    %cst_10 = arith.constant dense<0xFF800000> : vector<2x10x5xf32>
    %13 = vector.multi_reduction <maximumf>, %12, %cst_10 [3] : vector<2x10x5x5xf32> to vector<2x10x5xf32>
    %cst_11 = arith.constant dense<0xFF800000> : vector<2x10xf32>
    %14 = vector.multi_reduction <maximumf>, %13, %cst_11 [2] : vector<2x10x5xf32> to vector<2x10xf32>
    %15 = vector.extract_strided_slice %0 {offsets = [0, 0, 0, 0], sizes = [2, 10, 3, 3], strides = [1, 1, 1, 1]} : vector<2x10x10x10xf32> to vector<2x10x3x3xf32>
    %cst_12 = arith.constant dense<0xFF800000> : vector<2x10x3xf32>
    %16 = vector.multi_reduction <maximumf>, %15, %cst_12 [3] : vector<2x10x3x3xf32> to vector<2x10x3xf32>
    %cst_13 = arith.constant dense<0xFF800000> : vector<2x10xf32>
    %17 = vector.multi_reduction <maximumf>, %16, %cst_13 [2] : vector<2x10x3xf32> to vector<2x10xf32>
    %18 = vector.extract_strided_slice %0 {offsets = [0, 0, 0, 2], sizes = [2, 10, 3, 3], strides = [1, 1, 1, 1]} : vector<2x10x10x10xf32> to vector<2x10x3x3xf32>
    %cst_14 = arith.constant dense<0xFF800000> : vector<2x10x3xf32>
    %19 = vector.multi_reduction <maximumf>, %18, %cst_14 [3] : vector<2x10x3x3xf32> to vector<2x10x3xf32>
    %cst_15 = arith.constant dense<0xFF800000> : vector<2x10xf32>
    %20 = vector.multi_reduction <maximumf>, %19, %cst_15 [2] : vector<2x10x3xf32> to vector<2x10xf32>
    %21 = vector.extract_strided_slice %0 {offsets = [0, 0, 0, 5], sizes = [2, 10, 3, 3], strides = [1, 1, 1, 1]} : vector<2x10x10x10xf32> to vector<2x10x3x3xf32>
    %cst_16 = arith.constant dense<0xFF800000> : vector<2x10x3xf32>
    %22 = vector.multi_reduction <maximumf>, %21, %cst_16 [3] : vector<2x10x3x3xf32> to vector<2x10x3xf32>
    %cst_17 = arith.constant dense<0xFF800000> : vector<2x10xf32>
    %23 = vector.multi_reduction <maximumf>, %22, %cst_17 [2] : vector<2x10x3xf32> to vector<2x10xf32>
    %24 = vector.extract_strided_slice %0 {offsets = [0, 0, 0, 7], sizes = [2, 10, 3, 3], strides = [1, 1, 1, 1]} : vector<2x10x10x10xf32> to vector<2x10x3x3xf32>
    %cst_18 = arith.constant dense<0xFF800000> : vector<2x10x3xf32>
    %25 = vector.multi_reduction <maximumf>, %24, %cst_18 [3] : vector<2x10x3x3xf32> to vector<2x10x3xf32>
    %cst_19 = arith.constant dense<0xFF800000> : vector<2x10xf32>
    %26 = vector.multi_reduction <maximumf>, %25, %cst_19 [2] : vector<2x10x3xf32> to vector<2x10xf32>
    %27 = vector.extract_strided_slice %0 {offsets = [0, 0, 2, 0], sizes = [2, 10, 3, 3], strides = [1, 1, 1, 1]} : vector<2x10x10x10xf32> to vector<2x10x3x3xf32>
    %cst_20 = arith.constant dense<0xFF800000> : vector<2x10x3xf32>
    %28 = vector.multi_reduction <maximumf>, %27, %cst_20 [3] : vector<2x10x3x3xf32> to vector<2x10x3xf32>
    %cst_21 = arith.constant dense<0xFF800000> : vector<2x10xf32>
    %29 = vector.multi_reduction <maximumf>, %28, %cst_21 [2] : vector<2x10x3xf32> to vector<2x10xf32>
    %30 = vector.extract_strided_slice %0 {offsets = [0, 0, 2, 2], sizes = [2, 10, 3, 3], strides = [1, 1, 1, 1]} : vector<2x10x10x10xf32> to vector<2x10x3x3xf32>
    %cst_22 = arith.constant dense<0xFF800000> : vector<2x10x3xf32>
    %31 = vector.multi_reduction <maximumf>, %30, %cst_22 [3] : vector<2x10x3x3xf32> to vector<2x10x3xf32>
    %cst_23 = arith.constant dense<0xFF800000> : vector<2x10xf32>
    %32 = vector.multi_reduction <maximumf>, %31, %cst_23 [2] : vector<2x10x3xf32> to vector<2x10xf32>
    %33 = vector.extract_strided_slice %0 {offsets = [0, 0, 2, 5], sizes = [2, 10, 3, 3], strides = [1, 1, 1, 1]} : vector<2x10x10x10xf32> to vector<2x10x3x3xf32>
    %cst_24 = arith.constant dense<0xFF800000> : vector<2x10x3xf32>
    %34 = vector.multi_reduction <maximumf>, %33, %cst_24 [3] : vector<2x10x3x3xf32> to vector<2x10x3xf32>
    %cst_25 = arith.constant dense<0xFF800000> : vector<2x10xf32>
    %35 = vector.multi_reduction <maximumf>, %34, %cst_25 [2] : vector<2x10x3xf32> to vector<2x10xf32>
    %36 = vector.extract_strided_slice %0 {offsets = [0, 0, 2, 7], sizes = [2, 10, 3, 3], strides = [1, 1, 1, 1]} : vector<2x10x10x10xf32> to vector<2x10x3x3xf32>
    %cst_26 = arith.constant dense<0xFF800000> : vector<2x10x3xf32>
    %37 = vector.multi_reduction <maximumf>, %36, %cst_26 [3] : vector<2x10x3x3xf32> to vector<2x10x3xf32>
    %cst_27 = arith.constant dense<0xFF800000> : vector<2x10xf32>
    %38 = vector.multi_reduction <maximumf>, %37, %cst_27 [2] : vector<2x10x3xf32> to vector<2x10xf32>
    %39 = vector.extract_strided_slice %0 {offsets = [0, 0, 5, 0], sizes = [2, 10, 3, 3], strides = [1, 1, 1, 1]} : vector<2x10x10x10xf32> to vector<2x10x3x3xf32>
    %cst_28 = arith.constant dense<0xFF800000> : vector<2x10x3xf32>
    %40 = vector.multi_reduction <maximumf>, %39, %cst_28 [3] : vector<2x10x3x3xf32> to vector<2x10x3xf32>
    %cst_29 = arith.constant dense<0xFF800000> : vector<2x10xf32>
    %41 = vector.multi_reduction <maximumf>, %40, %cst_29 [2] : vector<2x10x3xf32> to vector<2x10xf32>
    %42 = vector.extract_strided_slice %0 {offsets = [0, 0, 5, 2], sizes = [2, 10, 3, 3], strides = [1, 1, 1, 1]} : vector<2x10x10x10xf32> to vector<2x10x3x3xf32>
    %cst_30 = arith.constant dense<0xFF800000> : vector<2x10x3xf32>
    %43 = vector.multi_reduction <maximumf>, %42, %cst_30 [3] : vector<2x10x3x3xf32> to vector<2x10x3xf32>
    %cst_31 = arith.constant dense<0xFF800000> : vector<2x10xf32>
    %44 = vector.multi_reduction <maximumf>, %43, %cst_31 [2] : vector<2x10x3xf32> to vector<2x10xf32>
    %45 = vector.extract_strided_slice %0 {offsets = [0, 0, 5, 5], sizes = [2, 10, 3, 3], strides = [1, 1, 1, 1]} : vector<2x10x10x10xf32> to vector<2x10x3x3xf32>
    %cst_32 = arith.constant dense<0xFF800000> : vector<2x10x3xf32>
    %46 = vector.multi_reduction <maximumf>, %45, %cst_32 [3] : vector<2x10x3x3xf32> to vector<2x10x3xf32>
    %cst_33 = arith.constant dense<0xFF800000> : vector<2x10xf32>
    %47 = vector.multi_reduction <maximumf>, %46, %cst_33 [2] : vector<2x10x3xf32> to vector<2x10xf32>
    %48 = vector.extract_strided_slice %0 {offsets = [0, 0, 5, 7], sizes = [2, 10, 3, 3], strides = [1, 1, 1, 1]} : vector<2x10x10x10xf32> to vector<2x10x3x3xf32>
    %cst_34 = arith.constant dense<0xFF800000> : vector<2x10x3xf32>
    %49 = vector.multi_reduction <maximumf>, %48, %cst_34 [3] : vector<2x10x3x3xf32> to vector<2x10x3xf32>
    %cst_35 = arith.constant dense<0xFF800000> : vector<2x10xf32>
    %50 = vector.multi_reduction <maximumf>, %49, %cst_35 [2] : vector<2x10x3xf32> to vector<2x10xf32>
    %51 = vector.extract_strided_slice %0 {offsets = [0, 0, 7, 0], sizes = [2, 10, 3, 3], strides = [1, 1, 1, 1]} : vector<2x10x10x10xf32> to vector<2x10x3x3xf32>
    %cst_36 = arith.constant dense<0xFF800000> : vector<2x10x3xf32>
    %52 = vector.multi_reduction <maximumf>, %51, %cst_36 [3] : vector<2x10x3x3xf32> to vector<2x10x3xf32>
    %cst_37 = arith.constant dense<0xFF800000> : vector<2x10xf32>
    %53 = vector.multi_reduction <maximumf>, %52, %cst_37 [2] : vector<2x10x3xf32> to vector<2x10xf32>
    %54 = vector.extract_strided_slice %0 {offsets = [0, 0, 7, 2], sizes = [2, 10, 3, 3], strides = [1, 1, 1, 1]} : vector<2x10x10x10xf32> to vector<2x10x3x3xf32>
    %cst_38 = arith.constant dense<0xFF800000> : vector<2x10x3xf32>
    %55 = vector.multi_reduction <maximumf>, %54, %cst_38 [3] : vector<2x10x3x3xf32> to vector<2x10x3xf32>
    %cst_39 = arith.constant dense<0xFF800000> : vector<2x10xf32>
    %56 = vector.multi_reduction <maximumf>, %55, %cst_39 [2] : vector<2x10x3xf32> to vector<2x10xf32>
    %57 = vector.extract_strided_slice %0 {offsets = [0, 0, 7, 5], sizes = [2, 10, 3, 3], strides = [1, 1, 1, 1]} : vector<2x10x10x10xf32> to vector<2x10x3x3xf32>
    %cst_40 = arith.constant dense<0xFF800000> : vector<2x10x3xf32>
    %58 = vector.multi_reduction <maximumf>, %57, %cst_40 [3] : vector<2x10x3x3xf32> to vector<2x10x3xf32>
    %cst_41 = arith.constant dense<0xFF800000> : vector<2x10xf32>
    %59 = vector.multi_reduction <maximumf>, %58, %cst_41 [2] : vector<2x10x3xf32> to vector<2x10xf32>
    %60 = vector.extract_strided_slice %0 {offsets = [0, 0, 7, 7], sizes = [2, 10, 3, 3], strides = [1, 1, 1, 1]} : vector<2x10x10x10xf32> to vector<2x10x3x3xf32>
    %cst_42 = arith.constant dense<0xFF800000> : vector<2x10x3xf32>
    %61 = vector.multi_reduction <maximumf>, %60, %cst_42 [3] : vector<2x10x3x3xf32> to vector<2x10x3xf32>
    %cst_43 = arith.constant dense<0xFF800000> : vector<2x10xf32>
    %62 = vector.multi_reduction <maximumf>, %61, %cst_43 [2] : vector<2x10x3xf32> to vector<2x10xf32>
    %63 = tpu.concatenate %2, %5, %8, %11, %14, %17, %20, %23, %26, %29, %32, %35, %38, %41, %44, %47 in 1 : vector<2x10xf32>, vector<2x10xf32>, vector<2x10xf32>, vector<2x10xf32>, vector<2x10xf32>, vector<2x10xf32>, vector<2x10xf32>, vector<2x10xf32>, vector<2x10xf32>, vector<2x10xf32>, vector<2x10xf32>, vector<2x10xf32>, vector<2x10xf32>, vector<2x10xf32>, vector<2x10xf32>, vector<2x10xf32> -> vector<2x160xf32>
    %64 = tpu.concatenate %50, %53, %56, %59, %62 in 1 : vector<2x10xf32>, vector<2x10xf32>, vector<2x10xf32>, vector<2x10xf32>, vector<2x10xf32> -> vector<2x50xf32>
    %65 = tpu.concatenate %63, %64 in 1 : vector<2x160xf32>, vector<2x50xf32> -> vector<2x210xf32>
    %c0_44 = arith.constant 0 : index
    %c0_45 = arith.constant 0 : index
    %66 = vector.load %arg1[%c0_44, %c0_45] : memref<210x32xf32, #tpu.memory_space<vmem>>, vector<210x32xf32>
    %cst_46 = arith.constant dense<0.000000e+00> : vector<2x32xf32>
    %67 = tpu.matmul %65, %66, %cst_46 {dimension_numbers = #tpu.dot_dimension_numbers<[1], [0], [0], [1], [0, 0, 1, 1], [], []>} : vector<2x210xf32>, vector<210x32xf32>, vector<2x32xf32> -> vector<2x32xf32>
    %c0_47 = arith.constant 0 : index
    %c0_48 = arith.constant 0 : index
    %68 = vector.load %arg2[%c0_47, %c0_48] : memref<1x32xf32, #tpu.memory_space<vmem>>, vector<1x32xf32>
    %69 = vector.broadcast %68 : vector<1x32xf32> to vector<2x32xf32>
    %70 = arith.addf %67, %69 : vector<2x32xf32>
    %cst_49 = arith.constant 0.000000e+00 : f32
    %71 = vector.broadcast %cst_49 : f32 to vector<2x32xf32>
    %72 = arith.maximumf %70, %71 : vector<2x32xf32>
    %c0_50 = arith.constant 0 : index
    %c0_51 = arith.constant 0 : index
    %73 = vector.load %arg3[%c0_50, %c0_51] : memref<32x6xf32, #tpu.memory_space<vmem>>, vector<32x6xf32>
    %cst_52 = arith.constant dense<0.000000e+00> : vector<2x6xf32>
    %74 = tpu.matmul %72, %73, %cst_52 {dimension_numbers = #tpu.dot_dimension_numbers<[1], [0], [0], [1], [0, 0, 1, 1], [], []>} : vector<2x32xf32>, vector<32x6xf32>, vector<2x6xf32> -> vector<2x6xf32>
    %c0_53 = arith.constant 0 : index
    %c0_54 = arith.constant 0 : index
    %75 = vector.load %arg4[%c0_53, %c0_54] : memref<1x6xf32, #tpu.memory_space<vmem>>, vector<1x6xf32>
    %76 = vector.broadcast %75 : vector<1x6xf32> to vector<2x6xf32>
    %77 = arith.addf %74, %76 : vector<2x6xf32>
    %c0_55 = arith.constant 0 : index
    %c0_56 = arith.constant 0 : index
    %78 = vector.load %arg5[%c0_55, %c0_56] : memref<2x6xf32, #tpu.memory_space<vmem>>, vector<2x6xf32>
    tpu.vector_store %arg5[%c0_55, %c0_56], %77 {strides = array<i32>} : memref<2x6xf32, #tpu.memory_space<vmem>>, vector<2x6xf32>,
    return
  }
}

module attributes {stable_mosaic.version = 11 : i64} {
  func.func @_bilerp_kernel(%arg0: i32, %arg1: i32, %arg2: memref<4x1x3x256xf32, #tpu.memory_space<vmem>>, %arg3: memref<4x1x1x256xf32, #tpu.memory_space<vmem>>, %arg4: memref<1x3x256xf32, #tpu.memory_space<vmem>>) attributes {dimension_semantics = [#tpu.dimension_semantics<parallel>, #tpu.dimension_semantics<parallel>], iteration_bounds = array<i64: 2, 1>, scalar_prefetch = 0 : i64, scratch_operands = 0 : i64, tpu.core_type = #tpu.core_type<tc>, window_params = [{transform_indices = @transform_0, window_bounds = array<i64: 4, 1, 3, 256>}, {transform_indices = @transform_1, window_bounds = array<i64: 4, 1, 1, 256>}, {transform_indices = @transform_2, window_bounds = array<i64: 1, 3, 256>}]} {
    %c0 = arith.constant 0 : index
    %c0_0 = arith.constant 0 : index
    %c0_1 = arith.constant 0 : index
    %c0_2 = arith.constant 0 : index
    %0 = vector.load %arg2[%c0, %c0_0, %c0_1, %c0_2] : memref<4x1x3x256xf32, #tpu.memory_space<vmem>>, vector<1x1x3x256xf32>
    %1 = vector.shape_cast %0 : vector<1x1x3x256xf32> to vector<3x256xf32>
    %c0_3 = arith.constant 0 : index
    %c0_4 = arith.constant 0 : index
    %c0_5 = arith.constant 0 : index
    %c0_6 = arith.constant 0 : index
    %2 = vector.load %arg3[%c0_3, %c0_4, %c0_5, %c0_6] : memref<4x1x1x256xf32, #tpu.memory_space<vmem>>, vector<1x1x1x256xf32>
    %3 = vector.shape_cast %2 : vector<1x1x1x256xf32> to vector<1x256xf32>
    %4 = vector.broadcast %3 : vector<1x256xf32> to vector<3x256xf32>
    %5 = arith.mulf %1, %4 : vector<3x256xf32>
    %c1 = arith.constant 1 : index
    %c0_7 = arith.constant 0 : index
    %c0_8 = arith.constant 0 : index
    %c0_9 = arith.constant 0 : index
    %6 = vector.load %arg2[%c1, %c0_7, %c0_8, %c0_9] : memref<4x1x3x256xf32, #tpu.memory_space<vmem>>, vector<1x1x3x256xf32>
    %7 = vector.shape_cast %6 : vector<1x1x3x256xf32> to vector<3x256xf32>
    %c1_10 = arith.constant 1 : index
    %c0_11 = arith.constant 0 : index
    %c0_12 = arith.constant 0 : index
    %c0_13 = arith.constant 0 : index
    %8 = vector.load %arg3[%c1_10, %c0_11, %c0_12, %c0_13] : memref<4x1x1x256xf32, #tpu.memory_space<vmem>>, vector<1x1x1x256xf32>
    %9 = vector.shape_cast %8 : vector<1x1x1x256xf32> to vector<1x256xf32>
    %10 = vector.broadcast %9 : vector<1x256xf32> to vector<3x256xf32>
    %11 = arith.mulf %7, %10 : vector<3x256xf32>
    %12 = arith.addf %5, %11 : vector<3x256xf32>
    %c2 = arith.constant 2 : index
    %c0_14 = arith.constant 0 : index
    %c0_15 = arith.constant 0 : index
    %c0_16 = arith.constant 0 : index
    %13 = vector.load %arg2[%c2, %c0_14, %c0_15, %c0_16] : memref<4x1x3x256xf32, #tpu.memory_space<vmem>>, vector<1x1x3x256xf32>
    %14 = vector.shape_cast %13 : vector<1x1x3x256xf32> to vector<3x256xf32>
    %c2_17 = arith.constant 2 : index
    %c0_18 = arith.constant 0 : index
    %c0_19 = arith.constant 0 : index
    %c0_20 = arith.constant 0 : index
    %15 = vector.load %arg3[%c2_17, %c0_18, %c0_19, %c0_20] : memref<4x1x1x256xf32, #tpu.memory_space<vmem>>, vector<1x1x1x256xf32>
    %16 = vector.shape_cast %15 : vector<1x1x1x256xf32> to vector<1x256xf32>
    %17 = vector.broadcast %16 : vector<1x256xf32> to vector<3x256xf32>
    %18 = arith.mulf %14, %17 : vector<3x256xf32>
    %19 = arith.addf %12, %18 : vector<3x256xf32>
    %c3 = arith.constant 3 : index
    %c0_21 = arith.constant 0 : index
    %c0_22 = arith.constant 0 : index
    %c0_23 = arith.constant 0 : index
    %20 = vector.load %arg2[%c3, %c0_21, %c0_22, %c0_23] : memref<4x1x3x256xf32, #tpu.memory_space<vmem>>, vector<1x1x3x256xf32>
    %21 = vector.shape_cast %20 : vector<1x1x3x256xf32> to vector<3x256xf32>
    %c3_24 = arith.constant 3 : index
    %c0_25 = arith.constant 0 : index
    %c0_26 = arith.constant 0 : index
    %c0_27 = arith.constant 0 : index
    %22 = vector.load %arg3[%c3_24, %c0_25, %c0_26, %c0_27] : memref<4x1x1x256xf32, #tpu.memory_space<vmem>>, vector<1x1x1x256xf32>
    %23 = vector.shape_cast %22 : vector<1x1x1x256xf32> to vector<1x256xf32>
    %24 = vector.broadcast %23 : vector<1x256xf32> to vector<3x256xf32>
    %25 = arith.mulf %21, %24 : vector<3x256xf32>
    %26 = arith.addf %19, %25 : vector<3x256xf32>
    %c0_28 = arith.constant 0 : index
    %c0_29 = arith.constant 0 : index
    %c0_30 = arith.constant 0 : index
    %27 = vector.load %arg4[%c0_28, %c0_29, %c0_30] : memref<1x3x256xf32, #tpu.memory_space<vmem>>, vector<1x3x256xf32>
    %28 = vector.shape_cast %27 : vector<1x3x256xf32> to vector<3x256xf32>
    %29 = vector.shape_cast %26 : vector<3x256xf32> to vector<1x3x256xf32>
    tpu.vector_store %arg4[%c0_28, %c0_29, %c0_30], %29 {strides = array<i32>} : memref<1x3x256xf32, #tpu.memory_space<vmem>>, vector<1x3x256xf32>,
    return
  }
  func.func @transform_0(%arg0: i32, %arg1: i32) -> (i32, i32, i32, i32) {
    %c0_i32 = arith.constant 0 : i32
    %c0_i32_0 = arith.constant 0 : i32
    %c0_i32_1 = arith.constant 0 : i32
    return %c0_i32, %arg0, %c0_i32_0, %arg1 : i32, i32, i32, i32
  }
  func.func @transform_1(%arg0: i32, %arg1: i32) -> (i32, i32, i32, i32) {
    %c0_i32 = arith.constant 0 : i32
    %c0_i32_0 = arith.constant 0 : i32
    %c0_i32_1 = arith.constant 0 : i32
    return %c0_i32, %arg0, %c0_i32_0, %arg1 : i32, i32, i32, i32
  }
  func.func @transform_2(%arg0: i32, %arg1: i32) -> (i32, i32, i32) {
    %c0_i32 = arith.constant 0 : i32
    %c0_i32_0 = arith.constant 0 : i32
    return %arg0, %c0_i32, %arg1 : i32, i32, i32
  }
}

</mosaic_0001>

<bundles_post_ra>
// kernel: stn_forward.5
= control target key start
LH: loop header
LB: loop body
LE: loop exit
PB: predicated region body
PF: predicated region fallthrough
CT: control target
= control target key end

     0   :  { %7 = vsyncpa [#allocation3], 0  ;;  %s2597_s0 = inlined_call_operand.vmem [shape: bf16[8,256], index: 0, kind: input, shape index: {}]   ;;  %s2598_s1 = inlined_call_operand.hbm [shape: bf16[256,3072], index: 1, kind: input, shape index: {}]   ;;  %s2599_s2 = inlined_call_operand.vmem [shape: f32[8,3072], index: 2, kind: output, shape index: {}]  }
   0x1   :  { %9 = vsyncpa [#allocation3 + $0x1], 0  ;;  %s2272_s9 = smov 0   ;;  %s2274_s10 = smov 0  }
   0x2   :  { %s2276_s11 = smov 0   ;;  %s2278_s12 = smov 0  }
   0x3 LB: > { %s1651_s13 = sadd.s32 4294967295, %s2251_s12   ;;  %s2292_s14 = sadd.s32 1, %s2251_s12   ;;  %s2251_s12 = sphi %s2278_s12, %s2607_s12   ;;  %s2247_s11 = sphi %s2276_s11, %s2606_s11   ;;  %s2243_s10 = sphi %s2274_s10, %s2605_s10   ;;  %s2239_s9 = sphi %s2272_s9, %s2604_s9  }
   0x4   : > { %s40_s15 = ssub.s32 %s2251_s12, %s2292_s14  ;;  %s43_s16 = sadd.s32 1, %s2247_s11 }
   0x5   : > { %p41_p0 = scmp.eq.s32.totalorder %s40_s15, 0  ;;  %p50_p1 = scmp.ne.s32.totalorder %s2247_s11, %s2243_s10 }
   0x6   : > { %p51_p2 = scmp.eq.s32.totalorder %s2251_s12, 0  ;;  %p56_p3 = scmp.ne.s32.totalorder %s2243_s10, %s2239_s9 }
   0x7   : > { %s2302_s17 = scalar_select %p41_p0, %s2247_s11, %s43_s16  }
   0x8   : > { %p52_p4 = por %p51_p2, %p50_p1  ;;  %p57_p5 = scmp.eq.s32.totalorder %s1651_s13, 0 }
   0x9   : > { %p1863_p6 = scmp.lt.s32.totalorder %s2251_s12, 2  ;;  %s109_s19 = sand.u32 1, %s2247_s11  }
   0xa   : > { %p2307_p7 = por %p57_p5, %p56_p3  ;;  %s1855_s20 = smul.u32 1536, %s109_s19 }
   0xb   : > { %s1854_s21 = smul.u32 768, %s2251_s12  ;;  %p2313_p8 = pnand %p1863_p6, %p52_p4 }
   0xc   : > { %s2601_s18 = scalar_select %p2307_p7, 1, 0 }
   0xd   : > { %s2320_s25 = scalar_lea.hbm %s2598_s1, %s1854_s21  ;;  %s113_s26 = scalar_lea.vmem [#allocation2], %s1855_s20 }
   0xe   : > { %s120_s27 = sshll.u32 %s113_s26, 4  ;;  %s2324_s28 = scalar_lea.sflag [#allocation3], %s109_s19  ;;  %s2322_s27 = int_to_ptr.vmem [resolvable:$true] %s120_s27 }
   0xf   : > { %s2189_s29 = scalar_lea.hbm %s2320_s25, 24576  ;;  %p2191_p10 = pneg %p2313_p8 }
  0x10   : > { %p2190_p9 = scmp.ne.s32.totalorder %s2320_s25, %s2189_s29  ;;  %s2194_s4 = scalar_lea.hbm %s2598_s1, 49152 }
  0x11   : > { %p2195_p13 = scmp.lt.s32.totalorder %s2320_s25, %s2598_s1  ;;  %p2196_p0 = scmp.lt.s32.totalorder %s2194_s4, %s2189_s29 }
  0x12   : > { %p2192_p11 = pnand %p2191_p10, %p2190_p9 }
  0x13   : > { %p2197_p1 = por %p2196_p0, %p2195_p13 }
  0x14   : > { %p2193_p12 = pneg %p2192_p11 }
  0x16   : > { %p2198_p2 = pnand %p2197_p1, %p2193_p12 }
  0x18   : > { %2201 = shalt.err (!%p2198_p2)
}
  0x19   : > { %s2202_s7 = scalar_lea.vmem %s2322_s27, 24576  ;;  %s2253_s8 = smov [#allocation2]  }
  0x1a   : > { %p2203_p3 = scmp.ne.s32.totalorder %s2322_s27, %s2202_s7  ;;  %s2207_s9 = sshll.u32 %s2253_s8, 4  ;;  %s2208_s9 = int_to_ptr.vmem [resolvable:$false] %s2207_s9 }
  0x1b   : > { %s2209_s15 = scalar_lea.vmem %s2208_s9, 49152  ;;  %p2210_p6 = scmp.lt.s32.totalorder %s2322_s27, %s2208_s9 }
  0x1c   : > { %p2205_p4 = pnand %p2203_p3, %p2191_p10  ;;  %p2211_p9 = scmp.lt.s32.totalorder %s2209_s15, %s2202_s7 }
  0x1e   : > { %p2206_p5 = pneg %p2205_p4  ;;  %p2212_p11 = por %p2211_p9, %p2210_p6 }
  0x20   : > { %p2213_p7 = pnand %p2212_p11, %p2206_p5 }
  0x22   : > { %2216 = shalt.err (!%p2213_p7)
}
  0x23   : > { %s2254_s16 = smov 1536   ;;  %s2255_s19 = smov 768  }
  0x24   : > { %s2256_s20 = smov 48   ;;  %p1656_p10 = scmp.ge.s32.totalorder %s2251_s12, 1 }
  0x25   : > { %1862 = dma.hbm_to_vmem [thread:$0]  (!%p2313_p8), %s2320_s25, 24576, %s2322_s27, %s2324_s28, %s2254_s16, %s2255_s19, %s2256_s20  }
  0x26   : > { %p128_p12 = scmp.lt.s32.totalorder %s2251_s12, 3 }
  0x28   : > { %p129_p13 = pnand %p1656_p10, %p128_p12 }
  0x29   : > { %s134_s21 = sand.u32 (!%p129_p13), 1, %s2243_s10   ;;  %p2603_p7 = scmp.ne.s32.totalorder (!%p129_p13), %s2601_s18, 0 }
  0x2a   : > { %132 = sbr.rel (%p129_p13) target bundleno = 440 (0x1b8), region = 28  ;;  %s135_s24 = scalar_lea.sflag (!%p129_p13), [#allocation3], %s134_s21 }
  0x2b   : > { %s1856_s23 = smul.u32 (!%p129_p13), 1536, %s134_s21 }
  0x2d   : > { %s2348_s26 = scalar_lea.vmem (!%p129_p13), [#allocation2], %s1856_s23 }
  0x2f   : > { %2234 = dma.done.wait (%p2603_p7), %s135_s24, 24576  }
  0x30   : > { %2236 = vsyncadd (%p2603_p7), %s135_s24, 4294942720  ;;  %v1899_v0 = vld [vmem:[%s2348_s26 + $0x2a4] ss:$48 sps:$4 sm:$0xff]   ;;  %v1901_v1 = vld [vmem:[%s2348_s26 + $0x2ac] ss:$48 sps:$4 sm:$0xff]   ;;  %s160_s25 = smul.u32 12, %s1651_s13 }
  0x31   : > { %1326 = vmatprep.subr.bf16.mxu0 %v1899_v0  ;;  %v1903_v2 = vld [vmem:[%s2348_s26 + $0x2a0] ss:$48 sps:$4 sm:$0xff]   ;;  %v1904_v3 = vld [vmem:[%s2348_s26 + $0x2a8] ss:$48 sps:$4 sm:$0xff]   ;;  %1367 = vmatprep.subr.bf16.mxu1 %v1901_v1  ;;  %v1905_v4 = vld [vmem:[%s2348_s26 + $0x244] ss:$48 sps:$4 sm:$0xff]  }
  0x32   : > { %1327 = vmatpush1.bf16.msra.mxu0 %v1903_v2  ;;  %1368 = vmatpush1.bf16.msra.mxu1 %v1904_v3  ;;  %v1907_v5 = vld [vmem:[%s2348_s26 + $0x24c] ss:$48 sps:$4 sm:$0xff]   ;;  %v1909_v6 = vld [vmem:[%s2348_s26 + $0x240] ss:$48 sps:$4 sm:$0xff]   ;;  %v1910_v7 = vld [vmem:[%s2348_s26 + $0x248] ss:$48 sps:$4 sm:$0xff]  }
  0x33   : > { %1328 = vmatprep.subr.bf16.mxu0 %v1905_v4  ;;  %1369 = vmatprep.subr.bf16.mxu1 %v1907_v5  ;;  %v1911_v8 = vld [vmem:[%s2348_s26 + $0x1e4] ss:$48 sps:$4 sm:$0xff]   ;;  %v1913_v9 = vld [vmem:[%s2348_s26 + $0x1ec] ss:$48 sps:$4 sm:$0xff]   ;;  %v1915_v10 = vld [vmem:[%s2348_s26 + $0x1e0] ss:$48 sps:$4 sm:$0xff]  }
  0x34   : > { %v1916_v11 = vld [vmem:[%s2348_s26 + $0x1e8] ss:$48 sps:$4 sm:$0xff]   ;;  %v1917_v12 = vld [vmem:[%s2348_s26 + $0x184] ss:$48 sps:$4 sm:$0xff]   ;;  %v1919_v13 = vld [vmem:[%s2348_s26 + $0x18c] ss:$48 sps:$4 sm:$0xff]  }
  0x35   : > { %v1921_v14 = vld [vmem:[%s2348_s26 + $0x180] ss:$48 sps:$4 sm:$0xff]   ;;  %v1922_v15 = vld [vmem:[%s2348_s26 + $0x188] ss:$48 sps:$4 sm:$0xff]   ;;  %v1923_v16 = vld [vmem:[%s2348_s26 + $0x124] ss:$48 sps:$4 sm:$0xff]  }
  0x36   : > { %1329 = vmatpush1.bf16.msra.mxu0 %v1909_v6  ;;  %1370 = vmatpush1.bf16.msra.mxu1 %v1910_v7  ;;  %v1925_v17 = vld [vmem:[%s2348_s26 + $0x12c] ss:$48 sps:$4 sm:$0xff]   ;;  %v1927_v18 = vld [vmem:[%s2348_s26 + $0x120] ss:$48 sps:$4 sm:$0xff]   ;;  %v1928_v19 = vld [vmem:[%s2348_s26 + $0x128] ss:$48 sps:$4 sm:$0xff]  }
  0x37   : > { %1330 = vmatprep.subr.bf16.mxu0 %v1911_v8  ;;  %1371 = vmatprep.subr.bf16.mxu1 %v1913_v9  ;;  %v1929_v20 = vld [vmem:[%s2348_s26 + $0xc4] ss:$48 sps:$4 sm:$0xff]   ;;  %v1931_v21 = vld [vmem:[%s2348_s26 + $0xcc] ss:$48 sps:$4 sm:$0xff]   ;;  %v1933_v22 = vld [vmem:[%s2348_s26 + $0xc0] ss:$48 sps:$4 sm:$0xff]  }
  0x38   : > { %v1934_v23 = vld [vmem:[%s2348_s26 + $0xc8] ss:$48 sps:$4 sm:$0xff]   ;;  %v1935_v24 = vld [vmem:[%s2348_s26 + $0x64] ss:$48 sps:$4 sm:$0xff]   ;;  %v1937_v25 = vld [vmem:[%s2348_s26 + $0x6c] ss:$48 sps:$4 sm:$0xff]  }
  0x39   : > { %v1939_v26 = vld [vmem:[%s2348_s26 + $0x60] ss:$48 sps:$4 sm:$0xff]   ;;  %v1940_v27 = vld [vmem:[%s2348_s26 + $0x68] ss:$48 sps:$4 sm:$0xff]   ;;  %v1941_v28 = vld [vmem:[%s2348_s26 + $0x4] ss:$48 sps:$4 sm:$0xff]  }
  0x3a   : > { %1331 = vmatpush1.bf16.msra.mxu0 %v1915_v10  ;;  %1372 = vmatpush1.bf16.msra.mxu1 %v1916_v11  ;;  %v1943_v29 = vld [vmem:[%s2348_s26 + $0xc] ss:$48 sps:$4 sm:$0xff]   ;;  %v1945_v30 = vld [vmem:[%s2348_s26] ss:$48 sps:$4 sm:$0xff]   ;;  %v1946_v31 = vld [vmem:[%s2348_s26 + $0x8] ss:$48 sps:$4 sm:$0xff]  }
  0x3b   : > { %1332 = vmatprep.subr.bf16.mxu0 %v1917_v12  ;;  %1373 = vmatprep.subr.bf16.mxu1 %v1919_v13  ;;  %v1947_v32 = vld [vmem:[%s2348_s26 + $0x5a4] ss:$48 sps:$4 sm:$0xff]   ;;  %v1949_v33 = vld [vmem:[%s2348_s26 + $0x5ac] ss:$48 sps:$4 sm:$0xff]   ;;  %v1951_v34 = vld [vmem:[%s2348_s26 + $0x5a0] ss:$48 sps:$4 sm:$0xff]  }
  0x3c   : > { %v1952_v35 = vld [vmem:[%s2348_s26 + $0x5a8] ss:$48 sps:$4 sm:$0xff]   ;;  %v1953_v36 = vld [vmem:[%s2348_s26 + $0x544] ss:$48 sps:$4 sm:$0xff]   ;;  %v1955_v37 = vld [vmem:[%s2348_s26 + $0x54c] ss:$48 sps:$4 sm:$0xff]  }
  0x3d   : > { %v1957_v38 = vld [vmem:[%s2348_s26 + $0x540] ss:$48 sps:$4 sm:$0xff]   ;;  %v1958_v39 = vld [vmem:[%s2348_s26 + $0x548] ss:$48 sps:$4 sm:$0xff]   ;;  %v1959_v40 = vld [vmem:[%s2348_s26 + $0x4e4] ss:$48 sps:$4 sm:$0xff]  }
  0x3e   : > { %1333 = vmatpush1.bf16.msra.mxu0 %v1921_v14  ;;  %1374 = vmatpush1.bf16.msra.mxu1 %v1922_v15  ;;  %v1961_v41 = vld [vmem:[%s2348_s26 + $0x4ec] ss:$48 sps:$4 sm:$0xff]   ;;  %v1963_v42 = vld [vmem:[%s2348_s26 + $0x4e0] ss:$48 sps:$4 sm:$0xff]   ;;  %v1964_v43 = vld [vmem:[%s2348_s26 + $0x4e8] ss:$48 sps:$4 sm:$0xff]  }
  0x3f   : > { %1334 = vmatprep.subr.bf16.mxu0 %v1923_v16  ;;  %1375 = vmatprep.subr.bf16.mxu1 %v1925_v17  ;;  %v1965_v44 = vld [vmem:[%s2348_s26 + $0x484] ss:$48 sps:$4 sm:$0xff]   ;;  %v1967_v45 = vld [vmem:[%s2348_s26 + $0x48c] ss:$48 sps:$4 sm:$0xff]   ;;  %v1969_v47 = vld [vmem:[%s2348_s26 + $0x480] ss:$48 sps:$4 sm:$0xff]  }
  0x40   : > { %v166_v46 = vld [vmem:[%s2597_s0] sm:$0xff]  ;;  %v1970_v49 = vld [vmem:[%s2348_s26 + $0x488] ss:$48 sps:$4 sm:$0xff]   ;;  %v1973_v51 = vld [vmem:[%s2348_s26 + $0x42c] ss:$48 sps:$4 sm:$0xff]   ;;  %p161_p8 = scmp.lt.s32.totalorder %s160_s25, 23 }
  0x41   : > { %v2404_v48 = vcombine.high %v166_v46, %v166_v46  ;;  %v1971_v50 = vld [vmem:[%s2348_s26 + $0x424] ss:$48 sps:$4 sm:$0xff]   ;;  %v1975_v52 = vld [vmem:[%s2348_s26 + $0x420] ss:$48 sps:$4 sm:$0xff]   ;;  %v1976_v53 = vld [vmem:[%s2348_s26 + $0x428] ss:$48 sps:$4 sm:$0xff]   ;;  %v2427_v4 = vcombine.low %v166_v46, %v166_v46 }
  0x42   : > { %1335 = vmatpush1.bf16.msra.mxu0 %v1927_v18  ;;  %1376 = vmatpush1.bf16.msra.mxu1 %v1928_v19  ;;  %v1977_v54 = vld [vmem:[%s2348_s26 + $0x3c4] ss:$48 sps:$4 sm:$0xff]   ;;  %v1979_v55 = vld [vmem:[%s2348_s26 + $0x3cc] ss:$48 sps:$4 sm:$0xff]   ;;  %v1981_v56 = vld [vmem:[%s2348_s26 + $0x3c0] ss:$48 sps:$4 sm:$0xff]  }
  0x43   : > { %1336 = vmatprep.subr.bf16.mxu0 %v1929_v20  ;;  %1377 = vmatprep.subr.bf16.mxu1 %v1931_v21  ;;  %v1982_v57 = vld [vmem:[%s2348_s26 + $0x3c8] ss:$48 sps:$4 sm:$0xff]   ;;  %v1983_v58 = vld [vmem:[%s2348_s26 + $0x364] ss:$48 sps:$4 sm:$0xff]   ;;  %v1985_v59 = vld [vmem:[%s2348_s26 + $0x36c] ss:$48 sps:$4 sm:$0xff]  }
  0x44   : > { %1358 = vmatprep.mubr.bf16.mxu0 %v2404_v48  ;;  %1399 = vmatprep.mubr.bf16.mxu1 %v2404_v48  ;;  %v1987_v60 = vld [vmem:[%s2348_s26 + $0x360] ss:$48 sps:$4 sm:$0xff]   ;;  %v1988_v61 = vld [vmem:[%s2348_s26 + $0x368] ss:$48 sps:$4 sm:$0xff]   ;;  %v1989_v62 = vld [vmem:[%s2348_s26 + $0x304] ss:$48 sps:$4 sm:$0xff]  }
  0x45   : > { %v1991_v63 = vld [vmem:[%s2348_s26 + $0x30c] ss:$48 sps:$4 sm:$0xff]   ;;  %v1993_v0 = vld [vmem:[%s2348_s26 + $0x300] ss:$48 sps:$4 sm:$0xff]   ;;  %v1994_v1 = vld [vmem:[%s2348_s26 + $0x308] ss:$48 sps:$4 sm:$0xff]  }
  0x46   : > { %1337 = vmatpush1.bf16.msra.mxu0 %v1933_v22  ;;  %1378 = vmatpush1.bf16.msra.mxu1 %v1934_v23  ;;  %v1999_v2 = vld [vmem:[%s2348_s26 + $0x2b4] ss:$48 sps:$4 sm:$0xff]   ;;  %v2002_v3 = vld [vmem:[%s2348_s26 + $0x2bc] ss:$48 sps:$4 sm:$0xff]   ;;  %v1997_v5 = vld [vmem:[%s2348_s26 + $0x2b0] ss:$48 sps:$4 sm:$0xff]  }
  0x47   : > { %1338 = vmatprep.subr.bf16.mxu0 %v1935_v24  ;;  %1379 = vmatprep.subr.bf16.mxu1 %v1937_v25  ;;  %v2000_v6 = vld [vmem:[%s2348_s26 + $0x2b8] ss:$48 sps:$4 sm:$0xff]   ;;  %v2005_v7 = vld [vmem:[%s2348_s26 + $0x254] ss:$48 sps:$4 sm:$0xff]   ;;  %v2008_v8 = vld [vmem:[%s2348_s26 + $0x25c] ss:$48 sps:$4 sm:$0xff]  }
  0x48   : > { %v2003_v9 = vld [vmem:[%s2348_s26 + $0x250] ss:$48 sps:$4 sm:$0xff]   ;;  %v2006_v10 = vld [vmem:[%s2348_s26 + $0x258] ss:$48 sps:$4 sm:$0xff]   ;;  %v2011_v11 = vld [vmem:[%s2348_s26 + $0x1f4] ss:$48 sps:$4 sm:$0xff]  }
  0x49   : > { %v2014_v12 = vld [vmem:[%s2348_s26 + $0x1fc] ss:$48 sps:$4 sm:$0xff]   ;;  %v2009_v13 = vld [vmem:[%s2348_s26 + $0x1f0] ss:$48 sps:$4 sm:$0xff]   ;;  %v2012_v14 = vld [vmem:[%s2348_s26 + $0x1f8] ss:$48 sps:$4 sm:$0xff]  }
  0x4a   : > { %1339 = vmatpush1.bf16.msra.mxu0 %v1939_v26  ;;  %1380 = vmatpush1.bf16.msra.mxu1 %v1940_v27  ;;  %v2017_v15 = vld [vmem:[%s2348_s26 + $0x194] ss:$48 sps:$4 sm:$0xff]   ;;  %v2020_v16 = vld [vmem:[%s2348_s26 + $0x19c] ss:$48 sps:$4 sm:$0xff]   ;;  %v2015_v17 = vld [vmem:[%s2348_s26 + $0x190] ss:$48 sps:$4 sm:$0xff]  }
  0x4b   : > { %1340 = vmatprep.subr.bf16.mxu0 %v1941_v28  ;;  %1381 = vmatprep.subr.bf16.mxu1 %v1943_v29  ;;  %v2018_v18 = vld [vmem:[%s2348_s26 + $0x198] ss:$48 sps:$4 sm:$0xff]   ;;  %v2023_v19 = vld [vmem:[%s2348_s26 + $0x134] ss:$48 sps:$4 sm:$0xff]   ;;  %v2026_v20 = vld [vmem:[%s2348_s26 + $0x13c] ss:$48 sps:$4 sm:$0xff]  }
  0x4c   : > { %v2021_v21 = vld [vmem:[%s2348_s26 + $0x130] ss:$48 sps:$4 sm:$0xff]   ;;  %v2024_v22 = vld [vmem:[%s2348_s26 + $0x138] ss:$48 sps:$4 sm:$0xff]   ;;  %v2029_v23 = vld [vmem:[%s2348_s26 + $0xd4] ss:$48 sps:$4 sm:$0xff]  }
  0x4d   : > { %v2032_v24 = vld [vmem:[%s2348_s26 + $0xdc] ss:$48 sps:$4 sm:$0xff]   ;;  %v2027_v25 = vld [vmem:[%s2348_s26 + $0xd0] ss:$48 sps:$4 sm:$0xff]   ;;  %v2030_v26 = vld [vmem:[%s2348_s26 + $0xd8] ss:$48 sps:$4 sm:$0xff]  }
  0x4e   : > { %1341 = vmatpush1.bf16.msra.mxu0 %v1945_v30  ;;  %1382 = vmatpush1.bf16.msra.mxu1 %v1946_v31  ;;  %v2035_v27 = vld [vmem:[%s2348_s26 + $0x74] ss:$48 sps:$4 sm:$0xff]   ;;  %v2038_v28 = vld [vmem:[%s2348_s26 + $0x7c] ss:$48 sps:$4 sm:$0xff]   ;;  %v2033_v29 = vld [vmem:[%s2348_s26 + $0x70] ss:$48 sps:$4 sm:$0xff]  }
  0x4f   : > { %1342 = vmatprep.subr.bf16.mxu0 %v1947_v32  ;;  %1383 = vmatprep.subr.bf16.mxu1 %v1949_v33  ;;  %v2036_v30 = vld [vmem:[%s2348_s26 + $0x78] ss:$48 sps:$4 sm:$0xff]   ;;  %v2041_v31 = vld [vmem:[%s2348_s26 + $0x14] ss:$48 sps:$4 sm:$0xff]   ;;  %v2044_v32 = vld [vmem:[%s2348_s26 + $0x1c] ss:$48 sps:$4 sm:$0xff]  }
  0x50   : > { %v2039_v33 = vld [vmem:[%s2348_s26 + $0x10] ss:$48 sps:$4 sm:$0xff]   ;;  %v2060_v46 = vld [vmem:[%s2348_s26 + $0x4f8] ss:$48 sps:$4 sm:$0xff]   ;;  %s2609_s25 = smov (!%p161_p8, %s160_s25), 23 }
  0x51   : > { %s1657_s27 = sshll.u32 %s2609_s25, 3 }
  0x52   : > { %1343 = vmatpush2.bf16.msra.mxu0 %v1951_v34  ;;  %1384 = vmatpush2.bf16.msra.mxu1 %v1952_v35  ;;  %v2042_v34 = vld [vmem:[%s2348_s26 + $0x18] ss:$48 sps:$4 sm:$0xff]   ;;  %v2047_v35 = vld [vmem:[%s2348_s26 + $0x5b4] ss:$48 sps:$4 sm:$0xff]   ;;  %s2570_s30 = scalar_lea.vmem %s2599_s2, %s1657_s27 }
  0x53   : > { %1344 = vmatprep.subr.bf16.mxu0 %v1953_v36  ;;  %1385 = vmatprep.subr.bf16.mxu1 %v1955_v37  ;;  %v2050_v36 = vld [vmem:[%s2348_s26 + $0x5bc] ss:$48 sps:$4 sm:$0xff]   ;;  %v2045_v37 = vld [vmem:[%s2348_s26 + $0x5b0] ss:$48 sps:$4 sm:$0xff]  }
  0x56   : > { %1345 = vmatpush2.bf16.msra.mxu0 %v1957_v38  ;;  %1386 = vmatpush2.bf16.msra.mxu1 %v1958_v39  ;;  %v2048_v38 = vld [vmem:[%s2348_s26 + $0x5b8] ss:$48 sps:$4 sm:$0xff]   ;;  %v2053_v39 = vld [vmem:[%s2348_s26 + $0x554] ss:$48 sps:$4 sm:$0xff]  }
  0x57   : > { %1346 = vmatprep.subr.bf16.mxu0 %v1959_v40  ;;  %1387 = vmatprep.subr.bf16.mxu1 %v1961_v41  ;;  %v2056_v40 = vld [vmem:[%s2348_s26 + $0x55c] ss:$48 sps:$4 sm:$0xff]   ;;  %v2051_v41 = vld [vmem:[%s2348_s26 + $0x550] ss:$48 sps:$4 sm:$0xff]  }
  0x5a   : > { %1347 = vmatpush2.bf16.msra.mxu0 %v1963_v42  ;;  %1388 = vmatpush2.bf16.msra.mxu1 %v1964_v43  ;;  %v2054_v42 = vld [vmem:[%s2348_s26 + $0x558] ss:$48 sps:$4 sm:$0xff]   ;;  %v2059_v43 = vld [vmem:[%s2348_s26 + $0x4f4] ss:$48 sps:$4 sm:$0xff]  }
  0x5b   : > { %1348 = vmatprep.subr.bf16.mxu0 %v1965_v44  ;;  %1389 = vmatprep.subr.bf16.mxu1 %v1967_v45  ;;  %v2062_v44 = vld [vmem:[%s2348_s26 + $0x4fc] ss:$48 sps:$4 sm:$0xff]   ;;  %v2057_v45 = vld [vmem:[%s2348_s26 + $0x4f0] ss:$48 sps:$4 sm:$0xff]  }
  0x5e   : > { %1349 = vmatpush2.bf16.msra.mxu0 %v1969_v47  ;;  %1390 = vmatpush2.bf16.msra.mxu1 %v1970_v49  ;;  %v2065_v47 = vld [vmem:[%s2348_s26 + $0x494] ss:$48 sps:$4 sm:$0xff]   ;;  %v2068_v49 = vld [vmem:[%s2348_s26 + $0x49c] ss:$48 sps:$4 sm:$0xff]  }
  0x5f   : > { %1350 = vmatprep.subr.bf16.mxu0 %v1971_v50  ;;  %1391 = vmatprep.subr.bf16.mxu1 %v1973_v51  ;;  %v2063_v50 = vld [vmem:[%s2348_s26 + $0x490] ss:$48 sps:$4 sm:$0xff]   ;;  %v2066_v51 = vld [vmem:[%s2348_s26 + $0x498] ss:$48 sps:$4 sm:$0xff]  }
  0x62   : > { %1351 = vmatpush2.bf16.msra.mxu0 %v1975_v52  ;;  %1392 = vmatpush2.bf16.msra.mxu1 %v1976_v53  ;;  %v2071_v52 = vld [vmem:[%s2348_s26 + $0x434] ss:$48 sps:$4 sm:$0xff]   ;;  %v2074_v53 = vld [vmem:[%s2348_s26 + $0x43c] ss:$48 sps:$4 sm:$0xff]  }
  0x63   : > { %1352 = vmatprep.subr.bf16.mxu0 %v1977_v54  ;;  %1393 = vmatprep.subr.bf16.mxu1 %v1979_v55  ;;  %v2069_v54 = vld [vmem:[%s2348_s26 + $0x430] ss:$48 sps:$4 sm:$0xff]   ;;  %v2072_v55 = vld [vmem:[%s2348_s26 + $0x438] ss:$48 sps:$4 sm:$0xff]  }
  0x66   : > { %1353 = vmatpush2.bf16.msra.mxu0 %v1981_v56  ;;  %1394 = vmatpush2.bf16.msra.mxu1 %v1982_v57  ;;  %v2077_v56 = vld [vmem:[%s2348_s26 + $0x3d4] ss:$48 sps:$4 sm:$0xff]   ;;  %v2080_v57 = vld [vmem:[%s2348_s26 + $0x3dc] ss:$48 sps:$4 sm:$0xff]  }
  0x67   : > { %1354 = vmatprep.subr.bf16.mxu0 %v1983_v58  ;;  %1395 = vmatprep.subr.bf16.mxu1 %v1985_v59  ;;  %v2075_v58 = vld [vmem:[%s2348_s26 + $0x3d0] ss:$48 sps:$4 sm:$0xff]   ;;  %v2078_v59 = vld [vmem:[%s2348_s26 + $0x3d8] ss:$48 sps:$4 sm:$0xff]  }
  0x6a   : > { %1355 = vmatpush2.bf16.msra.mxu0 %v1987_v60  ;;  %1396 = vmatpush2.bf16.msra.mxu1 %v1988_v61  ;;  %v2083_v60 = vld [vmem:[%s2348_s26 + $0x374] ss:$48 sps:$4 sm:$0xff]   ;;  %v2086_v61 = vld [vmem:[%s2348_s26 + $0x37c] ss:$48 sps:$4 sm:$0xff]  }
  0x6b   : > { %1356 = vmatprep.subr.bf16.mxu0 %v1989_v62  ;;  %1397 = vmatprep.subr.bf16.mxu1 %v1991_v63  ;;  %v2081_v62 = vld [vmem:[%s2348_s26 + $0x370] ss:$48 sps:$4 sm:$0xff]   ;;  %v2084_v63 = vld [vmem:[%s2348_s26 + $0x378] ss:$48 sps:$4 sm:$0xff]  }
  0x6e   : > { %1357 = vmatpush2.bf16.msra.mxu0 %v1993_v0  ;;  %1398 = vmatpush2.bf16.msra.mxu1 %v1994_v1  ;;  %v2089_v0 = vld [vmem:[%s2348_s26 + $0x314] ss:$48 sps:$4 sm:$0xff]   ;;  %v2092_v1 = vld [vmem:[%s2348_s26 + $0x31c] ss:$48 sps:$4 sm:$0xff]  }
  0x6f   : > { %1408 = vmatprep.subr.bf16.mxu0 %v1999_v2  ;;  %1449 = vmatprep.subr.bf16.mxu1 %v2002_v3  ;;  %v2087_v2 = vld [vmem:[%s2348_s26 + $0x310] ss:$48 sps:$4 sm:$0xff]   ;;  %v2090_v3 = vld [vmem:[%s2348_s26 + $0x318] ss:$48 sps:$4 sm:$0xff]  }
  0x71   : > { %1359 = vmatmul.mubr.bf16.vlgmr.msra.gmra.mxu0 %v2427_v4  ;;  %1400 = vmatmul.mubr.bf16.vlgmr.msra.gmra.mxu1 %v2427_v4 }
  0x72   : > { %1409 = vmatpush1.bf16.msra.mxu0 %v1997_v5  ;;  %1450 = vmatpush1.bf16.msra.mxu1 %v2000_v6  ;;  %v2095_v5 = vld [vmem:[%s2348_s26 + $0x2c4] ss:$48 sps:$4 sm:$0xff]   ;;  %v2098_v6 = vld [vmem:[%s2348_s26 + $0x2cc] ss:$48 sps:$4 sm:$0xff]  }
  0x73   : > { %1410 = vmatprep.subr.bf16.mxu0 %v2005_v7  ;;  %1451 = vmatprep.subr.bf16.mxu1 %v2008_v8  ;;  %v2093_v7 = vld [vmem:[%s2348_s26 + $0x2c0] ss:$48 sps:$4 sm:$0xff]   ;;  %v2096_v8 = vld [vmem:[%s2348_s26 + $0x2c8] ss:$48 sps:$4 sm:$0xff]  }
  0x74   : > { %1440 = vmatprep.mubr.bf16.mxu0 %v2404_v48  ;;  %1481 = vmatprep.mubr.bf16.mxu1 %v2404_v48 }
  0x76   : > { %1411 = vmatpush1.bf16.msra.mxu0 %v2003_v9  ;;  %1452 = vmatpush1.bf16.msra.mxu1 %v2006_v10  ;;  %v2101_v9 = vld [vmem:[%s2348_s26 + $0x264] ss:$48 sps:$4 sm:$0xff]   ;;  %v2104_v10 = vld [vmem:[%s2348_s26 + $0x26c] ss:$48 sps:$4 sm:$0xff]  }
  0x77   : > { %1412 = vmatprep.subr.bf16.mxu0 %v2011_v11  ;;  %1453 = vmatprep.subr.bf16.mxu1 %v2014_v12  ;;  %v2099_v11 = vld [vmem:[%s2348_s26 + $0x260] ss:$48 sps:$4 sm:$0xff]   ;;  %v2102_v12 = vld [vmem:[%s2348_s26 + $0x268] ss:$48 sps:$4 sm:$0xff]  }
  0x7a   : > { %1413 = vmatpush1.bf16.msra.mxu0 %v2009_v13  ;;  %1454 = vmatpush1.bf16.msra.mxu1 %v2012_v14  ;;  %v2107_v13 = vld [vmem:[%s2348_s26 + $0x204] ss:$48 sps:$4 sm:$0xff]   ;;  %v2110_v14 = vld [vmem:[%s2348_s26 + $0x20c] ss:$48 sps:$4 sm:$0xff]  }
  0x7b   : > { %1414 = vmatprep.subr.bf16.mxu0 %v2017_v15  ;;  %1455 = vmatprep.subr.bf16.mxu1 %v2020_v16  ;;  %v2105_v15 = vld [vmem:[%s2348_s26 + $0x200] ss:$48 sps:$4 sm:$0xff]   ;;  %v2108_v16 = vld [vmem:[%s2348_s26 + $0x208] ss:$48 sps:$4 sm:$0xff]  }
  0x7e   : > { %1415 = vmatpush1.bf16.msra.mxu0 %v2015_v17  ;;  %1456 = vmatpush1.bf16.msra.mxu1 %v2018_v18  ;;  %v2113_v17 = vld [vmem:[%s2348_s26 + $0x1a4] ss:$48 sps:$4 sm:$0xff]   ;;  %v2116_v18 = vld [vmem:[%s2348_s26 + $0x1ac] ss:$48 sps:$4 sm:$0xff]  }
  0x7f   : > { %1416 = vmatprep.subr.bf16.mxu0 %v2023_v19  ;;  %1457 = vmatprep.subr.bf16.mxu1 %v2026_v20  ;;  %v2111_v19 = vld [vmem:[%s2348_s26 + $0x1a0] ss:$48 sps:$4 sm:$0xff]   ;;  %v2114_v20 = vld [vmem:[%s2348_s26 + $0x1a8] ss:$48 sps:$4 sm:$0xff]  }
  0x82   : > { %1417 = vmatpush1.bf16.msra.mxu0 %v2021_v21  ;;  %1458 = vmatpush1.bf16.msra.mxu1 %v2024_v22  ;;  %v2122_v21 = vld [vmem:[%s2348_s26 + $0x14c] ss:$48 sps:$4 sm:$0xff]   ;;  %v2117_v22 = vld [vmem:[%s2348_s26 + $0x140] ss:$48 sps:$4 sm:$0xff]  }
  0x83   : > { %1418 = vmatprep.subr.bf16.mxu0 %v2029_v23  ;;  %1459 = vmatprep.subr.bf16.mxu1 %v2032_v24  ;;  %v2120_v23 = vld [vmem:[%s2348_s26 + $0x148] ss:$48 sps:$4 sm:$0xff]   ;;  %v2125_v24 = vld [vmem:[%s2348_s26 + $0xe4] ss:$48 sps:$4 sm:$0xff]  }
  0x86   : > { %1419 = vmatpush1.bf16.msra.mxu0 %v2027_v25  ;;  %1460 = vmatpush1.bf16.msra.mxu1 %v2030_v26  ;;  %v2128_v25 = vld [vmem:[%s2348_s26 + $0xec] ss:$48 sps:$4 sm:$0xff]   ;;  %v2123_v26 = vld [vmem:[%s2348_s26 + $0xe0] ss:$48 sps:$4 sm:$0xff]  }
  0x87   : > { %1420 = vmatprep.subr.bf16.mxu0 %v2035_v27  ;;  %1461 = vmatprep.subr.bf16.mxu1 %v2038_v28  ;;  %v2126_v27 = vld [vmem:[%s2348_s26 + $0xe8] ss:$48 sps:$4 sm:$0xff]   ;;  %v2131_v28 = vld [vmem:[%s2348_s26 + $0x84] ss:$48 sps:$4 sm:$0xff]  }
  0x8a   : > { %1421 = vmatpush1.bf16.msra.mxu0 %v2033_v29  ;;  %1462 = vmatpush1.bf16.msra.mxu1 %v2036_v30  ;;  %v2134_v29 = vld [vmem:[%s2348_s26 + $0x8c] ss:$48 sps:$4 sm:$0xff]   ;;  %v2129_v30 = vld [vmem:[%s2348_s26 + $0x80] ss:$48 sps:$4 sm:$0xff]  }
  0x8b   : > { %1422 = vmatprep.subr.bf16.mxu0 %v2041_v31  ;;  %1463 = vmatprep.subr.bf16.mxu1 %v2044_v32  ;;  %v2132_v31 = vld [vmem:[%s2348_s26 + $0x88] ss:$48 sps:$4 sm:$0xff]   ;;  %v2137_v32 = vld [vmem:[%s2348_s26 + $0x24] ss:$48 sps:$4 sm:$0xff]  }
  0x8e   : > { %1423 = vmatpush1.bf16.msra.mxu0 %v2039_v33  ;;  %1464 = vmatpush1.bf16.msra.mxu1 %v2042_v34  ;;  %v2140_v33 = vld [vmem:[%s2348_s26 + $0x2c] ss:$48 sps:$4 sm:$0xff]   ;;  %v2135_v34 = vld [vmem:[%s2348_s26 + $0x20] ss:$48 sps:$4 sm:$0xff]  }
  0x8f   : > { %1424 = vmatprep.subr.bf16.mxu0 %v2047_v35  ;;  %1465 = vmatprep.subr.bf16.mxu1 %v2050_v36  ;;  %v2138_v35 = vld [vmem:[%s2348_s26 + $0x28] ss:$48 sps:$4 sm:$0xff]   ;;  %v2143_v36 = vld [vmem:[%s2348_s26 + $0x5c4] ss:$48 sps:$4 sm:$0xff]  }
  0x92   : > { %1425 = vmatpush2.bf16.msra.mxu0 %v2045_v37  ;;  %1466 = vmatpush2.bf16.msra.mxu1 %v2048_v38  ;;  %v2146_v37 = vld [vmem:[%s2348_s26 + $0x5cc] ss:$48 sps:$4 sm:$0xff]   ;;  %v2141_v38 = vld [vmem:[%s2348_s26 + $0x5c0] ss:$48 sps:$4 sm:$0xff]  }
  0x93   : > { %1426 = vmatprep.subr.bf16.mxu0 %v2053_v39  ;;  %1467 = vmatprep.subr.bf16.mxu1 %v2056_v40  ;;  %v2144_v39 = vld [vmem:[%s2348_s26 + $0x5c8] ss:$48 sps:$4 sm:$0xff]   ;;  %v2149_v40 = vld [vmem:[%s2348_s26 + $0x564] ss:$48 sps:$4 sm:$0xff]  }
  0x96   : > { %1427 = vmatpush2.bf16.msra.mxu0 %v2051_v41  ;;  %1468 = vmatpush2.bf16.msra.mxu1 %v2054_v42  ;;  %v2152_v41 = vld [vmem:[%s2348_s26 + $0x56c] ss:$48 sps:$4 sm:$0xff]   ;;  %v2147_v42 = vld [vmem:[%s2348_s26 + $0x560] ss:$48 sps:$4 sm:$0xff]  }
  0x97   : > { %1428 = vmatprep.subr.bf16.mxu0 %v2059_v43  ;;  %1469 = vmatprep.subr.bf16.mxu1 %v2062_v44  ;;  %v2150_v43 = vld [vmem:[%s2348_s26 + $0x568] ss:$48 sps:$4 sm:$0xff]   ;;  %v2155_v44 = vld [vmem:[%s2348_s26 + $0x504] ss:$48 sps:$4 sm:$0xff]  }
  0x9a   : > { %1429 = vmatpush2.bf16.msra.mxu0 %v2057_v45  ;;  %1470 = vmatpush2.bf16.msra.mxu1 %v2060_v46  ;;  %v2158_v45 = vld [vmem:[%s2348_s26 + $0x50c] ss:$48 sps:$4 sm:$0xff]   ;;  %v2153_v46 = vld [vmem:[%s2348_s26 + $0x500] ss:$48 sps:$4 sm:$0xff]  }
  0x9b   : > { %1430 = vmatprep.subr.bf16.mxu0 %v2065_v47  ;;  %1471 = vmatprep.subr.bf16.mxu1 %v2068_v49  ;;  %v2156_v47 = vld [vmem:[%s2348_s26 + $0x508] ss:$48 sps:$4 sm:$0xff]   ;;  %v2161_v49 = vld [vmem:[%s2348_s26 + $0x4a4] ss:$48 sps:$4 sm:$0xff]  }
  0x9e   : > { %1431 = vmatpush2.bf16.msra.mxu0 %v2063_v50  ;;  %1472 = vmatpush2.bf16.msra.mxu1 %v2066_v51  ;;  %v2164_v50 = vld [vmem:[%s2348_s26 + $0x4ac] ss:$48 sps:$4 sm:$0xff]   ;;  %v2159_v51 = vld [vmem:[%s2348_s26 + $0x4a0] ss:$48 sps:$4 sm:$0xff]  }
  0x9f   : > { %1432 = vmatprep.subr.bf16.mxu0 %v2071_v52  ;;  %1473 = vmatprep.subr.bf16.mxu1 %v2074_v53  ;;  %v2162_v52 = vld [vmem:[%s2348_s26 + $0x4a8] ss:$48 sps:$4 sm:$0xff]   ;;  %v2167_v53 = vld [vmem:[%s2348_s26 + $0x444] ss:$48 sps:$4 sm:$0xff]  }
  0xa2   : > { %1433 = vmatpush2.bf16.msra.mxu0 %v2069_v54  ;;  %1474 = vmatpush2.bf16.msra.mxu1 %v2072_v55  ;;  %v2170_v54 = vld [vmem:[%s2348_s26 + $0x44c] ss:$48 sps:$4 sm:$0xff]   ;;  %v2165_v55 = vld [vmem:[%s2348_s26 + $0x440] ss:$48 sps:$4 sm:$0xff]  }
  0xa3   : > { %1434 = vmatprep.subr.bf16.mxu0 %v2077_v56  ;;  %1475 = vmatprep.subr.bf16.mxu1 %v2080_v57  ;;  %v2168_v56 = vld [vmem:[%s2348_s26 + $0x448] ss:$48 sps:$4 sm:$0xff]   ;;  %v2173_v57 = vld [vmem:[%s2348_s26 + $0x3e4] ss:$48 sps:$4 sm:$0xff]  }
  0xa6   : > { %1435 = vmatpush2.bf16.msra.mxu0 %v2075_v58  ;;  %1476 = vmatpush2.bf16.msra.mxu1 %v2078_v59  ;;  %v2176_v58 = vld [vmem:[%s2348_s26 + $0x3ec] ss:$48 sps:$4 sm:$0xff]   ;;  %v2171_v59 = vld [vmem:[%s2348_s26 + $0x3e0] ss:$48 sps:$4 sm:$0xff]  }
  0xa7   : > { %1436 = vmatprep.subr.bf16.mxu0 %v2083_v60  ;;  %1477 = vmatprep.subr.bf16.mxu1 %v2086_v61  ;;  %v2174_v60 = vld [vmem:[%s2348_s26 + $0x3e8] ss:$48 sps:$4 sm:$0xff]   ;;  %v2179_v61 = vld [vmem:[%s2348_s26 + $0x384] ss:$48 sps:$4 sm:$0xff]  }
  0xaa   : > { %1437 = vmatpush2.bf16.msra.mxu0 %v2081_v62  ;;  %1478 = vmatpush2.bf16.msra.mxu1 %v2084_v63  ;;  %v2182_v62 = vld [vmem:[%s2348_s26 + $0x38c] ss:$48 sps:$4 sm:$0xff]   ;;  %v2177_v63 = vld [vmem:[%s2348_s26 + $0x380] ss:$48 sps:$4 sm:$0xff]  }
  0xab   : > { %1438 = vmatprep.subr.bf16.mxu0 %v2089_v0  ;;  %1479 = vmatprep.subr.bf16.mxu1 %v2092_v1  ;;  %v2180_v0 = vld [vmem:[%s2348_s26 + $0x388] ss:$48 sps:$4 sm:$0xff]   ;;  %v2185_v1 = vld [vmem:[%s2348_s26 + $0x324] ss:$48 sps:$4 sm:$0xff]  }
  0xae   : > { %1439 = vmatpush2.bf16.msra.mxu0 %v2087_v2  ;;  %1480 = vmatpush2.bf16.msra.mxu1 %v2090_v3  ;;  %v2188_v2 = vld [vmem:[%s2348_s26 + $0x32c] ss:$48 sps:$4 sm:$0xff]   ;;  %v2183_v3 = vld [vmem:[%s2348_s26 + $0x320] ss:$48 sps:$4 sm:$0xff]  }
  0xaf   : > { %1490 = vmatprep.subr.bf16.mxu0 %v2095_v5  ;;  %1531 = vmatprep.subr.bf16.mxu1 %v2098_v6  ;;  %v2186_v5 = vld [vmem:[%s2348_s26 + $0x328] ss:$48 sps:$4 sm:$0xff]  }
  0xb1   : > { %1441 = vmatmul.mubr.bf16.vlgmr.msra.gmra.mxu0 %v2427_v4  ;;  %1482 = vmatmul.mubr.bf16.vlgmr.msra.gmra.mxu1 %v2427_v4 }
  0xb2   : > { %1491 = vmatpush1.bf16.msra.mxu0 %v2093_v7  ;;  %1532 = vmatpush1.bf16.msra.mxu1 %v2096_v8 }
  0xb3   : > { %1492 = vmatprep.subr.bf16.mxu0 %v2101_v9  ;;  %1533 = vmatprep.subr.bf16.mxu1 %v2104_v10 }
  0xb4   : > { %1522 = vmatprep.mubr.bf16.mxu0 %v2404_v48  ;;  %1563 = vmatprep.mubr.bf16.mxu1 %v2404_v48  ;;  %v2119_v48 = vld [vmem:[%s2348_s26 + $0x144] ss:$48 sps:$4 sm:$0xff]  }
  0xb6   : > { %1493 = vmatpush1.bf16.msra.mxu0 %v2099_v11  ;;  %1534 = vmatpush1.bf16.msra.mxu1 %v2102_v12 }
  0xb7   : > { %1494 = vmatprep.subr.bf16.mxu0 %v2107_v13  ;;  %1535 = vmatprep.subr.bf16.mxu1 %v2110_v14 }
  0xba   : > { %1495 = vmatpush1.bf16.msra.mxu0 %v2105_v15  ;;  %1536 = vmatpush1.bf16.msra.mxu1 %v2108_v16 }
  0xbb   : > { %1496 = vmatprep.subr.bf16.mxu0 %v2113_v17  ;;  %1537 = vmatprep.subr.bf16.mxu1 %v2116_v18 }
  0xbe   : > { %1497 = vmatpush1.bf16.msra.mxu0 %v2111_v19  ;;  %1538 = vmatpush1.bf16.msra.mxu1 %v2114_v20 }
  0xbf   : > { %1498 = vmatprep.subr.bf16.mxu0 %v2119_v48  ;;  %1539 = vmatprep.subr.bf16.mxu1 %v2122_v21 }
  0xc2   : > { %1499 = vmatpush1.bf16.msra.mxu0 %v2117_v22  ;;  %1540 = vmatpush1.bf16.msra.mxu1 %v2120_v23 }
  0xc3   : > { %1500 = vmatprep.subr.bf16.mxu0 %v2125_v24  ;;  %1541 = vmatprep.subr.bf16.mxu1 %v2128_v25 }
  0xc6   : > { %1501 = vmatpush1.bf16.msra.mxu0 %v2123_v26  ;;  %1542 = vmatpush1.bf16.msra.mxu1 %v2126_v27 }
  0xc7   : > { %1502 = vmatprep.subr.bf16.mxu0 %v2131_v28  ;;  %1543 = vmatprep.subr.bf16.mxu1 %v2134_v29 }
  0xca   : > { %1503 = vmatpush1.bf16.msra.mxu0 %v2129_v30  ;;  %1544 = vmatpush1.bf16.msra.mxu1 %v2132_v31 }
  0xcb   : > { %1504 = vmatprep.subr.bf16.mxu0 %v2137_v32  ;;  %1545 = vmatprep.subr.bf16.mxu1 %v2140_v33 }
  0xce   : > { %1505 = vmatpush1.bf16.msra.mxu0 %v2135_v34  ;;  %1546 = vmatpush1.bf16.msra.mxu1 %v2138_v35 }
  0xcf   : > { %1506 = vmatprep.subr.bf16.mxu0 %v2143_v36  ;;  %1547 = vmatprep.subr.bf16.mxu1 %v2146_v37 }
  0xd2   : > { %1507 = vmatpush2.bf16.msra.mxu0 %v2141_v38  ;;  %1548 = vmatpush2.bf16.msra.mxu1 %v2144_v39 }
  0xd3   : > { %1508 = vmatprep.subr.bf16.mxu0 %v2149_v40  ;;  %1549 = vmatprep.subr.bf16.mxu1 %v2152_v41 }
  0xd6   : > { %1509 = vmatpush2.bf16.msra.mxu0 %v2147_v42  ;;  %1550 = vmatpush2.bf16.msra.mxu1 %v2150_v43 }
  0xd7   : > { %1510 = vmatprep.subr.bf16.mxu0 %v2155_v44  ;;  %1551 = vmatprep.subr.bf16.mxu1 %v2158_v45 }
  0xda   : > { %1511 = vmatpush2.bf16.msra.mxu0 %v2153_v46  ;;  %1552 = vmatpush2.bf16.msra.mxu1 %v2156_v47 }
  0xdb   : > { %1512 = vmatprep.subr.bf16.mxu0 %v2161_v49  ;;  %1553 = vmatprep.subr.bf16.mxu1 %v2164_v50 }
  0xde   : > { %1513 = vmatpush2.bf16.msra.mxu0 %v2159_v51  ;;  %1554 = vmatpush2.bf16.msra.mxu1 %v2162_v52 }
  0xdf   : > { %1514 = vmatprep.subr.bf16.mxu0 %v2167_v53  ;;  %1555 = vmatprep.subr.bf16.mxu1 %v2170_v54 }
  0xe2   : > { %1515 = vmatpush2.bf16.msra.mxu0 %v2165_v55  ;;  %1556 = vmatpush2.bf16.msra.mxu1 %v2168_v56 }
  0xe3   : > { %1516 = vmatprep.subr.bf16.mxu0 %v2173_v57  ;;  %1557 = vmatprep.subr.bf16.mxu1 %v2176_v58 }
  0xe6   : > { %1517 = vmatpush2.bf16.msra.mxu0 %v2171_v59  ;;  %1558 = vmatpush2.bf16.msra.mxu1 %v2174_v60 }
  0xe7   : > { %1518 = vmatprep.subr.bf16.mxu0 %v2179_v61  ;;  %1559 = vmatprep.subr.bf16.mxu1 %v2182_v62 }
  0xea   : > { %1519 = vmatpush2.bf16.msra.mxu0 %v2177_v63  ;;  %1560 = vmatpush2.bf16.msra.mxu1 %v2180_v0 }
  0xeb   : > { %1520 = vmatprep.subr.bf16.mxu0 %v2185_v1  ;;  %1561 = vmatprep.subr.bf16.mxu1 %v2188_v2 }
  0xee   : > { %1521 = vmatpush2.bf16.msra.mxu0 %v2183_v3  ;;  %1562 = vmatpush2.bf16.msra.mxu1 %v2186_v5 }
  0xf1   : > { %1523 = vmatmul.mubr.bf16.vlgmr.msra.gmra.mxu0 %v2427_v4  ;;  %1564 = vmatmul.mubr.bf16.vlgmr.msra.gmra.mxu1 %v2427_v4 }
 0x131   : > { %v1360_v6 = vpop.f32.mrf.mxu0  ;;  %v1401_v7 = vpop.f32.mrf.mxu1 }
 0x132   : > { %1572 = vst [vmem:[%s2570_s30] sm:$0xff] %v1360_v6  ;;  %1574 = vst [vmem:[%s2570_s30 + $0x10] sm:$0xff] %v1401_v7 }
 0x133   : > { %v1362_v4 = vpop.f32.mrf.mxu0  ;;  %v1403_v8 = vpop.f32.mrf.mxu1 }
 0x134   : > { %1573 = vst [vmem:[%s2570_s30 + $0x8] sm:$0xff] %v1362_v4  ;;  %1575 = vst [vmem:[%s2570_s30 + $0x18] sm:$0xff] %v1403_v8 }
 0x135   : > { %v1364_v9 = vpop.f32.mrf.mxu0  ;;  %v1405_v10 = vpop.f32.mrf.mxu1 }
 0x137   : > { %v1365_v11 = vpop.f32.mrf.mxu0  ;;  %v1406_v12 = vpop.f32.mrf.mxu1 }
 0x171   : > { %v1442_v13 = vpop.f32.mrf.mxu0  ;;  %v1483_v14 = vpop.f32.mrf.mxu1 }
 0x172   : > { %1576 = vst [vmem:[%s2570_s30 + $0x20] sm:$0xff] %v1442_v13  ;;  %1578 = vst [vmem:[%s2570_s30 + $0x30] sm:$0xff] %v1483_v14 }
 0x173   : > { %v1444_v15 = vpop.f32.mrf.mxu0  ;;  %v1485_v16 = vpop.f32.mrf.mxu1 }
 0x174   : > { %1577 = vst [vmem:[%s2570_s30 + $0x28] sm:$0xff] %v1444_v15  ;;  %1579 = vst [vmem:[%s2570_s30 + $0x38] sm:$0xff] %v1485_v16 }
 0x175   : > { %v1446_v17 = vpop.f32.mrf.mxu0  ;;  %v1487_v18 = vpop.f32.mrf.mxu1 }
 0x177   : > { %v1447_v19 = vpop.f32.mrf.mxu0  ;;  %v1488_v20 = vpop.f32.mrf.mxu1 }
 0x1b1   : > { %v1524_v48 = vpop.f32.mrf.mxu0  ;;  %v1565_v21 = vpop.f32.mrf.mxu1 }
 0x1b2   : > { %1580 = vst [vmem:[%s2570_s30 + $0x40] sm:$0xff] %v1524_v48  ;;  %1582 = vst [vmem:[%s2570_s30 + $0x50] sm:$0xff] %v1565_v21 }
 0x1b3   : > { %v1526_v22 = vpop.f32.mrf.mxu0  ;;  %v1567_v23 = vpop.f32.mrf.mxu1 }
 0x1b4   : > { %1581 = vst [vmem:[%s2570_s30 + $0x48] sm:$0xff] %v1526_v22  ;;  %1583 = vst [vmem:[%s2570_s30 + $0x58] sm:$0xff] %v1567_v23 }
 0x1b5   : > { %v1528_v24 = vpop.f32.mrf.mxu0  ;;  %v1569_v25 = vpop.f32.mrf.mxu1 }
 0x1b7   : > { %v1529_v26 = vpop.f32.mrf.mxu0  ;;  %v1570_v27 = vpop.f32.mrf.mxu1 }
 0x1b8 PF: > { %p12_p0 = scmp.ge.s32.totalorder %s2292_s14, 4   ;;  %s2604_s9 = smov %s2243_s10 }
 0x1b9   : > { %s2605_s10 = smov %s2247_s11  ;;  %s2606_s11 = smov %s2302_s17 }
 0x1ba   : > { %s2607_s12 = smov %s2292_s14  ;;  %14 = sbr.rel (!%p12_p0) target bundleno = 3 (0x3), region = 68 }
 0x1bf   :  { %1606 = vsyncpa [#allocation3], 1 }
 0x1c0   :  { %1608 = vsyncpa [#allocation3 + $0x1], 1 }

// kernel: stn_forward.6
= control target key start
LH: loop header
LB: loop body
LE: loop exit
PB: predicated region body
PF: predicated region fallthrough
CT: control target
= control target key end

     0   :  { %s3080_s12 = smov 0   ;;  %s3082_s13 = smov 0   ;;  %s3835_s0 = inlined_call_operand.vmem [shape: bf16[24,256], index: 0, kind: input, shape index: {}]   ;;  %s3836_s1 = inlined_call_operand.vmem [shape: f32[24,1], index: 1, kind: input, shape index: {}]   ;;  %s3837_s2 = inlined_call_operand.vmem [shape: bf16[256,4608], index: 2, kind: input, shape index: {}]   ;;  %s3838_s3 = inlined_call_operand.vmem [shape: f32[24,1152], index: 3, kind: output, shape index: {}]  }
   0x1   :  { %s3084_s14 = smov 0   ;;  %s3086_s15 = smov 0  }
   0x2   :  { %s3088_s16 = smov 0  }
   0x3 LB: > { %s25_s17 = sadd.s32 1, %s3053_s15  ;;  %s2472_s18 = sadd.s32 4294967295, %s3057_s16   ;;  %s3057_s16 = sphi %s3088_s16, %s13_s16   ;;  %s3053_s15 = sphi %s3086_s15, %s3843_s15   ;;  %s3049_s14 = sphi %s3084_s14, %s3842_s14   ;;  %s3045_s13 = sphi %s3082_s13, %s3841_s13   ;;  %s3041_s12 = sphi %s3080_s12, %s3840_s12  }
   0x4   : > { %p27_p0 = scmp.ge.s32.totalorder %s25_s17, 3  ;;  %p88_p1 = scmp.ne.s32.totalorder %s3045_s13, %s3041_s12 }
   0x5   : > { %p89_p2 = scmp.eq.s32.totalorder %s3057_s16, 0  ;;  %p118_p4 = scmp.eq.s32.totalorder %s2472_s18, 2 }
   0x6   : > { %s3845_s17 = smov (%p27_p0, %s25_s17), 0  ;;  %s81_s20 = sadd.s32 1, %s3045_s13 }
   0x7   : > { %p90_p3 = por %p89_p2, %p88_p1  ;;  %s77_s19 = ssub.s32 %s3053_s15, %s3845_s17 }
   0x8   : > { %p79_p5 = scmp.eq.s32.totalorder %s77_s19, 0  ;;  %p3115_p6 = por %p118_p4, %p88_p1 }
   0x9   : > { %p2476_p7 = scmp.ge.s32.totalorder %s3057_s16, 3 }
   0xa   : > { %s3120_s22 = scalar_select %p79_p5, %s3045_s13, %s81_s20  }
   0xb   : > { %152 = sbr.rel (%p2476_p7) target bundleno = 117 (0x75), region = 24 }
  0x10   : > { %155 = sbr.rel (!%p90_p3) target bundleno = 117 (0x75), region = 28  ;;  %s157_s23 = sand.u32 (%p90_p3), 1, %s3045_s13  }
  0x11   : > { %s2678_s24 = smul.u32 (%p90_p3), 48, %s3053_s15 }
  0x12   : > { %s2680_s25 = smul.u32 (%p90_p3), 1536, %s157_s23 }
  0x13   : > { %s3128_s28 = scalar_lea.vmem (%p90_p3), %s3837_s2, %s2678_s24 }
  0x14   : > { %v178_v0 = vld [vmem:[%s3128_s28] sm:$0xff] (%p90_p3)  ;;  %v180_v1 = vld [vmem:[%s3128_s28 + $0x8] sm:$0xff] (%p90_p3)  ;;  %v182_v2 = vld [vmem:[%s3128_s28 + $0x10] sm:$0xff] (%p90_p3)  ;;  %s3133_s29 = scalar_lea.vmem (%p90_p3), [#allocation3], %s2680_s25 }
  0x15   : > { %179 = vst [vmem:[%s3133_s29] sm:$0xff] %v178_v0  ;;  %181 = vst [vmem:[%s3133_s29 + $0x8] sm:$0xff] %v180_v1  ;;  %v184_v3 = vld [vmem:[%s3128_s28 + $0x18] sm:$0xff]  ;;  %v186_v4 = vld [vmem:[%s3128_s28 + $0x20] sm:$0xff] }
  0x16   : > { %183 = vst [vmem:[%s3133_s29 + $0x10] sm:$0xff] %v182_v2  ;;  %v188_v5 = vld [vmem:[%s3128_s28 + $0x28] sm:$0xff]  ;;  %185 = vst [vmem:[%s3133_s29 + $0x18] sm:$0xff] %v184_v3  ;;  %v190_v6 = vld [vmem:[%s3128_s28 + $0x90] sm:$0xff] }
  0x17   : > { %187 = vst [vmem:[%s3133_s29 + $0x20] sm:$0xff] %v186_v4  ;;  %189 = vst [vmem:[%s3133_s29 + $0x28] sm:$0xff] %v188_v5  ;;  %v192_v7 = vld [vmem:[%s3128_s28 + $0x98] sm:$0xff]  ;;  %v194_v8 = vld [vmem:[%s3128_s28 + $0xa0] sm:$0xff] }
  0x18   : > { %191 = vst [vmem:[%s3133_s29 + $0x30] sm:$0xff] %v190_v6  ;;  %193 = vst [vmem:[%s3133_s29 + $0x38] sm:$0xff] %v192_v7  ;;  %v196_v9 = vld [vmem:[%s3128_s28 + $0xa8] sm:$0xff]  ;;  %v198_v10 = vld [vmem:[%s3128_s28 + $0xb0] sm:$0xff] }
  0x19   : > { %195 = vst [vmem:[%s3133_s29 + $0x40] sm:$0xff] %v194_v8  ;;  %v200_v11 = vld [vmem:[%s3128_s28 + $0xb8] sm:$0xff]  ;;  %197 = vst [vmem:[%s3133_s29 + $0x48] sm:$0xff] %v196_v9  ;;  %v202_v12 = vld [vmem:[%s3128_s28 + $0x120] sm:$0xff] }
  0x1a   : > { %199 = vst [vmem:[%s3133_s29 + $0x50] sm:$0xff] %v198_v10  ;;  %201 = vst [vmem:[%s3133_s29 + $0x58] sm:$0xff] %v200_v11  ;;  %v204_v13 = vld [vmem:[%s3128_s28 + $0x128] sm:$0xff]  ;;  %v206_v14 = vld [vmem:[%s3128_s28 + $0x130] sm:$0xff] }
  0x1b   : > { %203 = vst [vmem:[%s3133_s29 + $0x60] sm:$0xff] %v202_v12  ;;  %205 = vst [vmem:[%s3133_s29 + $0x68] sm:$0xff] %v204_v13  ;;  %v208_v15 = vld [vmem:[%s3128_s28 + $0x138] sm:$0xff]  ;;  %v210_v16 = vld [vmem:[%s3128_s28 + $0x140] sm:$0xff] }
  0x1c   : > { %207 = vst [vmem:[%s3133_s29 + $0x70] sm:$0xff] %v206_v14  ;;  %v212_v17 = vld [vmem:[%s3128_s28 + $0x148] sm:$0xff]  ;;  %209 = vst [vmem:[%s3133_s29 + $0x78] sm:$0xff] %v208_v15  ;;  %v214_v18 = vld [vmem:[%s3128_s28 + $0x1b0] sm:$0xff] }
  0x1d   : > { %211 = vst [vmem:[%s3133_s29 + $0x80] sm:$0xff] %v210_v16  ;;  %213 = vst [vmem:[%s3133_s29 + $0x88] sm:$0xff] %v212_v17  ;;  %v216_v19 = vld [vmem:[%s3128_s28 + $0x1b8] sm:$0xff]  ;;  %v218_v20 = vld [vmem:[%s3128_s28 + $0x1c0] sm:$0xff] }
  0x1e   : > { %215 = vst [vmem:[%s3133_s29 + $0x90] sm:$0xff] %v214_v18  ;;  %217 = vst [vmem:[%s3133_s29 + $0x98] sm:$0xff] %v216_v19  ;;  %v220_v21 = vld [vmem:[%s3128_s28 + $0x1c8] sm:$0xff]  ;;  %v222_v22 = vld [vmem:[%s3128_s28 + $0x1d0] sm:$0xff] }
  0x1f   : > { %219 = vst [vmem:[%s3133_s29 + $0xa0] sm:$0xff] %v218_v20  ;;  %v224_v23 = vld [vmem:[%s3128_s28 + $0x1d8] sm:$0xff]  ;;  %221 = vst [vmem:[%s3133_s29 + $0xa8] sm:$0xff] %v220_v21  ;;  %v226_v24 = vld [vmem:[%s3128_s28 + $0x240] sm:$0xff] }
  0x20   : > { %223 = vst [vmem:[%s3133_s29 + $0xb0] sm:$0xff] %v222_v22  ;;  %225 = vst [vmem:[%s3133_s29 + $0xb8] sm:$0xff] %v224_v23  ;;  %v228_v25 = vld [vmem:[%s3128_s28 + $0x248] sm:$0xff]  ;;  %v230_v26 = vld [vmem:[%s3128_s28 + $0x250] sm:$0xff] }
  0x21   : > { %227 = vst [vmem:[%s3133_s29 + $0xc0] sm:$0xff] %v226_v24  ;;  %229 = vst [vmem:[%s3133_s29 + $0xc8] sm:$0xff] %v228_v25  ;;  %v232_v27 = vld [vmem:[%s3128_s28 + $0x258] sm:$0xff]  ;;  %v234_v28 = vld [vmem:[%s3128_s28 + $0x260] sm:$0xff] }
  0x22   : > { %231 = vst [vmem:[%s3133_s29 + $0xd0] sm:$0xff] %v230_v26  ;;  %v236_v29 = vld [vmem:[%s3128_s28 + $0x268] sm:$0xff]  ;;  %233 = vst [vmem:[%s3133_s29 + $0xd8] sm:$0xff] %v232_v27  ;;  %v238_v30 = vld [vmem:[%s3128_s28 + $0x2d0] sm:$0xff] }
  0x23   : > { %235 = vst [vmem:[%s3133_s29 + $0xe0] sm:$0xff] %v234_v28  ;;  %237 = vst [vmem:[%s3133_s29 + $0xe8] sm:$0xff] %v236_v29  ;;  %v240_v31 = vld [vmem:[%s3128_s28 + $0x2d8] sm:$0xff]  ;;  %v242_v32 = vld [vmem:[%s3128_s28 + $0x2e0] sm:$0xff] }
  0x24   : > { %239 = vst [vmem:[%s3133_s29 + $0xf0] sm:$0xff] %v238_v30  ;;  %241 = vst [vmem:[%s3133_s29 + $0xf8] sm:$0xff] %v240_v31  ;;  %v244_v33 = vld [vmem:[%s3128_s28 + $0x2e8] sm:$0xff]  ;;  %v246_v34 = vld [vmem:[%s3128_s28 + $0x2f0] sm:$0xff] }
  0x25   : > { %243 = vst [vmem:[%s3133_s29 + $0x100] sm:$0xff] %v242_v32  ;;  %v248_v35 = vld [vmem:[%s3128_s28 + $0x2f8] sm:$0xff]  ;;  %245 = vst [vmem:[%s3133_s29 + $0x108] sm:$0xff] %v244_v33  ;;  %v250_v36 = vld [vmem:[%s3128_s28 + $0x360] sm:$0xff] }
  0x26   : > { %247 = vst [vmem:[%s3133_s29 + $0x110] sm:$0xff] %v246_v34  ;;  %249 = vst [vmem:[%s3133_s29 + $0x118] sm:$0xff] %v248_v35  ;;  %v252_v37 = vld [vmem:[%s3128_s28 + $0x368] sm:$0xff]  ;;  %v254_v38 = vld [vmem:[%s3128_s28 + $0x370] sm:$0xff] }
  0x27   : > { %251 = vst [vmem:[%s3133_s29 + $0x120] sm:$0xff] %v250_v36  ;;  %253 = vst [vmem:[%s3133_s29 + $0x128] sm:$0xff] %v252_v37  ;;  %v256_v39 = vld [vmem:[%s3128_s28 + $0x378] sm:$0xff]  ;;  %v258_v40 = vld [vmem:[%s3128_s28 + $0x380] sm:$0xff] }
  0x28   : > { %255 = vst [vmem:[%s3133_s29 + $0x130] sm:$0xff] %v254_v38  ;;  %v260_v41 = vld [vmem:[%s3128_s28 + $0x388] sm:$0xff]  ;;  %257 = vst [vmem:[%s3133_s29 + $0x138] sm:$0xff] %v256_v39  ;;  %v262_v42 = vld [vmem:[%s3128_s28 + $0x3f0] sm:$0xff] }
  0x29   : > { %259 = vst [vmem:[%s3133_s29 + $0x140] sm:$0xff] %v258_v40  ;;  %261 = vst [vmem:[%s3133_s29 + $0x148] sm:$0xff] %v260_v41  ;;  %v264_v43 = vld [vmem:[%s3128_s28 + $0x3f8] sm:$0xff]  ;;  %v266_v44 = vld [vmem:[%s3128_s28 + $0x400] sm:$0xff] }
  0x2a   : > { %263 = vst [vmem:[%s3133_s29 + $0x150] sm:$0xff] %v262_v42  ;;  %265 = vst [vmem:[%s3133_s29 + $0x158] sm:$0xff] %v264_v43  ;;  %v268_v45 = vld [vmem:[%s3128_s28 + $0x408] sm:$0xff]  ;;  %v270_v46 = vld [vmem:[%s3128_s28 + $0x410] sm:$0xff] }
  0x2b   : > { %267 = vst [vmem:[%s3133_s29 + $0x160] sm:$0xff] %v266_v44  ;;  %v272_v47 = vld [vmem:[%s3128_s28 + $0x418] sm:$0xff]  ;;  %269 = vst [vmem:[%s3133_s29 + $0x168] sm:$0xff] %v268_v45  ;;  %v274_v48 = vld [vmem:[%s3128_s28 + $0x480] sm:$0xff] }
  0x2c   : > { %271 = vst [vmem:[%s3133_s29 + $0x170] sm:$0xff] %v270_v46  ;;  %273 = vst [vmem:[%s3133_s29 + $0x178] sm:$0xff] %v272_v47  ;;  %v276_v49 = vld [vmem:[%s3128_s28 + $0x488] sm:$0xff]  ;;  %v278_v50 = vld [vmem:[%s3128_s28 + $0x490] sm:$0xff] }
  0x2d   : > { %275 = vst [vmem:[%s3133_s29 + $0x180] sm:$0xff] %v274_v48  ;;  %277 = vst [vmem:[%s3133_s29 + $0x188] sm:$0xff] %v276_v49  ;;  %v280_v51 = vld [vmem:[%s3128_s28 + $0x498] sm:$0xff]  ;;  %v282_v52 = vld [vmem:[%s3128_s28 + $0x4a0] sm:$0xff] }
  0x2e   : > { %279 = vst [vmem:[%s3133_s29 + $0x190] sm:$0xff] %v278_v50  ;;  %v284_v53 = vld [vmem:[%s3128_s28 + $0x4a8] sm:$0xff]  ;;  %281 = vst [vmem:[%s3133_s29 + $0x198] sm:$0xff] %v280_v51  ;;  %v286_v54 = vld [vmem:[%s3128_s28 + $0x510] sm:$0xff] }
  0x2f   : > { %283 = vst [vmem:[%s3133_s29 + $0x1a0] sm:$0xff] %v282_v52  ;;  %285 = vst [vmem:[%s3133_s29 + $0x1a8] sm:$0xff] %v284_v53  ;;  %v288_v55 = vld [vmem:[%s3128_s28 + $0x518] sm:$0xff]  ;;  %v290_v56 = vld [vmem:[%s3128_s28 + $0x520] sm:$0xff] }
  0x30   : > { %287 = vst [vmem:[%s3133_s29 + $0x1b0] sm:$0xff] %v286_v54  ;;  %289 = vst [vmem:[%s3133_s29 + $0x1b8] sm:$0xff] %v288_v55  ;;  %v292_v57 = vld [vmem:[%s3128_s28 + $0x528] sm:$0xff]  ;;  %v294_v58 = vld [vmem:[%s3128_s28 + $0x530] sm:$0xff] }
  0x31   : > { %291 = vst [vmem:[%s3133_s29 + $0x1c0] sm:$0xff] %v290_v56  ;;  %v296_v59 = vld [vmem:[%s3128_s28 + $0x538] sm:$0xff]  ;;  %293 = vst [vmem:[%s3133_s29 + $0x1c8] sm:$0xff] %v292_v57  ;;  %v298_v60 = vld [vmem:[%s3128_s28 + $0x5a0] sm:$0xff] }
  0x32   : > { %295 = vst [vmem:[%s3133_s29 + $0x1d0] sm:$0xff] %v294_v58  ;;  %297 = vst [vmem:[%s3133_s29 + $0x1d8] sm:$0xff] %v296_v59  ;;  %v300_v61 = vld [vmem:[%s3128_s28 + $0x5a8] sm:$0xff]  ;;  %v302_v62 = vld [vmem:[%s3128_s28 + $0x5b0] sm:$0xff] }
  0x33   : > { %299 = vst [vmem:[%s3133_s29 + $0x1e0] sm:$0xff] %v298_v60  ;;  %301 = vst [vmem:[%s3133_s29 + $0x1e8] sm:$0xff] %v300_v61  ;;  %v304_v63 = vld [vmem:[%s3128_s28 + $0x5b8] sm:$0xff]  ;;  %v306_v0 = vld [vmem:[%s3128_s28 + $0x5c0] sm:$0xff] }
  0x34   : > { %303 = vst [vmem:[%s3133_s29 + $0x1f0] sm:$0xff] %v302_v62  ;;  %v308_v1 = vld [vmem:[%s3128_s28 + $0x5c8] sm:$0xff]  ;;  %305 = vst [vmem:[%s3133_s29 + $0x1f8] sm:$0xff] %v304_v63  ;;  %v310_v2 = vld [vmem:[%s3128_s28 + $0x630] sm:$0xff] }
  0x35   : > { %307 = vst [vmem:[%s3133_s29 + $0x200] sm:$0xff] %v306_v0  ;;  %309 = vst [vmem:[%s3133_s29 + $0x208] sm:$0xff] %v308_v1  ;;  %v312_v3 = vld [vmem:[%s3128_s28 + $0x638] sm:$0xff]  ;;  %v314_v4 = vld [vmem:[%s3128_s28 + $0x640] sm:$0xff] }
  0x36   : > { %311 = vst [vmem:[%s3133_s29 + $0x210] sm:$0xff] %v310_v2  ;;  %313 = vst [vmem:[%s3133_s29 + $0x218] sm:$0xff] %v312_v3  ;;  %v316_v5 = vld [vmem:[%s3128_s28 + $0x648] sm:$0xff]  ;;  %v318_v6 = vld [vmem:[%s3128_s28 + $0x650] sm:$0xff] }
  0x37   : > { %315 = vst [vmem:[%s3133_s29 + $0x220] sm:$0xff] %v314_v4  ;;  %v320_v7 = vld [vmem:[%s3128_s28 + $0x658] sm:$0xff]  ;;  %317 = vst [vmem:[%s3133_s29 + $0x228] sm:$0xff] %v316_v5  ;;  %v322_v8 = vld [vmem:[%s3128_s28 + $0x6c0] sm:$0xff] }
  0x38   : > { %319 = vst [vmem:[%s3133_s29 + $0x230] sm:$0xff] %v318_v6  ;;  %321 = vst [vmem:[%s3133_s29 + $0x238] sm:$0xff] %v320_v7  ;;  %v324_v9 = vld [vmem:[%s3128_s28 + $0x6c8] sm:$0xff]  ;;  %v326_v10 = vld [vmem:[%s3128_s28 + $0x6d0] sm:$0xff] }
  0x39   : > { %323 = vst [vmem:[%s3133_s29 + $0x240] sm:$0xff] %v322_v8  ;;  %325 = vst [vmem:[%s3133_s29 + $0x248] sm:$0xff] %v324_v9  ;;  %v328_v11 = vld [vmem:[%s3128_s28 + $0x6d8] sm:$0xff]  ;;  %v330_v12 = vld [vmem:[%s3128_s28 + $0x6e0] sm:$0xff] }
  0x3a   : > { %327 = vst [vmem:[%s3133_s29 + $0x250] sm:$0xff] %v326_v10  ;;  %v332_v13 = vld [vmem:[%s3128_s28 + $0x6e8] sm:$0xff]  ;;  %329 = vst [vmem:[%s3133_s29 + $0x258] sm:$0xff] %v328_v11  ;;  %v334_v14 = vld [vmem:[%s3128_s28 + $0x750] sm:$0xff] }
  0x3b   : > { %331 = vst [vmem:[%s3133_s29 + $0x260] sm:$0xff] %v330_v12  ;;  %333 = vst [vmem:[%s3133_s29 + $0x268] sm:$0xff] %v332_v13  ;;  %v336_v15 = vld [vmem:[%s3128_s28 + $0x758] sm:$0xff]  ;;  %v338_v16 = vld [vmem:[%s3128_s28 + $0x760] sm:$0xff] }
  0x3c   : > { %335 = vst [vmem:[%s3133_s29 + $0x270] sm:$0xff] %v334_v14  ;;  %337 = vst [vmem:[%s3133_s29 + $0x278] sm:$0xff] %v336_v15  ;;  %v340_v17 = vld [vmem:[%s3128_s28 + $0x768] sm:$0xff]  ;;  %v342_v18 = vld [vmem:[%s3128_s28 + $0x770] sm:$0xff] }
  0x3d   : > { %339 = vst [vmem:[%s3133_s29 + $0x280] sm:$0xff] %v338_v16  ;;  %v344_v19 = vld [vmem:[%s3128_s28 + $0x778] sm:$0xff]  ;;  %341 = vst [vmem:[%s3133_s29 + $0x288] sm:$0xff] %v340_v17  ;;  %v346_v20 = vld [vmem:[%s3128_s28 + $0x7e0] sm:$0xff] }
  0x3e   : > { %343 = vst [vmem:[%s3133_s29 + $0x290] sm:$0xff] %v342_v18  ;;  %345 = vst [vmem:[%s3133_s29 + $0x298] sm:$0xff] %v344_v19  ;;  %v348_v21 = vld [vmem:[%s3128_s28 + $0x7e8] sm:$0xff]  ;;  %v350_v22 = vld [vmem:[%s3128_s28 + $0x7f0] sm:$0xff] }
  0x3f   : > { %347 = vst [vmem:[%s3133_s29 + $0x2a0] sm:$0xff] %v346_v20  ;;  %349 = vst [vmem:[%s3133_s29 + $0x2a8] sm:$0xff] %v348_v21  ;;  %v352_v23 = vld [vmem:[%s3128_s28 + $0x7f8] sm:$0xff]  ;;  %v354_v24 = vld [vmem:[%s3128_s28 + $0x800] sm:$0xff] }
  0x40   : > { %351 = vst [vmem:[%s3133_s29 + $0x2b0] sm:$0xff] %v350_v22  ;;  %v356_v25 = vld [vmem:[%s3128_s28 + $0x808] sm:$0xff]  ;;  %353 = vst [vmem:[%s3133_s29 + $0x2b8] sm:$0xff] %v352_v23  ;;  %v358_v26 = vld [vmem:[%s3128_s28 + $0x870] sm:$0xff] }
  0x41   : > { %355 = vst [vmem:[%s3133_s29 + $0x2c0] sm:$0xff] %v354_v24  ;;  %357 = vst [vmem:[%s3133_s29 + $0x2c8] sm:$0xff] %v356_v25  ;;  %v360_v27 = vld [vmem:[%s3128_s28 + $0x878] sm:$0xff]  ;;  %v362_v28 = vld [vmem:[%s3128_s28 + $0x880] sm:$0xff] }
  0x42   : > { %359 = vst [vmem:[%s3133_s29 + $0x2d0] sm:$0xff] %v358_v26  ;;  %361 = vst [vmem:[%s3133_s29 + $0x2d8] sm:$0xff] %v360_v27  ;;  %v364_v29 = vld [vmem:[%s3128_s28 + $0x888] sm:$0xff]  ;;  %v366_v30 = vld [vmem:[%s3128_s28 + $0x890] sm:$0xff] }
  0x43   : > { %363 = vst [vmem:[%s3133_s29 + $0x2e0] sm:$0xff] %v362_v28  ;;  %v368_v31 = vld [vmem:[%s3128_s28 + $0x898] sm:$0xff]  ;;  %365 = vst [vmem:[%s3133_s29 + $0x2e8] sm:$0xff] %v364_v29  ;;  %v370_v32 = vld [vmem:[%s3128_s28 + $0x900] sm:$0xff] }
  0x44   : > { %367 = vst [vmem:[%s3133_s29 + $0x2f0] sm:$0xff] %v366_v30  ;;  %369 = vst [vmem:[%s3133_s29 + $0x2f8] sm:$0xff] %v368_v31  ;;  %v372_v33 = vld [vmem:[%s3128_s28 + $0x908] sm:$0xff]  ;;  %v374_v34 = vld [vmem:[%s3128_s28 + $0x910] sm:$0xff] }
  0x45   : > { %371 = vst [vmem:[%s3133_s29 + $0x300] sm:$0xff] %v370_v32  ;;  %373 = vst [vmem:[%s3133_s29 + $0x308] sm:$0xff] %v372_v33  ;;  %v376_v35 = vld [vmem:[%s3128_s28 + $0x918] sm:$0xff]  ;;  %v378_v36 = vld [vmem:[%s3128_s28 + $0x920] sm:$0xff] }
  0x46   : > { %375 = vst [vmem:[%s3133_s29 + $0x310] sm:$0xff] %v374_v34  ;;  %v380_v37 = vld [vmem:[%s3128_s28 + $0x928] sm:$0xff]  ;;  %377 = vst [vmem:[%s3133_s29 + $0x318] sm:$0xff] %v376_v35  ;;  %v382_v38 = vld [vmem:[%s3128_s28 + $0x990] sm:$0xff] }
  0x47   : > { %379 = vst [vmem:[%s3133_s29 + $0x320] sm:$0xff] %v378_v36  ;;  %381 = vst [vmem:[%s3133_s29 + $0x328] sm:$0xff] %v380_v37  ;;  %v384_v39 = vld [vmem:[%s3128_s28 + $0x998] sm:$0xff]  ;;  %v386_v40 = vld [vmem:[%s3128_s28 + $0x9a0] sm:$0xff] }
  0x48   : > { %383 = vst [vmem:[%s3133_s29 + $0x330] sm:$0xff] %v382_v38  ;;  %385 = vst [vmem:[%s3133_s29 + $0x338] sm:$0xff] %v384_v39  ;;  %v388_v41 = vld [vmem:[%s3128_s28 + $0x9a8] sm:$0xff]  ;;  %v390_v42 = vld [vmem:[%s3128_s28 + $0x9b0] sm:$0xff] }
  0x49   : > { %387 = vst [vmem:[%s3133_s29 + $0x340] sm:$0xff] %v386_v40  ;;  %v392_v43 = vld [vmem:[%s3128_s28 + $0x9b8] sm:$0xff]  ;;  %389 = vst [vmem:[%s3133_s29 + $0x348] sm:$0xff] %v388_v41  ;;  %v394_v44 = vld [vmem:[%s3128_s28 + $0xa20] sm:$0xff] }
  0x4a   : > { %391 = vst [vmem:[%s3133_s29 + $0x350] sm:$0xff] %v390_v42  ;;  %393 = vst [vmem:[%s3133_s29 + $0x358] sm:$0xff] %v392_v43  ;;  %v396_v45 = vld [vmem:[%s3128_s28 + $0xa28] sm:$0xff]  ;;  %v398_v46 = vld [vmem:[%s3128_s28 + $0xa30] sm:$0xff] }
  0x4b   : > { %395 = vst [vmem:[%s3133_s29 + $0x360] sm:$0xff] %v394_v44  ;;  %397 = vst [vmem:[%s3133_s29 + $0x368] sm:$0xff] %v396_v45  ;;  %v400_v47 = vld [vmem:[%s3128_s28 + $0xa38] sm:$0xff]  ;;  %v402_v48 = vld [vmem:[%s3128_s28 + $0xa40] sm:$0xff] }
  0x4c   : > { %399 = vst [vmem:[%s3133_s29 + $0x370] sm:$0xff] %v398_v46  ;;  %v404_v49 = vld [vmem:[%s3128_s28 + $0xa48] sm:$0xff]  ;;  %401 = vst [vmem:[%s3133_s29 + $0x378] sm:$0xff] %v400_v47  ;;  %v406_v50 = vld [vmem:[%s3128_s28 + $0xab0] sm:$0xff] }
  0x4d   : > { %403 = vst [vmem:[%s3133_s29 + $0x380] sm:$0xff] %v402_v48  ;;  %405 = vst [vmem:[%s3133_s29 + $0x388] sm:$0xff] %v404_v49  ;;  %v408_v51 = vld [vmem:[%s3128_s28 + $0xab8] sm:$0xff]  ;;  %v410_v52 = vld [vmem:[%s3128_s28 + $0xac0] sm:$0xff] }
  0x4e   : > { %407 = vst [vmem:[%s3133_s29 + $0x390] sm:$0xff] %v406_v50  ;;  %409 = vst [vmem:[%s3133_s29 + $0x398] sm:$0xff] %v408_v51  ;;  %v412_v53 = vld [vmem:[%s3128_s28 + $0xac8] sm:$0xff]  ;;  %v414_v54 = vld [vmem:[%s3128_s28 + $0xad0] sm:$0xff] }
  0x4f   : > { %411 = vst [vmem:[%s3133_s29 + $0x3a0] sm:$0xff] %v410_v52  ;;  %v416_v55 = vld [vmem:[%s3128_s28 + $0xad8] sm:$0xff]  ;;  %413 = vst [vmem:[%s3133_s29 + $0x3a8] sm:$0xff] %v412_v53  ;;  %v418_v56 = vld [vmem:[%s3128_s28 + $0xb40] sm:$0xff] }
  0x50   : > { %415 = vst [vmem:[%s3133_s29 + $0x3b0] sm:$0xff] %v414_v54  ;;  %417 = vst [vmem:[%s3133_s29 + $0x3b8] sm:$0xff] %v416_v55  ;;  %v420_v57 = vld [vmem:[%s3128_s28 + $0xb48] sm:$0xff]  ;;  %v422_v58 = vld [vmem:[%s3128_s28 + $0xb50] sm:$0xff] }
  0x51   : > { %419 = vst [vmem:[%s3133_s29 + $0x3c0] sm:$0xff] %v418_v56  ;;  %421 = vst [vmem:[%s3133_s29 + $0x3c8] sm:$0xff] %v420_v57  ;;  %v424_v59 = vld [vmem:[%s3128_s28 + $0xb58] sm:$0xff]  ;;  %v426_v60 = vld [vmem:[%s3128_s28 + $0xb60] sm:$0xff] }
  0x52   : > { %423 = vst [vmem:[%s3133_s29 + $0x3d0] sm:$0xff] %v422_v58  ;;  %v428_v61 = vld [vmem:[%s3128_s28 + $0xb68] sm:$0xff]  ;;  %425 = vst [vmem:[%s3133_s29 + $0x3d8] sm:$0xff] %v424_v59  ;;  %v430_v62 = vld [vmem:[%s3128_s28 + $0xbd0] sm:$0xff] }
  0x53   : > { %427 = vst [vmem:[%s3133_s29 + $0x3e0] sm:$0xff] %v426_v60  ;;  %429 = vst [vmem:[%s3133_s29 + $0x3e8] sm:$0xff] %v428_v61  ;;  %v432_v63 = vld [vmem:[%s3128_s28 + $0xbd8] sm:$0xff]  ;;  %v434_v0 = vld [vmem:[%s3128_s28 + $0xbe0] sm:$0xff] }
  0x54   : > { %431 = vst [vmem:[%s3133_s29 + $0x3f0] sm:$0xff] %v430_v62  ;;  %433 = vst [vmem:[%s3133_s29 + $0x3f8] sm:$0xff] %v432_v63  ;;  %v436_v1 = vld [vmem:[%s3128_s28 + $0xbe8] sm:$0xff]  ;;  %v438_v2 = vld [vmem:[%s3128_s28 + $0xbf0] sm:$0xff] }
  0x55   : > { %435 = vst [vmem:[%s3133_s29 + $0x400] sm:$0xff] %v434_v0  ;;  %v440_v3 = vld [vmem:[%s3128_s28 + $0xbf8] sm:$0xff]  ;;  %437 = vst [vmem:[%s3133_s29 + $0x408] sm:$0xff] %v436_v1  ;;  %v442_v4 = vld [vmem:[%s3128_s28 + $0xc60] sm:$0xff] }
  0x56   : > { %439 = vst [vmem:[%s3133_s29 + $0x410] sm:$0xff] %v438_v2  ;;  %441 = vst [vmem:[%s3133_s29 + $0x418] sm:$0xff] %v440_v3  ;;  %v444_v5 = vld [vmem:[%s3128_s28 + $0xc68] sm:$0xff]  ;;  %v446_v6 = vld [vmem:[%s3128_s28 + $0xc70] sm:$0xff] }
  0x57   : > { %443 = vst [vmem:[%s3133_s29 + $0x420] sm:$0xff] %v442_v4  ;;  %445 = vst [vmem:[%s3133_s29 + $0x428] sm:$0xff] %v444_v5  ;;  %v448_v7 = vld [vmem:[%s3128_s28 + $0xc78] sm:$0xff]  ;;  %v450_v8 = vld [vmem:[%s3128_s28 + $0xc80] sm:$0xff] }
  0x58   : > { %447 = vst [vmem:[%s3133_s29 + $0x430] sm:$0xff] %v446_v6  ;;  %v452_v9 = vld [vmem:[%s3128_s28 + $0xc88] sm:$0xff]  ;;  %449 = vst [vmem:[%s3133_s29 + $0x438] sm:$0xff] %v448_v7  ;;  %v454_v10 = vld [vmem:[%s3128_s28 + $0xcf0] sm:$0xff] }
  0x59   : > { %451 = vst [vmem:[%s3133_s29 + $0x440] sm:$0xff] %v450_v8  ;;  %453 = vst [vmem:[%s3133_s29 + $0x448] sm:$0xff] %v452_v9  ;;  %v456_v11 = vld [vmem:[%s3128_s28 + $0xcf8] sm:$0xff]  ;;  %v458_v12 = vld [vmem:[%s3128_s28 + $0xd00] sm:$0xff] }
  0x5a   : > { %455 = vst [vmem:[%s3133_s29 + $0x450] sm:$0xff] %v454_v10  ;;  %457 = vst [vmem:[%s3133_s29 + $0x458] sm:$0xff] %v456_v11  ;;  %v460_v13 = vld [vmem:[%s3128_s28 + $0xd08] sm:$0xff]  ;;  %v462_v14 = vld [vmem:[%s3128_s28 + $0xd10] sm:$0xff] }
  0x5b   : > { %459 = vst [vmem:[%s3133_s29 + $0x460] sm:$0xff] %v458_v12  ;;  %v464_v15 = vld [vmem:[%s3128_s28 + $0xd18] sm:$0xff]  ;;  %461 = vst [vmem:[%s3133_s29 + $0x468] sm:$0xff] %v460_v13  ;;  %v466_v16 = vld [vmem:[%s3128_s28 + $0xd80] sm:$0xff] }
  0x5c   : > { %463 = vst [vmem:[%s3133_s29 + $0x470] sm:$0xff] %v462_v14  ;;  %465 = vst [vmem:[%s3133_s29 + $0x478] sm:$0xff] %v464_v15  ;;  %v468_v17 = vld [vmem:[%s3128_s28 + $0xd88] sm:$0xff]  ;;  %v470_v18 = vld [vmem:[%s3128_s28 + $0xd90] sm:$0xff] }
  0x5d   : > { %467 = vst [vmem:[%s3133_s29 + $0x480] sm:$0xff] %v466_v16  ;;  %469 = vst [vmem:[%s3133_s29 + $0x488] sm:$0xff] %v468_v17  ;;  %v472_v19 = vld [vmem:[%s3128_s28 + $0xd98] sm:$0xff]  ;;  %v474_v20 = vld [vmem:[%s3128_s28 + $0xda0] sm:$0xff] }
  0x5e   : > { %471 = vst [vmem:[%s3133_s29 + $0x490] sm:$0xff] %v470_v18  ;;  %v476_v21 = vld [vmem:[%s3128_s28 + $0xda8] sm:$0xff]  ;;  %473 = vst [vmem:[%s3133_s29 + $0x498] sm:$0xff] %v472_v19  ;;  %v478_v22 = vld [vmem:[%s3128_s28 + $0xe10] sm:$0xff] }
  0x5f   : > { %475 = vst [vmem:[%s3133_s29 + $0x4a0] sm:$0xff] %v474_v20  ;;  %477 = vst [vmem:[%s3133_s29 + $0x4a8] sm:$0xff] %v476_v21  ;;  %v480_v23 = vld [vmem:[%s3128_s28 + $0xe18] sm:$0xff]  ;;  %v482_v24 = vld [vmem:[%s3128_s28 + $0xe20] sm:$0xff] }
  0x60   : > { %479 = vst [vmem:[%s3133_s29 + $0x4b0] sm:$0xff] %v478_v22  ;;  %481 = vst [vmem:[%s3133_s29 + $0x4b8] sm:$0xff] %v480_v23  ;;  %v484_v25 = vld [vmem:[%s3128_s28 + $0xe28] sm:$0xff]  ;;  %v486_v26 = vld [vmem:[%s3128_s28 + $0xe30] sm:$0xff] }
  0x61   : > { %483 = vst [vmem:[%s3133_s29 + $0x4c0] sm:$0xff] %v482_v24  ;;  %v488_v27 = vld [vmem:[%s3128_s28 + $0xe38] sm:$0xff]  ;;  %485 = vst [vmem:[%s3133_s29 + $0x4c8] sm:$0xff] %v484_v25  ;;  %v490_v28 = vld [vmem:[%s3128_s28 + $0xea0] sm:$0xff] }
  0x62   : > { %487 = vst [vmem:[%s3133_s29 + $0x4d0] sm:$0xff] %v486_v26  ;;  %489 = vst [vmem:[%s3133_s29 + $0x4d8] sm:$0xff] %v488_v27  ;;  %v492_v29 = vld [vmem:[%s3128_s28 + $0xea8] sm:$0xff]  ;;  %v494_v30 = vld [vmem:[%s3128_s28 + $0xeb0] sm:$0xff] }
  0x63   : > { %491 = vst [vmem:[%s3133_s29 + $0x4e0] sm:$0xff] %v490_v28  ;;  %493 = vst [vmem:[%s3133_s29 + $0x4e8] sm:$0xff] %v492_v29  ;;  %v496_v31 = vld [vmem:[%s3128_s28 + $0xeb8] sm:$0xff]  ;;  %v498_v32 = vld [vmem:[%s3128_s28 + $0xec0] sm:$0xff] }
  0x64   : > { %495 = vst [vmem:[%s3133_s29 + $0x4f0] sm:$0xff] %v494_v30  ;;  %v500_v33 = vld [vmem:[%s3128_s28 + $0xec8] sm:$0xff]  ;;  %497 = vst [vmem:[%s3133_s29 + $0x4f8] sm:$0xff] %v496_v31  ;;  %v502_v34 = vld [vmem:[%s3128_s28 + $0xf30] sm:$0xff] }
  0x65   : > { %499 = vst [vmem:[%s3133_s29 + $0x500] sm:$0xff] %v498_v32  ;;  %501 = vst [vmem:[%s3133_s29 + $0x508] sm:$0xff] %v500_v33  ;;  %v504_v35 = vld [vmem:[%s3128_s28 + $0xf38] sm:$0xff]  ;;  %v506_v36 = vld [vmem:[%s3128_s28 + $0xf40] sm:$0xff] }
  0x66   : > { %503 = vst [vmem:[%s3133_s29 + $0x510] sm:$0xff] %v502_v34  ;;  %505 = vst [vmem:[%s3133_s29 + $0x518] sm:$0xff] %v504_v35  ;;  %v508_v37 = vld [vmem:[%s3128_s28 + $0xf48] sm:$0xff]  ;;  %v510_v38 = vld [vmem:[%s3128_s28 + $0xf50] sm:$0xff] }
  0x67   : > { %507 = vst [vmem:[%s3133_s29 + $0x520] sm:$0xff] %v506_v36  ;;  %v512_v39 = vld [vmem:[%s3128_s28 + $0xf58] sm:$0xff]  ;;  %509 = vst [vmem:[%s3133_s29 + $0x528] sm:$0xff] %v508_v37  ;;  %v514_v40 = vld [vmem:[%s3128_s28 + $0xfc0] sm:$0xff] }
  0x68   : > { %511 = vst [vmem:[%s3133_s29 + $0x530] sm:$0xff] %v510_v38  ;;  %513 = vst [vmem:[%s3133_s29 + $0x538] sm:$0xff] %v512_v39  ;;  %v516_v41 = vld [vmem:[%s3128_s28 + $0xfc8] sm:$0xff]  ;;  %v518_v42 = vld [vmem:[%s3128_s28 + $0xfd0] sm:$0xff] }
  0x69   : > { %515 = vst [vmem:[%s3133_s29 + $0x540] sm:$0xff] %v514_v40  ;;  %517 = vst [vmem:[%s3133_s29 + $0x548] sm:$0xff] %v516_v41  ;;  %v520_v43 = vld [vmem:[%s3128_s28 + $0xfd8] sm:$0xff]  ;;  %v522_v44 = vld [vmem:[%s3128_s28 + $0xfe0] sm:$0xff] }
  0x6a   : > { %519 = vst [vmem:[%s3133_s29 + $0x550] sm:$0xff] %v518_v42  ;;  %v524_v45 = vld [vmem:[%s3128_s28 + $0xfe8] sm:$0xff]  ;;  %521 = vst [vmem:[%s3133_s29 + $0x558] sm:$0xff] %v520_v43  ;;  %v526_v46 = vld [vmem:[%s3128_s28 + $0x1050] sm:$0xff] }
  0x6b   : > { %523 = vst [vmem:[%s3133_s29 + $0x560] sm:$0xff] %v522_v44  ;;  %525 = vst [vmem:[%s3133_s29 + $0x568] sm:$0xff] %v524_v45  ;;  %v528_v47 = vld [vmem:[%s3128_s28 + $0x1058] sm:$0xff]  ;;  %v530_v48 = vld [vmem:[%s3128_s28 + $0x1060] sm:$0xff] }
  0x6c   : > { %527 = vst [vmem:[%s3133_s29 + $0x570] sm:$0xff] %v526_v46  ;;  %529 = vst [vmem:[%s3133_s29 + $0x578] sm:$0xff] %v528_v47  ;;  %v532_v49 = vld [vmem:[%s3128_s28 + $0x1068] sm:$0xff]  ;;  %v534_v50 = vld [vmem:[%s3128_s28 + $0x1070] sm:$0xff] }
  0x6d   : > { %531 = vst [vmem:[%s3133_s29 + $0x580] sm:$0xff] %v530_v48  ;;  %v536_v51 = vld [vmem:[%s3128_s28 + $0x1078] sm:$0xff]  ;;  %533 = vst [vmem:[%s3133_s29 + $0x588] sm:$0xff] %v532_v49  ;;  %v538_v52 = vld [vmem:[%s3128_s28 + $0x10e0] sm:$0xff] }
  0x6e   : > { %535 = vst [vmem:[%s3133_s29 + $0x590] sm:$0xff] %v534_v50  ;;  %537 = vst [vmem:[%s3133_s29 + $0x598] sm:$0xff] %v536_v51  ;;  %v540_v53 = vld [vmem:[%s3128_s28 + $0x10e8] sm:$0xff]  ;;  %v542_v54 = vld [vmem:[%s3128_s28 + $0x10f0] sm:$0xff] }
  0x6f   : > { %539 = vst [vmem:[%s3133_s29 + $0x5a0] sm:$0xff] %v538_v52  ;;  %541 = vst [vmem:[%s3133_s29 + $0x5a8] sm:$0xff] %v540_v53  ;;  %v544_v55 = vld [vmem:[%s3128_s28 + $0x10f8] sm:$0xff]  ;;  %v546_v56 = vld [vmem:[%s3128_s28 + $0x1100] sm:$0xff] }
  0x70   : > { %543 = vst [vmem:[%s3133_s29 + $0x5b0] sm:$0xff] %v542_v54  ;;  %v548_v57 = vld [vmem:[%s3128_s28 + $0x1108] sm:$0xff]  ;;  %545 = vst [vmem:[%s3133_s29 + $0x5b8] sm:$0xff] %v544_v55  ;;  %v550_v58 = vld [vmem:[%s3128_s28 + $0x1170] sm:$0xff] }
  0x71   : > { %547 = vst [vmem:[%s3133_s29 + $0x5c0] sm:$0xff] %v546_v56  ;;  %549 = vst [vmem:[%s3133_s29 + $0x5c8] sm:$0xff] %v548_v57  ;;  %v552_v59 = vld [vmem:[%s3128_s28 + $0x1178] sm:$0xff]  ;;  %v554_v60 = vld [vmem:[%s3128_s28 + $0x1180] sm:$0xff] }
  0x72   : > { %551 = vst [vmem:[%s3133_s29 + $0x5d0] sm:$0xff] %v550_v58  ;;  %553 = vst [vmem:[%s3133_s29 + $0x5d8] sm:$0xff] %v552_v59  ;;  %v556_v61 = vld [vmem:[%s3128_s28 + $0x1188] sm:$0xff]  ;;  %v558_v62 = vld [vmem:[%s3128_s28 + $0x1190] sm:$0xff] }
  0x73   : > { %555 = vst [vmem:[%s3133_s29 + $0x5e0] sm:$0xff] %v554_v60  ;;  %v560_v63 = vld [vmem:[%s3128_s28 + $0x1198] sm:$0xff]  ;;  %557 = vst [vmem:[%s3133_s29 + $0x5e8] sm:$0xff] %v556_v61 }
  0x74   : > { %559 = vst [vmem:[%s3133_s29 + $0x5f0] sm:$0xff] %v558_v62  ;;  %561 = vst [vmem:[%s3133_s29 + $0x5f8] sm:$0xff] %v560_v63 }
  0x75 PF: > { %p2478_p8 = scmp.ge.s32.totalorder %s3057_s16, 1  ;;  %p566_p9 = scmp.lt.s32.totalorder %s3057_s16, 4 }
  0x77   : > { %p567_p10 = pnand %p2478_p8, %p566_p9 }
  0x78   : > { %s573_s30 = sand.u32 (!%p567_p10), 1, %s3041_s12  }
  0x79   : > { %570 = sbr.rel (%p567_p10) target bundleno = 540 (0x21c), region = 51 }
  0x7a   : > { %s2681_s6 = smul.u32 (!%p567_p10), 1536, %s573_s30 }
  0x7b   : > { %s2682_s26 = smul.u32 (!%p567_p10), 72, %s573_s30 }
  0x7c   : > { %s3528_s7 = scalar_lea.vmem (!%p567_p10), [#allocation3], %s2681_s6 }
  0x7d   : > { %s3787_s12 = scalar_lea.vmem (!%p567_p10), [#allocation4], %s2682_s26 }
  0x7e   : > { %v3522_v0 = vld [vmem:[%s3835_s0 + $0x4] ss:$8 sps:$4 sm:$0xff]   ;;  %v2730_v3 = vld [vmem:[%s3528_s7 + $0x2a0] ss:$48 sps:$4 sm:$0xff]   ;;  %v2731_v4 = vld [vmem:[%s3528_s7 + $0x2a8] ss:$48 sps:$4 sm:$0xff]  }
  0x7f   : > { %1889 = vmatprep.mubr.bf16.mxu0 %v3522_v0  ;;  %1940 = vmatprep.mubr.bf16.mxu1 %v3522_v0  ;;  %v2726_v1 = vld [vmem:[%s3528_s7 + $0x2a4] ss:$48 sps:$4 sm:$0xff]   ;;  %v2728_v2 = vld [vmem:[%s3528_s7 + $0x2ac] ss:$48 sps:$4 sm:$0xff]   ;;  %v2736_v7 = vld [vmem:[%s3528_s7 + $0x240] ss:$48 sps:$4 sm:$0xff]  }
  0x80   : > { %1857 = vmatprep.subr.bf16.mxu0 %v2726_v1  ;;  %1908 = vmatprep.subr.bf16.mxu1 %v2728_v2  ;;  %v2732_v5 = vld [vmem:[%s3528_s7 + $0x244] ss:$48 sps:$4 sm:$0xff]   ;;  %v2734_v6 = vld [vmem:[%s3528_s7 + $0x24c] ss:$48 sps:$4 sm:$0xff]   ;;  %v2737_v8 = vld [vmem:[%s3528_s7 + $0x248] ss:$48 sps:$4 sm:$0xff]  }
  0x81   : > { %1858 = vmatpush1.bf16.msra.mxu0 %v2730_v3  ;;  %1909 = vmatpush1.bf16.msra.mxu1 %v2731_v4  ;;  %v2738_v9 = vld [vmem:[%s3528_s7 + $0x1e4] ss:$48 sps:$4 sm:$0xff]   ;;  %v2740_v10 = vld [vmem:[%s3528_s7 + $0x1ec] ss:$48 sps:$4 sm:$0xff]   ;;  %v2742_v11 = vld [vmem:[%s3528_s7 + $0x1e0] ss:$48 sps:$4 sm:$0xff]  }
  0x82   : > { %1859 = vmatprep.subr.bf16.mxu0 %v2732_v5  ;;  %1910 = vmatprep.subr.bf16.mxu1 %v2734_v6  ;;  %v2743_v12 = vld [vmem:[%s3528_s7 + $0x1e8] ss:$48 sps:$4 sm:$0xff]   ;;  %v2744_v13 = vld [vmem:[%s3528_s7 + $0x184] ss:$48 sps:$4 sm:$0xff]   ;;  %v2746_v14 = vld [vmem:[%s3528_s7 + $0x18c] ss:$48 sps:$4 sm:$0xff]  }
  0x83   : > { %v2748_v15 = vld [vmem:[%s3528_s7 + $0x180] ss:$48 sps:$4 sm:$0xff]   ;;  %v2749_v16 = vld [vmem:[%s3528_s7 + $0x188] ss:$48 sps:$4 sm:$0xff]   ;;  %v2750_v17 = vld [vmem:[%s3528_s7 + $0x124] ss:$48 sps:$4 sm:$0xff]  }
  0x84   : > { %v2752_v18 = vld [vmem:[%s3528_s7 + $0x12c] ss:$48 sps:$4 sm:$0xff]   ;;  %v2754_v19 = vld [vmem:[%s3528_s7 + $0x120] ss:$48 sps:$4 sm:$0xff]   ;;  %v2755_v20 = vld [vmem:[%s3528_s7 + $0x128] ss:$48 sps:$4 sm:$0xff]  }
  0x85   : > { %1860 = vmatpush1.bf16.msra.mxu0 %v2736_v7  ;;  %1911 = vmatpush1.bf16.msra.mxu1 %v2737_v8  ;;  %v2756_v21 = vld [vmem:[%s3528_s7 + $0xc4] ss:$48 sps:$4 sm:$0xff]   ;;  %v2758_v22 = vld [vmem:[%s3528_s7 + $0xcc] ss:$48 sps:$4 sm:$0xff]   ;;  %v2760_v23 = vld [vmem:[%s3528_s7 + $0xc0] ss:$48 sps:$4 sm:$0xff]  }
  0x86   : > { %1861 = vmatprep.subr.bf16.mxu0 %v2738_v9  ;;  %1912 = vmatprep.subr.bf16.mxu1 %v2740_v10  ;;  %v2761_v24 = vld [vmem:[%s3528_s7 + $0xc8] ss:$48 sps:$4 sm:$0xff]   ;;  %v2762_v25 = vld [vmem:[%s3528_s7 + $0x64] ss:$48 sps:$4 sm:$0xff]   ;;  %v2764_v26 = vld [vmem:[%s3528_s7 + $0x6c] ss:$48 sps:$4 sm:$0xff]  }
  0x87   : > { %v2766_v27 = vld [vmem:[%s3528_s7 + $0x60] ss:$48 sps:$4 sm:$0xff]   ;;  %v2767_v28 = vld [vmem:[%s3528_s7 + $0x68] ss:$48 sps:$4 sm:$0xff]   ;;  %v2768_v29 = vld [vmem:[%s3528_s7 + $0x4] ss:$48 sps:$4 sm:$0xff]  }
  0x88   : > { %v2770_v30 = vld [vmem:[%s3528_s7 + $0xc] ss:$48 sps:$4 sm:$0xff]   ;;  %v2772_v31 = vld [vmem:[%s3528_s7] ss:$48 sps:$4 sm:$0xff]   ;;  %v2773_v32 = vld [vmem:[%s3528_s7 + $0x8] ss:$48 sps:$4 sm:$0xff]  }
  0x89   : > { %1862 = vmatpush1.bf16.msra.mxu0 %v2742_v11  ;;  %1913 = vmatpush1.bf16.msra.mxu1 %v2743_v12  ;;  %v2774_v33 = vld [vmem:[%s3528_s7 + $0x5a4] ss:$48 sps:$4 sm:$0xff]   ;;  %v2776_v34 = vld [vmem:[%s3528_s7 + $0x5ac] ss:$48 sps:$4 sm:$0xff]   ;;  %v2778_v35 = vld [vmem:[%s3528_s7 + $0x5a0] ss:$48 sps:$4 sm:$0xff]  }
  0x8a   : > { %1863 = vmatprep.subr.bf16.mxu0 %v2744_v13  ;;  %1914 = vmatprep.subr.bf16.mxu1 %v2746_v14  ;;  %v2779_v36 = vld [vmem:[%s3528_s7 + $0x5a8] ss:$48 sps:$4 sm:$0xff]   ;;  %v2780_v37 = vld [vmem:[%s3528_s7 + $0x544] ss:$48 sps:$4 sm:$0xff]   ;;  %v2782_v38 = vld [vmem:[%s3528_s7 + $0x54c] ss:$48 sps:$4 sm:$0xff]  }
  0x8b   : > { %v2784_v39 = vld [vmem:[%s3528_s7 + $0x540] ss:$48 sps:$4 sm:$0xff]   ;;  %v2785_v40 = vld [vmem:[%s3528_s7 + $0x548] ss:$48 sps:$4 sm:$0xff]   ;;  %v2786_v41 = vld [vmem:[%s3528_s7 + $0x4e4] ss:$48 sps:$4 sm:$0xff]  }
  0x8c   : > { %v2788_v42 = vld [vmem:[%s3528_s7 + $0x4ec] ss:$48 sps:$4 sm:$0xff]   ;;  %v2790_v43 = vld [vmem:[%s3528_s7 + $0x4e0] ss:$48 sps:$4 sm:$0xff]   ;;  %v2791_v44 = vld [vmem:[%s3528_s7 + $0x4e8] ss:$48 sps:$4 sm:$0xff]  }
  0x8d   : > { %1864 = vmatpush1.bf16.msra.mxu0 %v2748_v15  ;;  %1915 = vmatpush1.bf16.msra.mxu1 %v2749_v16  ;;  %v2792_v45 = vld [vmem:[%s3528_s7 + $0x484] ss:$48 sps:$4 sm:$0xff]   ;;  %v2794_v46 = vld [vmem:[%s3528_s7 + $0x48c] ss:$48 sps:$4 sm:$0xff]   ;;  %v2796_v47 = vld [vmem:[%s3528_s7 + $0x480] ss:$48 sps:$4 sm:$0xff]  }
  0x8e   : > { %1865 = vmatprep.subr.bf16.mxu0 %v2750_v17  ;;  %1916 = vmatprep.subr.bf16.mxu1 %v2752_v18  ;;  %v2797_v48 = vld [vmem:[%s3528_s7 + $0x488] ss:$48 sps:$4 sm:$0xff]   ;;  %v2798_v49 = vld [vmem:[%s3528_s7 + $0x424] ss:$48 sps:$4 sm:$0xff]   ;;  %v2800_v50 = vld [vmem:[%s3528_s7 + $0x42c] ss:$48 sps:$4 sm:$0xff]  }
  0x8f   : > { %v2802_v51 = vld [vmem:[%s3528_s7 + $0x420] ss:$48 sps:$4 sm:$0xff]   ;;  %v2803_v52 = vld [vmem:[%s3528_s7 + $0x428] ss:$48 sps:$4 sm:$0xff]   ;;  %v2804_v53 = vld [vmem:[%s3528_s7 + $0x3c4] ss:$48 sps:$4 sm:$0xff]  }
  0x90   : > { %v2806_v54 = vld [vmem:[%s3528_s7 + $0x3cc] ss:$48 sps:$4 sm:$0xff]   ;;  %v2808_v55 = vld [vmem:[%s3528_s7 + $0x3c0] ss:$48 sps:$4 sm:$0xff]   ;;  %v2809_v56 = vld [vmem:[%s3528_s7 + $0x3c8] ss:$48 sps:$4 sm:$0xff]  }
  0x91   : > { %1866 = vmatpush1.bf16.msra.mxu0 %v2754_v19  ;;  %1917 = vmatpush1.bf16.msra.mxu1 %v2755_v20  ;;  %v2810_v57 = vld [vmem:[%s3528_s7 + $0x364] ss:$48 sps:$4 sm:$0xff]   ;;  %v2812_v58 = vld [vmem:[%s3528_s7 + $0x36c] ss:$48 sps:$4 sm:$0xff]   ;;  %v2814_v59 = vld [vmem:[%s3528_s7 + $0x360] ss:$48 sps:$4 sm:$0xff]  }
  0x92   : > { %1867 = vmatprep.subr.bf16.mxu0 %v2756_v21  ;;  %1918 = vmatprep.subr.bf16.mxu1 %v2758_v22  ;;  %v2815_v60 = vld [vmem:[%s3528_s7 + $0x368] ss:$48 sps:$4 sm:$0xff]   ;;  %v2816_v61 = vld [vmem:[%s3528_s7 + $0x304] ss:$48 sps:$4 sm:$0xff]   ;;  %v2818_v62 = vld [vmem:[%s3528_s7 + $0x30c] ss:$48 sps:$4 sm:$0xff]  }
  0x93   : > { %v2820_v63 = vld [vmem:[%s3528_s7 + $0x300] ss:$48 sps:$4 sm:$0xff]   ;;  %v2821_v1 = vld [vmem:[%s3528_s7 + $0x308] ss:$48 sps:$4 sm:$0xff]   ;;  %v2827_v2 = vld [vmem:[%s3528_s7 + $0x2b4] ss:$48 sps:$4 sm:$0xff]  }
  0x94   : > { %v2830_v3 = vld [vmem:[%s3528_s7 + $0x2bc] ss:$48 sps:$4 sm:$0xff]   ;;  %v3599_v4 = vld [vmem:[%s3835_s0] ss:$8 sps:$4 sm:$0xff]   ;;  %v687_v5 = vld [vmem:[%s3835_s0 + $0x10] sm:$0xff]  ;;  %s2679_s27 = smul.u32 (%p3115_p6), 24, %s3049_s14 }
  0x95   : > { %1868 = vmatpush1.bf16.msra.mxu0 %v2760_v23  ;;  %1919 = vmatpush1.bf16.msra.mxu1 %v2761_v24  ;;  %v2825_v6 = vld [vmem:[%s3528_s7 + $0x2b0] ss:$48 sps:$4 sm:$0xff]   ;;  %v2828_v7 = vld [vmem:[%s3528_s7 + $0x2b8] ss:$48 sps:$4 sm:$0xff]   ;;  %v2833_v8 = vld [vmem:[%s3528_s7 + $0x254] ss:$48 sps:$4 sm:$0xff]   ;;  %v3608_v10 = vcombine.high %v687_v5, %v687_v5  ;;  %v3620_v17 = vcombine.low %v687_v5, %v687_v5 }
  0x96   : > { %1869 = vmatprep.subr.bf16.mxu0 %v2762_v25  ;;  %1920 = vmatprep.subr.bf16.mxu1 %v2764_v26  ;;  %v2836_v9 = vld [vmem:[%s3528_s7 + $0x25c] ss:$48 sps:$4 sm:$0xff]   ;;  %v2831_v11 = vld [vmem:[%s3528_s7 + $0x250] ss:$48 sps:$4 sm:$0xff]   ;;  %v2834_v12 = vld [vmem:[%s3528_s7 + $0x258] ss:$48 sps:$4 sm:$0xff]   ;;  %s2355_s29 = scalar_lea.vmem (%p3115_p6), %s3838_s3, %s2679_s27 }
  0x97   : > { %v2839_v13 = vld [vmem:[%s3528_s7 + $0x1f4] ss:$48 sps:$4 sm:$0xff]   ;;  %v2842_v14 = vld [vmem:[%s3528_s7 + $0x1fc] ss:$48 sps:$4 sm:$0xff]   ;;  %v2837_v15 = vld [vmem:[%s3528_s7 + $0x1f0] ss:$48 sps:$4 sm:$0xff]  }
  0x98   : > { %v2840_v16 = vld [vmem:[%s3528_s7 + $0x1f8] ss:$48 sps:$4 sm:$0xff]   ;;  %v2845_v18 = vld [vmem:[%s3528_s7 + $0x194] ss:$48 sps:$4 sm:$0xff]   ;;  %v2848_v19 = vld [vmem:[%s3528_s7 + $0x19c] ss:$48 sps:$4 sm:$0xff]  }
  0x99   : > { %1870 = vmatpush1.bf16.msra.mxu0 %v2766_v27  ;;  %1921 = vmatpush1.bf16.msra.mxu1 %v2767_v28  ;;  %v2843_v20 = vld [vmem:[%s3528_s7 + $0x190] ss:$48 sps:$4 sm:$0xff]   ;;  %v2846_v21 = vld [vmem:[%s3528_s7 + $0x198] ss:$48 sps:$4 sm:$0xff]   ;;  %v2851_v22 = vld [vmem:[%s3528_s7 + $0x134] ss:$48 sps:$4 sm:$0xff]  }
  0x9a   : > { %1871 = vmatprep.subr.bf16.mxu0 %v2768_v29  ;;  %1922 = vmatprep.subr.bf16.mxu1 %v2770_v30  ;;  %v2854_v23 = vld [vmem:[%s3528_s7 + $0x13c] ss:$48 sps:$4 sm:$0xff]   ;;  %v2849_v24 = vld [vmem:[%s3528_s7 + $0x130] ss:$48 sps:$4 sm:$0xff]   ;;  %v2852_v25 = vld [vmem:[%s3528_s7 + $0x138] ss:$48 sps:$4 sm:$0xff]  }
  0x9b   : > { %v2857_v26 = vld [vmem:[%s3528_s7 + $0xd4] ss:$48 sps:$4 sm:$0xff]   ;;  %v2860_v27 = vld [vmem:[%s3528_s7 + $0xdc] ss:$48 sps:$4 sm:$0xff]   ;;  %v2855_v28 = vld [vmem:[%s3528_s7 + $0xd0] ss:$48 sps:$4 sm:$0xff]  }
  0x9c   : > { %v2858_v29 = vld [vmem:[%s3528_s7 + $0xd8] ss:$48 sps:$4 sm:$0xff]   ;;  %v2863_v30 = vld [vmem:[%s3528_s7 + $0x74] ss:$48 sps:$4 sm:$0xff]   ;;  %v2922_v5 = vld [vmem:[%s3528_s7 + $0x31c] ss:$48 sps:$4 sm:$0xff]  }
  0x9d   : > { %1872 = vmatpush1.bf16.msra.mxu0 %v2772_v31  ;;  %1923 = vmatpush1.bf16.msra.mxu1 %v2773_v32  ;;  %v2866_v31 = vld [vmem:[%s3528_s7 + $0x7c] ss:$48 sps:$4 sm:$0xff]   ;;  %v2861_v32 = vld [vmem:[%s3528_s7 + $0x70] ss:$48 sps:$4 sm:$0xff]  }
  0x9e   : > { %1873 = vmatprep.subr.bf16.mxu0 %v2774_v33  ;;  %1924 = vmatprep.subr.bf16.mxu1 %v2776_v34  ;;  %v2864_v33 = vld [vmem:[%s3528_s7 + $0x78] ss:$48 sps:$4 sm:$0xff]   ;;  %v2869_v34 = vld [vmem:[%s3528_s7 + $0x14] ss:$48 sps:$4 sm:$0xff]  }
  0xa1   : > { %1874 = vmatpush2.bf16.msra.mxu0 %v2778_v35  ;;  %1925 = vmatpush2.bf16.msra.mxu1 %v2779_v36  ;;  %v2872_v35 = vld [vmem:[%s3528_s7 + $0x1c] ss:$48 sps:$4 sm:$0xff]   ;;  %v2867_v36 = vld [vmem:[%s3528_s7 + $0x10] ss:$48 sps:$4 sm:$0xff]  }
  0xa2   : > { %1875 = vmatprep.subr.bf16.mxu0 %v2780_v37  ;;  %1926 = vmatprep.subr.bf16.mxu1 %v2782_v38  ;;  %v2870_v37 = vld [vmem:[%s3528_s7 + $0x18] ss:$48 sps:$4 sm:$0xff]   ;;  %v2875_v38 = vld [vmem:[%s3528_s7 + $0x5b4] ss:$48 sps:$4 sm:$0xff]  }
  0xa5   : > { %1876 = vmatpush2.bf16.msra.mxu0 %v2784_v39  ;;  %1927 = vmatpush2.bf16.msra.mxu1 %v2785_v40  ;;  %v2878_v39 = vld [vmem:[%s3528_s7 + $0x5bc] ss:$48 sps:$4 sm:$0xff]   ;;  %v2873_v40 = vld [vmem:[%s3528_s7 + $0x5b0] ss:$48 sps:$4 sm:$0xff]  }
  0xa6   : > { %1877 = vmatprep.subr.bf16.mxu0 %v2786_v41  ;;  %1928 = vmatprep.subr.bf16.mxu1 %v2788_v42  ;;  %v2876_v41 = vld [vmem:[%s3528_s7 + $0x5b8] ss:$48 sps:$4 sm:$0xff]   ;;  %v2881_v42 = vld [vmem:[%s3528_s7 + $0x554] ss:$48 sps:$4 sm:$0xff]  }
  0xa9   : > { %1878 = vmatpush2.bf16.msra.mxu0 %v2790_v43  ;;  %1929 = vmatpush2.bf16.msra.mxu1 %v2791_v44  ;;  %v2884_v43 = vld [vmem:[%s3528_s7 + $0x55c] ss:$48 sps:$4 sm:$0xff]   ;;  %v2879_v44 = vld [vmem:[%s3528_s7 + $0x550] ss:$48 sps:$4 sm:$0xff]  }
  0xaa   : > { %1879 = vmatprep.subr.bf16.mxu0 %v2792_v45  ;;  %1930 = vmatprep.subr.bf16.mxu1 %v2794_v46  ;;  %v2882_v45 = vld [vmem:[%s3528_s7 + $0x558] ss:$48 sps:$4 sm:$0xff]   ;;  %v2887_v46 = vld [vmem:[%s3528_s7 + $0x4f4] ss:$48 sps:$4 sm:$0xff]  }
  0xad   : > { %1880 = vmatpush2.bf16.msra.mxu0 %v2796_v47  ;;  %1931 = vmatpush2.bf16.msra.mxu1 %v2797_v48  ;;  %v2890_v47 = vld [vmem:[%s3528_s7 + $0x4fc] ss:$48 sps:$4 sm:$0xff]   ;;  %v2885_v48 = vld [vmem:[%s3528_s7 + $0x4f0] ss:$48 sps:$4 sm:$0xff]  }
  0xae   : > { %1881 = vmatprep.subr.bf16.mxu0 %v2798_v49  ;;  %1932 = vmatprep.subr.bf16.mxu1 %v2800_v50  ;;  %v2888_v49 = vld [vmem:[%s3528_s7 + $0x4f8] ss:$48 sps:$4 sm:$0xff]   ;;  %v2893_v50 = vld [vmem:[%s3528_s7 + $0x494] ss:$48 sps:$4 sm:$0xff]  }
  0xb1   : > { %1882 = vmatpush2.bf16.msra.mxu0 %v2802_v51  ;;  %1933 = vmatpush2.bf16.msra.mxu1 %v2803_v52  ;;  %v2896_v51 = vld [vmem:[%s3528_s7 + $0x49c] ss:$48 sps:$4 sm:$0xff]   ;;  %v2891_v52 = vld [vmem:[%s3528_s7 + $0x490] ss:$48 sps:$4 sm:$0xff]  }
  0xb2   : > { %1883 = vmatprep.subr.bf16.mxu0 %v2804_v53  ;;  %1934 = vmatprep.subr.bf16.mxu1 %v2806_v54  ;;  %v2894_v53 = vld [vmem:[%s3528_s7 + $0x498] ss:$48 sps:$4 sm:$0xff]   ;;  %v2899_v54 = vld [vmem:[%s3528_s7 + $0x434] ss:$48 sps:$4 sm:$0xff]  }
  0xb5   : > { %1884 = vmatpush2.bf16.msra.mxu0 %v2808_v55  ;;  %1935 = vmatpush2.bf16.msra.mxu1 %v2809_v56  ;;  %v2902_v55 = vld [vmem:[%s3528_s7 + $0x43c] ss:$48 sps:$4 sm:$0xff]   ;;  %v2897_v56 = vld [vmem:[%s3528_s7 + $0x430] ss:$48 sps:$4 sm:$0xff]  }
  0xb6   : > { %1885 = vmatprep.subr.bf16.mxu0 %v2810_v57  ;;  %1936 = vmatprep.subr.bf16.mxu1 %v2812_v58  ;;  %v2900_v57 = vld [vmem:[%s3528_s7 + $0x438] ss:$48 sps:$4 sm:$0xff]   ;;  %v2907_v58 = vld [vmem:[%s3528_s7 + $0x3d4] ss:$48 sps:$4 sm:$0xff]  }
  0xb9   : > { %1886 = vmatpush2.bf16.msra.mxu0 %v2814_v59  ;;  %1937 = vmatpush2.bf16.msra.mxu1 %v2815_v60  ;;  %v2910_v59 = vld [vmem:[%s3528_s7 + $0x3dc] ss:$48 sps:$4 sm:$0xff]   ;;  %v2905_v60 = vld [vmem:[%s3528_s7 + $0x3d0] ss:$48 sps:$4 sm:$0xff]  }
  0xba   : > { %1887 = vmatprep.subr.bf16.mxu0 %v2816_v61  ;;  %1938 = vmatprep.subr.bf16.mxu1 %v2818_v62  ;;  %v2908_v61 = vld [vmem:[%s3528_s7 + $0x3d8] ss:$48 sps:$4 sm:$0xff]   ;;  %v2913_v62 = vld [vmem:[%s3528_s7 + $0x374] ss:$48 sps:$4 sm:$0xff]  }
  0xbd   : > { %1888 = vmatpush2.bf16.msra.mxu0 %v2820_v63  ;;  %1939 = vmatpush2.bf16.msra.mxu1 %v2821_v1  ;;  %v2916_v63 = vld [vmem:[%s3528_s7 + $0x37c] ss:$48 sps:$4 sm:$0xff]   ;;  %v2911_v1 = vld [vmem:[%s3528_s7 + $0x370] ss:$48 sps:$4 sm:$0xff]  }
  0xbe   : > { %1959 = vmatprep.subr.bf16.mxu0 %v2827_v2  ;;  %2010 = vmatprep.subr.bf16.mxu1 %v2830_v3  ;;  %v2914_v2 = vld [vmem:[%s3528_s7 + $0x378] ss:$48 sps:$4 sm:$0xff]   ;;  %v2919_v3 = vld [vmem:[%s3528_s7 + $0x314] ss:$48 sps:$4 sm:$0xff]  }
  0xc0   : > { %1890 = vmatmul.mubr.bf16.vlgmr.msra.gmra.mxu0 %v3599_v4  ;;  %1941 = vmatmul.mubr.bf16.vlgmr.msra.gmra.mxu1 %v3599_v4 }
  0xc1   : > { %1960 = vmatpush1.bf16.msra.mxu0 %v2825_v6  ;;  %2011 = vmatpush1.bf16.msra.mxu1 %v2828_v7  ;;  %v2917_v6 = vld [vmem:[%s3528_s7 + $0x310] ss:$48 sps:$4 sm:$0xff]   ;;  %v2920_v7 = vld [vmem:[%s3528_s7 + $0x318] ss:$48 sps:$4 sm:$0xff]  }
  0xc2   : > { %1961 = vmatprep.subr.bf16.mxu0 %v2833_v8  ;;  %2012 = vmatprep.subr.bf16.mxu1 %v2836_v9  ;;  %v2925_v8 = vld [vmem:[%s3528_s7 + $0x2c4] ss:$48 sps:$4 sm:$0xff]   ;;  %v2928_v9 = vld [vmem:[%s3528_s7 + $0x2cc] ss:$48 sps:$4 sm:$0xff]  }
  0xc3   : > { %1899 = vmatprep.mubr.bf16.mxu0 %v3608_v10  ;;  %1950 = vmatprep.mubr.bf16.mxu1 %v3608_v10 }
  0xc5   : > { %1962 = vmatpush1.bf16.msra.mxu0 %v2831_v11  ;;  %2013 = vmatpush1.bf16.msra.mxu1 %v2834_v12  ;;  %v2923_v11 = vld [vmem:[%s3528_s7 + $0x2c0] ss:$48 sps:$4 sm:$0xff]   ;;  %v2926_v12 = vld [vmem:[%s3528_s7 + $0x2c8] ss:$48 sps:$4 sm:$0xff]  }
  0xc6   : > { %1963 = vmatprep.subr.bf16.mxu0 %v2839_v13  ;;  %2014 = vmatprep.subr.bf16.mxu1 %v2842_v14  ;;  %v2931_v13 = vld [vmem:[%s3528_s7 + $0x264] ss:$48 sps:$4 sm:$0xff]   ;;  %v2934_v14 = vld [vmem:[%s3528_s7 + $0x26c] ss:$48 sps:$4 sm:$0xff]  }
  0xc8   : > { %1900 = vmatmul.mubr.bf16.gmra.mxu0 %v3620_v17  ;;  %1951 = vmatmul.mubr.bf16.gmra.mxu1 %v3620_v17 }
  0xc9   : > { %1964 = vmatpush1.bf16.msra.mxu0 %v2837_v15  ;;  %2015 = vmatpush1.bf16.msra.mxu1 %v2840_v16  ;;  %v2929_v15 = vld [vmem:[%s3528_s7 + $0x260] ss:$48 sps:$4 sm:$0xff]   ;;  %v2932_v16 = vld [vmem:[%s3528_s7 + $0x268] ss:$48 sps:$4 sm:$0xff]  }
  0xca   : > { %1965 = vmatprep.subr.bf16.mxu0 %v2845_v18  ;;  %2016 = vmatprep.subr.bf16.mxu1 %v2848_v19  ;;  %v2937_v18 = vld [vmem:[%s3528_s7 + $0x204] ss:$48 sps:$4 sm:$0xff]   ;;  %v2940_v19 = vld [vmem:[%s3528_s7 + $0x20c] ss:$48 sps:$4 sm:$0xff]  }
  0xcb   : > { %1991 = vmatprep.mubr.bf16.mxu0 %v3522_v0  ;;  %2042 = vmatprep.mubr.bf16.mxu1 %v3522_v0 }
  0xcd   : > { %1966 = vmatpush1.bf16.msra.mxu0 %v2843_v20  ;;  %2017 = vmatpush1.bf16.msra.mxu1 %v2846_v21  ;;  %v2935_v20 = vld [vmem:[%s3528_s7 + $0x200] ss:$48 sps:$4 sm:$0xff]   ;;  %v2938_v21 = vld [vmem:[%s3528_s7 + $0x208] ss:$48 sps:$4 sm:$0xff]  }
  0xce   : > { %1967 = vmatprep.subr.bf16.mxu0 %v2851_v22  ;;  %2018 = vmatprep.subr.bf16.mxu1 %v2854_v23  ;;  %v2943_v22 = vld [vmem:[%s3528_s7 + $0x1a4] ss:$48 sps:$4 sm:$0xff]   ;;  %v2946_v23 = vld [vmem:[%s3528_s7 + $0x1ac] ss:$48 sps:$4 sm:$0xff]  }
  0xd1   : > { %1968 = vmatpush1.bf16.msra.mxu0 %v2849_v24  ;;  %2019 = vmatpush1.bf16.msra.mxu1 %v2852_v25  ;;  %v2941_v24 = vld [vmem:[%s3528_s7 + $0x1a0] ss:$48 sps:$4 sm:$0xff]   ;;  %v2944_v25 = vld [vmem:[%s3528_s7 + $0x1a8] ss:$48 sps:$4 sm:$0xff]  }
  0xd2   : > { %1969 = vmatprep.subr.bf16.mxu0 %v2857_v26  ;;  %2020 = vmatprep.subr.bf16.mxu1 %v2860_v27  ;;  %v2949_v26 = vld [vmem:[%s3528_s7 + $0x144] ss:$48 sps:$4 sm:$0xff]   ;;  %v2952_v27 = vld [vmem:[%s3528_s7 + $0x14c] ss:$48 sps:$4 sm:$0xff]  }
  0xd5   : > { %1970 = vmatpush1.bf16.msra.mxu0 %v2855_v28  ;;  %2021 = vmatpush1.bf16.msra.mxu1 %v2858_v29  ;;  %v3059_v28 = vmov 0   ;;  %v2301_v29 = vld [vmem:[%s3836_s1] sm:$0xff] }
  0xd6   : > { %1971 = vmatprep.subr.bf16.mxu0 %v2863_v30  ;;  %2022 = vmatprep.subr.bf16.mxu1 %v2866_v31  ;;  %v2303_v30 = vld [vmem:[%s3836_s1 + $0x10] sm:$0xff] }
  0xd7   : > { %2724 = vset.pattern.permute.xlu0 %v3059_v28  ;;  %2725 = vset.pattern.permute.xlu1 %v3059_v28  ;;  %v2947_v31 = vld [vmem:[%s3528_s7 + $0x140] ss:$48 sps:$4 sm:$0xff]  }
  0xd8   : > { %2306 = vperm.xlu0 %2724, %v2301_v29   ;;  %2316 = vperm.xlu1 %2725, %v2303_v30  }
  0xd9   : > { %1972 = vmatpush1.bf16.msra.mxu0 %v2861_v32  ;;  %2023 = vmatpush1.bf16.msra.mxu1 %v2864_v33  ;;  %v2950_v32 = vld [vmem:[%s3528_s7 + $0x148] ss:$48 sps:$4 sm:$0xff]   ;;  %v2958_v33 = vld [vmem:[%s3528_s7 + $0xec] ss:$48 sps:$4 sm:$0xff]  }
  0xda   : > { %1973 = vmatprep.subr.bf16.mxu0 %v2869_v34  ;;  %2024 = vmatprep.subr.bf16.mxu1 %v2872_v35  ;;  %v2302_v34 = vld [vmem:[%s3836_s1 + $0x8] sm:$0xff]  ;;  %v2953_v35 = vld [vmem:[%s3528_s7 + $0xe0] ss:$48 sps:$4 sm:$0xff]  }
  0xdc   : > { %2311 = vperm.xlu0 %2724, %v2302_v34  }
  0xdd   : > { %1974 = vmatpush1.bf16.msra.mxu0 %v2867_v36  ;;  %2025 = vmatpush1.bf16.msra.mxu1 %v2870_v37  ;;  %v2956_v36 = vld [vmem:[%s3528_s7 + $0xe8] ss:$48 sps:$4 sm:$0xff]   ;;  %v2961_v37 = vld [vmem:[%s3528_s7 + $0x84] ss:$48 sps:$4 sm:$0xff]  }
  0xde   : > { %1975 = vmatprep.subr.bf16.mxu0 %v2875_v38  ;;  %2026 = vmatprep.subr.bf16.mxu1 %v2878_v39  ;;  %v2964_v38 = vld [vmem:[%s3528_s7 + $0x8c] ss:$48 sps:$4 sm:$0xff]   ;;  %v2959_v39 = vld [vmem:[%s3528_s7 + $0x80] ss:$48 sps:$4 sm:$0xff]  }
  0xe1   : > { %1976 = vmatpush2.bf16.msra.mxu0 %v2873_v40  ;;  %2027 = vmatpush2.bf16.msra.mxu1 %v2876_v41  ;;  %v2962_v40 = vld [vmem:[%s3528_s7 + $0x88] ss:$48 sps:$4 sm:$0xff]   ;;  %v2967_v41 = vld [vmem:[%s3528_s7 + $0x24] ss:$48 sps:$4 sm:$0xff]  }
  0xe2   : > { %1977 = vmatprep.subr.bf16.mxu0 %v2881_v42  ;;  %2028 = vmatprep.subr.bf16.mxu1 %v2884_v43  ;;  %v2970_v42 = vld [vmem:[%s3528_s7 + $0x2c] ss:$48 sps:$4 sm:$0xff]   ;;  %v2965_v43 = vld [vmem:[%s3528_s7 + $0x20] ss:$48 sps:$4 sm:$0xff]  }
  0xe5   : > { %1978 = vmatpush2.bf16.msra.mxu0 %v2879_v44  ;;  %2029 = vmatpush2.bf16.msra.mxu1 %v2882_v45  ;;  %v2968_v44 = vld [vmem:[%s3528_s7 + $0x28] ss:$48 sps:$4 sm:$0xff]   ;;  %v2973_v45 = vld [vmem:[%s3528_s7 + $0x5c4] ss:$48 sps:$4 sm:$0xff]  }
  0xe6   : > { %1979 = vmatprep.subr.bf16.mxu0 %v2887_v46  ;;  %2030 = vmatprep.subr.bf16.mxu1 %v2890_v47  ;;  %v2976_v46 = vld [vmem:[%s3528_s7 + $0x5cc] ss:$48 sps:$4 sm:$0xff]   ;;  %v2971_v47 = vld [vmem:[%s3528_s7 + $0x5c0] ss:$48 sps:$4 sm:$0xff]  }
  0xe9   : > { %1980 = vmatpush2.bf16.msra.mxu0 %v2885_v48  ;;  %2031 = vmatpush2.bf16.msra.mxu1 %v2888_v49  ;;  %v2974_v48 = vld [vmem:[%s3528_s7 + $0x5c8] ss:$48 sps:$4 sm:$0xff]   ;;  %v2979_v49 = vld [vmem:[%s3528_s7 + $0x564] ss:$48 sps:$4 sm:$0xff]  }
  0xea   : > { %1981 = vmatprep.subr.bf16.mxu0 %v2893_v50  ;;  %2032 = vmatprep.subr.bf16.mxu1 %v2896_v51  ;;  %v2982_v50 = vld [vmem:[%s3528_s7 + $0x56c] ss:$48 sps:$4 sm:$0xff]   ;;  %v2977_v51 = vld [vmem:[%s3528_s7 + $0x560] ss:$48 sps:$4 sm:$0xff]  }
  0xed   : > { %1982 = vmatpush2.bf16.msra.mxu0 %v2891_v52  ;;  %2033 = vmatpush2.bf16.msra.mxu1 %v2894_v53  ;;  %v2980_v52 = vld [vmem:[%s3528_s7 + $0x568] ss:$48 sps:$4 sm:$0xff]   ;;  %v2985_v53 = vld [vmem:[%s3528_s7 + $0x504] ss:$48 sps:$4 sm:$0xff]  }
  0xee   : > { %1983 = vmatprep.subr.bf16.mxu0 %v2899_v54  ;;  %2034 = vmatprep.subr.bf16.mxu1 %v2902_v55  ;;  %v2988_v54 = vld [vmem:[%s3528_s7 + $0x50c] ss:$48 sps:$4 sm:$0xff]   ;;  %v2983_v55 = vld [vmem:[%s3528_s7 + $0x500] ss:$48 sps:$4 sm:$0xff]  }
  0xf1   : > { %1984 = vmatpush2.bf16.msra.mxu0 %v2897_v56  ;;  %2035 = vmatpush2.bf16.msra.mxu1 %v2900_v57  ;;  %v2986_v56 = vld [vmem:[%s3528_s7 + $0x508] ss:$48 sps:$4 sm:$0xff]   ;;  %v2991_v57 = vld [vmem:[%s3528_s7 + $0x4a4] ss:$48 sps:$4 sm:$0xff]  }
  0xf2   : > { %1985 = vmatprep.subr.bf16.mxu0 %v2907_v58  ;;  %2036 = vmatprep.subr.bf16.mxu1 %v2910_v59  ;;  %v2994_v58 = vld [vmem:[%s3528_s7 + $0x4ac] ss:$48 sps:$4 sm:$0xff]   ;;  %v2989_v59 = vld [vmem:[%s3528_s7 + $0x4a0] ss:$48 sps:$4 sm:$0xff]  }
  0xf5   : > { %1986 = vmatpush2.bf16.msra.mxu0 %v2905_v60  ;;  %2037 = vmatpush2.bf16.msra.mxu1 %v2908_v61  ;;  %v2992_v60 = vld [vmem:[%s3528_s7 + $0x4a8] ss:$48 sps:$4 sm:$0xff]   ;;  %v2997_v61 = vld [vmem:[%s3528_s7 + $0x444] ss:$48 sps:$4 sm:$0xff]  }
  0xf6   : > { %1987 = vmatprep.subr.bf16.mxu0 %v2913_v62  ;;  %2038 = vmatprep.subr.bf16.mxu1 %v2916_v63  ;;  %v3000_v62 = vld [vmem:[%s3528_s7 + $0x44c] ss:$48 sps:$4 sm:$0xff]   ;;  %v2995_v63 = vld [vmem:[%s3528_s7 + $0x440] ss:$48 sps:$4 sm:$0xff]  }
  0xf9   : > { %1988 = vmatpush2.bf16.msra.mxu0 %v2911_v1  ;;  %2039 = vmatpush2.bf16.msra.mxu1 %v2914_v2  ;;  %v2998_v1 = vld [vmem:[%s3528_s7 + $0x448] ss:$48 sps:$4 sm:$0xff]   ;;  %v3003_v2 = vld [vmem:[%s3528_s7 + $0x3e4] ss:$48 sps:$4 sm:$0xff]  }
  0xfa   : > { %1989 = vmatprep.subr.bf16.mxu0 %v2919_v3  ;;  %2040 = vmatprep.subr.bf16.mxu1 %v2922_v5  ;;  %v3006_v3 = vld [vmem:[%s3528_s7 + $0x3ec] ss:$48 sps:$4 sm:$0xff]   ;;  %v3001_v5 = vld [vmem:[%s3528_s7 + $0x3e0] ss:$48 sps:$4 sm:$0xff]  }
  0xfd   : > { %1990 = vmatpush2.bf16.msra.mxu0 %v2917_v6  ;;  %2041 = vmatpush2.bf16.msra.mxu1 %v2920_v7  ;;  %v3004_v6 = vld [vmem:[%s3528_s7 + $0x3e8] ss:$48 sps:$4 sm:$0xff]   ;;  %v3009_v7 = vld [vmem:[%s3528_s7 + $0x384] ss:$48 sps:$4 sm:$0xff]  }
  0xfe   : > { %2061 = vmatprep.subr.bf16.mxu0 %v2925_v8  ;;  %2112 = vmatprep.subr.bf16.mxu1 %v2928_v9  ;;  %v3012_v8 = vld [vmem:[%s3528_s7 + $0x38c] ss:$48 sps:$4 sm:$0xff]   ;;  %v3007_v9 = vld [vmem:[%s3528_s7 + $0x380] ss:$48 sps:$4 sm:$0xff]  }
 0x100   : > { %1992 = vmatmul.mubr.bf16.vlgmr.msra.gmra.mxu0 %v3599_v4  ;;  %2043 = vmatmul.mubr.bf16.vlgmr.msra.gmra.mxu1 %v3599_v4 }
 0x101   : > { %2062 = vmatpush1.bf16.msra.mxu0 %v2923_v11  ;;  %2113 = vmatpush1.bf16.msra.mxu1 %v2926_v12  ;;  %v3010_v11 = vld [vmem:[%s3528_s7 + $0x388] ss:$48 sps:$4 sm:$0xff]   ;;  %v3015_v12 = vld [vmem:[%s3528_s7 + $0x324] ss:$48 sps:$4 sm:$0xff]  }
 0x102   : > { %2063 = vmatprep.subr.bf16.mxu0 %v2931_v13  ;;  %2114 = vmatprep.subr.bf16.mxu1 %v2934_v14  ;;  %v3018_v13 = vld [vmem:[%s3528_s7 + $0x32c] ss:$48 sps:$4 sm:$0xff]   ;;  %v3013_v14 = vld [vmem:[%s3528_s7 + $0x320] ss:$48 sps:$4 sm:$0xff]  }
 0x103   : > { %2001 = vmatprep.mubr.bf16.mxu0 %v3608_v10  ;;  %2052 = vmatprep.mubr.bf16.mxu1 %v3608_v10 }
 0x105   : > { %2064 = vmatpush1.bf16.msra.mxu0 %v2929_v15  ;;  %2115 = vmatpush1.bf16.msra.mxu1 %v2932_v16  ;;  %v3016_v15 = vld [vmem:[%s3528_s7 + $0x328] ss:$48 sps:$4 sm:$0xff]  }
 0x106   : > { %2065 = vmatprep.subr.bf16.mxu0 %v2937_v18  ;;  %2116 = vmatprep.subr.bf16.mxu1 %v2940_v19 }
 0x108   : > { %2002 = vmatmul.mubr.bf16.gmra.mxu0 %v3620_v17  ;;  %2053 = vmatmul.mubr.bf16.gmra.mxu1 %v3620_v17 }
 0x109   : > { %2066 = vmatpush1.bf16.msra.mxu0 %v2935_v20  ;;  %2117 = vmatpush1.bf16.msra.mxu1 %v2938_v21 }
 0x10a   : > { %2067 = vmatprep.subr.bf16.mxu0 %v2943_v22  ;;  %2118 = vmatprep.subr.bf16.mxu1 %v2946_v23 }
 0x10b   : > { %2093 = vmatprep.mubr.bf16.mxu0 %v3522_v0  ;;  %2144 = vmatprep.mubr.bf16.mxu1 %v3522_v0  ;;  %v2955_v0 = vld [vmem:[%s3528_s7 + $0xe4] ss:$48 sps:$4 sm:$0xff]  }
 0x10d   : > { %2068 = vmatpush1.bf16.msra.mxu0 %v2941_v24  ;;  %2119 = vmatpush1.bf16.msra.mxu1 %v2944_v25 }
 0x10e   : > { %2069 = vmatprep.subr.bf16.mxu0 %v2949_v26  ;;  %2120 = vmatprep.subr.bf16.mxu1 %v2952_v27 }
 0x111   : > { %2070 = vmatpush1.bf16.msra.mxu0 %v2947_v31  ;;  %2121 = vmatpush1.bf16.msra.mxu1 %v2950_v32 }
 0x112   : > { %2071 = vmatprep.subr.bf16.mxu0 %v2955_v0  ;;  %2122 = vmatprep.subr.bf16.mxu1 %v2958_v33 }
 0x115   : > { %2072 = vmatpush1.bf16.msra.mxu0 %v2953_v35  ;;  %2123 = vmatpush1.bf16.msra.mxu1 %v2956_v36 }
 0x116   : > { %2073 = vmatprep.subr.bf16.mxu0 %v2961_v37  ;;  %2124 = vmatprep.subr.bf16.mxu1 %v2964_v38 }
 0x119   : > { %2074 = vmatpush1.bf16.msra.mxu0 %v2959_v39  ;;  %2125 = vmatpush1.bf16.msra.mxu1 %v2962_v40 }
 0x11a   : > { %2075 = vmatprep.subr.bf16.mxu0 %v2967_v41  ;;  %2126 = vmatprep.subr.bf16.mxu1 %v2970_v42 }
 0x11d   : > { %2076 = vmatpush1.bf16.msra.mxu0 %v2965_v43  ;;  %2127 = vmatpush1.bf16.msra.mxu1 %v2968_v44 }
 0x11e   : > { %2077 = vmatprep.subr.bf16.mxu0 %v2973_v45  ;;  %2128 = vmatprep.subr.bf16.mxu1 %v2976_v46 }
 0x121   : > { %2078 = vmatpush2.bf16.msra.mxu0 %v2971_v47  ;;  %2129 = vmatpush2.bf16.msra.mxu1 %v2974_v48 }
 0x122   : > { %2079 = vmatprep.subr.bf16.mxu0 %v2979_v49  ;;  %2130 = vmatprep.subr.bf16.mxu1 %v2982_v50 }
 0x125   : > { %2080 = vmatpush2.bf16.msra.mxu0 %v2977_v51  ;;  %2131 = vmatpush2.bf16.msra.mxu1 %v2980_v52 }
 0x126   : > { %2081 = vmatprep.subr.bf16.mxu0 %v2985_v53  ;;  %2132 = vmatprep.subr.bf16.mxu1 %v2988_v54 }
 0x129   : > { %2082 = vmatpush2.bf16.msra.mxu0 %v2983_v55  ;;  %2133 = vmatpush2.bf16.msra.mxu1 %v2986_v56 }
 0x12a   : > { %2083 = vmatprep.subr.bf16.mxu0 %v2991_v57  ;;  %2134 = vmatprep.subr.bf16.mxu1 %v2994_v58 }
 0x12d   : > { %2084 = vmatpush2.bf16.msra.mxu0 %v2989_v59  ;;  %2135 = vmatpush2.bf16.msra.mxu1 %v2992_v60 }
 0x12e   : > { %2085 = vmatprep.subr.bf16.mxu0 %v2997_v61  ;;  %2136 = vmatprep.subr.bf16.mxu1 %v3000_v62 }
 0x131   : > { %2086 = vmatpush2.bf16.msra.mxu0 %v2995_v63  ;;  %2137 = vmatpush2.bf16.msra.mxu1 %v2998_v1 }
 0x132   : > { %2087 = vmatprep.subr.bf16.mxu0 %v3003_v2  ;;  %2138 = vmatprep.subr.bf16.mxu1 %v3006_v3 }
 0x135   : > { %2088 = vmatpush2.bf16.msra.mxu0 %v3001_v5  ;;  %2139 = vmatpush2.bf16.msra.mxu1 %v3004_v6 }
 0x136   : > { %2089 = vmatprep.subr.bf16.mxu0 %v3009_v7  ;;  %2140 = vmatprep.subr.bf16.mxu1 %v3012_v8 }
 0x139   : > { %2090 = vmatpush2.bf16.msra.mxu0 %v3007_v9  ;;  %2141 = vmatpush2.bf16.msra.mxu1 %v3010_v11 }
 0x13a   : > { %2091 = vmatprep.subr.bf16.mxu0 %v3015_v12  ;;  %2142 = vmatprep.subr.bf16.mxu1 %v3018_v13 }
 0x13d   : > { %2092 = vmatpush2.bf16.msra.mxu0 %v3013_v14  ;;  %2143 = vmatpush2.bf16.msra.mxu1 %v3016_v15 }
 0x140   : > { %2094 = vmatmul.mubr.bf16.vlgmr.msra.gmra.mxu0 %v3599_v4  ;;  %2145 = vmatmul.mubr.bf16.vlgmr.msra.gmra.mxu1 %v3599_v4 }
 0x141   : > { %2103 = vmatprep.mubr.bf16.mxu0 %v3608_v10  ;;  %2154 = vmatprep.mubr.bf16.mxu1 %v3608_v10 }
 0x148   : > { %2104 = vmatmul.mubr.bf16.gmra.mxu0 %v3620_v17  ;;  %2155 = vmatmul.mubr.bf16.gmra.mxu1 %v3620_v17 }
 0x153   : > { %v2307_v51 = vpop.permute.xlu0 %2306 }
 0x157   : > { %v2312_v5 = vpop.permute.xlu0 %2311 }
 0x180   : > { %v1891_v16 = vpop.f32.mrf.mxu0  ;;  %v1942_v18 = vpop.f32.mrf.mxu1 }
 0x182   : > { %v1893_v19 = vpop.f32.mrf.mxu0  ;;  %v1944_v20 = vpop.f32.mrf.mxu1 }
 0x183   : > { %v2274_v21 = vmax.f32 %v1891_v16, %v1944_v20 }
 0x184   : > { %v3765_v22 = vpop.f32.mrf.mxu0  ;;  %v3767_v23 = vpop.f32.mrf.mxu1 }
 0x186   : > { %v1897_v24 = vpop.f32.mrf.mxu0  ;;  %v3769_v25 = vpop.f32.mrf.mxu1 }
 0x187   : > { %v2277_v4 = vmax.f32 %v3765_v22, %v3769_v25 }
 0x188   : > { %v3773_v10 = vpop.f32.mrf.mxu0  ;;  %v3775_v26 = vpop.f32.mrf.mxu1 }
 0x18a   : > { %v3777_v17 = vpop.f32.mrf.mxu0  ;;  %v3779_v27 = vpop.f32.mrf.mxu1 }
 0x18b   : > { %v2280_v28 = vmax.f32 %v3773_v10, %v3779_v27 }
 0x18c   : > { %v1905_v29 = vpop.f32.mrf.mxu0  ;;  %v1956_v30 = vpop.f32.mrf.mxu1 }
 0x18e   : > { %v1906_v31 = vpop.f32.mrf.mxu0  ;;  %v1957_v32 = vpop.f32.mrf.mxu1 }
 0x1c0   : > { %v1993_v0 = vpop.f32.mrf.mxu0  ;;  %v2044_v33 = vpop.f32.mrf.mxu1 }
 0x1c1   : > { %v2275_v34 = vmax.f32 %v1893_v19, %v1993_v0 }
 0x1c2   : > { %v1995_v35 = vpop.f32.mrf.mxu0  ;;  %v2046_v36 = vpop.f32.mrf.mxu1 }
 0x1c3   : > { %v2276_v57 = vmax.f32 %v1942_v18, %v1995_v35 }
 0x1c4   : > { %v1997_v37 = vpop.f32.mrf.mxu0  ;;  %v2048_v38 = vpop.f32.mrf.mxu1 }
 0x1c5   : > { %v2278_v39 = vmax.f32 %v1897_v24, %v1997_v37 }
 0x1c6   : > { %v1999_v40 = vpop.f32.mrf.mxu0  ;;  %v2050_v41 = vpop.f32.mrf.mxu1 }
 0x1c7   : > { %v2279_v13 = vmax.f32 %v3767_v23, %v1999_v40 }
 0x1c8   : > { %v2003_v42 = vpop.f32.mrf.mxu0  ;;  %v2054_v43 = vpop.f32.mrf.mxu1 }
 0x1c9   : > { %v2281_v44 = vmax.f32 %v3777_v17, %v2003_v42  ;;  %v2317_v17 = vpop.permute.xlu1 %2316 }
 0x1ca   : > { %v2005_v45 = vpop.f32.mrf.mxu0  ;;  %v2056_v46 = vpop.f32.mrf.mxu1 }
 0x1cb   : > { %v2282_v29 = vmax.f32 %v3775_v26, %v2005_v45 }
 0x1cc   : > { %v2007_v47 = vpop.f32.mrf.mxu0  ;;  %v2058_v48 = vpop.f32.mrf.mxu1 }
 0x1ce   : > { %v2008_v49 = vpop.f32.mrf.mxu0  ;;  %v2059_v50 = vpop.f32.mrf.mxu1 }
 0x200   : > { %v2095_v52 = vpop.f32.mrf.mxu0  ;;  %v2146_v53 = vpop.f32.mrf.mxu1 }
 0x201   : > { %v2284_v54 = vmax.f32 %v2046_v36, %v2146_v53 }
 0x202   : > { %v2097_v55 = vpop.f32.mrf.mxu0  ;;  %v2148_v56 = vpop.f32.mrf.mxu1 }
 0x203   : > { %v2293_v58 = vmax.f32 %v2275_v34, %v2284_v54  ;;  %v2283_v59 = vmax.f32 %v2044_v33, %v2097_v55  ;;  %v2285_v60 = vmax.f32 %v2095_v52, %v2148_v56 }
 0x204   : > { %v2099_v61 = vpop.f32.mrf.mxu0  ;;  %v2150_v62 = vpop.f32.mrf.mxu1 }
 0x205   : > { %v2292_v63 = vmax.f32 %v2274_v21, %v2283_v59  ;;  %v2294_v1 = vmax.f32 %v2276_v57, %v2285_v60  ;;  %v2320_v2 = vadd.f32 %v2307_v51, %v2293_v58  ;;  %v2287_v3 = vmax.f32 %v2050_v41, %v2150_v62 }
 0x206   : > { %v2101_v6 = vpop.f32.mrf.mxu0  ;;  %v2152_v7 = vpop.f32.mrf.mxu1 }
 0x207   : > { %v2319_v8 = vadd.f32 %v2307_v51, %v2292_v63  ;;  %v2321_v9 = vadd.f32 %v2307_v51, %v2294_v1  ;;  %v2329_v11 = vmax.f32 %v2320_v2, 0.0  ;;  %v2296_v12 = vmax.f32 %v2278_v39, %v2287_v3 }
 0x208   : > { %v2286_v14 = vmax.f32 %v2048_v38, %v2101_v6  ;;  %v2288_v15 = vmax.f32 %v2099_v61, %v2152_v7  ;;  %v2105_v16 = vpop.f32.mrf.mxu0  ;;  %v2156_v18 = vpop.f32.mrf.mxu1 }
 0x209   : > { %v2328_v19 = vmax.f32 %v2319_v8, 0.0  ;;  %v2330_v20 = vmax.f32 %v2321_v9, 0.0  ;;  %2338 = vst [vmem:[%s3787_s12 + $0x8] sm:$0xff] %v2329_v11  ;;  %v2323_v21 = vadd.f32 %v2312_v5, %v2296_v12  ;;  %v2290_v24 = vmax.f32 %v2056_v46, %v2156_v18 }
 0x20a   : > { %v2295_v23 = vmax.f32 %v2277_v4, %v2286_v14  ;;  %v2297_v30 = vmax.f32 %v2279_v13, %v2288_v15  ;;  %v2107_v31 = vpop.f32.mrf.mxu0  ;;  %v2158_v32 = vpop.f32.mrf.mxu1 }
 0x20b   : > { %2337 = vst [vmem:[%s3787_s12] sm:$0xff] %v2328_v19  ;;  %2339 = vst [vmem:[%s3787_s12 + $0x10] sm:$0xff] %v2330_v20  ;;  %v2332_v0 = vmax.f32 %v2323_v21, 0.0  ;;  %v2299_v33 = vmax.f32 %v2281_v44, %v2290_v24  ;;  %v2289_v34 = vmax.f32 %v2054_v43, %v2107_v31  ;;  %v2291_v35 = vmax.f32 %v2105_v16, %v2158_v32 }
 0x20c   : > { %v2322_v36 = vadd.f32 %v2312_v5, %v2295_v23  ;;  %v2324_v37 = vadd.f32 %v2312_v5, %v2297_v30  ;;  %v2109_v38 = vpop.f32.mrf.mxu0  ;;  %v2160_v39 = vpop.f32.mrf.mxu1 }
 0x20d   : > { %2341 = vst [vmem:[%s3787_s12 + $0x20] sm:$0xff] %v2332_v0  ;;  %v2298_v22 = vmax.f32 %v2280_v28, %v2289_v34  ;;  %v2300_v25 = vmax.f32 %v2282_v29, %v2291_v35  ;;  %v2326_v4 = vadd.f32 %v2317_v17, %v2299_v33 }
 0x20e   : > { %v2331_v26 = vmax.f32 %v2322_v36, 0.0  ;;  %v2333_v40 = vmax.f32 %v2324_v37, 0.0  ;;  %v2110_v41 = vpop.f32.mrf.mxu0  ;;  %v2161_v42 = vpop.f32.mrf.mxu1 }
 0x20f   : > { %v2325_v43 = vadd.f32 %v2317_v17, %v2298_v22  ;;  %v2327_v44 = vadd.f32 %v2317_v17, %v2300_v25  ;;  %v2335_v45 = vmax.f32 %v2326_v4, 0.0  ;;  %2352 = sbr.rel (!%p3115_p6) target bundleno = 540 (0x21c), region = 67 }
 0x210   : > { %2340 = vst [vmem:[%s3787_s12 + $0x18] sm:$0xff] %v2331_v26  ;;  %2342 = vst [vmem:[%s3787_s12 + $0x28] sm:$0xff] %v2333_v40  ;;  %v2370_v27 = vld [vmem:[%s3787_s12 + $0x8] sm:$0xff] (%p3115_p6) }
 0x211   : > { %v2334_v46 = vmax.f32 %v2325_v43, 0.0  ;;  %v2336_v47 = vmax.f32 %v2327_v44, 0.0  ;;  %2344 = vst [vmem:[%s3787_s12 + $0x38] sm:$0xff] %v2335_v45  ;;  %2371 = vst [vmem:[%s2355_s29 + $0x8] sm:$0xff] (%p3115_p6), %v2370_v27 }
 0x212   : > { %v2368_v10 = vld [vmem:[%s3787_s12] sm:$0xff] (%p3115_p6)  ;;  %v2372_v28 = vld [vmem:[%s3787_s12 + $0x10] sm:$0xff] (%p3115_p6) }
 0x213   : > { %2343 = vst [vmem:[%s3787_s12 + $0x30] sm:$0xff] %v2334_v46  ;;  %2345 = vst [vmem:[%s3787_s12 + $0x40] sm:$0xff] %v2336_v47 }
 0x214   : > { %v2376_v49 = vld [vmem:[%s3787_s12 + $0x20] sm:$0xff]  ;;  %2369 = vst [vmem:[%s2355_s29] sm:$0xff] %v2368_v10  ;;  %2373 = vst [vmem:[%s2355_s29 + $0x10] sm:$0xff] %v2372_v28 }
 0x215   : > { %2377 = vst [vmem:[%s2355_s29 + $0x50] sm:$0xff] %v2376_v49 }
 0x217   : > { %v2374_v48 = vld [vmem:[%s3787_s12 + $0x18] sm:$0xff]  ;;  %v2378_v50 = vld [vmem:[%s3787_s12 + $0x28] sm:$0xff] }
 0x218   : > { %v2382_v52 = vld [vmem:[%s3787_s12 + $0x38] sm:$0xff]  ;;  %2375 = vst [vmem:[%s2355_s29 + $0x48] sm:$0xff] %v2374_v48  ;;  %2379 = vst [vmem:[%s2355_s29 + $0x58] sm:$0xff] %v2378_v50 }
 0x219   : > { %2383 = vst [vmem:[%s2355_s29 + $0x98] sm:$0xff] %v2382_v52 }
 0x21a   : > { %v2380_v51 = vld [vmem:[%s3787_s12 + $0x30] sm:$0xff]  ;;  %v2384_v53 = vld [vmem:[%s3787_s12 + $0x40] sm:$0xff] }
 0x21b   : > { %2381 = vst [vmem:[%s2355_s29 + $0x90] sm:$0xff] %v2380_v51  ;;  %2385 = vst [vmem:[%s2355_s29 + $0xa0] sm:$0xff] %v2384_v53 }
 0x21c PF: > { %s13_s16 = sadd.s32 1, %s3057_s16   ;;  %s3840_s12 = smov %s3045_s13 }
 0x21d   : > { %p10_p11 = scmp.ge.s32.totalorder %s13_s16, 5   ;;  %s3841_s13 = smov %s3120_s22 }
 0x21e   : > { %s3842_s14 = smov %s3053_s15  ;;  %s3843_s15 = smov %s3845_s17 }
 0x21f   :  { %12 = sbr.rel (!%p10_p11) target bundleno = 3 (0x3), region = 124 }

// kernel: stn_forward.7
= control target key start
LH: loop header
LB: loop body
LE: loop exit
PB: predicated region body
PF: predicated region fallthrough
CT: control target
= control target key end

     0   :  { %s1470_s12 = smov 0   ;;  %s1472_s13 = smov 0   ;;  %s1847_s0 = inlined_call_operand.vmem [shape: bf16[10,768], index: 0, kind: input, shape index: {}]   ;;  %s1848_s1 = inlined_call_operand.vmem [shape: f32[10,1], index: 1, kind: input, shape index: {}]   ;;  %s1849_s2 = inlined_call_operand.vmem [shape: bf16[768,1024], index: 2, kind: input, shape index: {}]   ;;  %s1850_s3 = inlined_call_operand.vmem [shape: f32[10,256], index: 3, kind: output, shape index: {}]  }
   0x1   :  { %s1474_s14 = smov 0   ;;  %s1476_s15 = smov 0  }
   0x2   :  { %s1478_s16 = smov 0   ;;  %s1480_s17 = smov 0  }
   0x3   :  { %s1482_s18 = smov 0   ;;  %s1484_s19 = smov 0  }
   0x4   :  { %s1486_s20 = smov 0   ;;  %s1488_s21 = smov 0  }
   0x5   :  { %s1490_s22 = smov 0  }
   0x6 LB: > { %s1080_s23 = sadd.s32 4294967295, %s1446_s22   ;;  %s22_s24 = sadd.s32 1, %s1438_s20  ;;  %s1446_s22 = sphi %s1490_s22, %s13_s22   ;;  %s1442_s21 = sphi %s1488_s21, %s1871_s21   ;;  %s1438_s20 = sphi %s1486_s20, %s1870_s20   ;;  %s1434_s19 = sphi %s1484_s19, %s1869_s19   ;;  %s1430_s18 = sphi %s1482_s18, %s1868_s18   ;;  %s1426_s17 = sphi %s1480_s17, %s1867_s17   ;;  %s1422_s16 = sphi %s1478_s16, %s1866_s16   ;;  %s1418_s15 = sphi %s1476_s15, %s1865_s15   ;;  %s1414_s14 = sphi %s1474_s14, %s1864_s14   ;;  %s1410_s13 = sphi %s1472_s13, %s1863_s13   ;;  %s1406_s12 = sphi %s1470_s12, %s1862_s12  }
   0x7   : > { %p23_p0 = scmp.ge.s32.totalorder %s22_s24, 3  ;;  %s25_s25 = sadd.s32 1, %s1442_s21 }
   0x8   : > { %s32_s26 = sadd.s32 1, %s1426_s17  ;;  %p39_p1 = scmp.ne.s32.totalorder %s1426_s17, %s1422_s16 }
   0x9   : > { %s1873_s24 = smov (%p23_p0, %s22_s24), 0  ;;  %s1875_s25 = smov (!%p23_p0, %s25_s25), %s1442_s21 }
   0xa   : > { %1853 = sst [smem:[#allocation6_spill]] %s1873_s24  ;;  %s29_s27 = ssub.s32 %s1438_s20, %s1873_s24 }
   0xb   : > { %p40_p2 = scmp.eq.s32.totalorder %s1446_s22, 0  ;;  %p27_p3 = scmp.ge.s32.totalorder %s1875_s25, 2 }
   0xc   : > { %p30_p4 = scmp.eq.s32.totalorder %s29_s27, 0  ;;  %s81_s29 = sadd.s32 1, %s1418_s15 }
   0xd   : > { %p1537_p5 = por %p40_p2, %p39_p1  ;;  %s1877_s25 = smov (%p27_p3, %s1875_s25), 0 }
   0xe   : > { %1855 = sst [smem:[#allocation7_spill]] %s1877_s25  ;;  %s77_s4 = ssub.s32 %s1442_s21, %s1877_s25 }
   0xf   : > { %s1545_s30 = scalar_select %p30_p4, %s1426_s17, %s32_s26  }
  0x10   : > { %p88_p6 = scmp.ne.s32.totalorder %s1418_s15, %s1414_s14  ;;  %s78_s5 = sor.u32 %s77_s4, %s29_s27 }
  0x11   : > { %1856 = sst [smem:[#allocation8_spill]] %s1545_s30  ;;  %p105_p7 = scmp.eq.s32.totalorder %s77_s4, 0 }
  0x12   : > { %p79_p8 = scmp.eq.s32.totalorder %s78_s5, 0  ;;  %p1551_p9 = por %p88_p6, %p40_p2 }
  0x13   : > { %s107_s7 = sadd.s32 1, %s1410_s13  ;;  %p117_p10 = scmp.ne.s32.totalorder %s1410_s13, %s1406_s12 }
  0x14   : > { %s1559_s8 = scalar_select %p79_p8, %s1418_s15, %s81_s29  }
  0x15   : > { %s1562_s9 = scalar_select %p105_p7, %s1410_s13, %s107_s7  }
  0x16   : > { %p118_p11 = scmp.eq.s32.totalorder %s1080_s23, 5  ;;  %p1083_p13 = scmp.ge.s32.totalorder %s1446_s22, 6 }
  0x18   : > { %p1564_p12 = por %p118_p11, %p117_p10  ;;  %143 = sbr.rel (%p1083_p13) target bundleno = 73 (0x49), region = 20 }
  0x1d   : > { %146 = sbr.rel (!%p1537_p5) target bundleno = 34 (0x22), region = 24  ;;  %s148_s11 = sand.u32 (%p1537_p5), 1, %s1426_s17  }
  0x1e   : > { %s1168_s26 = sshll.u32 (%p1537_p5), %s1438_s20, 3  ;;  %s1084_s27 = sshll.u32 (%p1537_p5), %s148_s11, 4 }
  0x1f   : > { %s153_s5 = scalar_lea.vmem (%p1537_p5), %s1847_s0, %s1168_s26  ;;  %s150_s23 = scalar_lea.vmem (%p1537_p5), [#allocation3], %s1084_s27 }
  0x20   : > { %v184_v0 = vld [vmem:[%s153_s5] sm:$0xff] (%p1537_p5)  ;;  %v186_v1 = vld [vmem:[%s153_s5 + $0x18] sm:$0xff] (%p1537_p5) }
  0x21   : > { %185 = vst [vmem:[%s150_s23] sm:$0xff] (%p1537_p5), %v184_v0  ;;  %187 = vst [vmem:[%s150_s23 + $0x8] sm:$0xff] (%p1537_p5), %v186_v1 }
  0x22 PF: > { %193 = sbr.rel (!%p1551_p9) target bundleno = 73 (0x49), region = 62  ;;  %s195_s28 = sand.u32 (%p1551_p9), 1, %s1418_s15  }
  0x23   : > { %s1089_s7 = sshll.u32 (%p1551_p9), %s1442_s21, 2  ;;  %s1087_s25 = sshll.u32 (%p1551_p9), %s195_s28, 9 }
  0x24   : > { %s1169_s11 = sshll.u32 (%p1551_p9), %s1438_s20, 8  ;;  %s1589_s6 = scalar_lea.vmem (%p1551_p9), [#allocation4], %s1087_s25 }
  0x25   : > { %s201_s24 = sadd.s32 (%p1551_p9), %s1169_s11, %s1089_s7 }
  0x26   : > { %s1091_s30 = sshll.u32 (%p1551_p9), %s201_s24, 2 }
  0x27   : > { %s1584_s4 = scalar_lea.vmem %s1849_s2, %s1091_s30 }
  0x28   : > { %v216_v2 = vld [vmem:[%s1584_s4] sm:$0xff]  ;;  %v218_v3 = vld [vmem:[%s1584_s4 + $0x8] sm:$0xff] }
  0x29   : > { %v220_v4 = vld [vmem:[%s1584_s4 + $0x20] sm:$0xff]  ;;  %217 = vst [vmem:[%s1589_s6] sm:$0xff] %v216_v2  ;;  %219 = vst [vmem:[%s1589_s6 + $0x8] sm:$0xff] %v218_v3  ;;  %v222_v5 = vld [vmem:[%s1584_s4 + $0x28] sm:$0xff] }
  0x2a   : > { %221 = vst [vmem:[%s1589_s6 + $0x10] sm:$0xff] %v220_v4  ;;  %v224_v6 = vld [vmem:[%s1584_s4 + $0x40] sm:$0xff]  ;;  %v226_v7 = vld [vmem:[%s1584_s4 + $0x48] sm:$0xff]  ;;  %223 = vst [vmem:[%s1589_s6 + $0x18] sm:$0xff] %v222_v5 }
  0x2b   : > { %225 = vst [vmem:[%s1589_s6 + $0x20] sm:$0xff] %v224_v6  ;;  %227 = vst [vmem:[%s1589_s6 + $0x28] sm:$0xff] %v226_v7  ;;  %v228_v8 = vld [vmem:[%s1584_s4 + $0x60] sm:$0xff]  ;;  %v230_v9 = vld [vmem:[%s1584_s4 + $0x68] sm:$0xff] }
  0x2c   : > { %v232_v10 = vld [vmem:[%s1584_s4 + $0x80] sm:$0xff]  ;;  %229 = vst [vmem:[%s1589_s6 + $0x30] sm:$0xff] %v228_v8  ;;  %231 = vst [vmem:[%s1589_s6 + $0x38] sm:$0xff] %v230_v9  ;;  %v234_v11 = vld [vmem:[%s1584_s4 + $0x88] sm:$0xff] }
  0x2d   : > { %233 = vst [vmem:[%s1589_s6 + $0x40] sm:$0xff] %v232_v10  ;;  %v236_v12 = vld [vmem:[%s1584_s4 + $0xa0] sm:$0xff]  ;;  %v238_v13 = vld [vmem:[%s1584_s4 + $0xa8] sm:$0xff]  ;;  %235 = vst [vmem:[%s1589_s6 + $0x48] sm:$0xff] %v234_v11 }
  0x2e   : > { %237 = vst [vmem:[%s1589_s6 + $0x50] sm:$0xff] %v236_v12  ;;  %239 = vst [vmem:[%s1589_s6 + $0x58] sm:$0xff] %v238_v13  ;;  %v240_v14 = vld [vmem:[%s1584_s4 + $0xc0] sm:$0xff]  ;;  %v242_v15 = vld [vmem:[%s1584_s4 + $0xc8] sm:$0xff] }
  0x2f   : > { %v244_v16 = vld [vmem:[%s1584_s4 + $0xe0] sm:$0xff]  ;;  %241 = vst [vmem:[%s1589_s6 + $0x60] sm:$0xff] %v240_v14  ;;  %243 = vst [vmem:[%s1589_s6 + $0x68] sm:$0xff] %v242_v15  ;;  %v246_v17 = vld [vmem:[%s1584_s4 + $0xe8] sm:$0xff] }
  0x30   : > { %245 = vst [vmem:[%s1589_s6 + $0x70] sm:$0xff] %v244_v16  ;;  %v248_v18 = vld [vmem:[%s1584_s4 + $0x100] sm:$0xff]  ;;  %v250_v19 = vld [vmem:[%s1584_s4 + $0x108] sm:$0xff]  ;;  %247 = vst [vmem:[%s1589_s6 + $0x78] sm:$0xff] %v246_v17 }
  0x31   : > { %249 = vst [vmem:[%s1589_s6 + $0x80] sm:$0xff] %v248_v18  ;;  %251 = vst [vmem:[%s1589_s6 + $0x88] sm:$0xff] %v250_v19  ;;  %v252_v20 = vld [vmem:[%s1584_s4 + $0x120] sm:$0xff]  ;;  %v254_v21 = vld [vmem:[%s1584_s4 + $0x128] sm:$0xff] }
  0x32   : > { %v256_v22 = vld [vmem:[%s1584_s4 + $0x140] sm:$0xff]  ;;  %253 = vst [vmem:[%s1589_s6 + $0x90] sm:$0xff] %v252_v20  ;;  %255 = vst [vmem:[%s1589_s6 + $0x98] sm:$0xff] %v254_v21  ;;  %v258_v23 = vld [vmem:[%s1584_s4 + $0x148] sm:$0xff] }
  0x33   : > { %257 = vst [vmem:[%s1589_s6 + $0xa0] sm:$0xff] %v256_v22  ;;  %v260_v24 = vld [vmem:[%s1584_s4 + $0x160] sm:$0xff]  ;;  %v262_v25 = vld [vmem:[%s1584_s4 + $0x168] sm:$0xff]  ;;  %259 = vst [vmem:[%s1589_s6 + $0xa8] sm:$0xff] %v258_v23 }
  0x34   : > { %261 = vst [vmem:[%s1589_s6 + $0xb0] sm:$0xff] %v260_v24  ;;  %263 = vst [vmem:[%s1589_s6 + $0xb8] sm:$0xff] %v262_v25  ;;  %v264_v26 = vld [vmem:[%s1584_s4 + $0x180] sm:$0xff]  ;;  %v266_v27 = vld [vmem:[%s1584_s4 + $0x188] sm:$0xff] }
  0x35   : > { %v268_v28 = vld [vmem:[%s1584_s4 + $0x1a0] sm:$0xff]  ;;  %265 = vst [vmem:[%s1589_s6 + $0xc0] sm:$0xff] %v264_v26  ;;  %267 = vst [vmem:[%s1589_s6 + $0xc8] sm:$0xff] %v266_v27  ;;  %v270_v29 = vld [vmem:[%s1584_s4 + $0x1a8] sm:$0xff] }
  0x36   : > { %269 = vst [vmem:[%s1589_s6 + $0xd0] sm:$0xff] %v268_v28  ;;  %v272_v30 = vld [vmem:[%s1584_s4 + $0x1c0] sm:$0xff]  ;;  %v274_v31 = vld [vmem:[%s1584_s4 + $0x1c8] sm:$0xff]  ;;  %271 = vst [vmem:[%s1589_s6 + $0xd8] sm:$0xff] %v270_v29 }
  0x37   : > { %273 = vst [vmem:[%s1589_s6 + $0xe0] sm:$0xff] %v272_v30  ;;  %275 = vst [vmem:[%s1589_s6 + $0xe8] sm:$0xff] %v274_v31  ;;  %v276_v32 = vld [vmem:[%s1584_s4 + $0x1e0] sm:$0xff]  ;;  %v278_v33 = vld [vmem:[%s1584_s4 + $0x1e8] sm:$0xff] }
  0x38   : > { %v280_v34 = vld [vmem:[%s1584_s4 + $0x200] sm:$0xff]  ;;  %277 = vst [vmem:[%s1589_s6 + $0xf0] sm:$0xff] %v276_v32  ;;  %279 = vst [vmem:[%s1589_s6 + $0xf8] sm:$0xff] %v278_v33  ;;  %v282_v35 = vld [vmem:[%s1584_s4 + $0x208] sm:$0xff] }
  0x39   : > { %281 = vst [vmem:[%s1589_s6 + $0x100] sm:$0xff] %v280_v34  ;;  %v284_v36 = vld [vmem:[%s1584_s4 + $0x220] sm:$0xff]  ;;  %v286_v37 = vld [vmem:[%s1584_s4 + $0x228] sm:$0xff]  ;;  %283 = vst [vmem:[%s1589_s6 + $0x108] sm:$0xff] %v282_v35 }
  0x3a   : > { %285 = vst [vmem:[%s1589_s6 + $0x110] sm:$0xff] %v284_v36  ;;  %287 = vst [vmem:[%s1589_s6 + $0x118] sm:$0xff] %v286_v37  ;;  %v288_v38 = vld [vmem:[%s1584_s4 + $0x240] sm:$0xff]  ;;  %v290_v39 = vld [vmem:[%s1584_s4 + $0x248] sm:$0xff] }
  0x3b   : > { %v292_v40 = vld [vmem:[%s1584_s4 + $0x260] sm:$0xff]  ;;  %289 = vst [vmem:[%s1589_s6 + $0x120] sm:$0xff] %v288_v38  ;;  %291 = vst [vmem:[%s1589_s6 + $0x128] sm:$0xff] %v290_v39  ;;  %v294_v41 = vld [vmem:[%s1584_s4 + $0x268] sm:$0xff] }
  0x3c   : > { %293 = vst [vmem:[%s1589_s6 + $0x130] sm:$0xff] %v292_v40  ;;  %v296_v42 = vld [vmem:[%s1584_s4 + $0x280] sm:$0xff]  ;;  %v298_v43 = vld [vmem:[%s1584_s4 + $0x288] sm:$0xff]  ;;  %295 = vst [vmem:[%s1589_s6 + $0x138] sm:$0xff] %v294_v41 }
  0x3d   : > { %297 = vst [vmem:[%s1589_s6 + $0x140] sm:$0xff] %v296_v42  ;;  %299 = vst [vmem:[%s1589_s6 + $0x148] sm:$0xff] %v298_v43  ;;  %v300_v44 = vld [vmem:[%s1584_s4 + $0x2a0] sm:$0xff]  ;;  %v302_v45 = vld [vmem:[%s1584_s4 + $0x2a8] sm:$0xff] }
  0x3e   : > { %v304_v46 = vld [vmem:[%s1584_s4 + $0x2c0] sm:$0xff]  ;;  %301 = vst [vmem:[%s1589_s6 + $0x150] sm:$0xff] %v300_v44  ;;  %303 = vst [vmem:[%s1589_s6 + $0x158] sm:$0xff] %v302_v45  ;;  %v306_v47 = vld [vmem:[%s1584_s4 + $0x2c8] sm:$0xff] }
  0x3f   : > { %305 = vst [vmem:[%s1589_s6 + $0x160] sm:$0xff] %v304_v46  ;;  %v308_v48 = vld [vmem:[%s1584_s4 + $0x2e0] sm:$0xff]  ;;  %v310_v49 = vld [vmem:[%s1584_s4 + $0x2e8] sm:$0xff]  ;;  %307 = vst [vmem:[%s1589_s6 + $0x168] sm:$0xff] %v306_v47 }
  0x40   : > { %309 = vst [vmem:[%s1589_s6 + $0x170] sm:$0xff] %v308_v48  ;;  %311 = vst [vmem:[%s1589_s6 + $0x178] sm:$0xff] %v310_v49  ;;  %v312_v50 = vld [vmem:[%s1584_s4 + $0x300] sm:$0xff]  ;;  %v314_v51 = vld [vmem:[%s1584_s4 + $0x308] sm:$0xff] }
  0x41   : > { %v316_v52 = vld [vmem:[%s1584_s4 + $0x320] sm:$0xff]  ;;  %313 = vst [vmem:[%s1589_s6 + $0x180] sm:$0xff] %v312_v50  ;;  %315 = vst [vmem:[%s1589_s6 + $0x188] sm:$0xff] %v314_v51  ;;  %v318_v53 = vld [vmem:[%s1584_s4 + $0x328] sm:$0xff] }
  0x42   : > { %317 = vst [vmem:[%s1589_s6 + $0x190] sm:$0xff] %v316_v52  ;;  %v320_v54 = vld [vmem:[%s1584_s4 + $0x340] sm:$0xff]  ;;  %v322_v55 = vld [vmem:[%s1584_s4 + $0x348] sm:$0xff]  ;;  %319 = vst [vmem:[%s1589_s6 + $0x198] sm:$0xff] %v318_v53 }
  0x43   : > { %321 = vst [vmem:[%s1589_s6 + $0x1a0] sm:$0xff] %v320_v54  ;;  %323 = vst [vmem:[%s1589_s6 + $0x1a8] sm:$0xff] %v322_v55  ;;  %v324_v56 = vld [vmem:[%s1584_s4 + $0x360] sm:$0xff]  ;;  %v326_v57 = vld [vmem:[%s1584_s4 + $0x368] sm:$0xff] }
  0x44   : > { %v328_v58 = vld [vmem:[%s1584_s4 + $0x380] sm:$0xff]  ;;  %325 = vst [vmem:[%s1589_s6 + $0x1b0] sm:$0xff] %v324_v56  ;;  %327 = vst [vmem:[%s1589_s6 + $0x1b8] sm:$0xff] %v326_v57  ;;  %v330_v59 = vld [vmem:[%s1584_s4 + $0x388] sm:$0xff] }
  0x45   : > { %329 = vst [vmem:[%s1589_s6 + $0x1c0] sm:$0xff] %v328_v58  ;;  %v332_v60 = vld [vmem:[%s1584_s4 + $0x3a0] sm:$0xff]  ;;  %v334_v61 = vld [vmem:[%s1584_s4 + $0x3a8] sm:$0xff]  ;;  %331 = vst [vmem:[%s1589_s6 + $0x1c8] sm:$0xff] %v330_v59 }
  0x46   : > { %333 = vst [vmem:[%s1589_s6 + $0x1d0] sm:$0xff] %v332_v60  ;;  %335 = vst [vmem:[%s1589_s6 + $0x1d8] sm:$0xff] %v334_v61  ;;  %v336_v62 = vld [vmem:[%s1584_s4 + $0x3c0] sm:$0xff]  ;;  %v338_v63 = vld [vmem:[%s1584_s4 + $0x3c8] sm:$0xff] }
  0x47   : > { %v340_v0 = vld [vmem:[%s1584_s4 + $0x3e0] sm:$0xff]  ;;  %337 = vst [vmem:[%s1589_s6 + $0x1e0] sm:$0xff] %v336_v62  ;;  %339 = vst [vmem:[%s1589_s6 + $0x1e8] sm:$0xff] %v338_v63  ;;  %v342_v1 = vld [vmem:[%s1584_s4 + $0x3e8] sm:$0xff] }
  0x48   : > { %341 = vst [vmem:[%s1589_s6 + $0x1f0] sm:$0xff] %v340_v0  ;;  %343 = vst [vmem:[%s1589_s6 + $0x1f8] sm:$0xff] %v342_v1 }
  0x49 PF: > { %p1092_p0 = scmp.ge.s32.totalorder %s1446_s22, 1  ;;  %p348_p1 = scmp.lt.s32.totalorder %s1446_s22, 7 }
  0x4b   : > { %p349_p2 = pnand %p1092_p0, %p348_p1 }
  0x4c   : > { %s355_s24 = sand.u32 (!%p349_p2), 1, %s1422_s16   ;;  %s362_s25 = sand.u32 (!%p349_p2), 1, %s1414_s14  }
  0x4d   : > { %352 = sbr.rel (%p349_p2) target bundleno = 503 (0x1f7), region = 85  ;;  %s1720_s30 = sshll.u32 (!%p349_p2), %s355_s24, 4 }
  0x4e   : > { %s1094_s27 = sshll.u32 (!%p349_p2), %s362_s25, 9  ;;  %s385_s5 = sand.u32 (!%p349_p2), 1, %s1406_s12  }
  0x4f   : > { %s1095_s23 = sshll.u32 (!%p349_p2), %s385_s5, 4  ;;  %s357_s28 = scalar_lea.vmem (!%p349_p2), [#allocation3], %s1720_s30 }
  0x50   : > { %s1724_s7 = scalar_lea.vmem (!%p349_p2), [#allocation4], %s1094_s27  ;;  %s1726_s11 = scalar_lea.vmem (!%p349_p2), [#allocation5], %s1095_s23 }
  0x51   : > { %p1096_p3 = scmp.ne.s32.totalorder (!%p349_p2), %s1430_s18, 0 }
  0x53   : > { %394 = sbr.rel (%p1096_p3) target bundleno = 93 (0x5d), region = 97 }
  0x58   : > { %v1448_v2 = vmov 0.0  }
  0x59   : > { %395 = vst [vmem:[#allocation2 + $0x30] sm:$0xff] %v1448_v2  ;;  %396 = vst [vmem:[#allocation2] sm:$0xff] %v1448_v2 }
  0x5a   : > { %397 = vst [vmem:[#allocation2 + $0x18] sm:$0xff] %v1448_v2  ;;  %398 = vst [vmem:[#allocation2 + $0x10] sm:$0xff] %v1448_v2 }
  0x5b   : > { %399 = vst [vmem:[#allocation2 + $0x8] sm:$0x3] %v1448_v2  ;;  %400 = vst [vmem:[#allocation2 + $0x20] sm:$0x3] %v1448_v2 }
  0x5c   : > { %401 = vst [vmem:[#allocation2 + $0x28] sm:$0x3] %v1448_v2  ;;  %402 = vst [vmem:[#allocation2 + $0x38] sm:$0x3] %v1448_v2 }
  0x5d PF: > { %v1260_v3 = vld [vmem:[%s1724_s7 + $0xe4] ss:$16 sps:$4 sm:$0xff]   ;;  %v1262_v4 = vld [vmem:[%s1724_s7 + $0xec] ss:$16 sps:$4 sm:$0xff]   ;;  %v1264_v5 = vld [vmem:[%s1724_s7 + $0xe0] ss:$16 sps:$4 sm:$0xff]  }
  0x5e   : > { %807 = vmatprep.subr.bf16.mxu0 %v1260_v3  ;;  %v1265_v6 = vld [vmem:[%s1724_s7 + $0xe8] ss:$16 sps:$4 sm:$0xff]   ;;  %850 = vmatprep.subr.bf16.mxu1 %v1262_v4  ;;  %v1266_v7 = vld [vmem:[%s1724_s7 + $0xc4] ss:$16 sps:$4 sm:$0xff]   ;;  %v1268_v8 = vld [vmem:[%s1724_s7 + $0xcc] ss:$16 sps:$4 sm:$0xff]  }
  0x5f   : > { %808 = vmatpush1.bf16.msra.mxu0 %v1264_v5  ;;  %851 = vmatpush1.bf16.msra.mxu1 %v1265_v6  ;;  %v1270_v9 = vld [vmem:[%s1724_s7 + $0xc0] ss:$16 sps:$4 sm:$0xff]   ;;  %v1271_v10 = vld [vmem:[%s1724_s7 + $0xc8] ss:$16 sps:$4 sm:$0xff]   ;;  %v1272_v11 = vld [vmem:[%s1724_s7 + $0xa4] ss:$16 sps:$4 sm:$0xff]  }
  0x60   : > { %809 = vmatprep.subr.bf16.mxu0 %v1266_v7  ;;  %852 = vmatprep.subr.bf16.mxu1 %v1268_v8  ;;  %v1274_v12 = vld [vmem:[%s1724_s7 + $0xac] ss:$16 sps:$4 sm:$0xff]   ;;  %v1276_v13 = vld [vmem:[%s1724_s7 + $0xa0] ss:$16 sps:$4 sm:$0xff]   ;;  %v1277_v14 = vld [vmem:[%s1724_s7 + $0xa8] ss:$16 sps:$4 sm:$0xff]  }
  0x61   : > { %v1278_v15 = vld [vmem:[%s1724_s7 + $0x84] ss:$16 sps:$4 sm:$0xff]   ;;  %v1280_v16 = vld [vmem:[%s1724_s7 + $0x8c] ss:$16 sps:$4 sm:$0xff]   ;;  %v1282_v17 = vld [vmem:[%s1724_s7 + $0x80] ss:$16 sps:$4 sm:$0xff]  }
  0x62   : > { %v1283_v18 = vld [vmem:[%s1724_s7 + $0x88] ss:$16 sps:$4 sm:$0xff]   ;;  %v1284_v19 = vld [vmem:[%s1724_s7 + $0x64] ss:$16 sps:$4 sm:$0xff]   ;;  %v1286_v20 = vld [vmem:[%s1724_s7 + $0x6c] ss:$16 sps:$4 sm:$0xff]  }
  0x63   : > { %810 = vmatpush1.bf16.msra.mxu0 %v1270_v9  ;;  %853 = vmatpush1.bf16.msra.mxu1 %v1271_v10  ;;  %v1288_v21 = vld [vmem:[%s1724_s7 + $0x60] ss:$16 sps:$4 sm:$0xff]   ;;  %v1289_v22 = vld [vmem:[%s1724_s7 + $0x68] ss:$16 sps:$4 sm:$0xff]   ;;  %v1290_v23 = vld [vmem:[%s1724_s7 + $0x44] ss:$16 sps:$4 sm:$0xff]  }
  0x64   : > { %811 = vmatprep.subr.bf16.mxu0 %v1272_v11  ;;  %854 = vmatprep.subr.bf16.mxu1 %v1274_v12  ;;  %v1292_v24 = vld [vmem:[%s1724_s7 + $0x4c] ss:$16 sps:$4 sm:$0xff]   ;;  %v1294_v25 = vld [vmem:[%s1724_s7 + $0x40] ss:$16 sps:$4 sm:$0xff]   ;;  %v1295_v26 = vld [vmem:[%s1724_s7 + $0x48] ss:$16 sps:$4 sm:$0xff]  }
  0x65   : > { %v1296_v27 = vld [vmem:[%s1724_s7 + $0x24] ss:$16 sps:$4 sm:$0xff]   ;;  %v1298_v28 = vld [vmem:[%s1724_s7 + $0x2c] ss:$16 sps:$4 sm:$0xff]   ;;  %v1300_v29 = vld [vmem:[%s1724_s7 + $0x20] ss:$16 sps:$4 sm:$0xff]  }
  0x66   : > { %v1301_v30 = vld [vmem:[%s1724_s7 + $0x28] ss:$16 sps:$4 sm:$0xff]   ;;  %v1302_v31 = vld [vmem:[%s1724_s7 + $0x4] ss:$16 sps:$4 sm:$0xff]   ;;  %v1304_v32 = vld [vmem:[%s1724_s7 + $0xc] ss:$16 sps:$4 sm:$0xff]  }
  0x67   : > { %812 = vmatpush1.bf16.msra.mxu0 %v1276_v13  ;;  %855 = vmatpush1.bf16.msra.mxu1 %v1277_v14  ;;  %v1306_v33 = vld [vmem:[%s1724_s7] ss:$16 sps:$4 sm:$0xff]   ;;  %v1307_v34 = vld [vmem:[%s1724_s7 + $0x8] ss:$16 sps:$4 sm:$0xff]   ;;  %v1308_v35 = vld [vmem:[%s1724_s7 + $0x1e4] ss:$16 sps:$4 sm:$0xff]  }
  0x68   : > { %813 = vmatprep.subr.bf16.mxu0 %v1278_v15  ;;  %856 = vmatprep.subr.bf16.mxu1 %v1280_v16  ;;  %v1310_v36 = vld [vmem:[%s1724_s7 + $0x1ec] ss:$16 sps:$4 sm:$0xff]   ;;  %v1312_v37 = vld [vmem:[%s1724_s7 + $0x1e0] ss:$16 sps:$4 sm:$0xff]   ;;  %v1313_v38 = vld [vmem:[%s1724_s7 + $0x1e8] ss:$16 sps:$4 sm:$0xff]  }
  0x69   : > { %v1314_v39 = vld [vmem:[%s1724_s7 + $0x1c4] ss:$16 sps:$4 sm:$0xff]   ;;  %v1316_v40 = vld [vmem:[%s1724_s7 + $0x1cc] ss:$16 sps:$4 sm:$0xff]   ;;  %v1318_v41 = vld [vmem:[%s1724_s7 + $0x1c0] ss:$16 sps:$4 sm:$0xff]  }
  0x6a   : > { %v1319_v42 = vld [vmem:[%s1724_s7 + $0x1c8] ss:$16 sps:$4 sm:$0xff]   ;;  %v1320_v43 = vld [vmem:[%s1724_s7 + $0x1a4] ss:$16 sps:$4 sm:$0xff]   ;;  %v1322_v44 = vld [vmem:[%s1724_s7 + $0x1ac] ss:$16 sps:$4 sm:$0xff]  }
  0x6b   : > { %814 = vmatpush1.bf16.msra.mxu0 %v1282_v17  ;;  %857 = vmatpush1.bf16.msra.mxu1 %v1283_v18  ;;  %v1324_v45 = vld [vmem:[%s1724_s7 + $0x1a0] ss:$16 sps:$4 sm:$0xff]   ;;  %v1325_v46 = vld [vmem:[%s1724_s7 + $0x1a8] ss:$16 sps:$4 sm:$0xff]   ;;  %v1326_v47 = vld [vmem:[%s1724_s7 + $0x184] ss:$16 sps:$4 sm:$0xff]  }
  0x6c   : > { %815 = vmatprep.subr.bf16.mxu0 %v1284_v19  ;;  %858 = vmatprep.subr.bf16.mxu1 %v1286_v20  ;;  %v1328_v48 = vld [vmem:[%s1724_s7 + $0x18c] ss:$16 sps:$4 sm:$0xff]   ;;  %v1330_v49 = vld [vmem:[%s1724_s7 + $0x180] ss:$16 sps:$4 sm:$0xff]   ;;  %v1331_v50 = vld [vmem:[%s1724_s7 + $0x188] ss:$16 sps:$4 sm:$0xff]  }
  0x6d   : > { %v1358_v51 = vld [vmem:[%s357_s28 + $0x4] ss:$8 sps:$4 sm:$0x1f]   ;;  %v1336_v54 = vld [vmem:[%s1724_s7 + $0x160] ss:$16 sps:$4 sm:$0xff]   ;;  %p1163_p4 = scmp.ne.s32.totalorder %s1430_s18, 2 }
  0x6e   : > { %v1332_v52 = vld [vmem:[%s1724_s7 + $0x164] ss:$16 sps:$4 sm:$0xff]   ;;  %v1334_v53 = vld [vmem:[%s1724_s7 + $0x16c] ss:$16 sps:$4 sm:$0xff]   ;;  %839 = vmatprep.mubr.bf16.mxu0 %v1358_v51  ;;  %882 = vmatprep.mubr.bf16.mxu1 %v1358_v51  ;;  %v1337_v55 = vld [vmem:[%s1724_s7 + $0x168] ss:$16 sps:$4 sm:$0xff]  }
  0x6f   : > { %816 = vmatpush1.bf16.msra.mxu0 %v1288_v21  ;;  %859 = vmatpush1.bf16.msra.mxu1 %v1289_v22  ;;  %v1338_v56 = vld [vmem:[%s1724_s7 + $0x144] ss:$16 sps:$4 sm:$0xff]   ;;  %v1340_v57 = vld [vmem:[%s1724_s7 + $0x14c] ss:$16 sps:$4 sm:$0xff]   ;;  %v1342_v58 = vld [vmem:[%s1724_s7 + $0x140] ss:$16 sps:$4 sm:$0xff]  }
  0x70   : > { %817 = vmatprep.subr.bf16.mxu0 %v1290_v23  ;;  %860 = vmatprep.subr.bf16.mxu1 %v1292_v24  ;;  %v1343_v59 = vld [vmem:[%s1724_s7 + $0x148] ss:$16 sps:$4 sm:$0xff]   ;;  %v1344_v60 = vld [vmem:[%s1724_s7 + $0x124] ss:$16 sps:$4 sm:$0xff]   ;;  %v1346_v61 = vld [vmem:[%s1724_s7 + $0x12c] ss:$16 sps:$4 sm:$0xff]  }
  0x71   : > { %v1348_v62 = vld [vmem:[%s1724_s7 + $0x120] ss:$16 sps:$4 sm:$0xff]   ;;  %v1349_v63 = vld [vmem:[%s1724_s7 + $0x128] ss:$16 sps:$4 sm:$0xff]   ;;  %v1350_v0 = vld [vmem:[%s1724_s7 + $0x104] ss:$16 sps:$4 sm:$0xff]  }
  0x72   : > { %v1352_v1 = vld [vmem:[%s1724_s7 + $0x10c] ss:$16 sps:$4 sm:$0xff]   ;;  %v1354_v2 = vld [vmem:[%s1724_s7 + $0x100] ss:$16 sps:$4 sm:$0xff]   ;;  %v1355_v3 = vld [vmem:[%s1724_s7 + $0x108] ss:$16 sps:$4 sm:$0xff]  }
  0x73   : > { %818 = vmatpush1.bf16.msra.mxu0 %v1294_v25  ;;  %861 = vmatpush1.bf16.msra.mxu1 %v1295_v26  ;;  %v1356_v4 = vld [vmem:[%s357_s28] ss:$8 sps:$4 sm:$0x1f]  }
  0x74   : > { %819 = vmatprep.subr.bf16.mxu0 %v1296_v27  ;;  %862 = vmatprep.subr.bf16.mxu1 %v1298_v28  ;;  %v403_v5 = vld [vmem:[#allocation2 + $0x30] sm:$0xff]  ;;  %v405_v6 = vld [vmem:[#allocation2 + $0x18] sm:$0xff]  ;;  %v404_v9 = vld [vmem:[#allocation2] sm:$0xff] }
  0x75   : > { %v406_v10 = vld [vmem:[#allocation2 + $0x10] sm:$0xff]  ;;  %v407_v15 = vld [vmem:[#allocation2 + $0x8] sm:$0x3]  ;;  %v408_v21 = vld [vmem:[#allocation2 + $0x20] sm:$0x3] }
  0x76   : > { %v409_v16 = vld [vmem:[#allocation2 + $0x28] sm:$0x3]  ;;  %v410_v22 = vld [vmem:[#allocation2 + $0x38] sm:$0x3] }
  0x77   : > { %820 = vmatpush1.bf16.msra.mxu0 %v1300_v29  ;;  %863 = vmatpush1.bf16.msra.mxu1 %v1301_v30 }
  0x78   : > { %821 = vmatprep.subr.bf16.mxu0 %v1302_v31  ;;  %864 = vmatprep.subr.bf16.mxu1 %v1304_v32 }
  0x7b   : > { %822 = vmatpush1.bf16.msra.mxu0 %v1306_v33  ;;  %865 = vmatpush1.bf16.msra.mxu1 %v1307_v34 }
  0x7c   : > { %823 = vmatprep.subr.bf16.mxu0 %v1308_v35  ;;  %866 = vmatprep.subr.bf16.mxu1 %v1310_v36 }
  0x7f   : > { %824 = vmatpush2.bf16.msra.mxu0 %v1312_v37  ;;  %867 = vmatpush2.bf16.msra.mxu1 %v1313_v38 }
  0x80   : > { %825 = vmatprep.subr.bf16.mxu0 %v1314_v39  ;;  %868 = vmatprep.subr.bf16.mxu1 %v1316_v40 }
  0x83   : > { %826 = vmatpush2.bf16.msra.mxu0 %v1318_v41  ;;  %869 = vmatpush2.bf16.msra.mxu1 %v1319_v42 }
  0x84   : > { %827 = vmatprep.subr.bf16.mxu0 %v1320_v43  ;;  %870 = vmatprep.subr.bf16.mxu1 %v1322_v44 }
  0x87   : > { %828 = vmatpush2.bf16.msra.mxu0 %v1324_v45  ;;  %871 = vmatpush2.bf16.msra.mxu1 %v1325_v46 }
  0x88   : > { %829 = vmatprep.subr.bf16.mxu0 %v1326_v47  ;;  %872 = vmatprep.subr.bf16.mxu1 %v1328_v48 }
  0x8b   : > { %830 = vmatpush2.bf16.msra.mxu0 %v1330_v49  ;;  %873 = vmatpush2.bf16.msra.mxu1 %v1331_v50 }
  0x8c   : > { %831 = vmatprep.subr.bf16.mxu0 %v1332_v52  ;;  %874 = vmatprep.subr.bf16.mxu1 %v1334_v53 }
  0x8f   : > { %832 = vmatpush2.bf16.msra.mxu0 %v1336_v54  ;;  %875 = vmatpush2.bf16.msra.mxu1 %v1337_v55 }
  0x90   : > { %833 = vmatprep.subr.bf16.mxu0 %v1338_v56  ;;  %876 = vmatprep.subr.bf16.mxu1 %v1340_v57 }
  0x93   : > { %834 = vmatpush2.bf16.msra.mxu0 %v1342_v58  ;;  %877 = vmatpush2.bf16.msra.mxu1 %v1343_v59 }
  0x94   : > { %835 = vmatprep.subr.bf16.mxu0 %v1344_v60  ;;  %878 = vmatprep.subr.bf16.mxu1 %v1346_v61 }
  0x97   : > { %836 = vmatpush2.bf16.msra.mxu0 %v1348_v62  ;;  %879 = vmatpush2.bf16.msra.mxu1 %v1349_v63 }
  0x98   : > { %837 = vmatprep.subr.bf16.mxu0 %v1350_v0  ;;  %880 = vmatprep.subr.bf16.mxu1 %v1352_v1 }
  0x9b   : > { %838 = vmatpush2.bf16.msra.mxu0 %v1354_v2  ;;  %881 = vmatpush2.bf16.msra.mxu1 %v1355_v3 }
  0x9e   : > { %840 = vmatmul.mubr.bf16.vlgmr.msra.gmra.mxu0 %v1356_v4  ;;  %883 = vmatmul.mubr.bf16.vlgmr.msra.gmra.mxu1 %v1356_v4 }
 0x15e   : > { %v841_v7 = vpop.f32.mrf.mxu0  ;;  %v884_v8 = vpop.f32.mrf.mxu1 }
 0x15f   : > { %v893_v11 = vadd.f32 %v841_v7, %v403_v5  ;;  %v895_v12 = vadd.f32 %v884_v8, %v405_v6 }
 0x160   : > { %v843_v13 = vpop.f32.mrf.mxu0  ;;  %v886_v14 = vpop.f32.mrf.mxu1 }
 0x161   : > { %901 = vst [vmem:[#allocation2 + $0x30] sm:$0xff] %v893_v11  ;;  %903 = vst [vmem:[#allocation2 + $0x18] sm:$0xff] %v895_v12  ;;  %v894_v17 = vadd.f32 %v843_v13, %v404_v9  ;;  %v896_v18 = vadd.f32 %v886_v14, %v406_v10 }
 0x162   : > { %v845_v19 = vpop.f32.mrf.mxu0  ;;  %v888_v20 = vpop.f32.mrf.mxu1 }
 0x163   : > { %902 = vst [vmem:[#allocation2] sm:$0xff] %v894_v17  ;;  %904 = vst [vmem:[#allocation2 + $0x10] sm:$0xff] %v896_v18  ;;  %v897_v23 = vadd.f32 %v845_v19, %v407_v15  ;;  %v899_v24 = vadd.f32 %v888_v20, %v409_v16  ;;  %912 = sbr.rel (%p1163_p4) target bundleno = 495 (0x1ef), region = 101 }
 0x164   : > { %v847_v25 = vpop.f32.mrf.mxu0  ;;  %v890_v26 = vpop.f32.mrf.mxu1 }
 0x165   : > { %905 = vst [vmem:[#allocation2 + $0x8] sm:$0x3] %v897_v23  ;;  %907 = vst [vmem:[#allocation2 + $0x28] sm:$0x3] %v899_v24  ;;  %v898_v27 = vadd.f32 %v847_v25, %v408_v21  ;;  %v900_v28 = vadd.f32 %v890_v26, %v410_v22 }
 0x167   : > { %906 = vst [vmem:[#allocation2 + $0x20] sm:$0x3] %v898_v27  ;;  %908 = vst [vmem:[#allocation2 + $0x38] sm:$0x3] %v900_v28 }
 0x168   : > { %v927_v29 = vld [vmem:[%s1848_s1] sm:$0xff]  ;;  %v1449_v30 = vmov 0   ;;  %v928_v31 = vld [vmem:[%s1848_s1 + $0x8] sm:$0x3]  ;;  %v913_v32 = vld [vmem:[#allocation2 + $0x30] sm:$0xff] }
 0x169   : > { %1359 = vset.pattern.permute.xlu0 %v1449_v30  ;;  %v915_v34 = vld [vmem:[#allocation2 + $0x18] sm:$0xff] }
 0x16a   : > { %931 = vperm.xlu0 %1359, %v927_v29   ;;  %v914_v33 = vld [vmem:[#allocation2] sm:$0xff]  ;;  %v916_v35 = vld [vmem:[#allocation2 + $0x10] sm:$0xff] }
 0x16b   : > { %v921_v36 = vmax.f32 %v913_v32, %v914_v33  ;;  %v923_v37 = vmax.f32 %v915_v34, %v916_v35 }
 0x16c   : > { %v917_v38 = vld [vmem:[#allocation2 + $0x8] sm:$0x3] }
 0x16d   : > { %v919_v40 = vld [vmem:[#allocation2 + $0x28] sm:$0x3]  ;;  %v925_v42 = vmax.f32 %v921_v36, %v923_v37 }
 0x16e   : > { %936 = vperm.xlu0 %1359, %v928_v31   ;;  %v918_v39 = vld [vmem:[#allocation2 + $0x20] sm:$0x3]  ;;  %v920_v41 = vld [vmem:[#allocation2 + $0x38] sm:$0x3] }
 0x16f   : > { %v922_v43 = vmax.f32 %v917_v38, %v918_v39  ;;  %v924_v44 = vmax.f32 %v919_v40, %v920_v41 }
 0x171   : > { %v926_v47 = vmax.f32 %v922_v43, %v924_v44 }
 0x1e5   : > { %v932_v45 = vpop.permute.xlu0 %931 }
 0x1e6   : > { %v939_v46 = vadd.f32 %v932_v45, %v925_v42 }
 0x1e8   : > { %v941_v48 = vmax.f32 %v939_v46, 0.0 }
 0x1e9   : > { %v937_v49 = vpop.permute.xlu0 %936 }
 0x1ea   : > { %943 = vst [vmem:[%s1726_s11] sm:$0xff] %v941_v48  ;;  %v940_v50 = vadd.f32 %v937_v49, %v926_v47 }
 0x1ec   : > { %v942_v51 = vmax.f32 %v940_v50, 0.0 }
 0x1ee   : > { %944 = vst [vmem:[%s1726_s11 + $0x8] sm:$0x3] %v942_v51 }
 0x1ef PF: > { %951 = sbr.rel (!%p1564_p12) target bundleno = 503 (0x1f7), region = 105  ;;  %s1165_s18 = sshll.u32 (%p1564_p12), %s1434_s19, 3 }
 0x1f0   : > { %s953_s6 = scalar_lea.vmem (%p1564_p12), %s1850_s3, %s1165_s18 }
 0x1f1   : > { %v984_v52 = vld [vmem:[%s1726_s11] sm:$0xff] (%p1564_p12) }
 0x1f2   : > { %985 = vst [vmem:[%s953_s6] sm:$0xff] (%p1564_p12), %v984_v52 }
 0x1f5   : > { %v986_v53 = vld [vmem:[%s1726_s11 + $0x8] sm:$0xff] }
 0x1f6   : > { %987 = vst [vmem:[%s953_s6 + $0x10] sm:$0xff] %v986_v53 }
 0x1f7 PF: > { %s13_s22 = sadd.s32 1, %s1446_s22   ;;  %s1859_s10 = sld [smem:[#allocation8_spill]] }
 0x1f8   : > { %p10_p5 = scmp.ge.s32.totalorder %s13_s22, 8   ;;  %s1860_s24 = sld [smem:[#allocation6_spill]] }
 0x1f9   : > { %s1861_s25 = sld [smem:[#allocation7_spill]]  ;;  %s1862_s12 = smov %s1410_s13 }
 0x1fa   : > { %s1863_s13 = smov %s1562_s9  ;;  %s1864_s14 = smov %s1418_s15 }
 0x1fb   : > { %s1865_s15 = smov %s1559_s8  ;;  %s1866_s16 = smov %s1426_s17 }
 0x1fc   : > { %s1868_s18 = smov %s1438_s20  ;;  %s1869_s19 = smov %s1442_s21 }
 0x1fd   : > { %s1867_s17 = smov %s1859_s10  ;;  %12 = sbr.rel (!%p10_p5) target bundleno = 6 (0x6), region = 182 }
 0x1fe   : > { %s1870_s20 = smov %s1860_s24 }
 0x1ff   : > { %s1871_s21 = smov %s1861_s25 }

// kernel: stn_forward.8
= control target key start
LH: loop header
LB: loop body
LE: loop exit
PB: predicated region body
PF: predicated region fallthrough
CT: control target
= control target key end

     0   :  { %vm10401_vm0 = vcmask 80896   ;;  %vm64_vm1 = vcmask 74752   ;;  %vm445_vm2 = vcmask 36864   ;;  %vm640_vm3 = vcmask 77864   ;;  %s6328_s15 = smov 32   ;;  %s10355_s0 = inlined_call_operand.vmem [shape: f32[2,10,10,10], index: 0, kind: input, shape index: {}]   ;;  %s10356_s1 = inlined_call_operand.vmem [shape: f32[210,32], index: 1, kind: input, shape index: {}]   ;;  %s10357_s3 = inlined_call_operand.vmem [shape: f32[32,6], index: 3, kind: input, shape index: {}]   ;;  %s10358_s2 = inlined_call_operand.vmem [shape: f32[1,32], index: 2, kind: input, shape index: {}]   ;;  %s10359_s4 = inlined_call_operand.vmem [shape: f32[1,6], index: 4, kind: input, shape index: {}]   ;;  %s10360_s5 = inlined_call_operand.vmem [shape: f32[2,6], index: 5, kind: output, shape index: {}]  }
   0x1   :  { %v6363_v0 = vld [vmem:[%s10355_s0 + $0x10] sm:$0xff]  ;;  %v6368_v1 = vld [vmem:[%s10355_s0] sm:$0xff]  ;;  %v6373_v2 = vld [vmem:[%s10355_s0 + $0x18] sm:$0x3]  ;;  %vm406_vm4 = vcmask 1041409   ;;  %vm408_vm5 = vcmask 1042434  }
   0x2   :  { %10409 = vst [vmem:[#allocation2_spill] sm:$0xff] %v6363_v0  ;;  %10410 = vst [vmem:[#allocation3_spill] sm:$0xff] %v6368_v1  ;;  %v68_v3 = vsel %vm10401_vm0, %v6363_v0, -inf  ;;  %v61_v4 = vsel %vm10401_vm0, %v6368_v1, -inf  ;;  %v6382_v5 = vld [vmem:[%s10355_s0 + $0x8] sm:$0x3] }
   0x3   :  { %10411 = vst [vmem:[#allocation4_spill] sm:$0xff] %v6373_v2  ;;  %10412 = vst [vmem:[#allocation5_spill] sm:$0xff] %v6382_v5  ;;  %69 = vmax.xlane.f32.xlu1 %v68_v3  ;;  %62 = vmax.xlane.f32.xlu0 %v61_v4  ;;  %v71_v6 = vsel %vm64_vm1, %v6373_v2, -inf  ;;  %v65_v7 = vsel %vm64_vm1, %v6382_v5, -inf  ;;  %v6391_v8 = vld [vmem:[%s10355_s0 + $0x28] sm:$0x3] }
   0x4   :  { %10413 = vst [vmem:[#allocation6_spill] sm:$0xff] %v6391_v8  ;;  %v6396_v9 = vld [vmem:[%s10355_s0 + $0x20] sm:$0xff]  ;;  %v77_v10 = vsel %vm64_vm1, %v6391_v8, -inf  ;;  %v6405_v12 = vld [vmem:[%s10355_s0 + $0x38] sm:$0x3]  ;;  %v6410_v13 = vld [vmem:[%s10355_s0 + $0x30] sm:$0xff] }
   0x5   :  { %10414 = vst [vmem:[#allocation7_spill] sm:$0xff] %v6396_v9  ;;  %v74_v11 = vsel %vm10401_vm0, %v6396_v9, -inf  ;;  %10415 = vst [vmem:[#allocation8_spill] sm:$0xff] %v6405_v12  ;;  %v83_v14 = vsel %vm64_vm1, %v6405_v12, -inf  ;;  %v80_v15 = vsel %vm10401_vm0, %v6410_v13, -inf  ;;  %v6424_v17 = vld [vmem:[%s10355_s0 + $0x40] sm:$0xff] }
   0x6   :  { %10416 = vst [vmem:[#allocation9_spill] sm:$0xff] %v6410_v13  ;;  %v6419_v16 = vld [vmem:[%s10355_s0 + $0x48] sm:$0x3]  ;;  %10418 = vst [vmem:[#allocation11_spill] sm:$0xff] %v6424_v17  ;;  %v86_v19 = vsel %vm10401_vm0, %v6424_v17, -inf  ;;  %v6438_v21 = vld [vmem:[%s10355_s0 + $0x50] sm:$0xff] }
   0x7   :  { %72 = vmax.xlane.f32.xlu1 %v71_v6  ;;  %66 = vmax.xlane.f32.xlu0 %v65_v7  ;;  %10417 = vst [vmem:[#allocation10_spill] sm:$0xff] %v6419_v16  ;;  %v89_v18 = vsel %vm64_vm1, %v6419_v16, -inf  ;;  %v6433_v20 = vld [vmem:[%s10355_s0 + $0x58] sm:$0x3]  ;;  %10420 = vst [vmem:[#allocation13_spill] sm:$0xff] %v6438_v21  ;;  %v92_v23 = vsel %vm10401_vm0, %v6438_v21, -inf }
   0x8   :  { %10419 = vst [vmem:[#allocation12_spill] sm:$0xff] %v6433_v20  ;;  %v95_v22 = vsel %vm64_vm1, %v6433_v20, -inf  ;;  %v6447_v24 = vld [vmem:[%s10355_s0 + $0x68] sm:$0x3]  ;;  %v6452_v25 = vld [vmem:[%s10355_s0 + $0x60] sm:$0xff]  ;;  %v6466_v29 = vld [vmem:[%s10355_s0 + $0x70] sm:$0xff] }
   0x9   :  { %10421 = vst [vmem:[#allocation14_spill] sm:$0xff] %v6447_v24  ;;  %10422 = vst [vmem:[#allocation15_spill] sm:$0xff] %v6452_v25  ;;  %v101_v26 = vsel %vm64_vm1, %v6447_v24, -inf  ;;  %v98_v27 = vsel %vm10401_vm0, %v6452_v25, -inf  ;;  %v6461_v28 = vld [vmem:[%s10355_s0 + $0x78] sm:$0x3] }
   0xa   :  { %10423 = vst [vmem:[#allocation16_spill] sm:$0xff] %v6461_v28  ;;  %v107_v30 = vsel %vm64_vm1, %v6461_v28, -inf  ;;  %v104_v31 = vsel %vm10401_vm0, %v6466_v29, -inf  ;;  %v6475_v32 = vld [vmem:[%s10355_s0 + $0x88] sm:$0x3]  ;;  %v6480_v33 = vld [vmem:[%s10355_s0 + $0x80] sm:$0xff] }
   0xb   :  { %78 = vmax.xlane.f32.xlu1 %v77_v10  ;;  %75 = vmax.xlane.f32.xlu0 %v74_v11  ;;  %10424 = vst [vmem:[#allocation17_spill] sm:$0xff] %v6475_v32  ;;  %10425 = vst [vmem:[#allocation18_spill] sm:$0xff] %v6480_v33  ;;  %v113_v34 = vsel %vm64_vm1, %v6475_v32, -inf  ;;  %v110_v35 = vsel %vm10401_vm0, %v6480_v33, -inf  ;;  %v6489_v36 = vld [vmem:[%s10355_s0 + $0x98] sm:$0x3] }
   0xc   :  { %10426 = vst [vmem:[#allocation19_spill] sm:$0xff] %v6489_v36  ;;  %v6494_v37 = vld [vmem:[%s10355_s0 + $0x90] sm:$0xff]  ;;  %v119_v38 = vsel %vm64_vm1, %v6489_v36, -inf  ;;  %v6503_v40 = vld [vmem:[%s10355_s0 + $0xa8] sm:$0x3]  ;;  %v6508_v41 = vld [vmem:[%s10355_s0 + $0xa0] sm:$0xff] }
   0xd   :  { %v116_v39 = vsel %vm10401_vm0, %v6494_v37, -inf  ;;  %10427 = vst [vmem:[#allocation20_spill] sm:$0xff] %v6503_v40  ;;  %v125_v42 = vsel %vm64_vm1, %v6503_v40, -inf  ;;  %v122_v43 = vsel %vm10401_vm0, %v6508_v41, -inf  ;;  %v6517_v44 = vld [vmem:[%s10355_s0 + $0xb8] sm:$0x3] }
   0xe   :  { %10428 = vst [vmem:[#allocation21_spill] sm:$0xff] %v6517_v44  ;;  %v6522_v45 = vld [vmem:[%s10355_s0 + $0xb0] sm:$0xff]  ;;  %v131_v46 = vsel %vm64_vm1, %v6517_v44, -inf  ;;  %v6531_v48 = vld [vmem:[%s10355_s0 + $0xc8] sm:$0x3]  ;;  %v6536_v49 = vld [vmem:[%s10355_s0 + $0xc0] sm:$0xff] }
   0xf   :  { %84 = vmax.xlane.f32.xlu1 %v83_v14  ;;  %81 = vmax.xlane.f32.xlu0 %v80_v15  ;;  %v128_v47 = vsel %vm10401_vm0, %v6522_v45, -inf  ;;  %10429 = vst [vmem:[#allocation22_spill] sm:$0xff] %v6531_v48  ;;  %v137_v50 = vsel %vm64_vm1, %v6531_v48, -inf  ;;  %v134_v51 = vsel %vm10401_vm0, %v6536_v49, -inf  ;;  %v6545_v52 = vld [vmem:[%s10355_s0 + $0xd8] sm:$0x3] }
  0x10   :  { %10430 = vst [vmem:[#allocation23_spill] sm:$0xff] %v6545_v52  ;;  %v6550_v53 = vld [vmem:[%s10355_s0 + $0xd0] sm:$0xff]  ;;  %v143_v54 = vsel %vm64_vm1, %v6545_v52, -inf  ;;  %v6559_v56 = vld [vmem:[%s10355_s0 + $0xe8] sm:$0x3]  ;;  %v6564_v57 = vld [vmem:[%s10355_s0 + $0xe0] sm:$0xff] }
  0x11   :  { %10431 = vst [vmem:[#allocation24_spill] sm:$0xff] %v6550_v53  ;;  %v140_v55 = vsel %vm10401_vm0, %v6550_v53, -inf  ;;  %10432 = vst [vmem:[#allocation25_spill] sm:$0xff] %v6559_v56  ;;  %v149_v58 = vsel %vm64_vm1, %v6559_v56, -inf  ;;  %v146_v59 = vsel %vm10401_vm0, %v6564_v57, -inf  ;;  %v6578_v61 = vld [vmem:[%s10355_s0 + $0xf0] sm:$0xff] }
  0x12   :  { %v6573_v60 = vld [vmem:[%s10355_s0 + $0xf8] sm:$0x3]  ;;  %10434 = vst [vmem:[#allocation27_spill] sm:$0xff] %v6578_v61  ;;  %v152_v63 = vsel %vm10401_vm0, %v6578_v61, -inf  ;;  %v6587_v3 = vld [vmem:[%s10355_s0 + $0x108] sm:$0x3] }
  0x13   :  { %90 = vmax.xlane.f32.xlu1 %v89_v18  ;;  %87 = vmax.xlane.f32.xlu0 %v86_v19  ;;  %10433 = vst [vmem:[#allocation26_spill] sm:$0xff] %v6573_v60  ;;  %v155_v62 = vsel %vm64_vm1, %v6573_v60, -inf  ;;  %10435 = vst [vmem:[#allocation28_spill] sm:$0xff] %v6587_v3  ;;  %v6592_v4 = vld [vmem:[%s10355_s0 + $0x100] sm:$0xff]  ;;  %v161_v6 = vsel %vm64_vm1, %v6587_v3, -inf  ;;  %v6606_v11 = vld [vmem:[%s10355_s0 + $0x110] sm:$0xff] }
  0x14   :  { %v158_v7 = vsel %vm10401_vm0, %v6592_v4, -inf  ;;  %v6601_v10 = vld [vmem:[%s10355_s0 + $0x118] sm:$0x3]  ;;  %10437 = vst [vmem:[#allocation30_spill] sm:$0xff] %v6606_v11  ;;  %v164_v15 = vsel %vm10401_vm0, %v6606_v11, -inf  ;;  %v6620_v19 = vld [vmem:[%s10355_s0 + $0x120] sm:$0xff] }
  0x15   :  { %10436 = vst [vmem:[#allocation29_spill] sm:$0xff] %v6601_v10  ;;  %v167_v14 = vsel %vm64_vm1, %v6601_v10, -inf  ;;  %v6615_v18 = vld [vmem:[%s10355_s0 + $0x128] sm:$0x3]  ;;  %10439 = vst [vmem:[#allocation32_spill] sm:$0xff] %v6620_v19  ;;  %vm410_vm6 = vcmask 1043459  }
  0x16   :  { %10438 = vst [vmem:[#allocation31_spill] sm:$0xff] %v6615_v18  ;;  %vm412_vm7 = vcmask 1044484   ;;  %vm233_vm8 = vcmask 130112   ;;  %vm414_vm9 = vcmask 1045509   ;;  %vm10408_vm10 = vcmask 1046534  }
  0x17   :  { %96 = vmax.xlane.f32.xlu1 %v95_v22  ;;  %93 = vmax.xlane.f32.xlu0 %v92_v23  ;;  %v173_v22 = vsel %vm64_vm1, %v6615_v18, -inf  ;;  %v170_v23 = vsel %vm10401_vm0, %v6620_v19, -inf  ;;  %vm10405_vm11 = vcmask 1047559   ;;  %vm626_vm12 = vcmask 39936  }
  0x18   :  { %vm630_vm13 = vcmask 33792   ;;  %vm833_vm14 = vcmask 39941   ;;  %vm1194_vm15 = vcmask 80936  }
  0x1b   :  { %102 = vmax.xlane.f32.xlu1 %v101_v26  ;;  %99 = vmax.xlane.f32.xlu0 %v98_v27  ;;  %v6629_v26 = vld [vmem:[%s10355_s0 + $0x138] sm:$0x3]  ;;  %v6634_v27 = vld [vmem:[%s10355_s0 + $0x130] sm:$0xff] }
  0x1c   :  { %10440 = vst [vmem:[#allocation33_spill] sm:$0xff] %v6629_v26  ;;  %10441 = vst [vmem:[#allocation34_spill] sm:$0xff] %v6634_v27 }
  0x1f   :  { %108 = vmax.xlane.f32.xlu1 %v107_v30  ;;  %105 = vmax.xlane.f32.xlu0 %v104_v31  ;;  %v179_v30 = vsel %vm64_vm1, %v6629_v26, -inf  ;;  %v176_v31 = vsel %vm10401_vm0, %v6634_v27, -inf }
  0x23   :  { %114 = vmax.xlane.f32.xlu1 %v113_v34  ;;  %111 = vmax.xlane.f32.xlu0 %v110_v35  ;;  %v449_v34 = vsel %vm445_vm2, %v6363_v0, -inf  ;;  %v446_v35 = vsel %vm445_vm2, %v6368_v1, -inf }
  0x27   :  { %120 = vmax.xlane.f32.xlu1 %v119_v38  ;;  %117 = vmax.xlane.f32.xlu0 %v116_v39  ;;  %v455_v38 = vsel %vm445_vm2, %v6410_v13, -inf  ;;  %v452_v39 = vsel %vm445_vm2, %v6396_v9, -inf }
  0x2b   :  { %126 = vmax.xlane.f32.xlu1 %v125_v42  ;;  %123 = vmax.xlane.f32.xlu0 %v122_v43  ;;  %v461_v42 = vsel %vm445_vm2, %v6438_v21, -inf  ;;  %v458_v43 = vsel %vm445_vm2, %v6424_v17, -inf }
  0x2f   :  { %132 = vmax.xlane.f32.xlu1 %v131_v46  ;;  %129 = vmax.xlane.f32.xlu0 %v128_v47  ;;  %v467_v46 = vsel %vm445_vm2, %v6466_v29, -inf  ;;  %v464_v47 = vsel %vm445_vm2, %v6452_v25, -inf }
  0x33   :  { %138 = vmax.xlane.f32.xlu1 %v137_v50  ;;  %135 = vmax.xlane.f32.xlu0 %v134_v51  ;;  %v473_v50 = vsel %vm445_vm2, %v6494_v37, -inf  ;;  %v470_v51 = vsel %vm445_vm2, %v6480_v33, -inf }
  0x37   :  { %144 = vmax.xlane.f32.xlu1 %v143_v54  ;;  %141 = vmax.xlane.f32.xlu0 %v140_v55  ;;  %v479_v54 = vsel %vm445_vm2, %v6522_v45, -inf  ;;  %v476_v55 = vsel %vm445_vm2, %v6508_v41, -inf }
  0x3b   :  { %150 = vmax.xlane.f32.xlu1 %v149_v58  ;;  %147 = vmax.xlane.f32.xlu0 %v146_v59  ;;  %v485_v58 = vsel %vm445_vm2, %v6550_v53, -inf  ;;  %v482_v59 = vsel %vm445_vm2, %v6536_v49, -inf }
  0x3f   :  { %156 = vmax.xlane.f32.xlu1 %v155_v62  ;;  %153 = vmax.xlane.f32.xlu0 %v152_v63  ;;  %v491_v62 = vsel %vm445_vm2, %v6578_v61, -inf  ;;  %v488_v63 = vsel %vm445_vm2, %v6564_v57, -inf }
  0x43   :  { %162 = vmax.xlane.f32.xlu1 %v161_v6  ;;  %159 = vmax.xlane.f32.xlu0 %v158_v7  ;;  %v497_v6 = vsel %vm445_vm2, %v6606_v11, -inf  ;;  %v494_v7 = vsel %vm445_vm2, %v6592_v4, -inf }
  0x47   :  { %168 = vmax.xlane.f32.xlu1 %v167_v14  ;;  %165 = vmax.xlane.f32.xlu0 %v164_v15  ;;  %v503_v14 = vsel %vm445_vm2, %v6634_v27, -inf  ;;  %v500_v15 = vsel %vm445_vm2, %v6620_v19, -inf  ;;  %vm1208_vm2 = vcmask 80941  }
  0x4b   :  { %174 = vmax.xlane.f32.xlu1 %v173_v22  ;;  %171 = vmax.xlane.f32.xlu0 %v170_v23  ;;  %v641_v22 = vsel %vm640_vm3, %v6368_v1, -inf  ;;  %v644_v23 = vsel %vm640_vm3, %v6363_v0, -inf }
  0x4f   :  { %180 = vmax.xlane.f32.xlu1 %v179_v30  ;;  %177 = vmax.xlane.f32.xlu0 %v176_v31  ;;  %v647_v30 = vsel %vm640_vm3, %v6396_v9, -inf  ;;  %v650_v31 = vsel %vm640_vm3, %v6410_v13, -inf }
  0x53   :  { %450 = vmax.xlane.f32.xlu1 %v449_v34  ;;  %447 = vmax.xlane.f32.xlu0 %v446_v35  ;;  %v653_v34 = vsel %vm640_vm3, %v6424_v17, -inf  ;;  %v656_v35 = vsel %vm640_vm3, %v6438_v21, -inf }
  0x57   :  { %456 = vmax.xlane.f32.xlu1 %v455_v38  ;;  %453 = vmax.xlane.f32.xlu0 %v452_v39  ;;  %v659_v38 = vsel %vm640_vm3, %v6452_v25, -inf  ;;  %v665_v39 = vsel %vm640_vm3, %v6480_v33, -inf  ;;  %v222_v33 = vlaneseq }
  0x59   :  { %v6772_v25 = vand.u32 127, %v222_v33  ;;  %v6774_v20 = vshrl.u32 %v222_v33, 7 }
  0x5b   :  { %462 = vmax.xlane.f32.xlu1 %v461_v42  ;;  %459 = vmax.xlane.f32.xlu0 %v458_v43  ;;  %10442 = vst [vmem:[#allocation35_spill] sm:$0xff] %v6772_v25  ;;  %v6782_v17 = vsub.s32 %v6772_v25, %v6774_v20  ;;  %v228_v5 = vadd.s32 4294967288, %v6772_v25 }
  0x5f   :  { %468 = vmax.xlane.f32.xlu1 %v467_v46  ;;  %465 = vmax.xlane.f32.xlu0 %v464_v47 }
  0x63   :  { %474 = vmax.xlane.f32.xlu1 %v473_v50  ;;  %471 = vmax.xlane.f32.xlu0 %v470_v51 }
  0x67   :  { %480 = vmax.xlane.f32.xlu1 %v479_v54  ;;  %477 = vmax.xlane.f32.xlu0 %v476_v55 }
  0x6b   :  { %486 = vmax.xlane.f32.xlu1 %v485_v58  ;;  %483 = vmax.xlane.f32.xlu0 %v482_v59 }
  0x6f   :  { %492 = vmax.xlane.f32.xlu1 %v491_v62  ;;  %489 = vmax.xlane.f32.xlu0 %v488_v63 }
  0x73   :  { %498 = vmax.xlane.f32.xlu1 %v497_v6  ;;  %495 = vmax.xlane.f32.xlu0 %v494_v7 }
  0x77   :  { %504 = vmax.xlane.f32.xlu1 %v503_v14  ;;  %501 = vmax.xlane.f32.xlu0 %v500_v15 }
  0x7b   :  { %642 = vmax.xlane.f32.xlu0 %v641_v22  ;;  %645 = vmax.xlane.f32.xlu1 %v644_v23 }
  0x7f   :  { %648 = vmax.xlane.f32.xlu0 %v647_v30  ;;  %651 = vmax.xlane.f32.xlu1 %v650_v31 }
  0x83   :  { %654 = vmax.xlane.f32.xlu0 %v653_v34  ;;  %657 = vmax.xlane.f32.xlu1 %v656_v35 }
  0x87   :  { %660 = vmax.xlane.f32.xlu0 %v659_v38 }
  0x8b   :  { %666 = vmax.xlane.f32.xlu0 %v665_v39 }
  0x8c   :  { %v6696_v42 = vpop.xlane.xlu1 %69  ;;  %v6698_v43 = vpop.xlane.xlu0 %62 }
  0x90   :  { %v6700_v46 = vpop.xlane.xlu1 %72  ;;  %v6702_v47 = vpop.xlane.xlu0 %66 }
  0x94   :  { %v6704_v50 = vpop.xlane.xlu1 %78  ;;  %v6706_v51 = vpop.xlane.xlu0 %75 }
  0x98   :  { %v6708_v54 = vpop.xlane.xlu1 %84  ;;  %v6710_v55 = vpop.xlane.xlu0 %81 }
  0x9c   :  { %v6712_v58 = vpop.xlane.xlu1 %90  ;;  %v6714_v59 = vpop.xlane.xlu0 %87 }
  0xa0   :  { %v6716_v62 = vpop.xlane.xlu1 %96  ;;  %v6718_v63 = vpop.xlane.xlu0 %93 }
  0xa4   :  { %v6720_v6 = vpop.xlane.xlu1 %102  ;;  %v6722_v7 = vpop.xlane.xlu0 %99 }
  0xa8   :  { %v6724_v14 = vpop.xlane.xlu1 %108  ;;  %v6726_v15 = vpop.xlane.xlu0 %105 }
  0xac   :  { %v6728_v22 = vpop.xlane.xlu1 %114  ;;  %v6730_v23 = vpop.xlane.xlu0 %111 }
  0xb0   :  { %v6732_v30 = vpop.xlane.xlu1 %120  ;;  %v6734_v31 = vpop.xlane.xlu0 %117 }
  0xb4   :  { %v6736_v34 = vpop.xlane.xlu1 %126  ;;  %v6738_v35 = vpop.xlane.xlu0 %123 }
  0xb8   :  { %v6740_v38 = vpop.xlane.xlu1 %132  ;;  %v6742_v39 = vpop.xlane.xlu0 %129 }
  0xbc   :  { %v6744_v26 = vpop.xlane.xlu1 %138  ;;  %v6746_v18 = vpop.xlane.xlu0 %135 }
  0xc0   :  { %v6748_v10 = vpop.xlane.xlu1 %144  ;;  %v6750_v3 = vpop.xlane.xlu0 %141 }
  0xc4   :  { %v6752_v60 = vpop.xlane.xlu1 %150  ;;  %v6754_v56 = vpop.xlane.xlu0 %147 }
  0xc8   :  { %v6756_v52 = vpop.xlane.xlu1 %156  ;;  %v6758_v48 = vpop.xlane.xlu0 %153 }
  0xcc   :  { %v6760_v44 = vpop.xlane.xlu1 %162  ;;  %v6762_v40 = vpop.xlane.xlu0 %159 }
  0xd0   :  { %v6764_v36 = vpop.xlane.xlu1 %168  ;;  %v6766_v32 = vpop.xlane.xlu0 %165 }
  0xd4   :  { %v6768_v28 = vpop.xlane.xlu1 %174  ;;  %v6770_v24 = vpop.xlane.xlu0 %171 }
  0xd8   :  { %v6776_v21 = vpop.xlane.xlu1 %180  ;;  %v6778_v16 = vpop.xlane.xlu0 %177 }
  0xdc   :  { %v451_v12 = vpop.xlane.xlu1 %450  ;;  %v448_v13 = vpop.xlane.xlu0 %447 }
  0xdd   :  { %v533_v8 = vrot.slane %v451_v12, %v6782_v17  ;;  %v529_v9 = vrot.slane %v448_v13, %v6782_v17  ;;  %v6793_v13 = vsub.s32 %v228_v5, %v6774_v20  ;;  %v238_v5 = vrot.slane %v6696_v42, %v6782_v17 }
  0xdf   :  { %v606_v1 = vsel %vm406_vm4, %v533_v8, %v529_v9  ;;  %v260_v42 = vrot.slane %v6708_v54, %v6793_v13 }
  0xe0   :  { %v457_v2 = vpop.xlane.xlu1 %456  ;;  %v454_v0 = vpop.xlane.xlu0 %453 }
  0xe1   :  { %v537_v33 = vrot.slane %v454_v0, %v6782_v17  ;;  %v541_v27 = vrot.slane %v457_v2, %v6782_v17 }
  0xe3   :  { %v607_v11 = vsel %vm408_vm5, %v537_v33, %v606_v1  ;;  %v251_v33 = vrot.slane %v6704_v50, %v6793_v13  ;;  %v265_v50 = vrot.slane %v6714_v59, %v6782_v17 }
  0xe4   :  { %v463_v61 = vpop.xlane.xlu1 %462  ;;  %v460_v19 = vpop.xlane.xlu0 %459  ;;  %v608_v0 = vsel %vm410_vm6, %v541_v27, %v607_v11  ;;  %v232_v11 = vrot.slane %v6702_v47, %v6793_v13  ;;  %v227_v27 = vrot.slane %v6698_v43, %v6782_v17 }
  0xe5   :  { %v545_v12 = vrot.slane %v460_v19, %v6782_v17  ;;  %v549_v53 = vrot.slane %v463_v61, %v6782_v17  ;;  %v242_v61 = vrot.slane %v6700_v46, %v6793_v13  ;;  %v256_v46 = vrot.slane %v6710_v55, %v6782_v17 }
  0xe6   :  { %v234_v55 = vsel %vm233_vm8, %v232_v11, %v227_v27 }
  0xe7   :  { %v609_v25 = vsel %vm412_vm7, %v545_v12, %v608_v0  ;;  %v247_v12 = vrot.slane %v6706_v51, %v6782_v17  ;;  %v243_v54 = vsel %vm233_vm8, %v242_v61, %v238_v5 }
  0xe8   :  { %v469_v8 = vpop.xlane.xlu1 %468  ;;  %v466_v2 = vpop.xlane.xlu0 %465  ;;  %v610_v19 = vsel %vm414_vm9, %v549_v53, %v609_v25  ;;  %v269_v25 = vrot.slane %v6712_v58, %v6793_v13  ;;  %v278_v58 = vrot.slane %v6716_v62, %v6793_v13  ;;  %v407_v27 = vsel %vm406_vm4, %v243_v54, %v234_v55 }
  0xe9   :  { %v557_v1 = vrot.slane %v469_v8, %v6782_v17  ;;  %v553_v9 = vrot.slane %v466_v2, %v6782_v17  ;;  %v252_v59 = vsel %vm233_vm8, %v251_v33, %v247_v12  ;;  %v261_v62 = vsel %vm233_vm8, %v260_v42, %v256_v46 }
  0xea   :  { %v296_v33 = vrot.slane %v6724_v14, %v6793_v13  ;;  %v332_v54 = vrot.slane %v6740_v38, %v6793_v13  ;;  %v328_v55 = vrot.slane %v6742_v39, %v6782_v17  ;;  %v305_v39 = vrot.slane %v6728_v22, %v6793_v13 }
  0xeb   :  { %v611_v0 = vsel %vm10408_vm10, %v553_v9, %v610_v19  ;;  %v287_v19 = vrot.slane %v6720_v6, %v6793_v13  ;;  %v292_v6 = vrot.slane %v6726_v15, %v6782_v17  ;;  %v350_v22 = vrot.slane %v6748_v10, %v6793_v13 }
  0xec   :  { %v475_v53 = vpop.xlane.xlu1 %474  ;;  %v472_v47 = vpop.xlane.xlu0 %471  ;;  %v612_v43 = vsel %vm10405_vm11, %v557_v1, %v611_v0  ;;  %v274_v1 = vrot.slane %v6718_v63, %v6782_v17  ;;  %v283_v0 = vrot.slane %v6722_v7, %v6782_v17  ;;  %v270_v63 = vsel %vm233_vm8, %v269_v25, %v265_v50 }
  0xed   :  { %v565_v51 = vrot.slane %v475_v53, %v6782_v17  ;;  %v561_v8 = vrot.slane %v472_v47, %v6782_v17  ;;  %v627_v2 = vsel %vm626_vm12, %v612_v43, -inf  ;;  %v409_v53 = vsel %vm408_vm5, %v252_v59, %v407_v27 }
  0xee   :  { %628 = vmax.xlane.f32.xlu0 %v627_v2  ;;  %v279_v47 = vsel %vm233_vm8, %v278_v58, %v274_v1  ;;  %v411_v43 = vsel %vm410_vm6, %v261_v62, %v409_v53  ;;  %v288_v25 = vsel %vm233_vm8, %v287_v19, %v283_v0  ;;  %v319_v59 = vrot.slane %v6738_v35, %v6782_v17 }
  0xef   :  { %v613_v9 = vsel %vm406_vm4, %v565_v51, %v561_v8  ;;  %v413_v14 = vsel %vm412_vm7, %v270_v63, %v411_v43  ;;  %v297_v8 = vsel %vm233_vm8, %v296_v33, %v292_v6  ;;  %v341_v19 = vrot.slane %v6744_v26, %v6793_v13 }
  0xf0   :  { %v481_v5 = vpop.xlane.xlu1 %480  ;;  %v478_v61 = vpop.xlane.xlu0 %477  ;;  %v631_v11 = vsel %vm630_vm13, %v613_v9, -inf  ;;  %v415_v2 = vsel %vm414_vm9, %v279_v47, %v413_v14  ;;  %v323_v9 = vrot.slane %v6736_v34, %v6793_v13  ;;  %v337_v0 = vrot.slane %v6746_v18, %v6782_v17 }
  0xf1   :  { %632 = vmax.xlane.f32.xlu1 %v631_v11  ;;  %v573_v12 = vrot.slane %v481_v5, %v6782_v17  ;;  %v569_v7 = vrot.slane %v478_v61, %v6782_v17  ;;  %v417_v1 = vsel %vm10408_vm10, %v288_v25, %v415_v2  ;;  %v301_v61 = vrot.slane %v6730_v23, %v6782_v17 }
  0xf2   :  { %v419_v34 = vsel %vm10405_vm11, %v297_v8, %v417_v1  ;;  %v314_v35 = vrot.slane %v6732_v30, %v6793_v13  ;;  %v310_v26 = vrot.slane %v6734_v31, %v6782_v17  ;;  %v333_v62 = vsel %vm233_vm8, %v332_v54, %v328_v55 }
  0xf3   :  { %v614_v15 = vsel %vm406_vm4, %v573_v12, %v569_v7  ;;  %v346_v23 = vrot.slane %v6750_v3, %v6782_v17  ;;  %v324_v33 = vsel %vm233_vm8, %v323_v9, %v319_v59  ;;  %v342_v30 = vsel %vm233_vm8, %v341_v19, %v337_v0 }
  0xf4   :  { %v487_v42 = vpop.xlane.xlu1 %486  ;;  %v484_v46 = vpop.xlane.xlu0 %483  ;;  %v359_v31 = vrot.slane %v6752_v60, %v6793_v13  ;;  %v355_v6 = vrot.slane %v6754_v56, %v6782_v17  ;;  %v368_v10 = vrot.slane %v6756_v52, %v6793_v13  ;;  %v364_v3 = vrot.slane %v6758_v48, %v6782_v17 }
  0xf5   :  { %v577_v50 = vrot.slane %v484_v46, %v6782_v17  ;;  %v581_v51 = vrot.slane %v487_v42, %v6782_v17  ;;  %v421_v43 = vsel %vm406_vm4, %v333_v62, %v324_v33  ;;  %v377_v60 = vrot.slane %v6760_v44, %v6793_v13 }
  0xf6   :  { %v373_v56 = vrot.slane %v6762_v40, %v6782_v17  ;;  %v351_v46 = vsel %vm233_vm8, %v350_v22, %v346_v23  ;;  %v386_v52 = vrot.slane %v6764_v36, %v6793_v13  ;;  %v382_v48 = vrot.slane %v6766_v32, %v6782_v17 }
  0xf7   :  { %v615_v58 = vsel %vm408_vm5, %v577_v50, %v614_v15  ;;  %v422_v50 = vsel %vm408_vm5, %v342_v30, %v421_v43  ;;  %v360_v14 = vsel %vm233_vm8, %v359_v31, %v355_v6  ;;  %v369_v8 = vsel %vm233_vm8, %v368_v10, %v364_v3  ;;  %v10443_v6 = vld [vmem:[#allocation24_spill] sm:$0xff]  ;;  %v10445_v3 = vld [vmem:[#allocation27_spill] sm:$0xff] }
  0xf8   :  { %v493_v38 = vpop.xlane.xlu1 %492  ;;  %v490_v5 = vpop.xlane.xlu0 %489  ;;  %v616_v27 = vsel %vm410_vm6, %v581_v51, %v615_v58  ;;  %v315_v51 = vsel %vm233_vm8, %v314_v35, %v310_v26  ;;  %v423_v54 = vsel %vm410_vm6, %v351_v46, %v422_v50  ;;  %v404_v55 = vrot.slane %v6776_v21, %v6793_v13 }
  0xf9   :  { %v585_v11 = vrot.slane %v490_v5, %v6782_v17  ;;  %v589_v18 = vrot.slane %v493_v38, %v6782_v17  ;;  %v400_v58 = vrot.slane %v6778_v16, %v6782_v17  ;;  %v378_v1 = vsel %vm233_vm8, %v377_v60, %v373_v56  ;;  %v10447_v60 = vld [vmem:[#allocation34_spill] sm:$0xff] }
  0xfa   :  { %v306_v59 = vsel %vm233_vm8, %v305_v39, %v301_v61  ;;  %v387_v19 = vsel %vm233_vm8, %v386_v52, %v382_v48  ;;  %v424_v0 = vsel %vm412_vm7, %v360_v14, %v423_v54  ;;  %v395_v38 = vrot.slane %v6768_v28, %v6793_v13 }
  0xfb   :  { %v617_v63 = vsel %vm412_vm7, %v585_v11, %v616_v27  ;;  %v391_v21 = vrot.slane %v6770_v24, %v6782_v17  ;;  %v425_v16 = vsel %vm414_vm9, %v369_v8, %v424_v0  ;;  %v433_v11 = vsel %vm10401_vm0, %v419_v34, -inf }
  0xfc   :  { %v499_v12 = vpop.xlane.xlu1 %498  ;;  %v496_v7 = vpop.xlane.xlu0 %495  ;;  %v618_v42 = vsel %vm414_vm9, %v589_v18, %v617_v63  ;;  %v420_v35 = vsel %vm406_vm4, %v315_v51, %v306_v59  ;;  %v426_v39 = vsel %vm10408_vm10, %v378_v1, %v425_v16  ;;  %v405_v26 = vsel %vm233_vm8, %v404_v55, %v400_v58 }
  0xfd   :  { %v597_v53 = vrot.slane %v499_v12, %v6782_v17  ;;  %v593_v47 = vrot.slane %v496_v7, %v6782_v17  ;;  %v427_v61 = vsel %vm10405_vm11, %v387_v19, %v426_v39  ;;  %v436_v28 = vsel %vm64_vm1, %v420_v35, -inf  ;;  %v10444_v7 = vld [vmem:[#allocation32_spill] sm:$0xff] }
  0xfe   :  { %v396_v24 = vsel %vm233_vm8, %v395_v38, %v391_v21  ;;  %v439_v18 = vsel %vm10401_vm0, %v427_v61, -inf  ;;  %v671_v34 = vsel %vm640_vm3, %v6508_v41, -inf  ;;  %v662_v22 = vsel %vm640_vm3, %v6466_v29, -inf }
  0xff   :  { %v619_v25 = vsel %vm10408_vm10, %v593_v47, %v618_v42  ;;  %v428_v27 = vsel %vm406_vm4, %v405_v26, %v396_v24  ;;  %v677_v23 = vsel %vm640_vm3, %v6536_v49, -inf  ;;  %v668_v63 = vsel %vm640_vm3, %v6494_v37, -inf  ;;  %v10446_v47 = vld [vmem:[#allocation30_spill] sm:$0xff] }
 0x100   :  { %v505_v44 = vpop.xlane.xlu1 %504  ;;  %v502_v15 = vpop.xlane.xlu0 %501  ;;  %v620_v40 = vsel %vm10405_vm11, %v597_v53, %v619_v25  ;;  %v442_v62 = vsel %vm64_vm1, %v428_v27, -inf  ;;  %v683_v33 = vsel %vm640_vm3, %v6564_v57, -inf  ;;  %v674_v30 = vsel %vm640_vm3, %v6522_v45, -inf }
 0x101   :  { %v605_v2 = vrot.slane %v505_v44, %v6782_v17  ;;  %v601_v36 = vrot.slane %v502_v15, %v6782_v17  ;;  %v634_v32 = vsel %vm626_vm12, %v620_v40, -inf  ;;  %v689_v31 = vsel %vm640_vm3, %v6592_v4, -inf }
 0x102   :  { %635 = vmax.xlane.f32.xlu0 %v634_v32  ;;  %v680_v12 = vsel %vm640_vm3, %v10443_v6, -inf  ;;  %v695_v10 = vsel %vm640_vm3, %v10444_v7, -inf  ;;  %v686_v53 = vsel %vm640_vm3, %v10445_v3, -inf  ;;  %v692_v43 = vsel %vm640_vm3, %v10446_v47, -inf }
 0x103   :  { %v621_v9 = vsel %vm406_vm4, %v605_v2, %v601_v36  ;;  %v698_v56 = vsel %vm640_vm3, %v10447_v60, -inf  ;;  %vm1198_vm1 = vcmask 74792   ;;  %vm1581_vm3 = vcmask 18432  }
 0x104   :  { %v637_v5 = vsel %vm630_vm13, %v621_v9, -inf  ;;  %v643_v42 = vpop.xlane.xlu0 %642  ;;  %v646_v48 = vpop.xlane.xlu1 %645  ;;  %vm3314_vm0 = vcmask 58408  }
 0x105   :  { %638 = vmax.xlane.f32.xlu1 %v637_v5  ;;  %v724_v40 = vrot.slane %v643_v42, %v6782_v17  ;;  %v728_v51 = vrot.slane %v646_v48, %v6782_v17 }
 0x106   :  { %434 = vmax.xlane.f32.xlu0 %v433_v11 }
 0x107   :  { %v801_v32 = vsel %vm406_vm4, %v728_v51, %v724_v40 }
 0x108   :  { %v649_v46 = vpop.xlane.xlu0 %648  ;;  %v652_v50 = vpop.xlane.xlu1 %651 }
 0x109   :  { %437 = vmax.xlane.f32.xlu1 %v436_v28  ;;  %v732_v36 = vrot.slane %v649_v46, %v6782_v17  ;;  %v736_v55 = vrot.slane %v652_v50, %v6782_v17 }
 0x10a   :  { %440 = vmax.xlane.f32.xlu0 %v439_v18 }
 0x10b   :  { %v802_v1 = vsel %vm408_vm5, %v732_v36, %v801_v32 }
 0x10c   :  { %v655_v52 = vpop.xlane.xlu0 %654  ;;  %v658_v44 = vpop.xlane.xlu1 %657  ;;  %v803_v19 = vsel %vm410_vm6, %v736_v55, %v802_v1 }
 0x10d   :  { %443 = vmax.xlane.f32.xlu1 %v442_v62  ;;  %v740_v9 = vrot.slane %v655_v52, %v6782_v17  ;;  %v744_v38 = vrot.slane %v658_v44, %v6782_v17 }
 0x10e   :  { %672 = vmax.xlane.f32.xlu0 %v671_v34 }
 0x10f   :  { %v804_v5 = vsel %vm412_vm7, %v740_v9, %v803_v19 }
 0x110   :  { %v661_v25 = vpop.xlane.xlu0 %660  ;;  %v805_v35 = vsel %vm414_vm9, %v744_v38, %v804_v5  ;;  %v10448_v5 = vld [vmem:[#allocation3_spill] sm:$0xff] }
 0x111   :  { %663 = vmax.xlane.f32.xlu1 %v662_v22  ;;  %v748_v11 = vrot.slane %v661_v25, %v6782_v17 }
 0x112   :  { %678 = vmax.xlane.f32.xlu0 %v677_v23 }
 0x113   :  { %v806_v26 = vsel %vm10408_vm10, %v748_v11, %v805_v35 }
 0x114   :  { %v667_v14 = vpop.xlane.xlu0 %666 }
 0x115   :  { %669 = vmax.xlane.f32.xlu1 %v668_v63  ;;  %v756_v34 = vrot.slane %v667_v14, %v6782_v17 }
 0x116   :  { %684 = vmax.xlane.f32.xlu0 %v683_v33 }
 0x119   :  { %675 = vmax.xlane.f32.xlu1 %v674_v30 }
 0x11a   :  { %690 = vmax.xlane.f32.xlu0 %v689_v31 }
 0x11d   :  { %681 = vmax.xlane.f32.xlu1 %v680_v12 }
 0x11e   :  { %696 = vmax.xlane.f32.xlu0 %v695_v10 }
 0x121   :  { %687 = vmax.xlane.f32.xlu1 %v686_v53 }
 0x125   :  { %693 = vmax.xlane.f32.xlu1 %v692_v43 }
 0x129   :  { %699 = vmax.xlane.f32.xlu1 %v698_v56 }
 0x177   :  { %v6972_v15 = vpop.xlane.xlu0 %628 }
 0x17a   :  { %v6976_v8 = vpop.xlane.xlu1 %632 }
 0x18b   :  { %v6978_v2 = vpop.xlane.xlu0 %635 }
 0x18e   :  { %v6982_v54 = vpop.xlane.xlu1 %638 }
 0x18f   :  { %v6985_v58 = vpop.xlane.xlu0 %434 }
 0x192   :  { %v6989_v59 = vpop.xlane.xlu1 %437 }
 0x193   :  { %v6992_v0 = vpop.xlane.xlu0 %440 }
 0x196   :  { %v6995_v21 = vpop.xlane.xlu1 %443 }
 0x197   :  { %v673_v16 = vpop.xlane.xlu0 %672 }
 0x198   :  { %v764_v22 = vrot.slane %v673_v16, %v6782_v17  ;;  %v834_v16 = vsel %vm833_vm14, %v10448_v5, -inf }
 0x19a   :  { %v664_v39 = vpop.xlane.xlu1 %663 }
 0x19b   :  { %v752_v61 = vrot.slane %v664_v39, %v6782_v17  ;;  %v679_v24 = vpop.xlane.xlu0 %678  ;;  %v10449_v39 = vld [vmem:[#allocation5_spill] sm:$0xff] }
 0x19c   :  { %v772_v12 = vrot.slane %v679_v24, %v6782_v17  ;;  %v10451_v24 = vld [vmem:[#allocation4_spill] sm:$0xff] }
 0x19d   :  { %v807_v28 = vsel %vm10405_vm11, %v752_v61, %v806_v26  ;;  %v837_v61 = vsel %vm630_vm13, %v10449_v39, -inf  ;;  %v10450_v26 = vld [vmem:[#allocation2_spill] sm:$0xff] }
 0x19e   :  { %v670_v18 = vpop.xlane.xlu1 %669  ;;  %v821_v27 = vsel %vm626_vm12, %v807_v28, -inf  ;;  %v840_v28 = vsel %vm833_vm14, %v10450_v26, -inf  ;;  %v10468_v39 = vld [vmem:[#allocation22_spill] sm:$0xff]  ;;  %v10469_v26 = vld [vmem:[#allocation23_spill] sm:$0xff] }
 0x19f   :  { %v760_v62 = vrot.slane %v670_v18, %v6782_v17  ;;  %822 = vmax.xlane.f32.xlu0 %v821_v27  ;;  %v685_v31 = vpop.xlane.xlu0 %684  ;;  %v843_v18 = vsel %vm630_vm13, %v10451_v24, -inf  ;;  %v10452_v27 = vld [vmem:[#allocation7_spill] sm:$0xff]  ;;  %v10470_v24 = vld [vmem:[#allocation25_spill] sm:$0xff] }
 0x1a0   :  { %v780_v42 = vrot.slane %v685_v31, %v6782_v17  ;;  %v10456_v31 = vld [vmem:[#allocation11_spill] sm:$0xff] }
 0x1a1   :  { %v808_v23 = vsel %vm406_vm4, %v760_v62, %v756_v34  ;;  %v846_v34 = vsel %vm833_vm14, %v10452_v27, -inf  ;;  %v10453_v62 = vld [vmem:[#allocation6_spill] sm:$0xff] }
 0x1a2   :  { %v676_v63 = vpop.xlane.xlu1 %675  ;;  %v824_v33 = vsel %vm630_vm13, %v808_v23, -inf  ;;  %v10454_v23 = vld [vmem:[#allocation9_spill] sm:$0xff]  ;;  %v10471_v27 = vld [vmem:[#allocation26_spill] sm:$0xff] }
 0x1a3   :  { %v768_v30 = vrot.slane %v676_v63, %v6782_v17  ;;  %825 = vmax.xlane.f32.xlu1 %v824_v33  ;;  %v691_v52 = vpop.xlane.xlu0 %690  ;;  %v852_v63 = vsel %vm833_vm14, %v10454_v23, -inf  ;;  %v10455_v33 = vld [vmem:[#allocation8_spill] sm:$0xff]  ;;  %v10473_v23 = vld [vmem:[#allocation29_spill] sm:$0xff] }
 0x1a4   :  { %v788_v14 = vrot.slane %v691_v52, %v6782_v17  ;;  %v10460_v52 = vld [vmem:[#allocation15_spill] sm:$0xff] }
 0x1a5   :  { %v809_v10 = vsel %vm406_vm4, %v768_v30, %v764_v22  ;;  %v849_v22 = vsel %vm630_vm13, %v10453_v62, -inf  ;;  %v855_v30 = vsel %vm630_vm13, %v10455_v33, -inf  ;;  %v10472_v62 = vld [vmem:[#allocation28_spill] sm:$0xff]  ;;  %v10474_v33 = vld [vmem:[#allocation31_spill] sm:$0xff] }
 0x1a6   :  { %v682_v53 = vpop.xlane.xlu1 %681  ;;  %v810_v56 = vsel %vm408_vm5, %v772_v12, %v809_v10  ;;  %v858_v12 = vsel %vm833_vm14, %v10456_v31, -inf  ;;  %v10457_v10 = vld [vmem:[#allocation10_spill] sm:$0xff]  ;;  %v10475_v31 = vld [vmem:[#allocation33_spill] sm:$0xff] }
 0x1a7   :  { %v776_v43 = vrot.slane %v682_v53, %v6782_v17  ;;  %v697_v51 = vpop.xlane.xlu0 %696  ;;  %v861_v53 = vsel %vm630_vm13, %v10457_v10, -inf }
 0x1a8   :  { %v796_v55 = vrot.slane %v697_v51, %v6782_v17  ;;  %v10463_v51 = vld [vmem:[#allocation18_spill] sm:$0xff] }
 0x1a9   :  { %v811_v46 = vsel %vm410_vm6, %v776_v43, %v810_v56  ;;  %v10458_v43 = vld [vmem:[#allocation13_spill] sm:$0xff] }
 0x1aa   :  { %v688_v48 = vpop.xlane.xlu1 %687  ;;  %v812_v50 = vsel %vm412_vm7, %v780_v42, %v811_v46  ;;  %v864_v56 = vsel %vm833_vm14, %v10458_v43, -inf  ;;  %v10459_v42 = vld [vmem:[#allocation12_spill] sm:$0xff] }
 0x1ab   :  { %v784_v25 = vrot.slane %v688_v48, %v6782_v17  ;;  %v867_v46 = vsel %vm630_vm13, %v10459_v42, -inf  ;;  %v870_v48 = vsel %vm833_vm14, %v10460_v52, -inf }
 0x1ad   :  { %v813_v44 = vsel %vm414_vm9, %v784_v25, %v812_v50  ;;  %v10461_v25 = vld [vmem:[#allocation14_spill] sm:$0xff] }
 0x1ae   :  { %v694_v40 = vpop.xlane.xlu1 %693  ;;  %v814_v32 = vsel %vm10408_vm10, %v788_v14, %v813_v44  ;;  %v873_v50 = vsel %vm630_vm13, %v10461_v25, -inf  ;;  %v876_v14 = vsel %vm833_vm14, %v6466_v29, -inf  ;;  %v10462_v44 = vld [vmem:[#allocation16_spill] sm:$0xff] }
 0x1af   :  { %v792_v36 = vrot.slane %v694_v40, %v6782_v17  ;;  %v879_v40 = vsel %vm630_vm13, %v10462_v44, -inf }
 0x1b1   :  { %v815_v1 = vsel %vm10405_vm11, %v792_v36, %v814_v32  ;;  %v882_v36 = vsel %vm833_vm14, %v10463_v51, -inf  ;;  %v10464_v32 = vld [vmem:[#allocation17_spill] sm:$0xff] }
 0x1b2   :  { %v700_v9 = vpop.xlane.xlu1 %699  ;;  %v827_v19 = vsel %vm626_vm12, %v815_v1, -inf  ;;  %v888_v1 = vsel %vm833_vm14, %v6494_v37, -inf  ;;  %vm1762_vm12 = vcmask 23552  }
 0x1b3   :  { %v800_v38 = vrot.slane %v700_v9, %v6782_v17  ;;  %828 = vmax.xlane.f32.xlu0 %v827_v19  ;;  %v10465_v9 = vld [vmem:[#allocation19_spill] sm:$0xff]  ;;  %v894_v19 = vsel %vm833_vm14, %v6508_v41, -inf  ;;  %v909_v41 = vsel %vm630_vm13, %v10468_v39, -inf }
 0x1b4   :  { %v891_v29 = vsel %vm630_vm13, %v10465_v9, -inf }
 0x1b5   :  { %v816_v11 = vsel %vm406_vm4, %v800_v38, %v796_v55  ;;  %v885_v55 = vsel %vm630_vm13, %v10464_v32, -inf  ;;  %v10466_v38 = vld [vmem:[#allocation20_spill] sm:$0xff] }
 0x1b6   :  { %v830_v35 = vsel %vm630_vm13, %v816_v11, -inf  ;;  %v897_v5 = vsel %vm630_vm13, %v10466_v38, -inf  ;;  %v10467_v11 = vld [vmem:[#allocation21_spill] sm:$0xff] }
 0x1b7   :  { %831 = vmax.xlane.f32.xlu1 %v830_v35  ;;  %835 = vmax.xlane.f32.xlu0 %v834_v16  ;;  %v900_v16 = vsel %vm833_vm14, %v6522_v45, -inf  ;;  %v903_v37 = vsel %vm630_vm13, %v10467_v11, -inf  ;;  %v906_v35 = vsel %vm833_vm14, %v6536_v49, -inf  ;;  %v915_v45 = vsel %vm630_vm13, %v10469_v26, -inf }
 0x1b8   :  { %v921_v49 = vsel %vm630_vm13, %v10470_v24, -inf }
 0x1bb   :  { %838 = vmax.xlane.f32.xlu1 %v837_v61  ;;  %841 = vmax.xlane.f32.xlu0 %v840_v28  ;;  %v912_v61 = vsel %vm833_vm14, %v10443_v6, -inf  ;;  %v918_v28 = vsel %vm833_vm14, %v6564_v57, -inf  ;;  %v927_v6 = vsel %vm630_vm13, %v10471_v27, -inf  ;;  %v933_v57 = vsel %vm630_vm13, %v10472_v62, -inf }
 0x1bf   :  { %844 = vmax.xlane.f32.xlu1 %v843_v18  ;;  %847 = vmax.xlane.f32.xlu0 %v846_v34  ;;  %v924_v18 = vsel %vm833_vm14, %v10445_v3, -inf  ;;  %v930_v34 = vsel %vm833_vm14, %v6592_v4, -inf  ;;  %v939_v3 = vsel %vm630_vm13, %v10473_v23, -inf  ;;  %v945_v4 = vsel %vm630_vm13, %v10474_v33, -inf }
 0x1c3   :  { %850 = vmax.xlane.f32.xlu1 %v849_v22  ;;  %853 = vmax.xlane.f32.xlu0 %v852_v63  ;;  %v936_v22 = vsel %vm833_vm14, %v10446_v47, -inf  ;;  %v942_v63 = vsel %vm833_vm14, %v10444_v7, -inf  ;;  %v951_v47 = vsel %vm630_vm13, %v10475_v31, -inf  ;;  %vm1766_vm13 = vcmask 17408  }
 0x1c7   :  { %856 = vmax.xlane.f32.xlu1 %v855_v30  ;;  %859 = vmax.xlane.f32.xlu0 %v858_v12  ;;  %v948_v30 = vsel %vm833_vm14, %v10447_v60, -inf  ;;  %vm1776_vm14 = vcmask 34832  }
 0x1cb   :  { %862 = vmax.xlane.f32.xlu1 %v861_v53  ;;  %865 = vmax.xlane.f32.xlu0 %v864_v56 }
 0x1cf   :  { %868 = vmax.xlane.f32.xlu1 %v867_v46  ;;  %871 = vmax.xlane.f32.xlu0 %v870_v48 }
 0x1d3   :  { %874 = vmax.xlane.f32.xlu1 %v873_v50  ;;  %877 = vmax.xlane.f32.xlu0 %v876_v14 }
 0x1d7   :  { %880 = vmax.xlane.f32.xlu1 %v879_v40  ;;  %883 = vmax.xlane.f32.xlu0 %v882_v36 }
 0x1db   :  { %886 = vmax.xlane.f32.xlu1 %v885_v55  ;;  %889 = vmax.xlane.f32.xlu0 %v888_v1 }
 0x1df   :  { %892 = vmax.xlane.f32.xlu1 %v891_v29  ;;  %895 = vmax.xlane.f32.xlu0 %v894_v19 }
 0x1e3   :  { %898 = vmax.xlane.f32.xlu1 %v897_v5  ;;  %901 = vmax.xlane.f32.xlu0 %v900_v16 }
 0x1e7   :  { %904 = vmax.xlane.f32.xlu1 %v903_v37  ;;  %907 = vmax.xlane.f32.xlu0 %v906_v35 }
 0x1eb   :  { %910 = vmax.xlane.f32.xlu1 %v909_v41  ;;  %913 = vmax.xlane.f32.xlu0 %v912_v61 }
 0x1ef   :  { %916 = vmax.xlane.f32.xlu1 %v915_v45  ;;  %919 = vmax.xlane.f32.xlu0 %v918_v28 }
 0x1f3   :  { %922 = vmax.xlane.f32.xlu1 %v921_v49  ;;  %925 = vmax.xlane.f32.xlu0 %v924_v18 }
 0x1f7   :  { %928 = vmax.xlane.f32.xlu1 %v927_v6  ;;  %931 = vmax.xlane.f32.xlu0 %v930_v34 }
 0x1fb   :  { %934 = vmax.xlane.f32.xlu1 %v933_v57  ;;  %937 = vmax.xlane.f32.xlu0 %v936_v22 }
 0x1ff   :  { %940 = vmax.xlane.f32.xlu1 %v939_v3  ;;  %943 = vmax.xlane.f32.xlu0 %v942_v63 }
 0x203   :  { %946 = vmax.xlane.f32.xlu1 %v945_v4  ;;  %949 = vmax.xlane.f32.xlu0 %v948_v30 }
 0x207   :  { %952 = vmax.xlane.f32.xlu1 %v951_v47 }
 0x228   :  { %v7108_v12 = vpop.xlane.xlu0 %822 }
 0x229   :  { %10476 = vst [vmem:[#allocation24_spill] sm:$0xff] %v7108_v12 }
 0x22c   :  { %v7110_v10 = vpop.xlane.xlu1 %825 }
 0x23c   :  { %v7112_v53 = vpop.xlane.xlu0 %828 }
 0x23d   :  { %10477 = vst [vmem:[#allocation32_spill] sm:$0xff] %v7112_v53 }
 0x240   :  { %v7114_v7 = vpop.xlane.xlu1 %831  ;;  %v836_v43 = vpop.xlane.xlu0 %835 }
 0x241   :  { %v997_v29 = vrot.slane %v836_v43, %v6782_v17 }
 0x244   :  { %v839_v56 = vpop.xlane.xlu1 %838  ;;  %v842_v42 = vpop.xlane.xlu0 %841 }
 0x245   :  { %v1006_v51 = vrot.slane %v842_v42, %v6782_v17  ;;  %v1001_v9 = vrot.slane %v839_v56, %v6793_v13 }
 0x247   :  { %v1002_v45 = vsel %vm233_vm8, %v1001_v9, %v997_v29 }
 0x248   :  { %v845_v46 = vpop.xlane.xlu1 %844  ;;  %v848_v52 = vpop.xlane.xlu0 %847 }
 0x249   :  { %v1010_v40 = vrot.slane %v845_v46, %v6793_v13  ;;  %v1015_v32 = vrot.slane %v848_v52, %v6782_v17 }
 0x24b   :  { %v1011_v11 = vsel %vm233_vm8, %v1010_v40, %v1006_v51 }
 0x24c   :  { %v851_v60 = vpop.xlane.xlu1 %850  ;;  %v854_v48 = vpop.xlane.xlu0 %853  ;;  %v1174_v49 = vsel %vm406_vm4, %v1011_v11, %v1002_v45 }
 0x24d   :  { %v1019_v36 = vrot.slane %v851_v60, %v6793_v13  ;;  %v1024_v38 = vrot.slane %v854_v48, %v6782_v17 }
 0x24f   :  { %v1020_v39 = vsel %vm233_vm8, %v1019_v36, %v1015_v32 }
 0x250   :  { %v857_v25 = vpop.xlane.xlu1 %856  ;;  %v860_v50 = vpop.xlane.xlu0 %859  ;;  %v1175_v27 = vsel %vm408_vm5, %v1020_v39, %v1174_v49 }
 0x251   :  { %v1028_v19 = vrot.slane %v857_v25, %v6793_v13  ;;  %v1033_v16 = vrot.slane %v860_v50, %v6782_v17 }
 0x253   :  { %v1029_v28 = vsel %vm233_vm8, %v1028_v19, %v1024_v38 }
 0x254   :  { %v863_v14 = vpop.xlane.xlu1 %862  ;;  %v866_v44 = vpop.xlane.xlu0 %865  ;;  %v1176_v62 = vsel %vm410_vm6, %v1029_v28, %v1175_v27 }
 0x255   :  { %v1037_v5 = vrot.slane %v863_v14, %v6793_v13  ;;  %v1042_v35 = vrot.slane %v866_v44, %v6782_v17 }
 0x257   :  { %v1038_v18 = vsel %vm233_vm8, %v1037_v5, %v1033_v16 }
 0x258   :  { %v869_v55 = vpop.xlane.xlu1 %868  ;;  %v872_v1 = vpop.xlane.xlu0 %871  ;;  %v1177_v3 = vsel %vm412_vm7, %v1038_v18, %v1176_v62 }
 0x259   :  { %v1046_v37 = vrot.slane %v869_v55, %v6793_v13  ;;  %v1051_v61 = vrot.slane %v872_v1, %v6782_v17 }
 0x25b   :  { %v1047_v6 = vsel %vm233_vm8, %v1046_v37, %v1042_v35 }
 0x25c   :  { %v875_v41 = vpop.xlane.xlu1 %874  ;;  %v878_v26 = vpop.xlane.xlu0 %877  ;;  %v1178_v33 = vsel %vm414_vm9, %v1047_v6, %v1177_v3 }
 0x25d   :  { %v1055_v24 = vrot.slane %v875_v41, %v6793_v13  ;;  %v1060_v34 = vrot.slane %v878_v26, %v6782_v17 }
 0x25f   :  { %v1056_v57 = vsel %vm233_vm8, %v1055_v24, %v1051_v61 }
 0x260   :  { %v881_v22 = vpop.xlane.xlu1 %880  ;;  %v884_v23 = vpop.xlane.xlu0 %883  ;;  %v1179_v30 = vsel %vm10408_vm10, %v1056_v57, %v1178_v33 }
 0x261   :  { %v1064_v63 = vrot.slane %v881_v22, %v6793_v13  ;;  %v1069_v46 = vrot.slane %v884_v23, %v6782_v17 }
 0x263   :  { %v1065_v4 = vsel %vm233_vm8, %v1064_v63, %v1060_v34 }
 0x264   :  { %v887_v31 = vpop.xlane.xlu1 %886  ;;  %v1180_v47 = vsel %vm10405_vm11, %v1065_v4, %v1179_v30  ;;  %v890_v43 = vpop.xlane.xlu0 %889 }
 0x265   :  { %v1195_v56 = vsel %vm1194_vm15, %v1180_v47, -inf  ;;  %v1073_v42 = vrot.slane %v887_v31, %v6793_v13  ;;  %v1078_v52 = vrot.slane %v890_v43, %v6782_v17 }
 0x266   :  { %1196 = vmax.xlane.f32.xlu0 %v1195_v56 }
 0x267   :  { %v1074_v50 = vsel %vm233_vm8, %v1073_v42, %v1069_v46 }
 0x268   :  { %v893_v60 = vpop.xlane.xlu1 %892  ;;  %v896_v48 = vpop.xlane.xlu0 %895 }
 0x269   :  { %v1082_v25 = vrot.slane %v893_v60, %v6793_v13  ;;  %v1087_v26 = vrot.slane %v896_v48, %v6782_v17 }
 0x26b   :  { %v1083_v14 = vsel %vm233_vm8, %v1082_v25, %v1078_v52 }
 0x26c   :  { %v899_v44 = vpop.xlane.xlu1 %898  ;;  %v1181_v40 = vsel %vm406_vm4, %v1083_v14, %v1074_v50  ;;  %v902_v51 = vpop.xlane.xlu0 %901 }
 0x26d   :  { %v1199_v36 = vsel %vm1198_vm1, %v1181_v40, -inf  ;;  %v1096_v11 = vrot.slane %v902_v51, %v6782_v17  ;;  %v1091_v61 = vrot.slane %v899_v44, %v6793_v13 }
 0x26e   :  { %1200 = vmax.xlane.f32.xlu1 %v1199_v36 }
 0x26f   :  { %v1092_v23 = vsel %vm233_vm8, %v1091_v61, %v1087_v26  ;;  %v7217_v61 = vld [vmem:[%s10355_s0 + $0x20] sm:$0xff] }
 0x270   :  { %v905_v32 = vpop.xlane.xlu1 %904  ;;  %v908_v55 = vpop.xlane.xlu0 %907  ;;  %v1221_v26 = vsel %vm1208_vm2, %v7217_v61, -inf }
 0x271   :  { %v1100_v16 = vrot.slane %v905_v32, %v6793_v13  ;;  %v1105_v35 = vrot.slane %v908_v55, %v6782_v17 }
 0x273   :  { %v1101_v18 = vsel %vm233_vm8, %v1100_v16, %v1096_v11  ;;  %v7204_v16 = vld [vmem:[%s10355_s0 + $0x10] sm:$0xff] }
 0x274   :  { %v911_v1 = vpop.xlane.xlu1 %910  ;;  %v914_v9 = vpop.xlane.xlu0 %913  ;;  %v1182_v33 = vsel %vm406_vm4, %v1101_v18, %v1092_v23  ;;  %v1215_v11 = vsel %vm1208_vm2, %v7204_v16, -inf  ;;  %v6213_v18 = vld [vmem:[%s10355_s0 + $0x28] sm:$0x3] }
 0x275   :  { %v1109_v37 = vrot.slane %v911_v1, %v6793_v13  ;;  %v1114_v28 = vrot.slane %v914_v9, %v6782_v17  ;;  %v7194_v1 = vld [vmem:[%s10355_s0] sm:$0xff] }
 0x276   :  { %v1209_v9 = vsel %vm1208_vm2, %v7194_v1, -inf }
 0x277   :  { %v1110_v34 = vsel %vm233_vm8, %v1109_v37, %v1105_v35 }
 0x278   :  { %v917_v29 = vpop.xlane.xlu1 %916  ;;  %v920_v19 = vpop.xlane.xlu0 %919  ;;  %v1183_v30 = vsel %vm408_vm5, %v1110_v34, %v1182_v33  ;;  %v7261_v33 = vld [vmem:[%s10355_s0 + $0x60] sm:$0xff] }
 0x279   :  { %v1118_v45 = vrot.slane %v917_v29, %v6793_v13  ;;  %v1123_v49 = vrot.slane %v920_v19, %v6782_v17 }
 0x27b   :  { %v1119_v3 = vsel %vm233_vm8, %v1118_v45, %v1114_v28  ;;  %v6211_v45 = vld [vmem:[%s10355_s0 + $0x18] sm:$0x3] }
 0x27c   :  { %v923_v38 = vpop.xlane.xlu1 %922  ;;  %v926_v5 = vpop.xlane.xlu0 %925  ;;  %v1184_v43 = vsel %vm410_vm6, %v1119_v3, %v1183_v30  ;;  %v1218_v28 = vsel %vm1198_vm1, %v6211_v45, -inf  ;;  %v6217_v3 = vld [vmem:[%s10355_s0 + $0x48] sm:$0x3]  ;;  %v6219_v30 = vld [vmem:[%s10355_s0 + $0x58] sm:$0x3]  ;;  %v7349_v45 = vld [vmem:[%s10355_s0 + $0xe0] sm:$0xff] }
 0x27d   :  { %v1127_v24 = vrot.slane %v923_v38, %v6793_v13  ;;  %v1132_v6 = vrot.slane %v926_v5, %v6782_v17 }
 0x27f   :  { %v1128_v4 = vsel %vm233_vm8, %v1127_v24, %v1123_v49  ;;  %v7228_v24 = vld [vmem:[%s10355_s0 + $0x30] sm:$0xff] }
 0x280   :  { %v929_v39 = vpop.xlane.xlu1 %928  ;;  %v932_v41 = vpop.xlane.xlu0 %931  ;;  %v1185_v52 = vsel %vm412_vm7, %v1128_v4, %v1184_v43  ;;  %v1227_v49 = vsel %vm1208_vm2, %v7228_v24, -inf  ;;  %v1245_v4 = vsel %vm1208_vm2, %v7261_v33, -inf }
 0x281   :  { %v1136_v27 = vrot.slane %v929_v39, %v6793_v13  ;;  %v1141_v57 = vrot.slane %v932_v41, %v6782_v17  ;;  %v6209_v39 = vld [vmem:[%s10355_s0 + $0x8] sm:$0x3] }
 0x282   :  { %v1212_v41 = vsel %vm1198_vm1, %v6209_v39, -inf }
 0x283   :  { %v1137_v31 = vsel %vm233_vm8, %v1136_v27, %v1132_v6  ;;  %v1224_v27 = vsel %vm1198_vm1, %v6213_v18, -inf  ;;  %v7239_v6 = vld [vmem:[%s10355_s0 + $0x40] sm:$0xff] }
 0x284   :  { %v935_v62 = vpop.xlane.xlu1 %934  ;;  %v938_v22 = vpop.xlane.xlu0 %937  ;;  %v1186_v48 = vsel %vm414_vm9, %v1137_v31, %v1185_v52  ;;  %v1233_v34 = vsel %vm1208_vm2, %v7239_v6, -inf  ;;  %v1242_v31 = vsel %vm1198_vm1, %v6219_v30, -inf  ;;  %v7382_v30 = vld [vmem:[%s10355_s0 + $0x110] sm:$0xff] }
 0x285   :  { %v1145_v63 = vrot.slane %v935_v62, %v6793_v13  ;;  %v1150_v47 = vrot.slane %v938_v22, %v6782_v17  ;;  %v6215_v62 = vld [vmem:[%s10355_s0 + $0x38] sm:$0x3]  ;;  %v7250_v22 = vld [vmem:[%s10355_s0 + $0x50] sm:$0xff] }
 0x286   :  { %v1239_v23 = vsel %vm1208_vm2, %v7250_v22, -inf }
 0x287   :  { %v1146_v56 = vsel %vm233_vm8, %v1145_v63, %v1141_v57  ;;  %v1230_v57 = vsel %vm1198_vm1, %v6215_v62, -inf  ;;  %v1236_v63 = vsel %vm1198_vm1, %v6217_v3, -inf  ;;  %v6237_v62 = vld [vmem:[%s10355_s0 + $0xe8] sm:$0x3] }
 0x288   :  { %v941_v42 = vpop.xlane.xlu1 %940  ;;  %v944_v46 = vpop.xlane.xlu0 %943  ;;  %v1187_v50 = vsel %vm10408_vm10, %v1146_v56, %v1186_v48  ;;  %v6221_v56 = vld [vmem:[%s10355_s0 + $0x68] sm:$0x3] }
 0x289   :  { %v1154_v60 = vrot.slane %v941_v42, %v6793_v13  ;;  %v1159_v32 = vrot.slane %v944_v46, %v6782_v17  ;;  %v1248_v42 = vsel %vm1198_vm1, %v6221_v56, -inf  ;;  %v7283_v46 = vld [vmem:[%s10355_s0 + $0x80] sm:$0xff] }
 0x28a   :  { %v1257_v52 = vsel %vm1208_vm2, %v7283_v46, -inf }
 0x28b   :  { %v1155_v25 = vsel %vm233_vm8, %v1154_v60, %v1150_v47  ;;  %v7272_v47 = vld [vmem:[%s10355_s0 + $0x70] sm:$0xff]  ;;  %v6223_v60 = vld [vmem:[%s10355_s0 + $0x78] sm:$0x3] }
 0x28c   :  { %v947_v14 = vpop.xlane.xlu1 %946  ;;  %v1188_v44 = vsel %vm10405_vm11, %v1155_v25, %v1187_v50  ;;  %v950_v40 = vpop.xlane.xlu0 %949  ;;  %v1251_v43 = vsel %vm1208_vm2, %v7272_v47, -inf  ;;  %v1254_v48 = vsel %vm1198_vm1, %v6223_v60, -inf  ;;  %v7294_v25 = vld [vmem:[%s10355_s0 + $0x90] sm:$0xff]  ;;  %v6243_v60 = vld [vmem:[%s10355_s0 + $0x118] sm:$0x3] }
 0x28d   :  { %v1202_v51 = vsel %vm1194_vm15, %v1188_v44, -inf  ;;  %v1163_v36 = vrot.slane %v947_v14, %v6793_v13  ;;  %v1168_v55 = vrot.slane %v950_v40, %v6782_v17  ;;  %v1263_v50 = vsel %vm1208_vm2, %v7294_v25, -inf  ;;  %v6225_v14 = vld [vmem:[%s10355_s0 + $0x88] sm:$0x3]  ;;  %v7305_v40 = vld [vmem:[%s10355_s0 + $0xa0] sm:$0xff] }
 0x28e   :  { %1203 = vmax.xlane.f32.xlu0 %v1202_v51  ;;  %v1260_v44 = vsel %vm1198_vm1, %v6225_v14, -inf  ;;  %v1269_v51 = vsel %vm1208_vm2, %v7305_v40, -inf }
 0x28f   :  { %v1164_v38 = vsel %vm233_vm8, %v1163_v36, %v1159_v32  ;;  %v6227_v36 = vld [vmem:[%s10355_s0 + $0x98] sm:$0x3] }
 0x290   :  { %v953_v29 = vpop.xlane.xlu1 %952  ;;  %v1266_v32 = vsel %vm1198_vm1, %v6227_v36, -inf  ;;  %v6246_v36 = vld [vmem:[%s10355_s0 + $0x138] sm:$0x3] }
 0x291   :  { %v1172_v19 = vrot.slane %v953_v29, %v6793_v13  ;;  %v6229_v29 = vld [vmem:[%s10355_s0 + $0xa8] sm:$0x3] }
 0x292   :  { %1210 = vmax.xlane.f32.xlu0 %v1209_v9 }
 0x293   :  { %v1173_v5 = vsel %vm233_vm8, %v1172_v19, %v1168_v55  ;;  %v7316_v55 = vld [vmem:[%s10355_s0 + $0xb0] sm:$0xff]  ;;  %v1272_v19 = vsel %vm1198_vm1, %v6229_v29, -inf }
 0x294   :  { %v1189_v37 = vsel %vm406_vm4, %v1173_v5, %v1164_v38  ;;  %v1275_v9 = vsel %vm1208_vm2, %v7316_v55, -inf  ;;  %v7327_v38 = vld [vmem:[%s10355_s0 + $0xc0] sm:$0xff] }
 0x295   :  { %v1205_v35 = vsel %vm1198_vm1, %v1189_v37, -inf  ;;  %v1281_v5 = vsel %vm1208_vm2, %v7327_v38, -inf }
 0x296   :  { %1206 = vmax.xlane.f32.xlu1 %v1205_v35  ;;  %1216 = vmax.xlane.f32.xlu0 %v1215_v11  ;;  %v6231_v11 = vld [vmem:[%s10355_s0 + $0xb8] sm:$0x3]  ;;  %v7338_v35 = vld [vmem:[%s10355_s0 + $0xd0] sm:$0xff] }
 0x297   :  { %v1278_v37 = vsel %vm1198_vm1, %v6231_v11, -inf  ;;  %v1287_v39 = vsel %vm1208_vm2, %v7338_v35, -inf }
 0x29a   :  { %1213 = vmax.xlane.f32.xlu1 %v1212_v41  ;;  %1222 = vmax.xlane.f32.xlu0 %v1221_v26  ;;  %v6233_v41 = vld [vmem:[%s10355_s0 + $0xc8] sm:$0x3] }
 0x29b   :  { %v1284_v26 = vsel %vm1198_vm1, %v6233_v41, -inf }
 0x29e   :  { %1219 = vmax.xlane.f32.xlu1 %v1218_v28  ;;  %1228 = vmax.xlane.f32.xlu0 %v1227_v49  ;;  %v1293_v28 = vsel %vm1208_vm2, %v7349_v45, -inf  ;;  %v6235_v49 = vld [vmem:[%s10355_s0 + $0xd8] sm:$0x3] }
 0x29f   :  { %v1290_v18 = vsel %vm1198_vm1, %v6235_v49, -inf }
 0x2a2   :  { %1225 = vmax.xlane.f32.xlu1 %v1224_v27  ;;  %1234 = vmax.xlane.f32.xlu0 %v1233_v34  ;;  %v7360_v27 = vld [vmem:[%s10355_s0 + $0xf0] sm:$0xff] }
 0x2a3   :  { %v1299_v34 = vsel %vm1208_vm2, %v7360_v27, -inf }
 0x2a6   :  { %1231 = vmax.xlane.f32.xlu1 %v1230_v57  ;;  %1240 = vmax.xlane.f32.xlu0 %v1239_v23  ;;  %v1296_v57 = vsel %vm1198_vm1, %v6237_v62, -inf  ;;  %v7371_v23 = vld [vmem:[%s10355_s0 + $0x100] sm:$0xff] }
 0x2a7   :  { %v1305_v3 = vsel %vm1208_vm2, %v7371_v23, -inf }
 0x2aa   :  { %1237 = vmax.xlane.f32.xlu1 %v1236_v63  ;;  %1246 = vmax.xlane.f32.xlu0 %v1245_v4  ;;  %v6239_v63 = vld [vmem:[%s10355_s0 + $0xf8] sm:$0x3] }
 0x2ab   :  { %v1302_v4 = vsel %vm1198_vm1, %v6239_v63, -inf }
 0x2ae   :  { %1243 = vmax.xlane.f32.xlu1 %v1242_v31  ;;  %1252 = vmax.xlane.f32.xlu0 %v1251_v43  ;;  %v1311_v31 = vsel %vm1208_vm2, %v7382_v30, -inf  ;;  %v6241_v43 = vld [vmem:[%s10355_s0 + $0x108] sm:$0x3] }
 0x2af   :  { %v1308_v56 = vsel %vm1198_vm1, %v6241_v43, -inf }
 0x2b2   :  { %1249 = vmax.xlane.f32.xlu1 %v1248_v42  ;;  %1258 = vmax.xlane.f32.xlu0 %v1257_v52  ;;  %v7393_v42 = vld [vmem:[%s10355_s0 + $0x120] sm:$0xff] }
 0x2b3   :  { %v1317_v52 = vsel %vm1208_vm2, %v7393_v42, -inf }
 0x2b6   :  { %1255 = vmax.xlane.f32.xlu1 %v1254_v48  ;;  %1264 = vmax.xlane.f32.xlu0 %v1263_v50  ;;  %v1314_v48 = vsel %vm1198_vm1, %v6243_v60, -inf  ;;  %v7404_v50 = vld [vmem:[%s10355_s0 + $0x130] sm:$0xff] }
 0x2b7   :  { %v1323_v14 = vsel %vm1208_vm2, %v7404_v50, -inf  ;;  %vm2355_vm2 = vcmask 20482  }
 0x2ba   :  { %1261 = vmax.xlane.f32.xlu1 %v1260_v44  ;;  %1270 = vmax.xlane.f32.xlu0 %v1269_v51  ;;  %v6245_v44 = vld [vmem:[%s10355_s0 + $0x128] sm:$0x3] }
 0x2bb   :  { %v1320_v51 = vsel %vm1198_vm1, %v6245_v44, -inf }
 0x2be   :  { %1267 = vmax.xlane.f32.xlu1 %v1266_v32  ;;  %1276 = vmax.xlane.f32.xlu0 %v1275_v9  ;;  %v1326_v32 = vsel %vm1198_vm1, %v6246_v36, -inf }
 0x2c2   :  { %1273 = vmax.xlane.f32.xlu1 %v1272_v19  ;;  %1282 = vmax.xlane.f32.xlu0 %v1281_v5 }
 0x2c6   :  { %1279 = vmax.xlane.f32.xlu1 %v1278_v37  ;;  %1288 = vmax.xlane.f32.xlu0 %v1287_v39 }
 0x2ca   :  { %1285 = vmax.xlane.f32.xlu1 %v1284_v26  ;;  %1294 = vmax.xlane.f32.xlu0 %v1293_v28 }
 0x2ce   :  { %1291 = vmax.xlane.f32.xlu1 %v1290_v18  ;;  %1300 = vmax.xlane.f32.xlu0 %v1299_v34 }
 0x2d2   :  { %1297 = vmax.xlane.f32.xlu1 %v1296_v57  ;;  %1306 = vmax.xlane.f32.xlu0 %v1305_v3 }
 0x2d6   :  { %1303 = vmax.xlane.f32.xlu1 %v1302_v4  ;;  %1312 = vmax.xlane.f32.xlu0 %v1311_v31 }
 0x2da   :  { %1309 = vmax.xlane.f32.xlu1 %v1308_v56  ;;  %1318 = vmax.xlane.f32.xlu0 %v1317_v52 }
 0x2de   :  { %1315 = vmax.xlane.f32.xlu1 %v1314_v48  ;;  %1324 = vmax.xlane.f32.xlu0 %v1323_v14 }
 0x2e2   :  { %1321 = vmax.xlane.f32.xlu1 %v1320_v51 }
 0x2e6   :  { %1327 = vmax.xlane.f32.xlu1 %v1326_v32 }
 0x2ef   :  { %v7416_v9 = vpop.xlane.xlu0 %1196 }
 0x2f0   :  { %10478 = vst [vmem:[#allocation27_spill] sm:$0xff] %v7416_v9  ;;  %v8707_v9 = vld [vmem:[%s10355_s0 + $0x118] sm:$0x3] }
 0x2f7   :  { %v7420_v19 = vpop.xlane.xlu1 %1200 }
 0x2f8   :  { %10480 = vst [vmem:[#allocation34_spill] sm:$0xff] %v7420_v19 }
 0x317   :  { %v7418_v29 = vpop.xlane.xlu0 %1203 }
 0x318   :  { %10479 = vst [vmem:[#allocation30_spill] sm:$0xff] %v7418_v29 }
 0x31b   :  { %v1211_v5 = vpop.xlane.xlu0 %1210 }
 0x31c   :  { %v1372_v48 = vrot.slane %v1211_v5, %v6782_v17 }
 0x31f   :  { %v7422_v11 = vpop.xlane.xlu1 %1206  ;;  %v1217_v37 = vpop.xlane.xlu0 %1216 }
 0x320   :  { %v1381_v4 = vrot.slane %v1217_v37, %v6782_v17 }
 0x323   :  { %v1214_v39 = vpop.xlane.xlu1 %1213  ;;  %v1223_v41 = vpop.xlane.xlu0 %1222 }
 0x324   :  { %v1390_v43 = vrot.slane %v1223_v41, %v6782_v17  ;;  %v1376_v60 = vrot.slane %v1214_v39, %v6793_v13 }
 0x327   :  { %v1220_v26 = vpop.xlane.xlu1 %1219  ;;  %v1229_v28 = vpop.xlane.xlu0 %1228 }
 0x328   :  { %v1385_v63 = vrot.slane %v1220_v26, %v6793_v13  ;;  %v1399_v44 = vrot.slane %v1229_v28, %v6782_v17 }
 0x32a   :  { %v1386_v32 = vsel %vm233_vm8, %v1385_v63, %v1381_v4 }
 0x32b   :  { %v1226_v49 = vpop.xlane.xlu1 %1225  ;;  %v1235_v18 = vpop.xlane.xlu0 %1234 }
 0x32c   :  { %v1394_v31 = vrot.slane %v1226_v49, %v6793_v13  ;;  %v1408_v36 = vrot.slane %v1235_v18, %v6782_v17 }
 0x32e   :  { %v1395_v26 = vsel %vm233_vm8, %v1394_v31, %v1390_v43 }
 0x32f   :  { %v1232_v34 = vpop.xlane.xlu1 %1231  ;;  %v1241_v62 = vpop.xlane.xlu0 %1240 }
 0x330   :  { %v1403_v14 = vrot.slane %v1232_v34, %v6793_v13  ;;  %v1417_v41 = vrot.slane %v1241_v62, %v6782_v17  ;;  %v1377_v34 = vsel %vm233_vm8, %v1376_v60, %v1372_v48 }
 0x331   :  { %v1549_v18 = vsel %vm406_vm4, %v1386_v32, %v1377_v34 }
 0x332   :  { %v1404_v28 = vsel %vm233_vm8, %v1403_v14, %v1399_v44  ;;  %v1550_v4 = vsel %vm408_vm5, %v1395_v26, %v1549_v18 }
 0x333   :  { %v1238_v57 = vpop.xlane.xlu1 %1237  ;;  %v1247_v3 = vpop.xlane.xlu0 %1246  ;;  %v1551_v43 = vsel %vm410_vm6, %v1404_v28, %v1550_v4 }
 0x334   :  { %v1412_v51 = vrot.slane %v1238_v57, %v6793_v13  ;;  %v1426_v39 = vrot.slane %v1247_v3, %v6782_v17 }
 0x336   :  { %v1413_v63 = vsel %vm233_vm8, %v1412_v51, %v1408_v36 }
 0x337   :  { %v1244_v56 = vpop.xlane.xlu1 %1243  ;;  %v1253_v52 = vpop.xlane.xlu0 %1252  ;;  %v1552_v48 = vsel %vm412_vm7, %v1413_v63, %v1551_v43 }
 0x338   :  { %v1421_v37 = vrot.slane %v1244_v56, %v6793_v13  ;;  %v1435_v31 = vrot.slane %v1253_v52, %v6782_v17 }
 0x33a   :  { %v1422_v62 = vsel %vm233_vm8, %v1421_v37, %v1417_v41 }
 0x33b   :  { %v1250_v49 = vpop.xlane.xlu1 %1249  ;;  %v1259_v5 = vpop.xlane.xlu0 %1258  ;;  %v1553_v44 = vsel %vm414_vm9, %v1422_v62, %v1552_v48 }
 0x33c   :  { %v1430_v57 = vrot.slane %v1250_v49, %v6793_v13  ;;  %v1444_v49 = vrot.slane %v1259_v5, %v6782_v17 }
 0x33e   :  { %v1431_v3 = vsel %vm233_vm8, %v1430_v57, %v1426_v39 }
 0x33f   :  { %v1256_v56 = vpop.xlane.xlu1 %1255  ;;  %v1265_v60 = vpop.xlane.xlu0 %1264  ;;  %v1554_v36 = vsel %vm10408_vm10, %v1431_v3, %v1553_v44 }
 0x340   :  { %v1439_v14 = vrot.slane %v1256_v56, %v6793_v13  ;;  %v1453_v39 = vrot.slane %v1265_v60, %v6782_v17 }
 0x342   :  { %v1440_v51 = vsel %vm233_vm8, %v1439_v14, %v1435_v31 }
 0x343   :  { %v1262_v32 = vpop.xlane.xlu1 %1261  ;;  %v1555_v37 = vsel %vm10405_vm11, %v1440_v51, %v1554_v36  ;;  %v1271_v52 = vpop.xlane.xlu0 %1270 }
 0x344   :  { %v1569_v41 = vsel %vm1194_vm15, %v1555_v37, -inf  ;;  %v1448_v26 = vrot.slane %v1262_v32, %v6793_v13 }
 0x345   :  { %1570 = vmax.xlane.f32.xlu0 %v1569_v41 }
 0x346   :  { %v1449_v18 = vsel %vm233_vm8, %v1448_v26, %v1444_v49 }
 0x347   :  { %v1268_v34 = vpop.xlane.xlu1 %1267  ;;  %v1277_v28 = vpop.xlane.xlu0 %1276 }
 0x348   :  { %v1457_v57 = vrot.slane %v1268_v34, %v6793_v13  ;;  %v1471_v32 = vrot.slane %v1277_v28, %v6782_v17  ;;  %v1462_v34 = vrot.slane %v1271_v52, %v6782_v17 }
 0x34a   :  { %v1458_v63 = vsel %vm233_vm8, %v1457_v57, %v1453_v39 }
 0x34b   :  { %v1274_v4 = vpop.xlane.xlu1 %1273  ;;  %v1556_v62 = vsel %vm406_vm4, %v1458_v63, %v1449_v18  ;;  %v1283_v31 = vpop.xlane.xlu0 %1282 }
 0x34c   :  { %v1572_v43 = vsel %vm1198_vm1, %v1556_v62, -inf  ;;  %v1480_v41 = vrot.slane %v1283_v31, %v6782_v17  ;;  %v1466_v39 = vrot.slane %v1274_v4, %v6793_v13 }
 0x34d   :  { %1573 = vmax.xlane.f32.xlu1 %v1572_v43 }
 0x34e   :  { %v1467_v52 = vsel %vm233_vm8, %v1466_v39, %v1462_v34 }
 0x34f   :  { %v1280_v3 = vpop.xlane.xlu1 %1279  ;;  %v1289_v56 = vpop.xlane.xlu0 %1288 }
 0x350   :  { %v1475_v36 = vrot.slane %v1280_v3, %v6793_v13  ;;  %v1489_v18 = vrot.slane %v1289_v56, %v6782_v17 }
 0x352   :  { %v1476_v28 = vsel %vm233_vm8, %v1475_v36, %v1471_v32 }
 0x353   :  { %v1286_v5 = vpop.xlane.xlu1 %1285  ;;  %v1295_v48 = vpop.xlane.xlu0 %1294 }
 0x354   :  { %v1484_v37 = vrot.slane %v1286_v5, %v6793_v13  ;;  %v1498_v62 = vrot.slane %v1295_v48, %v6782_v17 }
 0x356   :  { %v1485_v3 = vsel %vm233_vm8, %v1484_v37, %v1480_v41 }
 0x357   :  { %v1292_v60 = vpop.xlane.xlu1 %1291  ;;  %v1301_v14 = vpop.xlane.xlu0 %1300 }
 0x358   :  { %v1493_v57 = vrot.slane %v1292_v60, %v6793_v13  ;;  %v1507_v31 = vrot.slane %v1301_v14, %v6782_v17 }
 0x35a   :  { %v1494_v60 = vsel %vm233_vm8, %v1493_v57, %v1489_v18 }
 0x35b   :  { %v1298_v44 = vpop.xlane.xlu1 %1297  ;;  %v1307_v51 = vpop.xlane.xlu0 %1306 }
 0x35c   :  { %v1502_v63 = vrot.slane %v1298_v44, %v6793_v13  ;;  %v1516_v4 = vrot.slane %v1307_v51, %v6782_v17  ;;  %v1557_v44 = vsel %vm406_vm4, %v1476_v28, %v1467_v52 }
 0x35d   :  { %v1558_v32 = vsel %vm408_vm5, %v1485_v3, %v1557_v44 }
 0x35e   :  { %v1503_v48 = vsel %vm233_vm8, %v1502_v63, %v1498_v62  ;;  %v1559_v41 = vsel %vm410_vm6, %v1494_v60, %v1558_v32 }
 0x35f   :  { %v1304_v26 = vpop.xlane.xlu1 %1303  ;;  %v1313_v49 = vpop.xlane.xlu0 %1312  ;;  %v1560_v39 = vsel %vm412_vm7, %v1503_v48, %v1559_v41  ;;  %v1588_v48 = vsel %vm1581_vm3, %v7217_v61, -inf  ;;  %v1591_v41 = vsel %vm1581_vm3, %v7228_v24, -inf }
 0x360   :  { %v1511_v43 = vrot.slane %v1304_v26, %v6793_v13  ;;  %v1525_v37 = vrot.slane %v1313_v49, %v6782_v17 }
 0x362   :  { %v1512_v14 = vsel %vm233_vm8, %v1511_v43, %v1507_v31 }
 0x363   :  { %v1310_v5 = vpop.xlane.xlu1 %1309  ;;  %v1319_v36 = vpop.xlane.xlu0 %1318  ;;  %v1561_v57 = vsel %vm414_vm9, %v1512_v14, %v1560_v39  ;;  %v1585_v14 = vsel %vm1581_vm3, %v7204_v16, -inf  ;;  %v1606_v39 = vsel %vm1581_vm3, %v7283_v46, -inf }
 0x364   :  { %v1520_v56 = vrot.slane %v1310_v5, %v6793_v13  ;;  %v1534_v3 = vrot.slane %v1319_v36, %v6782_v17 }
 0x366   :  { %v1521_v51 = vsel %vm233_vm8, %v1520_v56, %v1516_v4  ;;  %v1582_v4 = vsel %vm1581_vm3, %v7194_v1, -inf }
 0x367   :  { %v1316_v26 = vpop.xlane.xlu1 %1315  ;;  %v1562_v63 = vsel %vm10408_vm10, %v1521_v51, %v1561_v57  ;;  %v1325_v43 = vpop.xlane.xlu0 %1324  ;;  %v1600_v51 = vsel %vm1581_vm3, %v7261_v33, -inf  ;;  %v1612_v57 = vsel %vm1581_vm3, %v7305_v40, -inf }
 0x368   :  { %v1529_v34 = vrot.slane %v1316_v26, %v6793_v13  ;;  %v1543_v5 = vrot.slane %v1325_v43, %v6782_v17  ;;  %v1597_v26 = vsel %vm1581_vm3, %v7250_v22, -inf  ;;  %v1621_v43 = vsel %vm1581_vm3, %v7338_v35, -inf }
 0x36a   :  { %v1530_v18 = vsel %vm233_vm8, %v1529_v34, %v1525_v37  ;;  %v1594_v37 = vsel %vm1581_vm3, %v7239_v6, -inf  ;;  %v1603_v34 = vsel %vm1581_vm3, %v7272_v47, -inf }
 0x36b   :  { %v1322_v62 = vpop.xlane.xlu1 %1321  ;;  %v1563_v28 = vsel %vm10405_vm11, %v1530_v18, %v1562_v63  ;;  %v1609_v18 = vsel %vm1581_vm3, %v7294_v25, -inf  ;;  %v1618_v63 = vsel %vm1581_vm3, %v7327_v38, -inf }
 0x36c   :  { %v1575_v49 = vsel %vm1194_vm15, %v1563_v28, -inf  ;;  %v1538_v31 = vrot.slane %v1322_v62, %v6793_v13  ;;  %v1615_v62 = vsel %vm1581_vm3, %v7316_v55, -inf  ;;  %v1624_v28 = vsel %vm1581_vm3, %v7349_v45, -inf }
 0x36d   :  { %1576 = vmax.xlane.f32.xlu0 %v1575_v49  ;;  %v1630_v49 = vsel %vm1581_vm3, %v7371_v23, -inf  ;;  %vm1969_vm15 = vcmask 59432  }
 0x36e   :  { %v1539_v56 = vsel %vm233_vm8, %v1538_v31, %v1534_v3  ;;  %v1627_v31 = vsel %vm1581_vm3, %v7360_v27, -inf  ;;  %v1636_v3 = vsel %vm1581_vm3, %v7393_v42, -inf }
 0x36f   :  { %v1328_v52 = vpop.xlane.xlu1 %1327 }
 0x370   :  { %v1547_v60 = vrot.slane %v1328_v52, %v6793_v13 }
 0x371   :  { %1583 = vmax.xlane.f32.xlu0 %v1582_v4  ;;  %v1639_v4 = vsel %vm1581_vm3, %v7404_v50, -inf }
 0x372   :  { %v1548_v44 = vsel %vm233_vm8, %v1547_v60, %v1543_v5  ;;  %v1633_v5 = vsel %vm1581_vm3, %v7382_v30, -inf  ;;  %vm10402_vm3 = vcmask 39952  }
 0x373   :  { %v1564_v32 = vsel %vm406_vm4, %v1548_v44, %v1539_v56 }
 0x374   :  { %v1578_v36 = vsel %vm1198_vm1, %v1564_v32, -inf  ;;  %vm2162_vm1 = vcmask 75832  }
 0x375   :  { %1579 = vmax.xlane.f32.xlu1 %v1578_v36  ;;  %1589 = vmax.xlane.f32.xlu0 %v1588_v48 }
 0x379   :  { %1586 = vmax.xlane.f32.xlu1 %v1585_v14  ;;  %1595 = vmax.xlane.f32.xlu0 %v1594_v37 }
 0x37d   :  { %1592 = vmax.xlane.f32.xlu1 %v1591_v41  ;;  %1601 = vmax.xlane.f32.xlu0 %v1600_v51 }
 0x381   :  { %1598 = vmax.xlane.f32.xlu1 %v1597_v26  ;;  %1607 = vmax.xlane.f32.xlu0 %v1606_v39 }
 0x385   :  { %1604 = vmax.xlane.f32.xlu1 %v1603_v34  ;;  %1613 = vmax.xlane.f32.xlu0 %v1612_v57 }
 0x389   :  { %1610 = vmax.xlane.f32.xlu1 %v1609_v18  ;;  %1619 = vmax.xlane.f32.xlu0 %v1618_v63 }
 0x38d   :  { %1616 = vmax.xlane.f32.xlu1 %v1615_v62  ;;  %1625 = vmax.xlane.f32.xlu0 %v1624_v28 }
 0x391   :  { %1622 = vmax.xlane.f32.xlu1 %v1621_v43  ;;  %1631 = vmax.xlane.f32.xlu0 %v1630_v49 }
 0x395   :  { %1628 = vmax.xlane.f32.xlu1 %v1627_v31  ;;  %1637 = vmax.xlane.f32.xlu0 %v1636_v3 }
 0x399   :  { %1634 = vmax.xlane.f32.xlu1 %v1633_v5 }
 0x39d   :  { %1640 = vmax.xlane.f32.xlu1 %v1639_v4 }
 0x3ce   :  { %v7544_v52 = vpop.xlane.xlu0 %1570 }
 0x3cf   :  { %10481 = vst [vmem:[#allocation3_spill] sm:$0xff] %v7544_v52 }
 0x3d6   :  { %v7548_v56 = vpop.xlane.xlu1 %1573 }
 0x3d7   :  { %10483 = vst [vmem:[#allocation2_spill] sm:$0xff] %v7548_v56 }
 0x3f6   :  { %v7546_v60 = vpop.xlane.xlu0 %1576 }
 0x3f7   :  { %10482 = vst [vmem:[#allocation5_spill] sm:$0xff] %v7546_v60  ;;  %v4009_v60 = vsel %vm1766_vm13, %v8707_v9, -inf }
 0x3fa   :  { %v1584_v44 = vpop.xlane.xlu0 %1583 }
 0x3fb   :  { %v1665_v36 = vrot.slane %v1584_v44, %v6782_v17 }
 0x3fe   :  { %v7550_v48 = vpop.xlane.xlu1 %1579  ;;  %v1590_v32 = vpop.xlane.xlu0 %1589 }
 0x3ff   :  { %10484 = vst [vmem:[#allocation4_spill] sm:$0xff] %v7550_v48  ;;  %v1673_v51 = vrot.slane %v1590_v32, %v6782_v17  ;;  %v8748_v48 = vld [vmem:[%s10355_s0 + $0x138] sm:$0x3] }
 0x402   :  { %v1587_v14 = vpop.xlane.xlu1 %1586  ;;  %v1596_v37 = vpop.xlane.xlu0 %1595 }
 0x403   :  { %v1669_v41 = vrot.slane %v1587_v14, %v6782_v17  ;;  %v1681_v63 = vrot.slane %v1596_v37, %v6782_v17 }
 0x405   :  { %v1742_v26 = vsel %vm406_vm4, %v1669_v41, %v1665_v36 }
 0x406   :  { %v1593_v39 = vpop.xlane.xlu1 %1592  ;;  %v1602_v34 = vpop.xlane.xlu0 %1601  ;;  %v1743_v18 = vsel %vm408_vm5, %v1673_v51, %v1742_v26 }
 0x407   :  { %v1677_v57 = vrot.slane %v1593_v39, %v6782_v17  ;;  %v1689_v3 = vrot.slane %v1602_v34, %v6782_v17 }
 0x409   :  { %v1744_v62 = vsel %vm410_vm6, %v1677_v57, %v1743_v18 }
 0x40a   :  { %v1599_v28 = vpop.xlane.xlu1 %1598  ;;  %v1608_v43 = vpop.xlane.xlu0 %1607  ;;  %v1745_v31 = vsel %vm412_vm7, %v1681_v63, %v1744_v62 }
 0x40b   :  { %v1685_v49 = vrot.slane %v1599_v28, %v6782_v17  ;;  %v1697_v14 = vrot.slane %v1608_v43, %v6782_v17 }
 0x40d   :  { %v1746_v5 = vsel %vm414_vm9, %v1685_v49, %v1745_v31 }
 0x40e   :  { %v1605_v4 = vpop.xlane.xlu1 %1604  ;;  %v1614_v44 = vpop.xlane.xlu0 %1613  ;;  %v1747_v36 = vsel %vm10408_vm10, %v1689_v3, %v1746_v5 }
 0x40f   :  { %v1693_v32 = vrot.slane %v1605_v4, %v6782_v17  ;;  %v1705_v34 = vrot.slane %v1614_v44, %v6782_v17 }
 0x411   :  { %v1748_v37 = vsel %vm10405_vm11, %v1693_v32, %v1747_v36 }
 0x412   :  { %v1611_v41 = vpop.xlane.xlu1 %1610  ;;  %v1763_v51 = vsel %vm1762_vm12, %v1748_v37, -inf  ;;  %v1620_v26 = vpop.xlane.xlu0 %1619 }
 0x413   :  { %v1701_v39 = vrot.slane %v1611_v41, %v6782_v17  ;;  %1764 = vmax.xlane.f32.xlu0 %v1763_v51  ;;  %v1713_v43 = vrot.slane %v1620_v26, %v6782_v17 }
 0x415   :  { %v1749_v57 = vsel %vm406_vm4, %v1701_v39, %v1697_v14 }
 0x416   :  { %v1617_v18 = vpop.xlane.xlu1 %1616  ;;  %v1767_v63 = vsel %vm1766_vm13, %v1749_v57, -inf  ;;  %v1626_v28 = vpop.xlane.xlu0 %1625 }
 0x417   :  { %v1709_v62 = vrot.slane %v1617_v18, %v6782_v17  ;;  %1768 = vmax.xlane.f32.xlu1 %v1767_v63  ;;  %v1721_v4 = vrot.slane %v1626_v28, %v6782_v17 }
 0x419   :  { %v1750_v49 = vsel %vm406_vm4, %v1709_v62, %v1705_v34 }
 0x41a   :  { %v1623_v31 = vpop.xlane.xlu1 %1622  ;;  %v1751_v5 = vsel %vm408_vm5, %v1713_v43, %v1750_v49  ;;  %v1632_v32 = vpop.xlane.xlu0 %1631  ;;  %v1777_v49 = vsel %vm1776_vm14, %v7194_v1, -inf }
 0x41b   :  { %v1717_v3 = vrot.slane %v1623_v31, %v6782_v17  ;;  %v1729_v41 = vrot.slane %v1632_v32, %v6782_v17  ;;  %v1789_v32 = vsel %vm1776_vm14, %v7239_v6, -inf }
 0x41d   :  { %v1752_v44 = vsel %vm410_vm6, %v1717_v3, %v1751_v5  ;;  %v1780_v5 = vsel %vm1776_vm14, %v7204_v16, -inf }
 0x41e   :  { %v1629_v36 = vpop.xlane.xlu1 %1628  ;;  %v1753_v37 = vsel %vm412_vm7, %v1721_v4, %v1752_v44  ;;  %v1638_v39 = vpop.xlane.xlu0 %1637  ;;  %v1783_v4 = vsel %vm1776_vm14, %v7217_v61, -inf  ;;  %v1786_v44 = vsel %vm1776_vm14, %v7228_v24, -inf }
 0x41f   :  { %v1725_v14 = vrot.slane %v1629_v36, %v6782_v17  ;;  %v1737_v18 = vrot.slane %v1638_v39, %v6782_v17  ;;  %v1792_v36 = vsel %vm1776_vm14, %v7250_v22, -inf  ;;  %v1810_v39 = vsel %vm1776_vm14, %v7316_v55, -inf }
 0x421   :  { %v1754_v51 = vsel %vm414_vm9, %v1725_v14, %v1753_v37  ;;  %v1795_v14 = vsel %vm1776_vm14, %v7261_v33, -inf  ;;  %v1798_v37 = vsel %vm1776_vm14, %v7272_v47, -inf }
 0x422   :  { %v1635_v26 = vpop.xlane.xlu1 %1634  ;;  %v1755_v57 = vsel %vm10408_vm10, %v1729_v41, %v1754_v51  ;;  %v1801_v41 = vsel %vm1776_vm14, %v7283_v46, -inf  ;;  %v1804_v51 = vsel %vm1776_vm14, %v7294_v25, -inf }
 0x423   :  { %v1733_v34 = vrot.slane %v1635_v26, %v6782_v17  ;;  %v1807_v26 = vsel %vm1776_vm14, %v7305_v40, -inf }
 0x425   :  { %v1756_v63 = vsel %vm10405_vm11, %v1733_v34, %v1755_v57  ;;  %v1813_v34 = vsel %vm1776_vm14, %v7327_v38, -inf  ;;  %v1816_v57 = vsel %vm1776_vm14, %v7338_v35, -inf }
 0x426   :  { %v1641_v62 = vpop.xlane.xlu1 %1640  ;;  %v1770_v28 = vsel %vm1762_vm12, %v1756_v63, -inf  ;;  %v1822_v63 = vsel %vm1776_vm14, %v7360_v27, -inf }
 0x427   :  { %v1741_v43 = vrot.slane %v1641_v62, %v6782_v17  ;;  %1771 = vmax.xlane.f32.xlu0 %v1770_v28  ;;  %v1825_v62 = vsel %vm1776_vm14, %v7371_v23, -inf  ;;  %v1828_v28 = vsel %vm1776_vm14, %v7382_v30, -inf }
 0x429   :  { %v1757_v31 = vsel %vm406_vm4, %v1741_v43, %v1737_v18  ;;  %v1819_v18 = vsel %vm1776_vm14, %v7349_v45, -inf  ;;  %v1831_v43 = vsel %vm1776_vm14, %v7393_v42, -inf }
 0x42a   :  { %v1773_v3 = vsel %vm1766_vm13, %v1757_v31, -inf }
 0x42b   :  { %1774 = vmax.xlane.f32.xlu1 %v1773_v3  ;;  %1778 = vmax.xlane.f32.xlu0 %v1777_v49  ;;  %v1834_v49 = vsel %vm1776_vm14, %v7404_v50, -inf  ;;  %vm2550_vm14 = vcmask 36882  }
 0x42f   :  { %1781 = vmax.xlane.f32.xlu1 %v1780_v5  ;;  %1784 = vmax.xlane.f32.xlu0 %v1783_v4 }
 0x433   :  { %1787 = vmax.xlane.f32.xlu1 %v1786_v44  ;;  %1790 = vmax.xlane.f32.xlu0 %v1789_v32 }
 0x437   :  { %1793 = vmax.xlane.f32.xlu1 %v1792_v36  ;;  %1796 = vmax.xlane.f32.xlu0 %v1795_v14 }
 0x43b   :  { %1799 = vmax.xlane.f32.xlu1 %v1798_v37  ;;  %1802 = vmax.xlane.f32.xlu0 %v1801_v41 }
 0x43f   :  { %1805 = vmax.xlane.f32.xlu1 %v1804_v51  ;;  %1808 = vmax.xlane.f32.xlu0 %v1807_v26 }
 0x443   :  { %1811 = vmax.xlane.f32.xlu1 %v1810_v39  ;;  %1814 = vmax.xlane.f32.xlu0 %v1813_v34 }
 0x447   :  { %1817 = vmax.xlane.f32.xlu1 %v1816_v57  ;;  %1820 = vmax.xlane.f32.xlu0 %v1819_v18 }
 0x44b   :  { %1823 = vmax.xlane.f32.xlu1 %v1822_v63  ;;  %1826 = vmax.xlane.f32.xlu0 %v1825_v62 }
 0x44f   :  { %1829 = vmax.xlane.f32.xlu1 %v1828_v28  ;;  %1832 = vmax.xlane.f32.xlu0 %v1831_v43 }
 0x453   :  { %1835 = vmax.xlane.f32.xlu1 %v1834_v49 }
 0x49c   :  { %v7632_v31 = vpop.xlane.xlu0 %1764 }
 0x49d   :  { %10485 = vst [vmem:[#allocation7_spill] sm:$0xff] %v7632_v31 }
 0x4a0   :  { %v7634_v3 = vpop.xlane.xlu1 %1768 }
 0x4a1   :  { %10486 = vst [vmem:[#allocation6_spill] sm:$0xff] %v7634_v3 }
 0x4b0   :  { %v7636_v5 = vpop.xlane.xlu0 %1771 }
 0x4b1   :  { %10487 = vst [vmem:[#allocation9_spill] sm:$0xff] %v7636_v5 }
 0x4b4   :  { %v7638_v4 = vpop.xlane.xlu1 %1774  ;;  %v1779_v44 = vpop.xlane.xlu0 %1778 }
 0x4b5   :  { %10488 = vst [vmem:[#allocation8_spill] sm:$0xff] %v7638_v4  ;;  %v1860_v32 = vrot.slane %v1779_v44, %v6782_v17 }
 0x4b8   :  { %v1782_v36 = vpop.xlane.xlu1 %1781  ;;  %v1785_v14 = vpop.xlane.xlu0 %1784 }
 0x4b9   :  { %v1864_v37 = vrot.slane %v1782_v36, %v6782_v17  ;;  %v1868_v41 = vrot.slane %v1785_v14, %v6782_v17 }
 0x4bb   :  { %v1937_v51 = vsel %vm406_vm4, %v1864_v37, %v1860_v32 }
 0x4bc   :  { %v1788_v26 = vpop.xlane.xlu1 %1787  ;;  %v1791_v39 = vpop.xlane.xlu0 %1790  ;;  %v1938_v57 = vsel %vm408_vm5, %v1868_v41, %v1937_v51 }
 0x4bd   :  { %v1872_v34 = vrot.slane %v1788_v26, %v6782_v17  ;;  %v1876_v18 = vrot.slane %v1791_v39, %v6782_v17 }
 0x4bf   :  { %v1939_v63 = vsel %vm410_vm6, %v1872_v34, %v1938_v57 }
 0x4c0   :  { %v1794_v62 = vpop.xlane.xlu1 %1793  ;;  %v1797_v28 = vpop.xlane.xlu0 %1796  ;;  %v1940_v49 = vsel %vm412_vm7, %v1876_v18, %v1939_v63 }
 0x4c1   :  { %v1880_v43 = vrot.slane %v1794_v62, %v6782_v17  ;;  %v1884_v44 = vrot.slane %v1797_v28, %v6782_v17 }
 0x4c3   :  { %v1941_v32 = vsel %vm414_vm9, %v1880_v43, %v1940_v49 }
 0x4c4   :  { %v1800_v36 = vpop.xlane.xlu1 %1799  ;;  %v1803_v14 = vpop.xlane.xlu0 %1802  ;;  %v1942_v41 = vsel %vm10408_vm10, %v1884_v44, %v1941_v32 }
 0x4c5   :  { %v1888_v37 = vrot.slane %v1800_v36, %v6782_v17  ;;  %v1892_v51 = vrot.slane %v1803_v14, %v6782_v17 }
 0x4c7   :  { %v1943_v26 = vsel %vm10405_vm11, %v1888_v37, %v1942_v41 }
 0x4c8   :  { %v1806_v39 = vpop.xlane.xlu1 %1805  ;;  %v1957_v34 = vsel %vm1762_vm12, %v1943_v26, -inf  ;;  %v1809_v57 = vpop.xlane.xlu0 %1808 }
 0x4c9   :  { %v1896_v18 = vrot.slane %v1806_v39, %v6782_v17  ;;  %1958 = vmax.xlane.f32.xlu0 %v1957_v34  ;;  %v1900_v63 = vrot.slane %v1809_v57, %v6782_v17 }
 0x4cb   :  { %v1944_v62 = vsel %vm406_vm4, %v1896_v18, %v1892_v51 }
 0x4cc   :  { %v1812_v28 = vpop.xlane.xlu1 %1811  ;;  %v1960_v43 = vsel %vm1766_vm13, %v1944_v62, -inf  ;;  %v1815_v49 = vpop.xlane.xlu0 %1814 }
 0x4cd   :  { %v1904_v44 = vrot.slane %v1812_v28, %v6782_v17  ;;  %1961 = vmax.xlane.f32.xlu1 %v1960_v43  ;;  %v1908_v32 = vrot.slane %v1815_v49, %v6782_v17 }
 0x4cf   :  { %v1945_v36 = vsel %vm406_vm4, %v1904_v44, %v1900_v63 }
 0x4d0   :  { %v1818_v14 = vpop.xlane.xlu1 %1817  ;;  %v1821_v37 = vpop.xlane.xlu0 %1820  ;;  %v1946_v26 = vsel %vm408_vm5, %v1908_v32, %v1945_v36 }
 0x4d1   :  { %v1912_v41 = vrot.slane %v1818_v14, %v6782_v17  ;;  %v1916_v39 = vrot.slane %v1821_v37, %v6782_v17 }
 0x4d3   :  { %v1947_v51 = vsel %vm410_vm6, %v1912_v41, %v1946_v26 }
 0x4d4   :  { %v1824_v34 = vpop.xlane.xlu1 %1823  ;;  %v1827_v57 = vpop.xlane.xlu0 %1826  ;;  %v1948_v62 = vsel %vm412_vm7, %v1916_v39, %v1947_v51  ;;  %v1970_v39 = vsel %vm1969_vm15, %v7194_v1, -inf  ;;  %v1982_v1 = vsel %vm1969_vm15, %v7239_v6, -inf  ;;  %v2000_v6 = vsel %vm1969_vm15, %v7305_v40, -inf }
 0x4d5   :  { %v1920_v18 = vrot.slane %v1824_v34, %v6782_v17  ;;  %v1924_v28 = vrot.slane %v1827_v57, %v6782_v17  ;;  %v1973_v57 = vsel %vm1969_vm15, %v7204_v16, -inf  ;;  %v1991_v16 = vsel %vm1969_vm15, %v7272_v47, -inf }
 0x4d6   :  { %v2009_v47 = vsel %vm1969_vm15, %v7338_v35, -inf  ;;  %v2018_v40 = vsel %vm1969_vm15, %v7371_v23, -inf  ;;  %v2027_v35 = vsel %vm1969_vm15, %v7404_v50, -inf }
 0x4d7   :  { %v1949_v63 = vsel %vm414_vm9, %v1920_v18, %v1948_v62  ;;  %v1976_v18 = vsel %vm1969_vm15, %v7217_v61, -inf  ;;  %v1979_v62 = vsel %vm1969_vm15, %v7228_v24, -inf  ;;  %v1994_v61 = vsel %vm1969_vm15, %v7283_v46, -inf }
 0x4d8   :  { %v1830_v43 = vpop.xlane.xlu1 %1829  ;;  %v1833_v49 = vpop.xlane.xlu0 %1832  ;;  %v1950_v32 = vsel %vm10408_vm10, %v1924_v28, %v1949_v63  ;;  %v1985_v28 = vsel %vm1969_vm15, %v7250_v22, -inf  ;;  %v1988_v63 = vsel %vm1969_vm15, %v7261_v33, -inf  ;;  %v1997_v24 = vsel %vm1969_vm15, %v7294_v25, -inf }
 0x4d9   :  { %v1928_v44 = vrot.slane %v1830_v43, %v6782_v17  ;;  %v1932_v36 = vrot.slane %v1833_v49, %v6782_v17  ;;  %v2003_v22 = vsel %vm1969_vm15, %v7316_v55, -inf  ;;  %v2006_v33 = vsel %vm1969_vm15, %v7327_v38, -inf }
 0x4da   :  { %v2012_v46 = vsel %vm1969_vm15, %v7349_v45, -inf  ;;  %v2015_v25 = vsel %vm1969_vm15, %v7360_v27, -inf  ;;  %v2021_v55 = vsel %vm1969_vm15, %v7382_v30, -inf  ;;  %v2024_v38 = vsel %vm1969_vm15, %v7393_v42, -inf }
 0x4db   :  { %v1951_v14 = vsel %vm10405_vm11, %v1928_v44, %v1950_v32  ;;  %vm2743_vm15 = vcmask 61482  }
 0x4dc   :  { %v1836_v37 = vpop.xlane.xlu1 %1835  ;;  %v1963_v41 = vsel %vm1762_vm12, %v1951_v14, -inf }
 0x4dd   :  { %v1936_v26 = vrot.slane %v1836_v37, %v6782_v17  ;;  %1964 = vmax.xlane.f32.xlu0 %v1963_v41 }
 0x4df   :  { %v1952_v51 = vsel %vm406_vm4, %v1936_v26, %v1932_v36 }
 0x4e0   :  { %v1966_v34 = vsel %vm1766_vm13, %v1952_v51, -inf }
 0x4e1   :  { %1967 = vmax.xlane.f32.xlu1 %v1966_v34  ;;  %1971 = vmax.xlane.f32.xlu0 %v1970_v39 }
 0x4e5   :  { %1974 = vmax.xlane.f32.xlu1 %v1973_v57  ;;  %1977 = vmax.xlane.f32.xlu0 %v1976_v18 }
 0x4e9   :  { %1980 = vmax.xlane.f32.xlu1 %v1979_v62  ;;  %1983 = vmax.xlane.f32.xlu0 %v1982_v1 }
 0x4ed   :  { %1986 = vmax.xlane.f32.xlu1 %v1985_v28  ;;  %1989 = vmax.xlane.f32.xlu0 %v1988_v63 }
 0x4f1   :  { %1992 = vmax.xlane.f32.xlu1 %v1991_v16  ;;  %1995 = vmax.xlane.f32.xlu0 %v1994_v61 }
 0x4f5   :  { %1998 = vmax.xlane.f32.xlu1 %v1997_v24  ;;  %2001 = vmax.xlane.f32.xlu0 %v2000_v6 }
 0x4f9   :  { %2004 = vmax.xlane.f32.xlu1 %v2003_v22  ;;  %2007 = vmax.xlane.f32.xlu0 %v2006_v33 }
 0x4fd   :  { %2010 = vmax.xlane.f32.xlu1 %v2009_v47  ;;  %2013 = vmax.xlane.f32.xlu0 %v2012_v46 }
 0x501   :  { %2016 = vmax.xlane.f32.xlu1 %v2015_v25  ;;  %2019 = vmax.xlane.f32.xlu0 %v2018_v40 }
 0x505   :  { %2022 = vmax.xlane.f32.xlu1 %v2021_v55  ;;  %2025 = vmax.xlane.f32.xlu0 %v2024_v38 }
 0x509   :  { %2028 = vmax.xlane.f32.xlu1 %v2027_v35 }
 0x552   :  { %v7720_v45 = vpop.xlane.xlu0 %1958 }
 0x553   :  { %10489 = vst [vmem:[#allocation11_spill] sm:$0xff] %v7720_v45 }
 0x556   :  { %v7722_v43 = vpop.xlane.xlu1 %1961 }
 0x557   :  { %10490 = vst [vmem:[#allocation10_spill] sm:$0xff] %v7722_v43 }
 0x566   :  { %v7724_v49 = vpop.xlane.xlu0 %1964 }
 0x567   :  { %10491 = vst [vmem:[#allocation13_spill] sm:$0xff] %v7724_v49 }
 0x56a   :  { %v7726_v44 = vpop.xlane.xlu1 %1967  ;;  %v1972_v32 = vpop.xlane.xlu0 %1971 }
 0x56b   :  { %10492 = vst [vmem:[#allocation12_spill] sm:$0xff] %v7726_v44  ;;  %v2053_v36 = vrot.slane %v1972_v32, %v6782_v17 }
 0x56e   :  { %v1975_v14 = vpop.xlane.xlu1 %1974  ;;  %v1978_v37 = vpop.xlane.xlu0 %1977 }
 0x56f   :  { %v2057_v41 = vrot.slane %v1975_v14, %v6782_v17  ;;  %v2061_v26 = vrot.slane %v1978_v37, %v6782_v17 }
 0x571   :  { %v2130_v39 = vsel %vm406_vm4, %v2057_v41, %v2053_v36 }
 0x572   :  { %v1981_v51 = vpop.xlane.xlu1 %1980  ;;  %v1984_v34 = vpop.xlane.xlu0 %1983  ;;  %v2131_v18 = vsel %vm408_vm5, %v2061_v26, %v2130_v39 }
 0x573   :  { %v2065_v57 = vrot.slane %v1981_v51, %v6782_v17  ;;  %v2069_v62 = vrot.slane %v1984_v34, %v6782_v17 }
 0x575   :  { %v2132_v1 = vsel %vm410_vm6, %v2065_v57, %v2131_v18 }
 0x576   :  { %v1987_v28 = vpop.xlane.xlu1 %1986  ;;  %v1990_v63 = vpop.xlane.xlu0 %1989  ;;  %v2133_v61 = vsel %vm412_vm7, %v2069_v62, %v2132_v1 }
 0x577   :  { %v2073_v16 = vrot.slane %v1987_v28, %v6782_v17  ;;  %v2077_v24 = vrot.slane %v1990_v63, %v6782_v17 }
 0x579   :  { %v2134_v6 = vsel %vm414_vm9, %v2073_v16, %v2133_v61 }
 0x57a   :  { %v1993_v22 = vpop.xlane.xlu1 %1992  ;;  %v1996_v33 = vpop.xlane.xlu0 %1995  ;;  %v2135_v46 = vsel %vm10408_vm10, %v2077_v24, %v2134_v6 }
 0x57b   :  { %v2081_v47 = vrot.slane %v1993_v22, %v6782_v17  ;;  %v2085_v25 = vrot.slane %v1996_v33, %v6782_v17 }
 0x57d   :  { %v2136_v40 = vsel %vm10405_vm11, %v2081_v47, %v2135_v46 }
 0x57e   :  { %v1999_v55 = vpop.xlane.xlu1 %1998  ;;  %v2150_v38 = vsel %vm1762_vm12, %v2136_v40, -inf  ;;  %v2002_v35 = vpop.xlane.xlu0 %2001 }
 0x57f   :  { %v2089_v32 = vrot.slane %v1999_v55, %v6782_v17  ;;  %2151 = vmax.xlane.f32.xlu0 %v2150_v38  ;;  %v2093_v36 = vrot.slane %v2002_v35, %v6782_v17 }
 0x581   :  { %v2137_v14 = vsel %vm406_vm4, %v2089_v32, %v2085_v25 }
 0x582   :  { %v2005_v37 = vpop.xlane.xlu1 %2004  ;;  %v2153_v41 = vsel %vm1766_vm13, %v2137_v14, -inf  ;;  %v2008_v26 = vpop.xlane.xlu0 %2007  ;;  %v7769_v14 = vld [vmem:[%s10355_s0] sm:$0xff] }
 0x583   :  { %v2097_v39 = vrot.slane %v2005_v37, %v6782_v17  ;;  %2154 = vmax.xlane.f32.xlu1 %v2153_v41  ;;  %v2101_v51 = vrot.slane %v2008_v26, %v6782_v17  ;;  %v2163_v37 = vsel %vm2162_vm1, %v7769_v14, -inf }
 0x585   :  { %v2138_v34 = vsel %vm406_vm4, %v2097_v39, %v2093_v36  ;;  %v7778_v39 = vld [vmem:[%s10355_s0 + $0x10] sm:$0xff] }
 0x586   :  { %v2011_v57 = vpop.xlane.xlu1 %2010  ;;  %v2014_v18 = vpop.xlane.xlu0 %2013  ;;  %v2139_v1 = vsel %vm408_vm5, %v2101_v51, %v2138_v34  ;;  %v2166_v51 = vsel %vm2162_vm1, %v7778_v39, -inf  ;;  %v7785_v34 = vld [vmem:[%s10355_s0 + $0x20] sm:$0xff] }
 0x587   :  { %v2105_v62 = vrot.slane %v2011_v57, %v6782_v17  ;;  %v2109_v28 = vrot.slane %v2014_v18, %v6782_v17  ;;  %v2169_v57 = vsel %vm2162_vm1, %v7785_v34, -inf  ;;  %v7792_v18 = vld [vmem:[%s10355_s0 + $0x30] sm:$0xff] }
 0x589   :  { %v2140_v63 = vsel %vm410_vm6, %v2105_v62, %v2139_v1  ;;  %v2172_v62 = vsel %vm2162_vm1, %v7792_v18, -inf  ;;  %v7799_v1 = vld [vmem:[%s10355_s0 + $0x40] sm:$0xff] }
 0x58a   :  { %v2017_v16 = vpop.xlane.xlu1 %2016  ;;  %v2020_v61 = vpop.xlane.xlu0 %2019  ;;  %v2141_v6 = vsel %vm412_vm7, %v2109_v28, %v2140_v63  ;;  %v2175_v28 = vsel %vm2162_vm1, %v7799_v1, -inf  ;;  %v7806_v63 = vld [vmem:[%s10355_s0 + $0x50] sm:$0xff] }
 0x58b   :  { %v2113_v24 = vrot.slane %v2017_v16, %v6782_v17  ;;  %v2117_v22 = vrot.slane %v2020_v61, %v6782_v17  ;;  %v2178_v16 = vsel %vm2162_vm1, %v7806_v63, -inf  ;;  %v7813_v61 = vld [vmem:[%s10355_s0 + $0x60] sm:$0xff] }
 0x58d   :  { %v2142_v33 = vsel %vm414_vm9, %v2113_v24, %v2141_v6  ;;  %v2181_v24 = vsel %vm2162_vm1, %v7813_v61, -inf  ;;  %v7820_v6 = vld [vmem:[%s10355_s0 + $0x70] sm:$0xff] }
 0x58e   :  { %v2023_v47 = vpop.xlane.xlu1 %2022  ;;  %v2026_v46 = vpop.xlane.xlu0 %2025  ;;  %v2143_v40 = vsel %vm10408_vm10, %v2117_v22, %v2142_v33  ;;  %v2184_v22 = vsel %vm2162_vm1, %v7820_v6, -inf  ;;  %v7827_v33 = vld [vmem:[%s10355_s0 + $0x80] sm:$0xff] }
 0x58f   :  { %v2121_v25 = vrot.slane %v2023_v47, %v6782_v17  ;;  %v2125_v55 = vrot.slane %v2026_v46, %v6782_v17  ;;  %v2187_v47 = vsel %vm2162_vm1, %v7827_v33, -inf  ;;  %v7834_v46 = vld [vmem:[%s10355_s0 + $0x90] sm:$0xff] }
 0x591   :  { %v2144_v38 = vsel %vm10405_vm11, %v2121_v25, %v2143_v40  ;;  %v2190_v25 = vsel %vm2162_vm1, %v7834_v46, -inf  ;;  %v7841_v40 = vld [vmem:[%s10355_s0 + $0xa0] sm:$0xff] }
 0x592   :  { %v2029_v35 = vpop.xlane.xlu1 %2028  ;;  %v2156_v32 = vsel %vm1762_vm12, %v2144_v38, -inf  ;;  %v7848_v38 = vld [vmem:[%s10355_s0 + $0xb0] sm:$0xff] }
 0x593   :  { %v2129_v36 = vrot.slane %v2029_v35, %v6782_v17  ;;  %2157 = vmax.xlane.f32.xlu0 %v2156_v32  ;;  %v2196_v35 = vsel %vm2162_vm1, %v7848_v38, -inf  ;;  %v7855_v32 = vld [vmem:[%s10355_s0 + $0xc0] sm:$0xff] }
 0x595   :  { %v2145_v41 = vsel %vm406_vm4, %v2129_v36, %v2125_v55  ;;  %v2193_v55 = vsel %vm2162_vm1, %v7841_v40, -inf  ;;  %v2199_v36 = vsel %vm2162_vm1, %v7855_v32, -inf }
 0x596   :  { %v2159_v26 = vsel %vm1766_vm13, %v2145_v41, -inf }
 0x597   :  { %2160 = vmax.xlane.f32.xlu1 %v2159_v26  ;;  %2164 = vmax.xlane.f32.xlu0 %v2163_v37  ;;  %v7862_v37 = vld [vmem:[%s10355_s0 + $0xd0] sm:$0xff]  ;;  %v7869_v26 = vld [vmem:[%s10355_s0 + $0xe0] sm:$0xff] }
 0x598   :  { %v2202_v41 = vsel %vm2162_vm1, %v7862_v37, -inf }
 0x59b   :  { %2167 = vmax.xlane.f32.xlu1 %v2166_v51  ;;  %2170 = vmax.xlane.f32.xlu0 %v2169_v57  ;;  %v2205_v51 = vsel %vm2162_vm1, %v7869_v26, -inf  ;;  %v2208_v57 = vsel %vm2162_vm1, %v7360_v27, -inf }
 0x59f   :  { %2173 = vmax.xlane.f32.xlu1 %v2172_v62  ;;  %2176 = vmax.xlane.f32.xlu0 %v2175_v28  ;;  %v2211_v62 = vsel %vm2162_vm1, %v7371_v23, -inf  ;;  %v2214_v28 = vsel %vm2162_vm1, %v7382_v30, -inf }
 0x5a3   :  { %2179 = vmax.xlane.f32.xlu1 %v2178_v16  ;;  %2182 = vmax.xlane.f32.xlu0 %v2181_v24  ;;  %v2217_v16 = vsel %vm2162_vm1, %v7393_v42, -inf  ;;  %v2220_v24 = vsel %vm2162_vm1, %v7404_v50, -inf  ;;  %vm3903_vm1 = vcmask 23559  }
 0x5a7   :  { %2185 = vmax.xlane.f32.xlu1 %v2184_v22  ;;  %2188 = vmax.xlane.f32.xlu0 %v2187_v47 }
 0x5ab   :  { %2191 = vmax.xlane.f32.xlu1 %v2190_v25  ;;  %2194 = vmax.xlane.f32.xlu0 %v2193_v55 }
 0x5af   :  { %2197 = vmax.xlane.f32.xlu1 %v2196_v35  ;;  %2200 = vmax.xlane.f32.xlu0 %v2199_v36 }
 0x5b3   :  { %2203 = vmax.xlane.f32.xlu1 %v2202_v41  ;;  %2206 = vmax.xlane.f32.xlu0 %v2205_v51 }
 0x5b7   :  { %2209 = vmax.xlane.f32.xlu1 %v2208_v57  ;;  %2212 = vmax.xlane.f32.xlu0 %v2211_v62 }
 0x5bb   :  { %2215 = vmax.xlane.f32.xlu1 %v2214_v28  ;;  %2218 = vmax.xlane.f32.xlu0 %v2217_v16 }
 0x5bf   :  { %2221 = vmax.xlane.f32.xlu1 %v2220_v24 }
 0x608   :  { %v7883_v22 = vpop.xlane.xlu0 %2151 }
 0x609   :  { %10493 = vst [vmem:[#allocation15_spill] sm:$0xff] %v7883_v22 }
 0x60c   :  { %v7885_v27 = vpop.xlane.xlu1 %2154 }
 0x60d   :  { %10494 = vst [vmem:[#allocation14_spill] sm:$0xff] %v7885_v27 }
 0x61c   :  { %v7887_v47 = vpop.xlane.xlu0 %2157 }
 0x61d   :  { %10495 = vst [vmem:[#allocation16_spill] sm:$0xff] %v7887_v47 }
 0x620   :  { %v7889_v23 = vpop.xlane.xlu1 %2160  ;;  %v2165_v25 = vpop.xlane.xlu0 %2164 }
 0x621   :  { %10496 = vst [vmem:[#allocation18_spill] sm:$0xff] %v7889_v23  ;;  %v2246_v30 = vrot.slane %v2165_v25, %v6782_v17 }
 0x624   :  { %v2168_v55 = vpop.xlane.xlu1 %2167  ;;  %v2171_v35 = vpop.xlane.xlu0 %2170 }
 0x625   :  { %v2250_v42 = vrot.slane %v2168_v55, %v6782_v17  ;;  %v2254_v36 = vrot.slane %v2171_v35, %v6782_v17 }
 0x627   :  { %v2323_v50 = vsel %vm406_vm4, %v2250_v42, %v2246_v30 }
 0x628   :  { %v2174_v41 = vpop.xlane.xlu1 %2173  ;;  %v2177_v51 = vpop.xlane.xlu0 %2176  ;;  %v2324_v62 = vsel %vm408_vm5, %v2254_v36, %v2323_v50 }
 0x629   :  { %v2258_v57 = vrot.slane %v2174_v41, %v6782_v17  ;;  %v2262_v28 = vrot.slane %v2177_v51, %v6782_v17 }
 0x62b   :  { %v2325_v16 = vsel %vm410_vm6, %v2258_v57, %v2324_v62 }
 0x62c   :  { %v2180_v24 = vpop.xlane.xlu1 %2179  ;;  %v2183_v25 = vpop.xlane.xlu0 %2182  ;;  %v2326_v55 = vsel %vm412_vm7, %v2262_v28, %v2325_v16 }
 0x62d   :  { %v2266_v22 = vrot.slane %v2180_v24, %v6782_v17  ;;  %v2270_v35 = vrot.slane %v2183_v25, %v6782_v17 }
 0x62f   :  { %v2327_v30 = vsel %vm414_vm9, %v2266_v22, %v2326_v55 }
 0x630   :  { %v2186_v42 = vpop.xlane.xlu1 %2185  ;;  %v2189_v47 = vpop.xlane.xlu0 %2188  ;;  %v2328_v36 = vsel %vm10408_vm10, %v2270_v35, %v2327_v30 }
 0x631   :  { %v2274_v41 = vrot.slane %v2186_v42, %v6782_v17  ;;  %v2278_v50 = vrot.slane %v2189_v47, %v6782_v17 }
 0x633   :  { %v2329_v51 = vsel %vm10405_vm11, %v2274_v41, %v2328_v36 }
 0x634   :  { %v2192_v57 = vpop.xlane.xlu1 %2191  ;;  %v2343_v62 = vsel %vm1762_vm12, %v2329_v51, -inf  ;;  %v2195_v24 = vpop.xlane.xlu0 %2194 }
 0x635   :  { %v2282_v28 = vrot.slane %v2192_v57, %v6782_v17  ;;  %2344 = vmax.xlane.f32.xlu0 %v2343_v62  ;;  %v2286_v16 = vrot.slane %v2195_v24, %v6782_v17 }
 0x637   :  { %v2330_v22 = vsel %vm406_vm4, %v2282_v28, %v2278_v50 }
 0x638   :  { %v2198_v25 = vpop.xlane.xlu1 %2197  ;;  %v2346_v55 = vsel %vm1766_vm13, %v2330_v22, -inf  ;;  %v2201_v42 = vpop.xlane.xlu0 %2200 }
 0x639   :  { %v2290_v35 = vrot.slane %v2198_v25, %v6782_v17  ;;  %2347 = vmax.xlane.f32.xlu1 %v2346_v55  ;;  %v2294_v47 = vrot.slane %v2201_v42, %v6782_v17 }
 0x63b   :  { %v2331_v30 = vsel %vm406_vm4, %v2290_v35, %v2286_v16 }
 0x63c   :  { %v2204_v41 = vpop.xlane.xlu1 %2203  ;;  %v2207_v36 = vpop.xlane.xlu0 %2206  ;;  %v2332_v57 = vsel %vm408_vm5, %v2294_v47, %v2331_v30 }
 0x63d   :  { %v2298_v51 = vrot.slane %v2204_v41, %v6782_v17  ;;  %v2302_v62 = vrot.slane %v2207_v36, %v6782_v17 }
 0x63f   :  { %v2333_v50 = vsel %vm410_vm6, %v2298_v51, %v2332_v57 }
 0x640   :  { %v2210_v24 = vpop.xlane.xlu1 %2209  ;;  %v2213_v28 = vpop.xlane.xlu0 %2212  ;;  %v2334_v25 = vsel %vm412_vm7, %v2302_v62, %v2333_v50  ;;  %v2356_v50 = vsel %vm2355_vm2, %v7769_v14, -inf }
 0x641   :  { %v2306_v22 = vrot.slane %v2210_v24, %v6782_v17  ;;  %v2310_v55 = vrot.slane %v2213_v28, %v6782_v17 }
 0x643   :  { %v2335_v16 = vsel %vm414_vm9, %v2306_v22, %v2334_v25  ;;  %v2359_v22 = vsel %vm2355_vm2, %v7778_v39, -inf  ;;  %v2362_v25 = vsel %vm2355_vm2, %v7785_v34, -inf }
 0x644   :  { %v2216_v42 = vpop.xlane.xlu1 %2215  ;;  %v2219_v35 = vpop.xlane.xlu0 %2218  ;;  %v2336_v47 = vsel %vm10408_vm10, %v2310_v55, %v2335_v16  ;;  %v2365_v55 = vsel %vm2355_vm2, %v7792_v18, -inf  ;;  %v2368_v16 = vsel %vm2355_vm2, %v7799_v1, -inf }
 0x645   :  { %v2314_v41 = vrot.slane %v2216_v42, %v6782_v17  ;;  %v2318_v30 = vrot.slane %v2219_v35, %v6782_v17  ;;  %v2371_v42 = vsel %vm2355_vm2, %v7806_v63, -inf  ;;  %v2374_v35 = vsel %vm2355_vm2, %v7813_v61, -inf }
 0x647   :  { %v2337_v36 = vsel %vm10405_vm11, %v2314_v41, %v2336_v47  ;;  %v2377_v41 = vsel %vm2355_vm2, %v7820_v6, -inf  ;;  %v2380_v47 = vsel %vm2355_vm2, %v7827_v33, -inf }
 0x648   :  { %v2222_v51 = vpop.xlane.xlu1 %2221  ;;  %v2349_v57 = vsel %vm1762_vm12, %v2337_v36, -inf  ;;  %v2386_v36 = vsel %vm2355_vm2, %v7841_v40, -inf  ;;  %vm2540_vm12 = vcmask 33808  }
 0x649   :  { %v2322_v62 = vrot.slane %v2222_v51, %v6782_v17  ;;  %2350 = vmax.xlane.f32.xlu0 %v2349_v57  ;;  %v2389_v51 = vsel %vm2355_vm2, %v7848_v38, -inf  ;;  %v2392_v57 = vsel %vm2355_vm2, %v7855_v32, -inf }
 0x64b   :  { %v2338_v24 = vsel %vm406_vm4, %v2322_v62, %v2318_v30  ;;  %v2383_v30 = vsel %vm2355_vm2, %v7834_v46, -inf  ;;  %v2395_v62 = vsel %vm2355_vm2, %v7862_v37, -inf }
 0x64c   :  { %v2352_v28 = vsel %vm1766_vm13, %v2338_v24, -inf  ;;  %v7964_v24 = vld [vmem:[%s10355_s0 + $0xf0] sm:$0xff] }
 0x64d   :  { %2353 = vmax.xlane.f32.xlu1 %v2352_v28  ;;  %2357 = vmax.xlane.f32.xlu0 %v2356_v50  ;;  %v2398_v50 = vsel %vm2355_vm2, %v7869_v26, -inf  ;;  %v2401_v28 = vsel %vm2355_vm2, %v7964_v24, -inf }
 0x651   :  { %2360 = vmax.xlane.f32.xlu1 %v2359_v22  ;;  %2363 = vmax.xlane.f32.xlu0 %v2362_v25  ;;  %v7971_v22 = vld [vmem:[%s10355_s0 + $0x100] sm:$0xff] }
 0x652   :  { %v2404_v25 = vsel %vm2355_vm2, %v7971_v22, -inf }
 0x655   :  { %2366 = vmax.xlane.f32.xlu1 %v2365_v55  ;;  %2369 = vmax.xlane.f32.xlu0 %v2368_v16  ;;  %v7978_v55 = vld [vmem:[%s10355_s0 + $0x110] sm:$0xff] }
 0x656   :  { %v2407_v16 = vsel %vm2355_vm2, %v7978_v55, -inf }
 0x659   :  { %2372 = vmax.xlane.f32.xlu1 %v2371_v42  ;;  %2375 = vmax.xlane.f32.xlu0 %v2374_v35  ;;  %v7985_v42 = vld [vmem:[%s10355_s0 + $0x120] sm:$0xff] }
 0x65a   :  { %v2410_v35 = vsel %vm2355_vm2, %v7985_v42, -inf }
 0x65d   :  { %2378 = vmax.xlane.f32.xlu1 %v2377_v41  ;;  %2381 = vmax.xlane.f32.xlu0 %v2380_v47  ;;  %v7992_v41 = vld [vmem:[%s10355_s0 + $0x130] sm:$0xff] }
 0x65e   :  { %v2413_v47 = vsel %vm2355_vm2, %v7992_v41, -inf  ;;  %vm3710_vm2 = vcmask 80957  }
 0x661   :  { %2384 = vmax.xlane.f32.xlu1 %v2383_v30  ;;  %2387 = vmax.xlane.f32.xlu0 %v2386_v36 }
 0x665   :  { %2390 = vmax.xlane.f32.xlu1 %v2389_v51  ;;  %2393 = vmax.xlane.f32.xlu0 %v2392_v57 }
 0x669   :  { %2396 = vmax.xlane.f32.xlu1 %v2395_v62  ;;  %2399 = vmax.xlane.f32.xlu0 %v2398_v50 }
 0x66d   :  { %2402 = vmax.xlane.f32.xlu1 %v2401_v28  ;;  %2405 = vmax.xlane.f32.xlu0 %v2404_v25 }
 0x671   :  { %2408 = vmax.xlane.f32.xlu1 %v2407_v16  ;;  %2411 = vmax.xlane.f32.xlu0 %v2410_v35 }
 0x675   :  { %2414 = vmax.xlane.f32.xlu1 %v2413_v47 }
 0x6be   :  { %v7996_v30 = vpop.xlane.xlu0 %2344 }
 0x6bf   :  { %10497 = vst [vmem:[#allocation17_spill] sm:$0xff] %v7996_v30 }
 0x6c2   :  { %v7998_v36 = vpop.xlane.xlu1 %2347 }
 0x6c3   :  { %10498 = vst [vmem:[#allocation19_spill] sm:$0xff] %v7998_v36 }
 0x6d2   :  { %v8000_v51 = vpop.xlane.xlu0 %2350 }
 0x6d3   :  { %10499 = vst [vmem:[#allocation20_spill] sm:$0xff] %v8000_v51 }
 0x6d6   :  { %v8002_v57 = vpop.xlane.xlu1 %2353  ;;  %v2358_v62 = vpop.xlane.xlu0 %2357 }
 0x6d7   :  { %10500 = vst [vmem:[#allocation21_spill] sm:$0xff] %v8002_v57  ;;  %v2439_v50 = vrot.slane %v2358_v62, %v6782_v17 }
 0x6da   :  { %v2361_v28 = vpop.xlane.xlu1 %2360  ;;  %v2364_v25 = vpop.xlane.xlu0 %2363 }
 0x6db   :  { %v2443_v16 = vrot.slane %v2361_v28, %v6782_v17  ;;  %v2447_v35 = vrot.slane %v2364_v25, %v6782_v17 }
 0x6dd   :  { %v2516_v27 = vsel %vm406_vm4, %v2443_v16, %v2439_v50 }
 0x6de   :  { %v2367_v47 = vpop.xlane.xlu1 %2366  ;;  %v2370_v23 = vpop.xlane.xlu0 %2369  ;;  %v2517_v36 = vsel %vm408_vm5, %v2447_v35, %v2516_v27 }
 0x6df   :  { %v2451_v30 = vrot.slane %v2367_v47, %v6782_v17  ;;  %v2455_v51 = vrot.slane %v2370_v23, %v6782_v17 }
 0x6e1   :  { %v2518_v57 = vsel %vm410_vm6, %v2451_v30, %v2517_v36 }
 0x6e2   :  { %v2373_v45 = vpop.xlane.xlu1 %2372  ;;  %v2376_v62 = vpop.xlane.xlu0 %2375  ;;  %v2519_v28 = vsel %vm412_vm7, %v2455_v51, %v2518_v57 }
 0x6e3   :  { %v2459_v31 = vrot.slane %v2373_v45, %v6782_v17  ;;  %v2463_v25 = vrot.slane %v2376_v62, %v6782_v17 }
 0x6e5   :  { %v2520_v50 = vsel %vm414_vm9, %v2459_v31, %v2519_v28 }
 0x6e6   :  { %v2379_v16 = vpop.xlane.xlu1 %2378  ;;  %v2382_v49 = vpop.xlane.xlu0 %2381  ;;  %v2521_v27 = vsel %vm10408_vm10, %v2463_v25, %v2520_v50 }
 0x6e7   :  { %v2467_v47 = vrot.slane %v2379_v16, %v6782_v17  ;;  %v2471_v23 = vrot.slane %v2382_v49, %v6782_v17 }
 0x6e9   :  { %v2522_v30 = vsel %vm10405_vm11, %v2467_v47, %v2521_v27 }
 0x6ea   :  { %v2385_v36 = vpop.xlane.xlu1 %2384  ;;  %v2537_v45 = vsel %vm10402_vm3, %v2522_v30, -inf  ;;  %v2388_v35 = vpop.xlane.xlu0 %2387 }
 0x6eb   :  { %v2475_v51 = vrot.slane %v2385_v36, %v6782_v17  ;;  %2538 = vmax.xlane.f32.xlu0 %v2537_v45  ;;  %v2479_v31 = vrot.slane %v2388_v35, %v6782_v17 }
 0x6ed   :  { %v2523_v57 = vsel %vm406_vm4, %v2475_v51, %v2471_v23 }
 0x6ee   :  { %v2391_v62 = vpop.xlane.xlu1 %2390  ;;  %v2541_v28 = vsel %vm2540_vm12, %v2523_v57, -inf  ;;  %v2394_v25 = vpop.xlane.xlu0 %2393 }
 0x6ef   :  { %v2483_v49 = vrot.slane %v2391_v62, %v6782_v17  ;;  %2542 = vmax.xlane.f32.xlu1 %v2541_v28  ;;  %v2487_v50 = vrot.slane %v2394_v25, %v6782_v17 }
 0x6f1   :  { %v2524_v16 = vsel %vm406_vm4, %v2483_v49, %v2479_v31 }
 0x6f2   :  { %v2397_v47 = vpop.xlane.xlu1 %2396  ;;  %v2400_v27 = vpop.xlane.xlu0 %2399  ;;  %v2525_v36 = vsel %vm408_vm5, %v2487_v50, %v2524_v16 }
 0x6f3   :  { %v2491_v30 = vrot.slane %v2397_v47, %v6782_v17  ;;  %v2495_v45 = vrot.slane %v2400_v27, %v6782_v17 }
 0x6f5   :  { %v2526_v23 = vsel %vm410_vm6, %v2491_v30, %v2525_v36 }
 0x6f6   :  { %v2403_v35 = vpop.xlane.xlu1 %2402  ;;  %v2406_v51 = vpop.xlane.xlu0 %2405  ;;  %v2527_v62 = vsel %vm412_vm7, %v2495_v45, %v2526_v23  ;;  %v2551_v23 = vsel %vm2550_vm14, %v7769_v14, -inf }
 0x6f7   :  { %v2499_v57 = vrot.slane %v2403_v35, %v6782_v17  ;;  %v2503_v28 = vrot.slane %v2406_v51, %v6782_v17 }
 0x6f9   :  { %v2528_v31 = vsel %vm414_vm9, %v2499_v57, %v2527_v62  ;;  %v2554_v57 = vsel %vm2550_vm14, %v7778_v39, -inf  ;;  %v2557_v62 = vsel %vm2550_vm14, %v7785_v34, -inf }
 0x6fa   :  { %v2409_v25 = vpop.xlane.xlu1 %2408  ;;  %v2412_v49 = vpop.xlane.xlu0 %2411  ;;  %v2529_v50 = vsel %vm10408_vm10, %v2503_v28, %v2528_v31  ;;  %v2560_v28 = vsel %vm2550_vm14, %v7792_v18, -inf  ;;  %v2563_v31 = vsel %vm2550_vm14, %v7799_v1, -inf }
 0x6fb   :  { %v2507_v47 = vrot.slane %v2409_v25, %v6782_v17  ;;  %v2511_v16 = vrot.slane %v2412_v49, %v6782_v17  ;;  %v2566_v25 = vsel %vm2550_vm14, %v7806_v63, -inf  ;;  %v2569_v49 = vsel %vm2550_vm14, %v7813_v61, -inf }
 0x6fd   :  { %v2530_v27 = vsel %vm10405_vm11, %v2507_v47, %v2529_v50  ;;  %v2572_v47 = vsel %vm2550_vm14, %v7820_v6, -inf  ;;  %v2575_v50 = vsel %vm2550_vm14, %v7827_v33, -inf }
 0x6fe   :  { %v2415_v30 = vpop.xlane.xlu1 %2414  ;;  %v2544_v36 = vsel %vm10402_vm3, %v2530_v27, -inf  ;;  %v2581_v27 = vsel %vm2550_vm14, %v7841_v40, -inf }
 0x6ff   :  { %v2515_v45 = vrot.slane %v2415_v30, %v6782_v17  ;;  %2545 = vmax.xlane.f32.xlu0 %v2544_v36  ;;  %v2584_v30 = vsel %vm2550_vm14, %v7848_v38, -inf  ;;  %v2587_v36 = vsel %vm2550_vm14, %v7855_v32, -inf }
 0x701   :  { %v2531_v35 = vsel %vm406_vm4, %v2515_v45, %v2511_v16  ;;  %v2578_v16 = vsel %vm2550_vm14, %v7834_v46, -inf  ;;  %v2590_v45 = vsel %vm2550_vm14, %v7862_v37, -inf }
 0x702   :  { %v2547_v51 = vsel %vm2540_vm12, %v2531_v35, -inf  ;;  %v2596_v35 = vsel %vm2550_vm14, %v7964_v24, -inf }
 0x703   :  { %2548 = vmax.xlane.f32.xlu1 %v2547_v51  ;;  %2552 = vmax.xlane.f32.xlu0 %v2551_v23  ;;  %v2593_v23 = vsel %vm2550_vm14, %v7869_v26, -inf  ;;  %v2599_v51 = vsel %vm2550_vm14, %v7971_v22, -inf }
 0x707   :  { %2555 = vmax.xlane.f32.xlu1 %v2554_v57  ;;  %2558 = vmax.xlane.f32.xlu0 %v2557_v62  ;;  %v2602_v57 = vsel %vm2550_vm14, %v7978_v55, -inf  ;;  %v2605_v62 = vsel %vm2550_vm14, %v7985_v42, -inf }
 0x70b   :  { %2561 = vmax.xlane.f32.xlu1 %v2560_v28  ;;  %2564 = vmax.xlane.f32.xlu0 %v2563_v31  ;;  %v2608_v28 = vsel %vm2550_vm14, %v7992_v41, -inf  ;;  %vm4278_vm14 = vcmask 39959  }
 0x70f   :  { %2567 = vmax.xlane.f32.xlu1 %v2566_v25  ;;  %2570 = vmax.xlane.f32.xlu0 %v2569_v49 }
 0x713   :  { %2573 = vmax.xlane.f32.xlu1 %v2572_v47  ;;  %2576 = vmax.xlane.f32.xlu0 %v2575_v50 }
 0x717   :  { %2579 = vmax.xlane.f32.xlu1 %v2578_v16  ;;  %2582 = vmax.xlane.f32.xlu0 %v2581_v27 }
 0x71b   :  { %2585 = vmax.xlane.f32.xlu1 %v2584_v30  ;;  %2588 = vmax.xlane.f32.xlu0 %v2587_v36 }
 0x71f   :  { %2591 = vmax.xlane.f32.xlu1 %v2590_v45  ;;  %2594 = vmax.xlane.f32.xlu0 %v2593_v23 }
 0x723   :  { %2597 = vmax.xlane.f32.xlu1 %v2596_v35  ;;  %2600 = vmax.xlane.f32.xlu0 %v2599_v51 }
 0x727   :  { %2603 = vmax.xlane.f32.xlu1 %v2602_v57  ;;  %2606 = vmax.xlane.f32.xlu0 %v2605_v62 }
 0x72b   :  { %2609 = vmax.xlane.f32.xlu1 %v2608_v28 }
 0x774   :  { %v8084_v31 = vpop.xlane.xlu0 %2538 }
 0x775   :  { %10501 = vst [vmem:[#allocation22_spill] sm:$0xff] %v8084_v31 }
 0x778   :  { %v8086_v25 = vpop.xlane.xlu1 %2542 }
 0x779   :  { %10502 = vst [vmem:[#allocation23_spill] sm:$0xff] %v8086_v25 }
 0x788   :  { %v8088_v49 = vpop.xlane.xlu0 %2545 }
 0x789   :  { %10503 = vst [vmem:[#allocation25_spill] sm:$0xff] %v8088_v49 }
 0x78c   :  { %v8090_v47 = vpop.xlane.xlu1 %2548  ;;  %v2553_v50 = vpop.xlane.xlu0 %2552 }
 0x78d   :  { %10504 = vst [vmem:[#allocation26_spill] sm:$0xff] %v8090_v47  ;;  %v2634_v16 = vrot.slane %v2553_v50, %v6782_v17 }
 0x790   :  { %v2556_v27 = vpop.xlane.xlu1 %2555  ;;  %v2559_v30 = vpop.xlane.xlu0 %2558 }
 0x791   :  { %v2638_v36 = vrot.slane %v2556_v27, %v6782_v17  ;;  %v2642_v45 = vrot.slane %v2559_v30, %v6782_v17 }
 0x793   :  { %v2711_v23 = vsel %vm406_vm4, %v2638_v36, %v2634_v16 }
 0x794   :  { %v2562_v35 = vpop.xlane.xlu1 %2561  ;;  %v2565_v51 = vpop.xlane.xlu0 %2564  ;;  %v2712_v62 = vsel %vm408_vm5, %v2642_v45, %v2711_v23 }
 0x795   :  { %v2646_v57 = vrot.slane %v2562_v35, %v6782_v17  ;;  %v2650_v28 = vrot.slane %v2565_v51, %v6782_v17 }
 0x797   :  { %v2713_v31 = vsel %vm410_vm6, %v2646_v57, %v2712_v62 }
 0x798   :  { %v2568_v49 = vpop.xlane.xlu1 %2567  ;;  %v2571_v50 = vpop.xlane.xlu0 %2570  ;;  %v2714_v27 = vsel %vm412_vm7, %v2650_v28, %v2713_v31 }
 0x799   :  { %v2654_v25 = vrot.slane %v2568_v49, %v6782_v17  ;;  %v2658_v30 = vrot.slane %v2571_v50, %v6782_v17 }
 0x79b   :  { %v2715_v16 = vsel %vm414_vm9, %v2654_v25, %v2714_v27 }
 0x79c   :  { %v2574_v36 = vpop.xlane.xlu1 %2573  ;;  %v2577_v47 = vpop.xlane.xlu0 %2576  ;;  %v2716_v45 = vsel %vm10408_vm10, %v2658_v30, %v2715_v16 }
 0x79d   :  { %v2662_v35 = vrot.slane %v2574_v36, %v6782_v17  ;;  %v2666_v23 = vrot.slane %v2577_v47, %v6782_v17 }
 0x79f   :  { %v2717_v51 = vsel %vm10405_vm11, %v2662_v35, %v2716_v45 }
 0x7a0   :  { %v2580_v57 = vpop.xlane.xlu1 %2579  ;;  %v2731_v62 = vsel %vm10402_vm3, %v2717_v51, -inf  ;;  %v2583_v49 = vpop.xlane.xlu0 %2582 }
 0x7a1   :  { %v2670_v31 = vrot.slane %v2580_v57, %v6782_v17  ;;  %2732 = vmax.xlane.f32.xlu0 %v2731_v62  ;;  %v2674_v28 = vrot.slane %v2583_v49, %v6782_v17 }
 0x7a3   :  { %v2718_v25 = vsel %vm406_vm4, %v2670_v31, %v2666_v23 }
 0x7a4   :  { %v2586_v50 = vpop.xlane.xlu1 %2585  ;;  %v2734_v27 = vsel %vm2540_vm12, %v2718_v25, -inf  ;;  %v2589_v36 = vpop.xlane.xlu0 %2588 }
 0x7a5   :  { %v2678_v30 = vrot.slane %v2586_v50, %v6782_v17  ;;  %2735 = vmax.xlane.f32.xlu1 %v2734_v27  ;;  %v2682_v47 = vrot.slane %v2589_v36, %v6782_v17 }
 0x7a7   :  { %v2719_v16 = vsel %vm406_vm4, %v2678_v30, %v2674_v28 }
 0x7a8   :  { %v2592_v35 = vpop.xlane.xlu1 %2591  ;;  %v2595_v45 = vpop.xlane.xlu0 %2594  ;;  %v2720_v57 = vsel %vm408_vm5, %v2682_v47, %v2719_v16 }
 0x7a9   :  { %v2686_v51 = vrot.slane %v2592_v35, %v6782_v17  ;;  %v2690_v62 = vrot.slane %v2595_v45, %v6782_v17 }
 0x7ab   :  { %v2721_v23 = vsel %vm410_vm6, %v2686_v51, %v2720_v57 }
 0x7ac   :  { %v2598_v49 = vpop.xlane.xlu1 %2597  ;;  %v2601_v31 = vpop.xlane.xlu0 %2600  ;;  %v2722_v50 = vsel %vm412_vm7, %v2690_v62, %v2721_v23  ;;  %v2744_v23 = vsel %vm2743_vm15, %v7769_v14, -inf }
 0x7ad   :  { %v2694_v25 = vrot.slane %v2598_v49, %v6782_v17  ;;  %v2698_v27 = vrot.slane %v2601_v31, %v6782_v17 }
 0x7af   :  { %v2723_v28 = vsel %vm414_vm9, %v2694_v25, %v2722_v50  ;;  %v2750_v25 = vsel %vm2743_vm15, %v7785_v34, -inf  ;;  %v2747_v50 = vsel %vm2743_vm15, %v7778_v39, -inf }
 0x7b0   :  { %v2604_v36 = vpop.xlane.xlu1 %2603  ;;  %v2607_v30 = vpop.xlane.xlu0 %2606  ;;  %v2724_v47 = vsel %vm10408_vm10, %v2698_v27, %v2723_v28  ;;  %v2756_v27 = vsel %vm2743_vm15, %v7799_v1, -inf  ;;  %v2753_v28 = vsel %vm2743_vm15, %v7792_v18, -inf }
 0x7b1   :  { %v2702_v35 = vrot.slane %v2604_v36, %v6782_v17  ;;  %v2706_v16 = vrot.slane %v2607_v30, %v6782_v17  ;;  %v2762_v36 = vsel %vm2743_vm15, %v7813_v61, -inf  ;;  %v2759_v30 = vsel %vm2743_vm15, %v7806_v63, -inf }
 0x7b2   :  { %v2780_v63 = vsel %vm2743_vm15, %v7855_v32, -inf  ;;  %v2777_v61 = vsel %vm2743_vm15, %v7848_v38, -inf }
 0x7b3   :  { %v2725_v45 = vsel %vm10405_vm11, %v2702_v35, %v2724_v47  ;;  %v2768_v35 = vsel %vm2743_vm15, %v7827_v33, -inf  ;;  %v2765_v47 = vsel %vm2743_vm15, %v7820_v6, -inf  ;;  %v2786_v6 = vsel %vm2743_vm15, %v7869_v26, -inf }
 0x7b4   :  { %v2610_v51 = vpop.xlane.xlu1 %2609  ;;  %v2737_v57 = vsel %vm10402_vm3, %v2725_v45, -inf  ;;  %v2771_v45 = vsel %vm2743_vm15, %v7834_v46, -inf  ;;  %v2783_v33 = vsel %vm2743_vm15, %v7862_v37, -inf  ;;  %v2792_v46 = vsel %vm2743_vm15, %v7971_v22, -inf }
 0x7b5   :  { %v2710_v62 = vrot.slane %v2610_v51, %v6782_v17  ;;  %2738 = vmax.xlane.f32.xlu0 %v2737_v57  ;;  %v2789_v51 = vsel %vm2743_vm15, %v7964_v24, -inf  ;;  %v2798_v57 = vsel %vm2743_vm15, %v7985_v42, -inf  ;;  %v2801_v22 = vsel %vm2743_vm15, %v7992_v41, -inf  ;;  %v8179_v42 = vld [vmem:[%s10355_s0 + $0x8] sm:$0x3] }
 0x7b6   :  { %v8188_v41 = vld [vmem:[%s10355_s0 + $0x18] sm:$0x3]  ;;  %vm10403_vm3 = vcmask 950112  }
 0x7b7   :  { %v2726_v49 = vsel %vm406_vm4, %v2710_v62, %v2706_v16  ;;  %v2774_v16 = vsel %vm2743_vm15, %v7841_v40, -inf  ;;  %v2795_v62 = vsel %vm2743_vm15, %v7978_v55, -inf  ;;  %v3907_v55 = vsel %vm1766_vm13, %v8179_v42, -inf }
 0x7b8   :  { %v2740_v31 = vsel %vm2540_vm12, %v2726_v49, -inf  ;;  %v3910_v49 = vsel %vm3903_vm1, %v7778_v39, -inf  ;;  %vm10404_vm15 = vcmask 64559  }
 0x7b9   :  { %2745 = vmax.xlane.f32.xlu0 %v2744_v23  ;;  %2741 = vmax.xlane.f32.xlu1 %v2740_v31  ;;  %v3904_v23 = vsel %vm3903_vm1, %v7769_v14, -inf  ;;  %v3964_v31 = vsel %vm3903_vm1, %v7841_v40, -inf }
 0x7bd   :  { %2751 = vmax.xlane.f32.xlu0 %v2750_v25  ;;  %2748 = vmax.xlane.f32.xlu1 %v2747_v50  ;;  %v3913_v25 = vsel %vm1766_vm13, %v8188_v41, -inf  ;;  %v3970_v50 = vsel %vm3903_vm1, %v7848_v38, -inf }
 0x7c1   :  { %2757 = vmax.xlane.f32.xlu0 %v2756_v27  ;;  %2754 = vmax.xlane.f32.xlu1 %v2753_v28  ;;  %v8197_v27 = vld [vmem:[%s10355_s0 + $0xa8] sm:$0x3] }
 0x7c2   :  { %v3967_v28 = vsel %vm1766_vm13, %v8197_v27, -inf }
 0x7c5   :  { %2763 = vmax.xlane.f32.xlu0 %v2762_v36  ;;  %2760 = vmax.xlane.f32.xlu1 %v2759_v30  ;;  %v3711_v36 = vsel %vm3710_vm2, %v7769_v14, -inf  ;;  %v8206_v30 = vld [vmem:[%s10355_s0 + $0xb8] sm:$0x3] }
 0x7c9   :  { %2769 = vmax.xlane.f32.xlu0 %v2768_v35  ;;  %2766 = vmax.xlane.f32.xlu1 %v2765_v47  ;;  %v3973_v35 = vsel %vm1766_vm13, %v8206_v30, -inf  ;;  %v3741_v47 = vsel %vm3710_vm2, %v7841_v40, -inf }
 0x7cd   :  { %2775 = vmax.xlane.f32.xlu0 %v2774_v16  ;;  %2772 = vmax.xlane.f32.xlu1 %v2771_v45  ;;  %v3714_v16 = vsel %vm3710_vm2, %v7778_v39, -inf  ;;  %v3916_v45 = vsel %vm3903_vm1, %v7785_v34, -inf }
 0x7d1   :  { %2781 = vmax.xlane.f32.xlu0 %v2780_v63  ;;  %2778 = vmax.xlane.f32.xlu1 %v2777_v61  ;;  %v3744_v63 = vsel %vm3710_vm2, %v7848_v38, -inf  ;;  %v3976_v61 = vsel %vm3903_vm1, %v7855_v32, -inf }
 0x7d5   :  { %2787 = vmax.xlane.f32.xlu0 %v2786_v6  ;;  %2784 = vmax.xlane.f32.xlu1 %v2783_v33  ;;  %v8223_v6 = vld [vmem:[%s10355_s0 + $0x28] sm:$0x3] }
 0x7d6   :  { %v3919_v33 = vsel %vm1766_vm13, %v8223_v6, -inf }
 0x7d9   :  { %2793 = vmax.xlane.f32.xlu0 %v2792_v46  ;;  %2790 = vmax.xlane.f32.xlu1 %v2789_v51  ;;  %v4279_v46 = vsel %vm4278_vm14, %v7769_v14, -inf  ;;  %v8232_v51 = vld [vmem:[%s10355_s0 + $0xc8] sm:$0x3] }
 0x7dd   :  { %2799 = vmax.xlane.f32.xlu0 %v2798_v57  ;;  %2796 = vmax.xlane.f32.xlu1 %v2795_v62  ;;  %v3979_v57 = vsel %vm1766_vm13, %v8232_v51, -inf  ;;  %v4285_v62 = vsel %vm4278_vm14, %v7778_v39, -inf }
 0x7e1   :  { %3905 = vmax.xlane.f32.xlu0 %v3904_v23  ;;  %2802 = vmax.xlane.f32.xlu1 %v2801_v22  ;;  %v4282_v23 = vsel %vm2540_vm12, %v8179_v42, -inf  ;;  %v4339_v22 = vsel %vm4278_vm14, %v7841_v40, -inf }
 0x7e5   :  { %3911 = vmax.xlane.f32.xlu0 %v3910_v49  ;;  %3908 = vmax.xlane.f32.xlu1 %v3907_v55  ;;  %v4288_v49 = vsel %vm2540_vm12, %v8188_v41, -inf  ;;  %v4345_v55 = vsel %vm4278_vm14, %v7848_v38, -inf }
 0x7e9   :  { %3965 = vmax.xlane.f32.xlu0 %v3964_v31  ;;  %3914 = vmax.xlane.f32.xlu1 %v3913_v25  ;;  %v4342_v31 = vsel %vm2540_vm12, %v8197_v27, -inf  ;;  %v3717_v25 = vsel %vm3710_vm2, %v7785_v34, -inf }
 0x7ed   :  { %3971 = vmax.xlane.f32.xlu0 %v3970_v50  ;;  %3968 = vmax.xlane.f32.xlu1 %v3967_v28  ;;  %v4348_v50 = vsel %vm2540_vm12, %v8206_v30, -inf  ;;  %v3922_v28 = vsel %vm3903_vm1, %v7792_v18, -inf }
 0x7f1   :  { %3712 = vmax.xlane.f32.xlu0 %v3711_v36  ;;  %3974 = vmax.xlane.f32.xlu1 %v3973_v35  ;;  %v3747_v36 = vsel %vm3710_vm2, %v7855_v32, -inf  ;;  %v3982_v35 = vsel %vm3903_vm1, %v7862_v37, -inf }
 0x7f5   :  { %3742 = vmax.xlane.f32.xlu0 %v3741_v47  ;;  %3715 = vmax.xlane.f32.xlu1 %v3714_v16  ;;  %v8261_v47 = vld [vmem:[%s10355_s0 + $0x38] sm:$0x3] }
 0x7f6   :  { %v3925_v16 = vsel %vm1766_vm13, %v8261_v47, -inf }
 0x7f9   :  { %3917 = vmax.xlane.f32.xlu0 %v3916_v45  ;;  %3745 = vmax.xlane.f32.xlu1 %v3744_v63  ;;  %v4291_v45 = vsel %vm4278_vm14, %v7785_v34, -inf  ;;  %v8270_v63 = vld [vmem:[%s10355_s0 + $0xd8] sm:$0x3] }
 0x7fd   :  { %3977 = vmax.xlane.f32.xlu0 %v3976_v61  ;;  %3920 = vmax.xlane.f32.xlu1 %v3919_v33  ;;  %v3985_v61 = vsel %vm1766_vm13, %v8270_v63, -inf  ;;  %v4351_v33 = vsel %vm4278_vm14, %v7855_v32, -inf }
 0x801   :  { %4280 = vmax.xlane.f32.xlu0 %v4279_v46  ;;  %3980 = vmax.xlane.f32.xlu1 %v3979_v57  ;;  %v4294_v46 = vsel %vm2540_vm12, %v8223_v6, -inf  ;;  %v4652_v57 = vsel %vm10404_vm15, %v7769_v14, -inf  ;;  %v4661_v14 = vsel %vm3314_vm0, %v8188_v41, -inf }
 0x805   :  { %4286 = vmax.xlane.f32.xlu0 %v4285_v62  ;;  %4283 = vmax.xlane.f32.xlu1 %v4282_v23  ;;  %v4354_v62 = vsel %vm2540_vm12, %v8232_v51, -inf  ;;  %v4658_v23 = vsel %vm10404_vm15, %v7778_v39, -inf  ;;  %v3720_v39 = vsel %vm3710_vm2, %v7792_v18, -inf }
 0x809   :  { %4340 = vmax.xlane.f32.xlu0 %v4339_v22  ;;  %4289 = vmax.xlane.f32.xlu1 %v4288_v49  ;;  %v4655_v22 = vsel %vm3314_vm0, %v8179_v42, -inf  ;;  %v4712_v49 = vsel %vm10404_vm15, %v7841_v40, -inf  ;;  %v3928_v40 = vsel %vm3903_vm1, %v7799_v1, -inf }
 0x80d   :  { %4346 = vmax.xlane.f32.xlu0 %v4345_v55  ;;  %4343 = vmax.xlane.f32.xlu1 %v4342_v31  ;;  %v4718_v55 = vsel %vm10404_vm15, %v7848_v38, -inf  ;;  %v4715_v31 = vsel %vm3314_vm0, %v8197_v27, -inf }
 0x811   :  { %3718 = vmax.xlane.f32.xlu0 %v3717_v25  ;;  %4349 = vmax.xlane.f32.xlu1 %v4348_v50  ;;  %v4721_v25 = vsel %vm3314_vm0, %v8206_v30, -inf  ;;  %v3750_v50 = vsel %vm3710_vm2, %v7862_v37, -inf }
 0x815   :  { %3923 = vmax.xlane.f32.xlu0 %v3922_v28  ;;  %3748 = vmax.xlane.f32.xlu1 %v3747_v36  ;;  %v3988_v28 = vsel %vm3903_vm1, %v7869_v26, -inf  ;;  %v8309_v36 = vld [vmem:[%s10355_s0 + $0x48] sm:$0x3]  ;;  %v4297_v26 = vsel %vm4278_vm14, %v7792_v18, -inf  ;;  %v4357_v18 = vsel %vm4278_vm14, %v7862_v37, -inf  ;;  %v4664_v37 = vsel %vm10404_vm15, %v7785_v34, -inf }
 0x816   :  { %v4667_v34 = vsel %vm3314_vm0, %v8223_v6, -inf }
 0x819   :  { %3983 = vmax.xlane.f32.xlu0 %v3982_v35  ;;  %3926 = vmax.xlane.f32.xlu1 %v3925_v16  ;;  %v3931_v35 = vsel %vm1766_vm13, %v8309_v36, -inf  ;;  %v10506_v16 = vld [vmem:[#allocation35_spill] sm:$0xff] }
 0x81a   :  { %v5668_v1 = vadd.s32 4294967196, %v10506_v16 }
 0x81d   :  { %4292 = vmax.xlane.f32.xlu0 %v4291_v45  ;;  %3986 = vmax.xlane.f32.xlu1 %v3985_v61  ;;  %v5673_v45 = vadd.s32 4294967188, %v10506_v16 }
 0x821   :  { %4352 = vmax.xlane.f32.xlu0 %v4351_v33  ;;  %4295 = vmax.xlane.f32.xlu1 %v4294_v46  ;;  %v8322_v46 = vld [vmem:[%s10355_s0 + $0xe8] sm:$0x3] }
 0x825   :  { %4653 = vmax.xlane.f32.xlu0 %v4652_v57  ;;  %4355 = vmax.xlane.f32.xlu1 %v4354_v62  ;;  %v3991_v57 = vsel %vm1766_vm13, %v8322_v46, -inf  ;;  %v8327_v62 = vsub.s32 %v5668_v1, %v6774_v20 }
 0x827   :  { %10508 = vst [vmem:[#allocation31_spill] sm:$0xff] %v8327_v62 }
 0x829   :  { %4659 = vmax.xlane.f32.xlu0 %v4658_v23  ;;  %4656 = vmax.xlane.f32.xlu1 %v4655_v22  ;;  %v8330_v23 = vsub.s32 %v5673_v45, %v6774_v20 }
 0x82a   :  { %v8302_v38 = vpop.xlane.xlu0 %2732 }
 0x82b   :  { %10505 = vst [vmem:[#allocation28_spill] sm:$0xff] %v8302_v38  ;;  %10509 = vst [vmem:[#allocation33_spill] sm:$0xff] %v8330_v23 }
 0x82d   :  { %4713 = vmax.xlane.f32.xlu0 %v4712_v49  ;;  %4662 = vmax.xlane.f32.xlu1 %v4661_v14  ;;  %v4300_v14 = vsel %vm2540_vm12, %v8261_v47, -inf }
 0x82e   :  { %v8315_v61 = vpop.xlane.xlu1 %2735 }
 0x82f   :  { %10507 = vst [vmem:[#allocation29_spill] sm:$0xff] %v8315_v61  ;;  %v6289_v61 = vld [vmem:[%s10355_s0 + $0xc0] sm:$0xff] }
 0x831   :  { %4719 = vmax.xlane.f32.xlu0 %v4718_v55  ;;  %4716 = vmax.xlane.f32.xlu1 %v4715_v31 }
 0x835   :  { %3721 = vmax.xlane.f32.xlu0 %v3720_v39  ;;  %4722 = vmax.xlane.f32.xlu1 %v4721_v25 }
 0x839   :  { %3929 = vmax.xlane.f32.xlu0 %v3928_v40  ;;  %3751 = vmax.xlane.f32.xlu1 %v3750_v50 }
 0x83d   :  { %3989 = vmax.xlane.f32.xlu0 %v3988_v28  ;;  %3932 = vmax.xlane.f32.xlu1 %v3931_v35  ;;  %v4360_v28 = vsel %vm2540_vm12, %v8270_v63, -inf }
 0x83e   :  { %v2739_v33 = vpop.xlane.xlu0 %2738 }
 0x83f   :  { %v5683_v55 = vrot.slane %v2739_v33, %v8327_v62 }
 0x841   :  { %4298 = vmax.xlane.f32.xlu0 %v4297_v26  ;;  %3992 = vmax.xlane.f32.xlu1 %v3991_v57 }
 0x842   :  { %v2742_v22 = vpop.xlane.xlu1 %2741  ;;  %v2746_v49 = vpop.xlane.xlu0 %2745 }
 0x843   :  { %v5687_v31 = vrot.slane %v2742_v22, %v8330_v23  ;;  %v2827_v25 = vrot.slane %v2746_v49, %v6782_v17  ;;  %v4724_v22 = vsel %vm10404_vm15, %v7855_v32, -inf  ;;  %v6277_v32 = vld [vmem:[%s10355_s0] sm:$0xff]  ;;  %vm4268_vm15 = vcmask 74808  }
 0x845   :  { %v8339_v39 = vsel %vm10403_vm3, %v5687_v31, %v5683_v55  ;;  %4358 = vmax.xlane.f32.xlu0 %v4357_v18  ;;  %4301 = vmax.xlane.f32.xlu1 %v4300_v14  ;;  %vm5024_vm3 = vcmask 80959  }
 0x846   :  { %10510 = vst [vmem:[#allocation35_spill] sm:$0xff] %v8339_v39  ;;  %v2749_v40 = vpop.xlane.xlu1 %2748  ;;  %v2752_v50 = vpop.xlane.xlu0 %2751  ;;  %v8484_v39 = vld [vmem:[%s10355_s0 + $0xd0] sm:$0xff] }
 0x847   :  { %v2831_v35 = vrot.slane %v2749_v40, %v6782_v17  ;;  %v2835_v1 = vrot.slane %v2752_v50, %v6782_v17  ;;  %v5025_v40 = vsel %vm5024_vm3, %v6277_v32, -inf  ;;  %v4727_v50 = vsel %vm3314_vm0, %v8232_v51, -inf }
 0x849   :  { %v2904_v45 = vsel %vm406_vm4, %v2831_v35, %v2827_v25  ;;  %4665 = vmax.xlane.f32.xlu0 %v4664_v37  ;;  %4361 = vmax.xlane.f32.xlu1 %v4360_v28 }
 0x84a   :  { %v2905_v33 = vsel %vm408_vm5, %v2835_v1, %v2904_v45  ;;  %v2755_v26 = vpop.xlane.xlu1 %2754  ;;  %v2758_v57 = vpop.xlane.xlu0 %2757 }
 0x84b   :  { %v2839_v49 = vrot.slane %v2755_v26, %v6782_v17  ;;  %v2843_v18 = vrot.slane %v2758_v57, %v6782_v17  ;;  %v5028_v57 = vsel %vm4268_vm15, %v8179_v42, -inf  ;;  %v5034_v42 = vsel %vm4268_vm15, %v8188_v41, -inf }
 0x84c   :  { %v5088_v41 = vsel %vm4268_vm15, %v8197_v27, -inf }
 0x84d   :  { %v2906_v14 = vsel %vm410_vm6, %v2839_v49, %v2905_v33  ;;  %4725 = vmax.xlane.f32.xlu0 %v4724_v22  ;;  %4668 = vmax.xlane.f32.xlu1 %v4667_v34  ;;  %v6278_v33 = vld [vmem:[%s10355_s0 + $0x10] sm:$0xff] }
 0x84e   :  { %v2907_v55 = vsel %vm412_vm7, %v2843_v18, %v2906_v14  ;;  %v2761_v31 = vpop.xlane.xlu1 %2760  ;;  %v2764_v25 = vpop.xlane.xlu0 %2763  ;;  %v5031_v26 = vsel %vm5024_vm3, %v6278_v33, -inf }
 0x84f   :  { %v2847_v37 = vrot.slane %v2761_v31, %v6782_v17  ;;  %v2851_v28 = vrot.slane %v2764_v25, %v6782_v17  ;;  %v6279_v31 = vld [vmem:[%s10355_s0 + $0xa0] sm:$0xff] }
 0x850   :  { %v5085_v25 = vsel %vm5024_vm3, %v6279_v31, -inf }
 0x851   :  { %v2908_v35 = vsel %vm414_vm9, %v2847_v37, %v2907_v55  ;;  %5026 = vmax.xlane.f32.xlu0 %v5025_v40  ;;  %4728 = vmax.xlane.f32.xlu1 %v4727_v50 }
 0x852   :  { %v2767_v1 = vpop.xlane.xlu1 %2766  ;;  %v2770_v45 = vpop.xlane.xlu0 %2769  ;;  %v2909_v22 = vsel %vm10408_vm10, %v2851_v28, %v2908_v35  ;;  %v6280_v35 = vld [vmem:[%s10355_s0 + $0xb0] sm:$0xff] }
 0x853   :  { %v2855_v34 = vrot.slane %v2767_v1, %v6782_v17  ;;  %v2859_v49 = vrot.slane %v2770_v45, %v6782_v17  ;;  %v5091_v1 = vsel %vm5024_vm3, %v6280_v35, -inf }
 0x855   :  { %5032 = vmax.xlane.f32.xlu0 %v5031_v26  ;;  %5029 = vmax.xlane.f32.xlu1 %v5028_v57  ;;  %v8377_v18 = vsel %vm10405_vm11, %v2855_v34, %v2909_v22 }
 0x856   :  { %v2773_v14 = vpop.xlane.xlu1 %2772  ;;  %v2776_v55 = vpop.xlane.xlu0 %2775 }
 0x857   :  { %v2863_v32 = vrot.slane %v2773_v14, %v6782_v17  ;;  %v2867_v40 = vrot.slane %v2776_v55, %v6782_v17  ;;  %v5094_v14 = vsel %vm4268_vm15, %v8206_v30, -inf }
 0x859   :  { %5086 = vmax.xlane.f32.xlu0 %v5085_v25  ;;  %5035 = vmax.xlane.f32.xlu1 %v5034_v42  ;;  %v8388_v50 = vsel %vm406_vm4, %v2863_v32, %v2859_v49  ;;  %v8403_v49 = vld [vmem:[%s10355_s0 + $0x40] sm:$0xff] }
 0x85a   :  { %v2779_v37 = vpop.xlane.xlu1 %2778  ;;  %v2782_v28 = vpop.xlane.xlu0 %2781  ;;  %v3723_v27 = vsel %vm3710_vm2, %v8403_v49, -inf }
 0x85b   :  { %v2871_v45 = vrot.slane %v2779_v37, %v6782_v17  ;;  %v2875_v33 = vrot.slane %v2782_v28, %v6782_v17  ;;  %v8416_v37 = vld [vmem:[%s10355_s0 + $0x50] sm:$0xff]  ;;  %v8423_v28 = vld [vmem:[%s10355_s0 + $0xe0] sm:$0xff] }
 0x85c   :  { %v3934_v30 = vsel %vm3903_vm1, %v8416_v37, -inf  ;;  %v3753_v35 = vsel %vm3710_vm2, %v8423_v28, -inf }
 0x85d   :  { %v2912_v26 = vsel %vm406_vm4, %v2871_v45, %v2867_v40  ;;  %5092 = vmax.xlane.f32.xlu0 %v5091_v1  ;;  %5089 = vmax.xlane.f32.xlu1 %v5088_v41 }
 0x85e   :  { %v2913_v57 = vsel %vm408_vm5, %v2875_v33, %v2912_v26  ;;  %v2785_v22 = vpop.xlane.xlu1 %2784  ;;  %v2788_v34 = vpop.xlane.xlu0 %2787 }
 0x85f   :  { %v2879_v55 = vrot.slane %v2785_v22, %v6782_v17  ;;  %v2883_v31 = vrot.slane %v2788_v34, %v6782_v17  ;;  %v8435_v22 = vld [vmem:[%s10355_s0 + $0x58] sm:$0x3] }
 0x860   :  { %v3937_v34 = vsel %vm1766_vm13, %v8435_v22, -inf }
 0x861   :  { %v2914_v25 = vsel %vm410_vm6, %v2879_v55, %v2913_v57  ;;  %3724 = vmax.xlane.f32.xlu0 %v3723_v27  ;;  %5095 = vmax.xlane.f32.xlu1 %v5094_v14  ;;  %v3994_v57 = vsel %vm3903_vm1, %v7964_v24, -inf }
 0x862   :  { %v2915_v42 = vsel %vm412_vm7, %v2883_v31, %v2914_v25  ;;  %v2791_v32 = vpop.xlane.xlu1 %2790  ;;  %v2794_v40 = vpop.xlane.xlu0 %2793 }
 0x863   :  { %v2887_v1 = vrot.slane %v2791_v32, %v6782_v17  ;;  %v2891_v41 = vrot.slane %v2794_v40, %v6782_v17  ;;  %v4303_v32 = vsel %vm4278_vm14, %v8403_v49, -inf  ;;  %v8450_v40 = vld [vmem:[%s10355_s0 + $0xf8] sm:$0x3] }
 0x864   :  { %v4372_v5 = vsel %vm2540_vm12, %v8450_v40, -inf }
 0x865   :  { %v2916_v45 = vsel %vm414_vm9, %v2887_v1, %v2915_v42  ;;  %3935 = vmax.xlane.f32.xlu0 %v3934_v30  ;;  %3754 = vmax.xlane.f32.xlu1 %v3753_v35  ;;  %v3997_v30 = vsel %vm1766_vm13, %v8450_v40, -inf }
 0x866   :  { %v2797_v33 = vpop.xlane.xlu1 %2796  ;;  %v2800_v26 = vpop.xlane.xlu0 %2799  ;;  %v2917_v27 = vsel %vm10408_vm10, %v2891_v41, %v2916_v45 }
 0x867   :  { %v2895_v14 = vrot.slane %v2797_v33, %v6782_v17  ;;  %v2899_v55 = vrot.slane %v2800_v26, %v6782_v17  ;;  %v4306_v26 = vsel %vm2540_vm12, %v8309_v36, -inf }
 0x869   :  { %3995 = vmax.xlane.f32.xlu0 %v3994_v57  ;;  %3938 = vmax.xlane.f32.xlu1 %v3937_v34  ;;  %v8443_v31 = vsel %vm10405_vm11, %v2895_v14, %v2917_v27  ;;  %v4363_v57 = vsel %vm4278_vm14, %v8423_v28, -inf  ;;  %vm10511_vm11 = vcmask 64559  }
 0x86a   :  { %v2803_v25 = vpop.xlane.xlu1 %2802  ;;  %v3906_v42 = vpop.xlane.xlu0 %3905  ;;  %v4676_v3 = vsel %vm10511_vm11, %v8403_v49, -inf  ;;  %vm10512_vm10 = vmmov %vm10511_vm11 }
 0x86b   :  { %v2903_v35 = vrot.slane %v2803_v25, %v6782_v17  ;;  %v4067_v1 = vrot.slane %v3906_v42, %v6782_v17 }
 0x86d   :  { %4304 = vmax.xlane.f32.xlu0 %v4303_v32  ;;  %3998 = vmax.xlane.f32.xlu1 %v3997_v30  ;;  %v8457_v41 = vsel %vm406_vm4, %v2903_v35, %v2899_v55  ;;  %v4366_v55 = vsel %vm2540_vm12, %v8322_v46, -inf  ;;  %v8471_v32 = vld [vmem:[%s10355_s0 + $0x30] sm:$0xff] }
 0x86e   :  { %v3909_v45 = vpop.xlane.xlu1 %3908  ;;  %v3912_v33 = vpop.xlane.xlu0 %3911  ;;  %v4670_v30 = vsel %vm10511_vm11, %v8471_v32, -inf }
 0x86f   :  { %v4071_v34 = vrot.slane %v3909_v45, %v6793_v13  ;;  %v4076_v14 = vrot.slane %v3912_v33, %v6782_v17 }
 0x871   :  { %v4072_v27 = vsel %vm233_vm8, %v4071_v34, %v4067_v1  ;;  %4307 = vmax.xlane.f32.xlu1 %v4306_v26  ;;  %4364 = vmax.xlane.f32.xlu0 %v4363_v57  ;;  %v4673_v34 = vsel %vm3314_vm0, %v8261_v47, -inf }
 0x872   :  { %v3915_v25 = vpop.xlane.xlu1 %3914  ;;  %v3966_v42 = vpop.xlane.xlu0 %3965 }
 0x873   :  { %v4080_v35 = vrot.slane %v3915_v25, %v6793_v13  ;;  %v4157_v45 = vrot.slane %v3966_v42, %v6782_v17  ;;  %v4730_v25 = vsel %vm10511_vm11, %v8484_v39, -inf }
 0x875   :  { %v4081_v1 = vsel %vm233_vm8, %v4080_v35, %v4076_v14  ;;  %4367 = vmax.xlane.f32.xlu1 %v4366_v55  ;;  %4671 = vmax.xlane.f32.xlu0 %v4670_v30  ;;  %v4733_v35 = vsel %vm3314_vm0, %v8270_v63, -inf }
 0x876   :  { %v4244_v33 = vsel %vm406_vm4, %v4081_v1, %v4072_v27  ;;  %v3969_v26 = vpop.xlane.xlu1 %3968  ;;  %v3972_v57 = vpop.xlane.xlu0 %3971  ;;  %v6288_v1 = vld [vmem:[%s10355_s0 + $0x20] sm:$0xff] }
 0x877   :  { %v4161_v14 = vrot.slane %v3969_v26, %v6793_v13  ;;  %v4166_v55 = vrot.slane %v3972_v57, %v6782_v17  ;;  %v5037_v38 = vsel %vm5024_vm3, %v6288_v1, -inf  ;;  %v5097_v1 = vsel %vm5024_vm3, %v6289_v61, -inf }
 0x879   :  { %v4162_v42 = vsel %vm233_vm8, %v4161_v14, %v4157_v45  ;;  %4674 = vmax.xlane.f32.xlu1 %v4673_v34  ;;  %4731 = vmax.xlane.f32.xlu0 %v4730_v25  ;;  %v5040_v14 = vsel %vm4268_vm15, %v8223_v6, -inf  ;;  %v5100_v6 = vsel %vm4268_vm15, %v8232_v51, -inf  ;;  %v8526_v51 = vld [vmem:[%s10355_s0 + $0x60] sm:$0xff] }
 0x87a   :  { %v3975_v27 = vpop.xlane.xlu1 %3974  ;;  %v3713_v30 = vpop.xlane.xlu0 %3712 }
 0x87b   :  { %v4170_v62 = vrot.slane %v3975_v27, %v6793_v13  ;;  %v3794_v45 = vrot.slane %v3713_v30, %v6782_v17  ;;  %v3726_v30 = vsel %vm3710_vm2, %v8416_v37, -inf }
 0x87d   :  { %v4171_v26 = vsel %vm233_vm8, %v4170_v62, %v4166_v55  ;;  %4734 = vmax.xlane.f32.xlu1 %v4733_v35  ;;  %5038 = vmax.xlane.f32.xlu0 %v5037_v38 }
 0x87e   :  { %v4252_v57 = vsel %vm406_vm4, %v4171_v26, %v4162_v42  ;;  %v3716_v34 = vpop.xlane.xlu1 %3715  ;;  %v3743_v25 = vpop.xlane.xlu0 %3742 }
 0x87f   :  { %v3798_v27 = vrot.slane %v3716_v34, %v6782_v17  ;;  %v3834_v38 = vrot.slane %v3743_v25, %v6782_v17  ;;  %v3756_v25 = vsel %vm3710_vm2, %v7964_v24, -inf }
 0x881   :  { %v8509_v62 = vsel %vm406_vm4, %v3798_v27, %v3794_v45  ;;  %5041 = vmax.xlane.f32.xlu1 %v5040_v14  ;;  %5098 = vmax.xlane.f32.xlu0 %v5097_v1  ;;  %v3940_v14 = vsel %vm3903_vm1, %v8526_v51, -inf }
 0x882   :  { %v3746_v42 = vpop.xlane.xlu1 %3745  ;;  %v3918_v55 = vpop.xlane.xlu0 %3917 }
 0x883   :  { %v3838_v35 = vrot.slane %v3746_v42, %v6782_v17  ;;  %v4085_v26 = vrot.slane %v3918_v55, %v6782_v17 }
 0x885   :  { %v8518_v61 = vsel %vm406_vm4, %v3838_v35, %v3834_v38  ;;  %5101 = vmax.xlane.f32.xlu1 %v5100_v6  ;;  %3727 = vmax.xlane.f32.xlu0 %v3726_v30  ;;  %v8539_v6 = vld [vmem:[%s10355_s0 + $0x68] sm:$0x3]  ;;  %v8546_v35 = vld [vmem:[%s10355_s0 + $0x100] sm:$0xff] }
 0x886   :  { %v3921_v45 = vpop.xlane.xlu1 %3920  ;;  %v3978_v34 = vpop.xlane.xlu0 %3977  ;;  %v3943_v30 = vsel %vm1766_vm13, %v8539_v6, -inf }
 0x887   :  { %v4089_v1 = vrot.slane %v3921_v45, %v6793_v13  ;;  %v4175_v38 = vrot.slane %v3978_v34, %v6782_v17 }
 0x889   :  { %v4090_v27 = vsel %vm233_vm8, %v4089_v1, %v4085_v26  ;;  %3757 = vmax.xlane.f32.xlu1 %v3756_v25  ;;  %3941 = vmax.xlane.f32.xlu0 %v3940_v14  ;;  %v4000_v26 = vsel %vm3903_vm1, %v8546_v35, -inf }
 0x88a   :  { %v8534_v42 = vsel %vm408_vm5, %v4090_v27, %v4244_v33  ;;  %v3981_v24 = vpop.xlane.xlu1 %3980  ;;  %v4281_v55 = vpop.xlane.xlu0 %4280  ;;  %v8559_v27 = vld [vmem:[%s10355_s0 + $0x108] sm:$0x3] }
 0x88b   :  { %v4179_v33 = vrot.slane %v3981_v24, %v6793_v13  ;;  %v4442_v34 = vrot.slane %v4281_v55, %v6782_v17  ;;  %v4003_v23 = vsel %vm1766_vm13, %v8559_v27, -inf }
 0x88d   :  { %v4180_v45 = vsel %vm233_vm8, %v4179_v33, %v4175_v38  ;;  %3944 = vmax.xlane.f32.xlu1 %v3943_v30  ;;  %4001 = vmax.xlane.f32.xlu0 %v4000_v26  ;;  %v4309_v38 = vsel %vm4278_vm14, %v8416_v37, -inf  ;;  %v4312_v33 = vsel %vm2540_vm12, %v8435_v22, -inf }
 0x88e   :  { %v8554_v25 = vsel %vm408_vm5, %v4180_v45, %v4252_v57  ;;  %v4284_v14 = vpop.xlane.xlu1 %4283  ;;  %v4287_v1 = vpop.xlane.xlu0 %4286  ;;  %v8573_v45 = vld [vmem:[%s10355_s0 + $0xf0] sm:$0xff] }
 0x88f   :  { %v4446_v24 = vrot.slane %v4284_v14, %v6793_v13  ;;  %v4451_v57 = vrot.slane %v4287_v1, %v6782_v17  ;;  %v4369_v43 = vsel %vm4278_vm14, %v8573_v45, -inf }
 0x891   :  { %v4447_v55 = vsel %vm233_vm8, %v4446_v24, %v4442_v34  ;;  %4004 = vmax.xlane.f32.xlu1 %v4003_v23  ;;  %4310 = vmax.xlane.f32.xlu0 %v4309_v38 }
 0x892   :  { %v4290_v30 = vpop.xlane.xlu1 %4289  ;;  %v4341_v26 = vpop.xlane.xlu0 %4340 }
 0x893   :  { %v4455_v14 = vrot.slane %v4290_v30, %v6793_v13  ;;  %v4532_v23 = vrot.slane %v4341_v26, %v6782_v17 }
 0x895   :  { %v4456_v34 = vsel %vm233_vm8, %v4455_v14, %v4451_v57  ;;  %4313 = vmax.xlane.f32.xlu1 %v4312_v33  ;;  %4370 = vmax.xlane.f32.xlu0 %v4369_v43  ;;  %v4736_v33 = vsel %vm10512_vm10, %v8423_v28, -inf }
 0x896   :  { %v4619_v1 = vsel %vm406_vm4, %v4456_v34, %v4447_v55  ;;  %v4344_v38 = vpop.xlane.xlu1 %4343  ;;  %v4347_v24 = vpop.xlane.xlu0 %4346  ;;  %v4679_v55 = vsel %vm3314_vm0, %v8309_v36, -inf }
 0x897   :  { %v4536_v44 = vrot.slane %v4344_v38, %v6793_v13  ;;  %v4541_v57 = vrot.slane %v4347_v24, %v6782_v17  ;;  %v4739_v24 = vsel %vm3314_vm0, %v8322_v46, -inf }
 0x899   :  { %v4537_v30 = vsel %vm233_vm8, %v4536_v44, %v4532_v23  ;;  %4373 = vmax.xlane.f32.xlu1 %v4372_v5  ;;  %4677 = vmax.xlane.f32.xlu0 %v4676_v3 }
 0x89a   :  { %v4350_v26 = vpop.xlane.xlu1 %4349  ;;  %v3719_v43 = vpop.xlane.xlu0 %3718 }
 0x89b   :  { %v4545_v14 = vrot.slane %v4350_v26, %v6793_v13  ;;  %v3802_v34 = vrot.slane %v3719_v43, %v6782_v17  ;;  %v5043_v26 = vsel %vm5024_vm3, %v8471_v32, -inf }
 0x89d   :  { %v4546_v38 = vsel %vm233_vm8, %v4545_v14, %v4541_v57  ;;  %v8597_v44 = vsel %vm408_vm5, %v3802_v34, %v8509_v62  ;;  %4680 = vmax.xlane.f32.xlu1 %v4679_v55  ;;  %4737 = vmax.xlane.f32.xlu0 %v4736_v33  ;;  %v5046_v33 = vsel %vm4268_vm15, %v8261_v47, -inf  ;;  %v5103_v14 = vsel %vm5024_vm3, %v8484_v39, -inf }
 0x89e   :  { %v4627_v3 = vsel %vm406_vm4, %v4546_v38, %v4537_v30  ;;  %v3749_v5 = vpop.xlane.xlu1 %3748  ;;  %v3924_v23 = vpop.xlane.xlu0 %3923  ;;  %v5106_v47 = vsel %vm4268_vm15, %v8270_v63, -inf  ;;  %v3729_v39 = vsel %vm3710_vm2, %v8526_v51, -inf  ;;  %v3759_v63 = vsel %vm3710_vm2, %v8546_v35, -inf }
 0x89f   :  { %v3842_v43 = vrot.slane %v3749_v5, %v6782_v17  ;;  %v4094_v62 = vrot.slane %v3924_v23, %v6782_v17 }
 0x8a1   :  { %v8607_v57 = vsel %vm408_vm5, %v3842_v43, %v8518_v61  ;;  %4740 = vmax.xlane.f32.xlu1 %v4739_v24  ;;  %5044 = vmax.xlane.f32.xlu0 %v5043_v26 }
 0x8a2   :  { %v3927_v55 = vpop.xlane.xlu1 %3926  ;;  %v3984_v30 = vpop.xlane.xlu0 %3983 }
 0x8a3   :  { %v4098_v32 = vrot.slane %v3927_v55, %v6793_v13  ;;  %v4184_v38 = vrot.slane %v3984_v30, %v6782_v17  ;;  %v8637_v30 = vld [vmem:[%s10355_s0 + $0x70] sm:$0xff] }
 0x8a5   :  { %v4099_v34 = vsel %vm233_vm8, %v4098_v32, %v4094_v62  ;;  %5047 = vmax.xlane.f32.xlu1 %v5046_v33  ;;  %5104 = vmax.xlane.f32.xlu0 %v5103_v14  ;;  %v3946_v33 = vsel %vm3903_vm1, %v8637_v30, -inf }
 0x8a6   :  { %v8619_v61 = vsel %vm410_vm6, %v4099_v34, %v8534_v42  ;;  %v3987_v5 = vpop.xlane.xlu1 %3986  ;;  %v4293_v23 = vpop.xlane.xlu0 %4292 }
 0x8a7   :  { %v4188_v24 = vrot.slane %v3987_v5, %v6793_v13  ;;  %v4460_v43 = vrot.slane %v4293_v23, %v6782_v17  ;;  %v8650_v23 = vld [vmem:[%s10355_s0 + $0x78] sm:$0x3] }
 0x8a9   :  { %v4189_v26 = vsel %vm233_vm8, %v4188_v24, %v4184_v38  ;;  %5107 = vmax.xlane.f32.xlu1 %v5106_v47  ;;  %3730 = vmax.xlane.f32.xlu0 %v3729_v39  ;;  %v3949_v47 = vsel %vm1766_vm13, %v8650_v23, -inf  ;;  %v8657_v39 = vld [vmem:[%s10355_s0 + $0x80] sm:$0xff] }
 0x8aa   :  { %v8630_v42 = vsel %vm410_vm6, %v4189_v26, %v8554_v25  ;;  %v4296_v62 = vpop.xlane.xlu1 %4295  ;;  %v4353_v55 = vpop.xlane.xlu0 %4352  ;;  %v3952_v24 = vsel %vm3903_vm1, %v8657_v39, -inf }
 0x8ab   :  { %v4464_v14 = vrot.slane %v4296_v62, %v6793_v13  ;;  %v4550_v25 = vrot.slane %v4353_v55, %v6782_v17 }
 0x8ad   :  { %v4465_v32 = vsel %vm233_vm8, %v4464_v14, %v4460_v43  ;;  %3760 = vmax.xlane.f32.xlu1 %v3759_v63  ;;  %3947 = vmax.xlane.f32.xlu0 %v3946_v33  ;;  %v8670_v33 = vld [vmem:[%s10355_s0 + $0x88] sm:$0x3] }
 0x8ae   :  { %v8645_v34 = vsel %vm408_vm5, %v4465_v32, %v4619_v1  ;;  %v4356_v38 = vpop.xlane.xlu1 %4355  ;;  %v4654_v5 = vpop.xlane.xlu0 %4653  ;;  %v3955_v14 = vsel %vm1766_vm13, %v8670_v33, -inf  ;;  %v8677_v32 = vld [vmem:[%s10355_s0 + $0x90] sm:$0xff] }
 0x8af   :  { %v4554_v1 = vrot.slane %v4356_v38, %v6793_v13  ;;  %v4815_v43 = vrot.slane %v4654_v5, %v6782_v17 }
 0x8b1   :  { %v4555_v26 = vsel %vm233_vm8, %v4554_v1, %v4550_v25  ;;  %3950 = vmax.xlane.f32.xlu1 %v3949_v47  ;;  %3953 = vmax.xlane.f32.xlu0 %v3952_v24  ;;  %v3958_v25 = vsel %vm3903_vm1, %v8677_v32, -inf  ;;  %v8687_v1 = vld [vmem:[%s10355_s0 + $0x98] sm:$0x3] }
 0x8b2   :  { %v8665_v62 = vsel %vm408_vm5, %v4555_v26, %v4627_v3  ;;  %v4657_v55 = vpop.xlane.xlu1 %4656  ;;  %v4660_v63 = vpop.xlane.xlu0 %4659  ;;  %v3961_v26 = vsel %vm1766_vm13, %v8687_v1, -inf }
 0x8b3   :  { %v4819_v3 = vrot.slane %v4657_v55, %v6793_v13  ;;  %v4824_v5 = vrot.slane %v4660_v63, %v6782_v17  ;;  %v8694_v55 = vld [vmem:[%s10355_s0 + $0x110] sm:$0xff] }
 0x8b5   :  { %v4820_v38 = vsel %vm233_vm8, %v4819_v3, %v4815_v43  ;;  %3956 = vmax.xlane.f32.xlu1 %v3955_v14  ;;  %3959 = vmax.xlane.f32.xlu0 %v3958_v25  ;;  %v4006_v43 = vsel %vm3903_vm1, %v8694_v55, -inf }
 0x8b6   :  { %v4663_v47 = vpop.xlane.xlu1 %4662  ;;  %v4714_v24 = vpop.xlane.xlu0 %4713 }
 0x8b7   :  { %v4828_v63 = vrot.slane %v4663_v47, %v6793_v13  ;;  %v4905_v25 = vrot.slane %v4714_v24, %v6782_v17 }
 0x8b9   :  { %v4829_v14 = vsel %vm233_vm8, %v4828_v63, %v4824_v5  ;;  %3962 = vmax.xlane.f32.xlu1 %v3961_v26  ;;  %4007 = vmax.xlane.f32.xlu0 %v4006_v43  ;;  %v8714_v5 = vld [vmem:[%s10355_s0 + $0x120] sm:$0xff] }
 0x8ba   :  { %v8702_v3 = vsel %vm406_vm4, %v4829_v14, %v4820_v38  ;;  %v4717_v4 = vpop.xlane.xlu1 %4716  ;;  %v4720_v52 = vpop.xlane.xlu0 %4719  ;;  %v4012_v47 = vsel %vm3903_vm1, %v8714_v5, -inf  ;;  %v8724_v14 = vld [vmem:[%s10355_s0 + $0x128] sm:$0x3] }
 0x8bb   :  { %v4909_v38 = vrot.slane %v4717_v4, %v6793_v13  ;;  %v4914_v26 = vrot.slane %v4720_v52, %v6782_v17  ;;  %v4015_v56 = vsel %vm1766_vm13, %v8724_v14, -inf  ;;  %v8731_v4 = vld [vmem:[%s10355_s0 + $0x130] sm:$0xff] }
 0x8bc   :  { %v4018_v52 = vsel %vm3903_vm1, %v8731_v4, -inf  ;;  %vm10514_vm1 = vmmov %vm10512_vm10 }
 0x8bd   :  { %v4910_v24 = vsel %vm233_vm8, %v4909_v38, %v4905_v25  ;;  %4010 = vmax.xlane.f32.xlu1 %v4009_v60  ;;  %4013 = vmax.xlane.f32.xlu0 %v4012_v47  ;;  %vm10517_vm11 = vmmov %vm10514_vm1 }
 0x8be   :  { %v4723_v43 = vpop.xlane.xlu1 %4722  ;;  %v3722_v63 = vpop.xlane.xlu0 %3721 }
 0x8bf   :  { %v4918_v60 = vrot.slane %v4723_v43, %v6793_v13  ;;  %v3806_v25 = vrot.slane %v3722_v63, %v6782_v17  ;;  %v4021_v43 = vsel %vm1766_vm13, %v8748_v48, -inf  ;;  %vm10513_vm13 = vmmov %vm10512_vm10 }
 0x8c1   :  { %v4919_v47 = vsel %vm233_vm8, %v4918_v60, %v4914_v26  ;;  %v8740_v38 = vsel %vm410_vm6, %v3806_v25, %v8597_v44  ;;  %4016 = vmax.xlane.f32.xlu1 %v4015_v56  ;;  %4019 = vmax.xlane.f32.xlu0 %v4018_v52  ;;  %v4315_v26 = vsel %vm4278_vm14, %v8526_v51, -inf  ;;  %v4318_v60 = vsel %vm2540_vm12, %v8539_v6, -inf }
 0x8c2   :  { %v8743_v12 = vsel %vm406_vm4, %v4919_v47, %v4910_v24  ;;  %v3752_v29 = vpop.xlane.xlu1 %3751  ;;  %v3930_v19 = vpop.xlane.xlu0 %3929  ;;  %v4375_v25 = vsel %vm4278_vm14, %v8546_v35, -inf }
 0x8c3   :  { %v3846_v44 = vrot.slane %v3752_v29, %v6782_v17  ;;  %v4103_v24 = vrot.slane %v3930_v19, %v6782_v17 }
 0x8c5   :  { %v8757_v56 = vsel %vm410_vm6, %v3846_v44, %v8607_v57  ;;  %4022 = vmax.xlane.f32.xlu1 %v4021_v43  ;;  %4316 = vmax.xlane.f32.xlu0 %v4315_v26  ;;  %v4378_v26 = vsel %vm2540_vm12, %v8559_v27, -inf  ;;  %v4682_v44 = vsel %vm10512_vm10, %v8416_v37, -inf  ;;  %vm10518_vm10 = vmmov %vm10514_vm1 }
 0x8c6   :  { %v3933_v63 = vpop.xlane.xlu1 %3932  ;;  %v3990_v52 = vpop.xlane.xlu0 %3989 }
 0x8c7   :  { %v4107_v47 = vrot.slane %v3933_v63, %v6793_v13  ;;  %v4193_v53 = vrot.slane %v3990_v52, %v6782_v17 }
 0x8c9   :  { %v4108_v29 = vsel %vm233_vm8, %v4107_v47, %v4103_v24  ;;  %4319 = vmax.xlane.f32.xlu1 %v4318_v60  ;;  %4376 = vmax.xlane.f32.xlu0 %v4375_v25  ;;  %v4685_v47 = vsel %vm3314_vm0, %v8435_v22, -inf }
 0x8ca   :  { %v8769_v19 = vsel %vm412_vm7, %v4108_v29, %v8619_v61  ;;  %v3993_v57 = vpop.xlane.xlu1 %3992  ;;  %v4299_v43 = vpop.xlane.xlu0 %4298  ;;  %v4742_v29 = vsel %vm10513_vm13, %v8573_v45, -inf  ;;  %vm10519_vm13 = vmmov %vm10514_vm1 }
 0x8cb   :  { %v4197_v63 = vrot.slane %v3993_v57, %v6793_v13  ;;  %v4469_v52 = vrot.slane %v4299_v43, %v6782_v17 }
 0x8cd   :  { %v4198_v24 = vsel %vm233_vm8, %v4197_v63, %v4193_v53  ;;  %4379 = vmax.xlane.f32.xlu1 %v4378_v26  ;;  %4683 = vmax.xlane.f32.xlu0 %v4682_v44  ;;  %v4745_v63 = vsel %vm3314_vm0, %v8450_v40, -inf }
 0x8ce   :  { %v8780_v61 = vsel %vm412_vm7, %v4198_v24, %v8630_v42  ;;  %v4302_v60 = vpop.xlane.xlu1 %4301  ;;  %v4359_v25 = vpop.xlane.xlu0 %4358  ;;  %v5049_v24 = vsel %vm5024_vm3, %v8403_v49, -inf  ;;  %v5109_v49 = vsel %vm5024_vm3, %v8423_v28, -inf  ;;  %v3732_v28 = vsel %vm3710_vm2, %v8637_v30, -inf }
 0x8cf   :  { %v4473_v57 = vrot.slane %v4302_v60, %v6793_v13  ;;  %v4559_v43 = vrot.slane %v4359_v25, %v6782_v17 }
 0x8d1   :  { %v4474_v53 = vsel %vm233_vm8, %v4473_v57, %v4469_v52  ;;  %4686 = vmax.xlane.f32.xlu1 %v4685_v47  ;;  %4743 = vmax.xlane.f32.xlu0 %v4742_v29  ;;  %v5052_v57 = vsel %vm4268_vm15, %v8309_v36, -inf  ;;  %v5112_v36 = vsel %vm4268_vm15, %v8322_v46, -inf  ;;  %v3735_v46 = vsel %vm3710_vm2, %v8657_v39, -inf }
 0x8d2   :  { %v8791_v42 = vsel %vm410_vm6, %v4474_v53, %v8645_v34  ;;  %v4362_v26 = vpop.xlane.xlu1 %4361  ;;  %v4666_v44 = vpop.xlane.xlu0 %4665 }
 0x8d3   :  { %v4563_v60 = vrot.slane %v4362_v26, %v6793_v13  ;;  %v4833_v25 = vrot.slane %v4666_v44, %v6782_v17 }
 0x8d5   :  { %v4564_v52 = vsel %vm233_vm8, %v4563_v60, %v4559_v43  ;;  %4746 = vmax.xlane.f32.xlu1 %v4745_v63  ;;  %5050 = vmax.xlane.f32.xlu0 %v5049_v24 }
 0x8d6   :  { %v8802_v34 = vsel %vm410_vm6, %v4564_v52, %v8665_v62  ;;  %v4669_v47 = vpop.xlane.xlu1 %4668  ;;  %v4726_v29 = vpop.xlane.xlu0 %4725 }
 0x8d7   :  { %v4837_v53 = vrot.slane %v4669_v47, %v6793_v13  ;;  %v4923_v26 = vrot.slane %v4726_v29, %v6782_v17  ;;  %v3738_v29 = vsel %vm3710_vm2, %v8677_v32, -inf }
 0x8d9   :  { %v4838_v43 = vsel %vm233_vm8, %v4837_v53, %v4833_v25  ;;  %5053 = vmax.xlane.f32.xlu1 %v5052_v57  ;;  %5110 = vmax.xlane.f32.xlu0 %v5109_v49 }
 0x8da   :  { %v8813_v62 = vsel %vm408_vm5, %v4838_v43, %v8702_v3  ;;  %v4729_v44 = vpop.xlane.xlu1 %4728  ;;  %v5027_v63 = vpop.xlane.xlu0 %5026 }
 0x8db   :  { %v4927_v24 = vrot.slane %v4729_v44, %v6793_v13  ;;  %v5188_v52 = vrot.slane %v5027_v63, %v6782_v17  ;;  %v3765_v44 = vsel %vm3710_vm2, %v8714_v5, -inf }
 0x8dd   :  { %v4928_v60 = vsel %vm233_vm8, %v4927_v24, %v4923_v26  ;;  %5113 = vmax.xlane.f32.xlu1 %v5112_v36  ;;  %3733 = vmax.xlane.f32.xlu0 %v3732_v28 }
 0x8de   :  { %v8824_v3 = vsel %vm408_vm5, %v4928_v60, %v8743_v12  ;;  %v5030_v25 = vpop.xlane.xlu1 %5029  ;;  %v5033_v47 = vpop.xlane.xlu0 %5032  ;;  %v3762_v12 = vsel %vm3710_vm2, %v8694_v55, -inf }
 0x8df   :  { %v5192_v57 = vrot.slane %v5030_v25, %v6793_v13  ;;  %v5197_v53 = vrot.slane %v5033_v47, %v6782_v17  ;;  %v3768_v25 = vsel %vm3710_vm2, %v8731_v4, -inf  ;;  %v4321_v47 = vsel %vm4278_vm14, %v8637_v30, -inf  ;;  %vm10515_vm2 = vmmov %vm10514_vm1 }
 0x8e1   :  { %v5193_v49 = vsel %vm233_vm8, %v5192_v57, %v5188_v52  ;;  %3736 = vmax.xlane.f32.xlu1 %v3735_v46  ;;  %3739 = vmax.xlane.f32.xlu0 %v3738_v29 }
 0x8e2   :  { %v5036_v43 = vpop.xlane.xlu1 %5035  ;;  %v5087_v26 = vpop.xlane.xlu0 %5086 }
 0x8e3   :  { %v5201_v63 = vrot.slane %v5036_v43, %v6793_v13  ;;  %v5278_v28 = vrot.slane %v5087_v26, %v6782_v17  ;;  %v4327_v26 = vsel %vm4278_vm14, %v8657_v39, -inf }
 0x8e5   :  { %v5202_v36 = vsel %vm233_vm8, %v5201_v63, %v5197_v53  ;;  %3763 = vmax.xlane.f32.xlu1 %v3762_v12  ;;  %3766 = vmax.xlane.f32.xlu0 %v3765_v44 }
 0x8e6   :  { %v8841_v24 = vsel %vm406_vm4, %v5202_v36, %v5193_v49  ;;  %v5090_v60 = vpop.xlane.xlu1 %5089  ;;  %v5093_v52 = vpop.xlane.xlu0 %5092  ;;  %v4324_v49 = vsel %vm2540_vm12, %v8650_v23, -inf }
 0x8e7   :  { %v5282_v46 = vrot.slane %v5090_v60, %v6793_v13  ;;  %v5287_v57 = vrot.slane %v5093_v52, %v6782_v17 }
 0x8e9   :  { %v5283_v29 = vsel %vm233_vm8, %v5282_v46, %v5278_v28  ;;  %3769 = vmax.xlane.f32.xlu1 %v3768_v25  ;;  %4322 = vmax.xlane.f32.xlu0 %v4321_v47  ;;  %v4330_v25 = vsel %vm2540_vm12, %v8670_v33, -inf  ;;  %v4333_v47 = vsel %vm4278_vm14, %v8677_v32, -inf }
 0x8ea   :  { %v5096_v53 = vpop.xlane.xlu1 %5095  ;;  %v3725_v43 = vpop.xlane.xlu0 %3724 }
 0x8eb   :  { %v5291_v12 = vrot.slane %v5096_v53, %v6793_v13  ;;  %v3810_v44 = vrot.slane %v3725_v43, %v6782_v17  ;;  %v4336_v43 = vsel %vm2540_vm12, %v8687_v1, -inf }
 0x8ed   :  { %v5292_v63 = vsel %vm233_vm8, %v5291_v12, %v5287_v57  ;;  %v8859_v36 = vsel %vm412_vm7, %v3810_v44, %v8740_v38  ;;  %4325 = vmax.xlane.f32.xlu1 %v4324_v49  ;;  %4328 = vmax.xlane.f32.xlu0 %v4327_v26  ;;  %v4381_v49 = vsel %vm4278_vm14, %v8694_v55, -inf }
 0x8ee   :  { %v8862_v28 = vsel %vm406_vm4, %v5292_v63, %v5283_v29  ;;  %v3755_v60 = vpop.xlane.xlu1 %3754  ;;  %v3936_v52 = vpop.xlane.xlu0 %3935 }
 0x8ef   :  { %v3850_v46 = vrot.slane %v3755_v60, %v6782_v17  ;;  %v4112_v38 = vrot.slane %v3936_v52, %v6782_v17  ;;  %v4384_v60 = vsel %vm2540_vm12, %v8707_v9, -inf  ;;  %v4387_v52 = vsel %vm4278_vm14, %v8714_v5, -inf }
 0x8f1   :  { %v8871_v57 = vsel %vm412_vm7, %v3850_v46, %v8757_v56  ;;  %4331 = vmax.xlane.f32.xlu1 %v4330_v25  ;;  %4334 = vmax.xlane.f32.xlu0 %v4333_v47 }
 0x8f2   :  { %v3939_v29 = vpop.xlane.xlu1 %3938  ;;  %v3996_v53 = vpop.xlane.xlu0 %3995 }
 0x8f3   :  { %v4116_v26 = vrot.slane %v3939_v29, %v6793_v13  ;;  %v4202_v44 = vrot.slane %v3996_v53, %v6782_v17 }
 0x8f5   :  { %v4117_v12 = vsel %vm233_vm8, %v4116_v26, %v4112_v38  ;;  %4337 = vmax.xlane.f32.xlu1 %v4336_v43  ;;  %4382 = vmax.xlane.f32.xlu0 %v4381_v49  ;;  %v4390_v43 = vsel %vm2540_vm12, %v8724_v14, -inf  ;;  %v4393_v49 = vsel %vm4278_vm14, %v8731_v4, -inf  ;;  %vm10516_vm14 = vmmov %vm10514_vm1 }
 0x8f6   :  { %v3999_v56 = vpop.xlane.xlu1 %3998  ;;  %v4305_v63 = vpop.xlane.xlu0 %4304  ;;  %v8887_v25 = vsel %vm414_vm9, %v4117_v12, %v8769_v19 }
 0x8f7   :  { %v4206_v47 = vrot.slane %v3999_v56, %v6793_v13  ;;  %v4478_v38 = vrot.slane %v4305_v63, %v6782_v17 }
 0x8f9   :  { %v4207_v46 = vsel %vm233_vm8, %v4206_v47, %v4202_v44  ;;  %4385 = vmax.xlane.f32.xlu1 %v4384_v60  ;;  %4388 = vmax.xlane.f32.xlu0 %v4387_v52  ;;  %v4396_v52 = vsel %vm2540_vm12, %v8748_v48, -inf }
 0x8fa   :  { %v4308_v29 = vpop.xlane.xlu1 %4307  ;;  %v4365_v53 = vpop.xlane.xlu0 %4364  ;;  %v8898_v19 = vsel %vm414_vm9, %v4207_v46, %v8780_v61  ;;  %v4688_v61 = vsel %vm10514_vm1, %v8526_v51, -inf  ;;  %vm10520_vm1 = vcmask 1046534  }
 0x8fb   :  { %v4482_v26 = vrot.slane %v4308_v29, %v6793_v13  ;;  %v4568_v44 = vrot.slane %v4365_v53, %v6782_v17 }
 0x8fd   :  { %v4483_v12 = vsel %vm233_vm8, %v4482_v26, %v4478_v38  ;;  %4391 = vmax.xlane.f32.xlu1 %v4390_v43  ;;  %4394 = vmax.xlane.f32.xlu0 %v4393_v49  ;;  %v4691_v43 = vsel %vm3314_vm0, %v8539_v6, -inf  ;;  %v4748_v49 = vsel %vm10515_vm2, %v8546_v35, -inf }
 0x8fe   :  { %v8905_v56 = vsel %vm412_vm7, %v4483_v12, %v8791_v42  ;;  %v4368_v63 = vpop.xlane.xlu1 %4367  ;;  %v4672_v60 = vpop.xlane.xlu0 %4671 }
 0x8ff   :  { %v4572_v47 = vrot.slane %v4368_v63, %v6793_v13  ;;  %v4842_v38 = vrot.slane %v4672_v60, %v6782_v17 }
 0x901   :  { %v4573_v46 = vsel %vm233_vm8, %v4572_v47, %v4568_v44  ;;  %4397 = vmax.xlane.f32.xlu1 %v4396_v52  ;;  %4689 = vmax.xlane.f32.xlu0 %v4688_v61  ;;  %v4751_v52 = vsel %vm3314_vm0, %v8559_v27, -inf  ;;  %v5055_v61 = vsel %vm5024_vm3, %v8416_v37, -inf  ;;  %v5115_v37 = vsel %vm5024_vm3, %v8573_v45, -inf }
 0x902   :  { %v8916_v42 = vsel %vm412_vm7, %v4573_v46, %v8802_v34  ;;  %v4675_v29 = vpop.xlane.xlu1 %4674  ;;  %v4732_v53 = vpop.xlane.xlu0 %4731  ;;  %v4694_v45 = vsel %vm10516_vm14, %v8637_v30, -inf  ;;  %vm10521_vm14 = vmmov %vm10520_vm1 }
 0x903   :  { %v4846_v26 = vrot.slane %v4675_v29, %v6793_v13  ;;  %v4932_v44 = vrot.slane %v4732_v53, %v6782_v17 }
 0x905   :  { %v4847_v12 = vsel %vm233_vm8, %v4846_v26, %v4842_v38  ;;  %4692 = vmax.xlane.f32.xlu1 %v4691_v43  ;;  %4749 = vmax.xlane.f32.xlu0 %v4748_v49  ;;  %v5058_v43 = vsel %vm4268_vm15, %v8435_v22, -inf  ;;  %v5118_v22 = vsel %vm4268_vm15, %v8450_v40, -inf }
 0x906   :  { %v8927_v34 = vsel %vm410_vm6, %v4847_v12, %v8813_v62  ;;  %v4735_v63 = vpop.xlane.xlu1 %4734  ;;  %v5039_v60 = vpop.xlane.xlu0 %5038 }
 0x907   :  { %v4936_v47 = vrot.slane %v4735_v63, %v6793_v13  ;;  %v5206_v38 = vrot.slane %v5039_v60, %v6782_v17 }
 0x909   :  { %v4937_v46 = vsel %vm233_vm8, %v4936_v47, %v4932_v44  ;;  %4752 = vmax.xlane.f32.xlu1 %v4751_v52  ;;  %5056 = vmax.xlane.f32.xlu0 %v5055_v61 }
 0x90a   :  { %v8938_v62 = vsel %vm410_vm6, %v4937_v46, %v8824_v3  ;;  %v5042_v29 = vpop.xlane.xlu1 %5041  ;;  %v5099_v53 = vpop.xlane.xlu0 %5098 }
 0x90b   :  { %v5210_v49 = vrot.slane %v5042_v29, %v6793_v13  ;;  %v5296_v12 = vrot.slane %v5099_v53, %v6782_v17  ;;  %v4700_v29 = vsel %vm10517_vm11, %v8657_v39, -inf  ;;  %vm10522_vm11 = vmmov %vm10515_vm2 }
 0x90d   :  { %v5211_v26 = vsel %vm233_vm8, %v5210_v49, %v5206_v38  ;;  %5059 = vmax.xlane.f32.xlu1 %v5058_v43  ;;  %5116 = vmax.xlane.f32.xlu0 %v5115_v37  ;;  %v4697_v38 = vsel %vm3314_vm0, %v8650_v23, -inf  ;;  %v4703_v49 = vsel %vm3314_vm0, %v8670_v33, -inf }
 0x90e   :  { %v8949_v3 = vsel %vm408_vm5, %v5211_v26, %v8841_v24  ;;  %v5102_v44 = vpop.xlane.xlu1 %5101  ;;  %v3728_v63 = vpop.xlane.xlu0 %3727  ;;  %v4706_v26 = vsel %vm10518_vm10, %v8677_v32, -inf  ;;  %vm10523_vm10 = vmmov %vm10520_vm1 }
 0x90f   :  { %v5300_v60 = vrot.slane %v5102_v44, %v6793_v13  ;;  %v3814_v52 = vrot.slane %v3728_v63, %v6782_v17 }
 0x911   :  { %v5301_v61 = vsel %vm233_vm8, %v5300_v60, %v5296_v12  ;;  %v8960_v47 = vsel %vm414_vm9, %v3814_v52, %v8859_v36  ;;  %5119 = vmax.xlane.f32.xlu1 %v5118_v22  ;;  %4695 = vmax.xlane.f32.xlu0 %v4694_v45  ;;  %v4709_v45 = vsel %vm3314_vm0, %v8687_v1, -inf  ;;  %v4754_v60 = vsel %vm10519_vm13, %v8694_v55, -inf  ;;  %vm10524_vm13 = vmmov %vm10520_vm1 }
 0x912   :  { %v8964_v24 = vsel %vm408_vm5, %v5301_v61, %v8862_v28  ;;  %v3758_v40 = vpop.xlane.xlu1 %3757  ;;  %v3942_v46 = vpop.xlane.xlu0 %3941 }
 0x913   :  { %v3854_v53 = vrot.slane %v3758_v40, %v6782_v17  ;;  %v4121_v43 = vrot.slane %v3942_v46, %v6782_v17 }
 0x915   :  { %v8973_v36 = vsel %vm414_vm9, %v3854_v53, %v8871_v57  ;;  %4698 = vmax.xlane.f32.xlu1 %v4697_v38  ;;  %4701 = vmax.xlane.f32.xlu0 %v4700_v29  ;;  %v4757_v53 = vsel %vm3314_vm0, %v8707_v9, -inf }
 0x916   :  { %v3945_v28 = vpop.xlane.xlu1 %3944  ;;  %v4002_v37 = vpop.xlane.xlu0 %4001 }
 0x917   :  { %v4125_v12 = vrot.slane %v3945_v28, %v6793_v13  ;;  %v4211_v63 = vrot.slane %v4002_v37, %v6782_v17 }
 0x919   :  { %v4126_v44 = vsel %vm233_vm8, %v4125_v12, %v4121_v43  ;;  %4704 = vmax.xlane.f32.xlu1 %v4703_v49  ;;  %4707 = vmax.xlane.f32.xlu0 %v4706_v26  ;;  %v4760_v43 = vsel %vm10515_vm2, %v8714_v5, -inf  ;;  %vm3129_vm2 = vcmask 23557  }
 0x91a   :  { %v4005_v57 = vpop.xlane.xlu1 %4004  ;;  %v4311_v22 = vpop.xlane.xlu0 %4310  ;;  %v8989_v52 = vsel %vm10520_vm1, %v4126_v44, %v8887_v25  ;;  %v4763_v44 = vsel %vm3314_vm0, %v8724_v14, -inf  ;;  %vm10525_vm1 = vcmask 1047559  }
 0x91b   :  { %v4215_v61 = vrot.slane %v4005_v57, %v6793_v13  ;;  %v4487_v46 = vrot.slane %v4311_v22, %v6782_v17 }
 0x91d   :  { %v4216_v40 = vsel %vm233_vm8, %v4215_v61, %v4211_v63  ;;  %4710 = vmax.xlane.f32.xlu1 %v4709_v45  ;;  %4755 = vmax.xlane.f32.xlu0 %v4754_v60  ;;  %v4766_v63 = vsel %vm10522_vm11, %v8731_v4, -inf  ;;  %vm10527_vm11 = vmmov %vm10523_vm10 }
 0x91e   :  { %v4314_v38 = vpop.xlane.xlu1 %4313  ;;  %v4371_v29 = vpop.xlane.xlu0 %4370  ;;  %v9000_v25 = vsel %vm10521_vm14, %v4216_v40, %v8898_v19  ;;  %v4769_v40 = vsel %vm3314_vm0, %v8748_v48, -inf  ;;  %vm3324_vm14 = vcmask 39957  }
 0x91f   :  { %v4491_v28 = vrot.slane %v4314_v38, %v6793_v13  ;;  %v4577_v49 = vrot.slane %v4371_v29, %v6782_v17 }
 0x921   :  { %v4492_v37 = vsel %vm233_vm8, %v4491_v28, %v4487_v46  ;;  %4758 = vmax.xlane.f32.xlu1 %v4757_v53  ;;  %4761 = vmax.xlane.f32.xlu0 %v4760_v43  ;;  %v5061_v46 = vsel %vm5024_vm3, %v8526_v51, -inf  ;;  %v5064_v51 = vsel %vm4268_vm15, %v8539_v6, -inf  ;;  %v5124_v6 = vsel %vm4268_vm15, %v8559_v27, -inf }
 0x922   :  { %v4374_v26 = vpop.xlane.xlu1 %4373  ;;  %v4678_v12 = vpop.xlane.xlu0 %4677  ;;  %v9011_v19 = vsel %vm414_vm9, %v4492_v37, %v8905_v56  ;;  %v5070_v27 = vsel %vm4268_vm15, %v8650_v23, -inf }
 0x923   :  { %v4581_v57 = vrot.slane %v4374_v26, %v6793_v13  ;;  %v4851_v45 = vrot.slane %v4678_v12, %v6782_v17 }
 0x925   :  { %v4582_v22 = vsel %vm233_vm8, %v4581_v57, %v4577_v49  ;;  %4764 = vmax.xlane.f32.xlu1 %v4763_v44  ;;  %4767 = vmax.xlane.f32.xlu0 %v4766_v63 }
 0x926   :  { %v4681_v60 = vpop.xlane.xlu1 %4680  ;;  %v4738_v61 = vpop.xlane.xlu0 %4737  ;;  %v9022_v56 = vsel %vm414_vm9, %v4582_v22, %v8916_v42  ;;  %v5121_v42 = vsel %vm5024_vm3, %v8546_v35, -inf  ;;  %v5067_v35 = vsel %vm5024_vm3, %v8637_v30, -inf  ;;  %v5073_v30 = vsel %vm5024_vm3, %v8657_v39, -inf }
 0x927   :  { %v4855_v38 = vrot.slane %v4681_v60, %v6793_v13  ;;  %v4941_v53 = vrot.slane %v4738_v61, %v6782_v17  ;;  %v5076_v39 = vsel %vm4268_vm15, %v8670_v33, -inf  ;;  %v5127_v33 = vsel %vm5024_vm3, %v8694_v55, -inf }
 0x929   :  { %v4856_v29 = vsel %vm233_vm8, %v4855_v38, %v4851_v45  ;;  %4770 = vmax.xlane.f32.xlu1 %v4769_v40  ;;  %5062 = vmax.xlane.f32.xlu0 %v5061_v46 }
 0x92a   :  { %v9029_v43 = vsel %vm412_vm7, %v4856_v29, %v8927_v34  ;;  %v4741_v28 = vpop.xlane.xlu1 %4740  ;;  %v5045_v37 = vpop.xlane.xlu0 %5044 }
 0x92b   :  { %v4945_v49 = vrot.slane %v4741_v28, %v6793_v13  ;;  %v5215_v12 = vrot.slane %v5045_v37, %v6782_v17  ;;  %v5079_v28 = vsel %vm5024_vm3, %v8677_v32, -inf }
 0x92d   :  { %v4946_v26 = vsel %vm233_vm8, %v4945_v49, %v4941_v53  ;;  %5065 = vmax.xlane.f32.xlu1 %v5064_v51  ;;  %5122 = vmax.xlane.f32.xlu0 %v5121_v42  ;;  %v5082_v49 = vsel %vm4268_vm15, %v8687_v1, -inf }
 0x92e   :  { %v9040_v34 = vsel %vm412_vm7, %v4946_v26, %v8938_v62  ;;  %v5048_v44 = vpop.xlane.xlu1 %5047  ;;  %v5105_v63 = vpop.xlane.xlu0 %5104 }
 0x92f   :  { %v5219_v57 = vrot.slane %v5048_v44, %v6793_v13  ;;  %v5305_v45 = vrot.slane %v5105_v63, %v6782_v17 }
 0x931   :  { %v5220_v22 = vsel %vm233_vm8, %v5219_v57, %v5215_v12  ;;  %5125 = vmax.xlane.f32.xlu1 %v5124_v6  ;;  %5068 = vmax.xlane.f32.xlu0 %v5067_v35  ;;  %v5133_v6 = vsel %vm5024_vm3, %v8714_v5, -inf  ;;  %v5139_v5 = vsel %vm5024_vm3, %v8731_v4, -inf  ;;  %vm10526_vm3 = vmmov %vm10525_vm1 }
 0x932   :  { %v9051_v62 = vsel %vm410_vm6, %v5220_v22, %v8949_v3  ;;  %v5108_v60 = vpop.xlane.xlu1 %5107  ;;  %v3731_v61 = vpop.xlane.xlu0 %3730 }
 0x933   :  { %v5309_v40 = vrot.slane %v5108_v60, %v6793_v13  ;;  %v3818_v46 = vrot.slane %v3731_v61, %v6782_v17 }
 0x935   :  { %v5310_v38 = vsel %vm233_vm8, %v5309_v40, %v5305_v45  ;;  %5071 = vmax.xlane.f32.xlu1 %v5070_v27  ;;  %5074 = vmax.xlane.f32.xlu0 %v5073_v30  ;;  %v9062_v3 = vsel %vm10523_vm10, %v3818_v46, %v8960_v47  ;;  %v5142_v40 = vsel %vm4268_vm15, %v8748_v48, -inf }
 0x936   :  { %v9066_v29 = vsel %vm410_vm6, %v5310_v38, %v8964_v24  ;;  %v3761_v23 = vpop.xlane.xlu1 %3760  ;;  %v3948_v53 = vpop.xlane.xlu0 %3947 }
 0x937   :  { %v3858_v37 = vrot.slane %v3761_v23, %v6782_v17  ;;  %v4130_v51 = vrot.slane %v3948_v53, %v6782_v17 }
 0x939   :  { %5077 = vmax.xlane.f32.xlu1 %v5076_v39  ;;  %5080 = vmax.xlane.f32.xlu0 %v5079_v28  ;;  %v9076_v47 = vsel %vm10524_vm13, %v3858_v37, %v8973_v36  ;;  %v5130_v36 = vsel %vm4268_vm15, %v8707_v9, -inf  ;;  %v5136_v9 = vsel %vm4268_vm15, %v8724_v14, -inf  ;;  %v9108_v14 = vld [vmem:[%s10355_s0] sm:$0xff]  ;;  %v9121_v28 = vld [vmem:[%s10355_s0 + $0x10] sm:$0xff]  ;;  %vm3517_vm13 = vcmask 64557  }
 0x93a   :  { %v3951_v24 = vpop.xlane.xlu1 %3950  ;;  %v3954_v42 = vpop.xlane.xlu0 %3953  ;;  %v3130_v4 = vsel %vm3129_vm2, %v9108_v14, -inf  ;;  %v3133_v37 = vsel %vm3129_vm2, %v9121_v28, -inf }
 0x93b   :  { %v4134_v32 = vrot.slane %v3951_v24, %v6793_v13  ;;  %v4139_v26 = vrot.slane %v3954_v42, %v6782_v17 }
 0x93d   :  { %5083 = vmax.xlane.f32.xlu1 %v5082_v49  ;;  %5128 = vmax.xlane.f32.xlu0 %v5127_v33  ;;  %v4135_v12 = vsel %vm233_vm8, %v4134_v32, %v4130_v51  ;;  %v9128_v51 = vld [vmem:[%s10355_s0 + $0xa0] sm:$0xff] }
 0x93e   :  { %v3957_v44 = vpop.xlane.xlu1 %3956  ;;  %v3960_v63 = vpop.xlane.xlu0 %3959  ;;  %v9091_v1 = vsel %vm10525_vm1, %v4135_v12, %v8989_v52  ;;  %v3160_v24 = vsel %vm3129_vm2, %v9128_v51, -inf }
 0x93f   :  { %v4143_v55 = vrot.slane %v3957_v44, %v6793_v13  ;;  %v4148_v35 = vrot.slane %v3960_v63, %v6782_v17  ;;  %v9142_v44 = vld [vmem:[%s10355_s0 + $0xb0] sm:$0xff] }
 0x940   :  { %v3163_v63 = vsel %vm3129_vm2, %v9142_v44, -inf }
 0x941   :  { %5131 = vmax.xlane.f32.xlu1 %v5130_v36  ;;  %5134 = vmax.xlane.f32.xlu0 %v5133_v6  ;;  %v4144_v57 = vsel %vm233_vm8, %v4143_v55, %v4139_v26 }
 0x942   :  { %v3963_v22 = vpop.xlane.xlu1 %3962  ;;  %v4008_v45 = vpop.xlane.xlu0 %4007 }
 0x943   :  { %v4152_v60 = vrot.slane %v3963_v22, %v6793_v13  ;;  %v4220_v52 = vrot.slane %v4008_v45, %v6782_v17  ;;  %v9159_v45 = vld [vmem:[%s10355_s0 + $0xc0] sm:$0xff] }
 0x945   :  { %5137 = vmax.xlane.f32.xlu1 %v5136_v9  ;;  %5140 = vmax.xlane.f32.xlu0 %v5139_v5  ;;  %v4153_v61 = vsel %vm233_vm8, %v4152_v60, %v4148_v35  ;;  %v3166_v9 = vsel %vm3129_vm2, %v9159_v45, -inf  ;;  %v3325_v5 = vsel %vm3324_vm14, %v9108_v14, -inf }
 0x946   :  { %v4011_v27 = vpop.xlane.xlu1 %4010  ;;  %v4014_v30 = vpop.xlane.xlu0 %4013  ;;  %v9113_v46 = vsel %vm406_vm4, %v4153_v61, %v4144_v57 }
 0x947   :  { %v4224_v38 = vrot.slane %v4011_v27, %v6793_v13  ;;  %v4229_v23 = vrot.slane %v4014_v30, %v6782_v17 }
 0x949   :  { %5143 = vmax.xlane.f32.xlu1 %v5142_v40  ;;  %3131 = vmax.xlane.f32.xlu0 %v3130_v4  ;;  %v4225_v53 = vsel %vm233_vm8, %v4224_v38, %v4220_v52  ;;  %v3328_v4 = vsel %vm3324_vm14, %v9121_v28, -inf  ;;  %v3355_v38 = vsel %vm3324_vm14, %v9128_v51, -inf }
 0x94a   :  { %v4017_v48 = vpop.xlane.xlu1 %4016  ;;  %v4020_v39 = vpop.xlane.xlu0 %4019  ;;  %v9134_v42 = vsel %vm10526_vm3, %v4225_v53, %v9000_v25  ;;  %v9149_v25 = vld [vmem:[%s10355_s0 + $0x20] sm:$0xff]  ;;  %vm10528_vm3 = vmmov %vm10525_vm1 }
 0x94b   :  { %v4233_v49 = vrot.slane %v4017_v48, %v6793_v13  ;;  %v4238_v33 = vrot.slane %v4020_v39, %v6782_v17  ;;  %v3136_v36 = vsel %vm3129_vm2, %v9149_v25, -inf }
 0x94d   :  { %3134 = vmax.xlane.f32.xlu1 %v3133_v37  ;;  %3161 = vmax.xlane.f32.xlu0 %v3160_v24  ;;  %v4234_v32 = vsel %vm233_vm8, %v4233_v49, %v4229_v23  ;;  %v3358_v49 = vsel %vm3324_vm14, %v9142_v44, -inf }
 0x94e   :  { %v4023_v26 = vpop.xlane.xlu1 %4022  ;;  %v4317_v12 = vpop.xlane.xlu0 %4316 }
 0x94f   :  { %v4242_v6 = vrot.slane %v4023_v26, %v6793_v13  ;;  %v4496_v55 = vrot.slane %v4317_v12, %v6782_v17 }
 0x951   :  { %3164 = vmax.xlane.f32.xlu1 %v3163_v63  ;;  %3137 = vmax.xlane.f32.xlu0 %v3136_v36  ;;  %v4243_v35 = vsel %vm233_vm8, %v4242_v6, %v4238_v33  ;;  %v9187_v33 = vld [vmem:[%s10355_s0 + $0x30] sm:$0xff] }
 0x952   :  { %v4320_v57 = vpop.xlane.xlu1 %4319  ;;  %v4377_v22 = vpop.xlane.xlu0 %4376  ;;  %v9166_v60 = vsel %vm406_vm4, %v4243_v35, %v4234_v32 }
 0x953   :  { %v4500_v52 = vrot.slane %v4320_v57, %v6793_v13  ;;  %v4586_v27 = vrot.slane %v4377_v22, %v6782_v17 }
 0x955   :  { %v4501_v61 = vsel %vm233_vm8, %v4500_v52, %v4496_v55  ;;  %3167 = vmax.xlane.f32.xlu1 %v3166_v9  ;;  %3326 = vmax.xlane.f32.xlu0 %v3325_v5  ;;  %v9201_v55 = vld [vmem:[%s10355_s0 + $0xd0] sm:$0xff] }
 0x956   :  { %v4380_v30 = vpop.xlane.xlu1 %4379  ;;  %v4684_v40 = vpop.xlane.xlu0 %4683  ;;  %v9177_v23 = vsel %vm10527_vm11, %v4501_v61, %v9011_v19  ;;  %v3139_v19 = vsel %vm3129_vm2, %v9187_v33, -inf  ;;  %v3169_v35 = vsel %vm3129_vm2, %v9201_v55, -inf  ;;  %vm10529_vm11 = vmmov %vm10525_vm1 }
 0x957   :  { %v4590_v53 = vrot.slane %v4380_v30, %v6793_v13  ;;  %v4860_v39 = vrot.slane %v4684_v40, %v6782_v17  ;;  %v3518_v30 = vsel %vm3517_vm13, %v9108_v14, -inf }
 0x959   :  { %v4591_v48 = vsel %vm233_vm8, %v4590_v53, %v4586_v27  ;;  %3329 = vmax.xlane.f32.xlu1 %v3328_v4  ;;  %3356 = vmax.xlane.f32.xlu0 %v3355_v38  ;;  %v3361_v27 = vsel %vm3324_vm14, %v9159_v45, -inf }
 0x95a   :  { %v4687_v37 = vpop.xlane.xlu1 %4686  ;;  %v4744_v24 = vpop.xlane.xlu0 %4743  ;;  %v9193_v32 = vsel %vm10523_vm10, %v4591_v48, %v9022_v56  ;;  %v3331_v56 = vsel %vm3324_vm14, %v9149_v25, -inf  ;;  %vm2936_vm10 = vcmask 77882  }
 0x95b   :  { %v4864_v26 = vrot.slane %v4687_v37, %v6793_v13  ;;  %v4950_v63 = vrot.slane %v4744_v24, %v6782_v17  ;;  %v3521_v37 = vsel %vm3517_vm13, %v9121_v28, -inf }
 0x95d   :  { %v4865_v12 = vsel %vm233_vm8, %v4864_v26, %v4860_v39  ;;  %3359 = vmax.xlane.f32.xlu1 %v3358_v49  ;;  %3140 = vmax.xlane.f32.xlu0 %v3139_v19 }
 0x95e   :  { %v4747_v36 = vpop.xlane.xlu1 %4746  ;;  %v5051_v6 = vpop.xlane.xlu0 %5050  ;;  %v9209_v57 = vsel %vm414_vm9, %v4865_v12, %v9029_v43 }
 0x95f   :  { %v4954_v22 = vrot.slane %v4747_v36, %v6793_v13  ;;  %v5224_v5 = vrot.slane %v5051_v6, %v6782_v17  ;;  %v3551_v36 = vsel %vm3517_vm13, %v9142_v44, -inf  ;;  %v9249_v6 = vld [vmem:[%s10355_s0 + $0x40] sm:$0xff] }
 0x961   :  { %v4955_v9 = vsel %vm233_vm8, %v4954_v22, %v4950_v63  ;;  %3170 = vmax.xlane.f32.xlu1 %v3169_v35  ;;  %3332 = vmax.xlane.f32.xlu0 %v3331_v56  ;;  %v3142_v35 = vsel %vm3129_vm2, %v9249_v6, -inf }
 0x962   :  { %v5054_v52 = vpop.xlane.xlu1 %5053  ;;  %v5111_v61 = vpop.xlane.xlu0 %5110  ;;  %v9220_v43 = vsel %vm414_vm9, %v4955_v9, %v9040_v34  ;;  %v3548_v34 = vsel %vm3517_vm13, %v9128_v51, -inf }
 0x963   :  { %v5228_v40 = vrot.slane %v5054_v52, %v6793_v13  ;;  %v5314_v38 = vrot.slane %v5111_v61, %v6782_v17  ;;  %v3334_v61 = vsel %vm3324_vm14, %v9187_v33, -inf }
 0x965   :  { %v5229_v4 = vsel %vm233_vm8, %v5228_v40, %v5224_v5  ;;  %3362 = vmax.xlane.f32.xlu1 %v3361_v27  ;;  %3519 = vmax.xlane.f32.xlu0 %v3518_v30  ;;  %v9261_v5 = vld [vmem:[%s10355_s0 + $0xe0] sm:$0xff] }
 0x966   :  { %v9227_v53 = vsel %vm412_vm7, %v5229_v4, %v9051_v62  ;;  %v5114_v48 = vpop.xlane.xlu1 %5113  ;;  %v3734_v39 = vpop.xlane.xlu0 %3733  ;;  %v3172_v52 = vsel %vm3129_vm2, %v9261_v5, -inf }
 0x967   :  { %v5318_v24 = vrot.slane %v5114_v48, %v6793_v13  ;;  %v3822_v49 = vrot.slane %v3734_v39, %v6782_v17  ;;  %v3364_v48 = vsel %vm3324_vm14, %v9201_v55, -inf  ;;  %v3524_v39 = vsel %vm3517_vm13, %v9149_v25, -inf }
 0x969   :  { %v5319_v19 = vsel %vm233_vm8, %v5318_v24, %v5314_v38  ;;  %3522 = vmax.xlane.f32.xlu1 %v3521_v37  ;;  %3549 = vmax.xlane.f32.xlu0 %v3548_v34  ;;  %v9238_v62 = vsel %vm10525_vm1, %v3822_v49, %v9062_v3 }
 0x96a   :  { %v9242_v26 = vsel %vm412_vm7, %v5319_v19, %v9066_v29  ;;  %v3737_v12 = vpop.xlane.xlu1 %3736  ;;  %v3740_v63 = vpop.xlane.xlu0 %3739  ;;  %v3554_v19 = vsel %vm3517_vm13, %v9159_v45, -inf }
 0x96b   :  { %v3826_v3 = vrot.slane %v3737_v12, %v6782_v17  ;;  %v3830_v56 = vrot.slane %v3740_v63, %v6782_v17  ;;  %v9287_v12 = vld [vmem:[%s10355_s0 + $0x50] sm:$0xff] }
 0x96c   :  { %v3145_v63 = vsel %vm3129_vm2, %v9287_v12, -inf }
 0x96d   :  { %3552 = vmax.xlane.f32.xlu1 %v3551_v36  ;;  %3143 = vmax.xlane.f32.xlu0 %v3142_v35  ;;  %v9256_v29 = vsel %vm406_vm4, %v3830_v56, %v3826_v3 }
 0x96e   :  { %v3764_v22 = vpop.xlane.xlu1 %3763  ;;  %v3767_v9 = vpop.xlane.xlu0 %3766 }
 0x96f   :  { %v3862_v27 = vrot.slane %v3764_v22, %v6782_v17  ;;  %v3866_v30 = vrot.slane %v3767_v9, %v6782_v17  ;;  %v9297_v9 = vld [vmem:[%s10355_s0 + $0xf0] sm:$0xff] }
 0x971   :  { %3173 = vmax.xlane.f32.xlu1 %v3172_v52  ;;  %3335 = vmax.xlane.f32.xlu0 %v3334_v61  ;;  %v9271_v40 = vsel %vm10528_vm3, %v3862_v27, %v9076_v47  ;;  %v3175_v52 = vsel %vm3129_vm2, %v9297_v9, -inf  ;;  %v3337_v61 = vsel %vm3324_vm14, %v9249_v6, -inf  ;;  %vm10530_vm3 = vcmask 1046534  }
 0x972   :  { %v3770_v4 = vpop.xlane.xlu1 %3769  ;;  %v4323_v38 = vpop.xlane.xlu0 %4322 }
 0x973   :  { %v3870_v37 = vrot.slane %v3770_v4, %v6782_v17  ;;  %v4505_v34 = vrot.slane %v4323_v38, %v6782_v17 }
 0x975   :  { %3365 = vmax.xlane.f32.xlu1 %v3364_v48  ;;  %3525 = vmax.xlane.f32.xlu0 %v3524_v39  ;;  %v9280_v24 = vsel %vm406_vm4, %v3870_v37, %v3866_v30  ;;  %v3367_v37 = vsel %vm3324_vm14, %v9261_v5, -inf }
 0x976   :  { %v4326_v49 = vpop.xlane.xlu1 %4325  ;;  %v4329_v47 = vpop.xlane.xlu0 %4328 }
 0x977   :  { %v4509_v36 = vrot.slane %v4326_v49, %v6793_v13  ;;  %v4514_v35 = vrot.slane %v4329_v47, %v6782_v17 }
 0x979   :  { %3555 = vmax.xlane.f32.xlu1 %v3554_v19  ;;  %3146 = vmax.xlane.f32.xlu0 %v3145_v63  ;;  %v4510_v3 = vsel %vm233_vm8, %v4509_v36, %v4505_v34  ;;  %v3527_v34 = vsel %vm3517_vm13, %v9187_v33, -inf  ;;  %v3557_v36 = vsel %vm3517_vm13, %v9201_v55, -inf }
 0x97a   :  { %v4332_v56 = vpop.xlane.xlu1 %4331  ;;  %v4335_v22 = vpop.xlane.xlu0 %4334  ;;  %v9305_v27 = vsel %vm10529_vm11, %v4510_v3, %v9177_v23  ;;  %vm10531_vm11 = vmmov %vm10530_vm3 }
 0x97b   :  { %v4518_v30 = vrot.slane %v4332_v56, %v6793_v13  ;;  %v4523_v4 = vrot.slane %v4335_v22, %v6782_v17 }
 0x97d   :  { %3176 = vmax.xlane.f32.xlu1 %v3175_v52  ;;  %3338 = vmax.xlane.f32.xlu0 %v3337_v61  ;;  %v4519_v38 = vsel %vm233_vm8, %v4518_v30, %v4514_v35  ;;  %v2937_v35 = vsel %vm2936_vm10, %v9108_v14, -inf }
 0x97e   :  { %v4338_v48 = vpop.xlane.xlu1 %4337  ;;  %v4383_v39 = vpop.xlane.xlu0 %4382 }
 0x97f   :  { %v4527_v49 = vrot.slane %v4338_v48, %v6793_v13  ;;  %v4595_v23 = vrot.slane %v4383_v39, %v6782_v17  ;;  %v2967_v48 = vsel %vm2936_vm10, %v9128_v51, -inf  ;;  %v9343_v51 = vld [vmem:[%s10355_s0 + $0x60] sm:$0xff] }
 0x981   :  { %3368 = vmax.xlane.f32.xlu1 %v3367_v37  ;;  %3528 = vmax.xlane.f32.xlu0 %v3527_v34  ;;  %v4528_v47 = vsel %vm233_vm8, %v4527_v49, %v4523_v4  ;;  %v2940_v4 = vsel %vm2936_vm10, %v9121_v28, -inf  ;;  %v2970_v28 = vsel %vm2936_vm10, %v9142_v44, -inf  ;;  %v9353_v44 = vld [vmem:[%s10355_s0 + $0x100] sm:$0xff] }
 0x982   :  { %v4386_v19 = vpop.xlane.xlu1 %4385  ;;  %v4389_v63 = vpop.xlane.xlu0 %4388  ;;  %v9322_v3 = vsel %vm406_vm4, %v4528_v47, %v4519_v38 }
 0x983   :  { %v4599_v56 = vrot.slane %v4386_v19, %v6793_v13  ;;  %v4604_v22 = vrot.slane %v4389_v63, %v6782_v17 }
 0x985   :  { %3558 = vmax.xlane.f32.xlu1 %v3557_v36  ;;  %2938 = vmax.xlane.f32.xlu0 %v2937_v35  ;;  %v4600_v52 = vsel %vm233_vm8, %v4599_v56, %v4595_v23  ;;  %v3178_v35 = vsel %vm3129_vm2, %v9353_v44, -inf  ;;  %v3340_v56 = vsel %vm3324_vm14, %v9287_v12, -inf }
 0x986   :  { %v4392_v61 = vpop.xlane.xlu1 %4391  ;;  %v4395_v30 = vpop.xlane.xlu0 %4394  ;;  %v9333_v14 = vsel %vm10525_vm1, %v4600_v52, %v9193_v32  ;;  %v3148_v32 = vsel %vm3129_vm2, %v9343_v51, -inf }
 0x987   :  { %v4608_v38 = vrot.slane %v4392_v61, %v6793_v13  ;;  %v4613_v39 = vrot.slane %v4395_v30, %v6782_v17 }
 0x989   :  { %2941 = vmax.xlane.f32.xlu1 %v2940_v4  ;;  %2968 = vmax.xlane.f32.xlu0 %v2967_v48  ;;  %v4609_v37 = vsel %vm233_vm8, %v4608_v38, %v4604_v22  ;;  %v3370_v38 = vsel %vm3324_vm14, %v9297_v9, -inf }
 0x98a   :  { %v4398_v34 = vpop.xlane.xlu1 %4397  ;;  %v4690_v49 = vpop.xlane.xlu0 %4689 }
 0x98b   :  { %v4617_v23 = vrot.slane %v4398_v34, %v6793_v13  ;;  %v4869_v47 = vrot.slane %v4690_v49, %v6782_v17 }
 0x98d   :  { %2971 = vmax.xlane.f32.xlu1 %v2970_v28  ;;  %3149 = vmax.xlane.f32.xlu0 %v3148_v32  ;;  %v4618_v19 = vsel %vm233_vm8, %v4617_v23, %v4613_v39  ;;  %v3530_v39 = vsel %vm3517_vm13, %v9249_v6, -inf }
 0x98e   :  { %v4693_v63 = vpop.xlane.xlu1 %4692  ;;  %v4750_v36 = vpop.xlane.xlu0 %4749  ;;  %v9360_v22 = vsel %vm406_vm4, %v4618_v19, %v4609_v37  ;;  %v2943_v19 = vsel %vm2936_vm10, %v9149_v25, -inf  ;;  %v9390_v25 = vld [vmem:[%s10355_s0 + $0x70] sm:$0xff] }
 0x98f   :  { %v4873_v52 = vrot.slane %v4693_v63, %v6793_v13  ;;  %v4959_v30 = vrot.slane %v4750_v36, %v6782_v17 }
 0x991   :  { %v4874_v61 = vsel %vm233_vm8, %v4873_v52, %v4869_v47  ;;  %3179 = vmax.xlane.f32.xlu1 %v3178_v35  ;;  %3341 = vmax.xlane.f32.xlu0 %v3340_v56  ;;  %v3560_v47 = vsel %vm3517_vm13, %v9261_v5, -inf }
 0x992   :  { %v4753_v4 = vpop.xlane.xlu1 %4752  ;;  %v5057_v48 = vpop.xlane.xlu0 %5056  ;;  %v4997_v37 = vsel %vm10530_vm3, %v4874_v61, %v9209_v57  ;;  %v2973_v61 = vsel %vm2936_vm10, %v9159_v45, -inf }
 0x993   :  { %v4963_v34 = vrot.slane %v4753_v4, %v6793_v13  ;;  %v5233_v28 = vrot.slane %v5057_v48, %v6782_v17 }
 0x995   :  { %v4964_v49 = vsel %vm233_vm8, %v4963_v34, %v4959_v30  ;;  %3371 = vmax.xlane.f32.xlu1 %v3370_v38  ;;  %3531 = vmax.xlane.f32.xlu0 %v3530_v39  ;;  %v9404_v34 = vld [vmem:[%s10355_s0 + $0x80] sm:$0xff] }
 0x996   :  { %v5060_v32 = vpop.xlane.xlu1 %5059  ;;  %v5117_v23 = vpop.xlane.xlu0 %5116  ;;  %v9380_v63 = vsel %vm10531_vm11, %v4964_v49, %v9220_v43  ;;  %v3151_v43 = vsel %vm3129_vm2, %v9390_v25, -inf  ;;  %v3154_v49 = vsel %vm3129_vm2, %v9404_v34, -inf  ;;  %vm10533_vm11 = vmmov %vm10530_vm3 }
 0x997   :  { %v5237_v57 = vrot.slane %v5060_v32, %v6793_v13  ;;  %v5323_v35 = vrot.slane %v5117_v23, %v6782_v17 }
 0x999   :  { %v5238_v36 = vsel %vm233_vm8, %v5237_v57, %v5233_v28  ;;  %3561 = vmax.xlane.f32.xlu1 %v3560_v47  ;;  %2944 = vmax.xlane.f32.xlu0 %v2943_v19 }
 0x99a   :  { %v5120_v56 = vpop.xlane.xlu1 %5119  ;;  %v4696_v52 = vpop.xlane.xlu0 %4695  ;;  %v9396_v30 = vsel %vm414_vm9, %v5238_v36, %v9227_v53  ;;  %v9411_v53 = vld [vmem:[%s10355_s0 + $0x90] sm:$0xff] }
 0x99b   :  { %v5327_v4 = vrot.slane %v5120_v56, %v6793_v13  ;;  %v4878_v38 = vrot.slane %v4696_v52, %v6782_v17  ;;  %v3157_v28 = vsel %vm3129_vm2, %v9411_v53, -inf }
 0x99d   :  { %v5328_v48 = vsel %vm233_vm8, %v5327_v4, %v5323_v35  ;;  %2974 = vmax.xlane.f32.xlu1 %v2973_v61  ;;  %3152 = vmax.xlane.f32.xlu0 %v3151_v43  ;;  %v9425_v35 = vld [vmem:[%s10355_s0 + $0x110] sm:$0xff] }
 0x99e   :  { %v4699_v45 = vpop.xlane.xlu1 %4698  ;;  %v4702_v39 = vpop.xlane.xlu0 %4701  ;;  %v9417_v32 = vsel %vm414_vm9, %v5328_v48, %v9242_v26  ;;  %v3181_v56 = vsel %vm3129_vm2, %v9425_v35, -inf  ;;  %v9432_v26 = vld [vmem:[%s10355_s0 + $0x120] sm:$0xff] }
 0x99f   :  { %v4882_v23 = vrot.slane %v4699_v45, %v6793_v13  ;;  %v4887_v47 = vrot.slane %v4702_v39, %v6782_v17  ;;  %v3184_v52 = vsel %vm3129_vm2, %v9432_v26, -inf  ;;  %v9445_v39 = vld [vmem:[%s10355_s0 + $0x130] sm:$0xff] }
 0x9a1   :  { %3155 = vmax.xlane.f32.xlu1 %v3154_v49  ;;  %3158 = vmax.xlane.f32.xlu0 %v3157_v28  ;;  %v4883_v19 = vsel %vm233_vm8, %v4882_v23, %v4878_v38  ;;  %v3187_v49 = vsel %vm3129_vm2, %v9445_v39, -inf  ;;  %vm10532_vm2 = vmmov %vm10525_vm1 }
 0x9a2   :  { %v4705_v57 = vpop.xlane.xlu1 %4704  ;;  %v4708_v36 = vpop.xlane.xlu0 %4707  ;;  %v9437_v61 = vsel %vm10525_vm1, %v4883_v19, %v4997_v37  ;;  %v3343_v37 = vsel %vm3324_vm14, %v9343_v51, -inf }
 0x9a3   :  { %v4891_v43 = vrot.slane %v4705_v57, %v6793_v13  ;;  %v4896_v4 = vrot.slane %v4708_v36, %v6782_v17  ;;  %v3373_v36 = vsel %vm3324_vm14, %v9353_v44, -inf }
 0x9a5   :  { %3182 = vmax.xlane.f32.xlu1 %v3181_v56  ;;  %3185 = vmax.xlane.f32.xlu0 %v3184_v52  ;;  %v4892_v48 = vsel %vm233_vm8, %v4891_v43, %v4887_v47  ;;  %v3533_v56 = vsel %vm3517_vm13, %v9287_v12, -inf }
 0x9a6   :  { %v4711_v38 = vpop.xlane.xlu1 %4710  ;;  %v4756_v45 = vpop.xlane.xlu0 %4755 }
 0x9a7   :  { %v4900_v28 = vrot.slane %v4711_v38, %v6793_v13  ;;  %v4968_v23 = vrot.slane %v4756_v45, %v6782_v17 }
 0x9a9   :  { %3188 = vmax.xlane.f32.xlu1 %v3187_v49  ;;  %3344 = vmax.xlane.f32.xlu0 %v3343_v37  ;;  %v4901_v47 = vsel %vm233_vm8, %v4900_v28, %v4896_v4  ;;  %v3563_v37 = vsel %vm3517_vm13, %v9297_v9, -inf  ;;  %v2946_v28 = vsel %vm2936_vm10, %v9187_v33, -inf  ;;  %v2964_v33 = vsel %vm2936_vm10, %v9411_v53, -inf }
 0x9aa   :  { %v4759_v19 = vpop.xlane.xlu1 %4758  ;;  %v4762_v57 = vpop.xlane.xlu0 %4761  ;;  %v9459_v52 = vsel %vm406_vm4, %v4901_v47, %v4892_v48 }
 0x9ab   :  { %v4972_v43 = vrot.slane %v4759_v19, %v6793_v13  ;;  %v4977_v38 = vrot.slane %v4762_v57, %v6782_v17 }
 0x9ad   :  { %3374 = vmax.xlane.f32.xlu1 %v3373_v36  ;;  %3534 = vmax.xlane.f32.xlu0 %v3533_v56  ;;  %v4973_v45 = vsel %vm233_vm8, %v4972_v43, %v4968_v23  ;;  %v2961_v56 = vsel %vm2936_vm10, %v9404_v34, -inf }
 0x9ae   :  { %v4765_v4 = vpop.xlane.xlu1 %4764  ;;  %v4768_v49 = vpop.xlane.xlu0 %4767  ;;  %v9470_v48 = vsel %vm10532_vm2, %v4973_v45, %v9380_v63  ;;  %vm4264_vm2 = vcmask 80952  }
 0x9af   :  { %v4981_v47 = vrot.slane %v4765_v4, %v6793_v13  ;;  %v4986_v19 = vrot.slane %v4768_v49, %v6782_v17 }
 0x9b1   :  { %3564 = vmax.xlane.f32.xlu1 %v3563_v37  ;;  %2947 = vmax.xlane.f32.xlu0 %v2946_v28  ;;  %v4982_v23 = vsel %vm233_vm8, %v4981_v47, %v4977_v38  ;;  %v2976_v38 = vsel %vm2936_vm10, %v9201_v55, -inf  ;;  %v2991_v37 = vsel %vm2936_vm10, %v9432_v26, -inf  ;;  %v3346_v55 = vsel %vm3324_vm14, %v9390_v25, -inf }
 0x9b2   :  { %v4771_v57 = vpop.xlane.xlu1 %4770  ;;  %v5063_v36 = vpop.xlane.xlu0 %5062 }
 0x9b3   :  { %v4990_v43 = vrot.slane %v4771_v57, %v6793_v13  ;;  %v5242_v63 = vrot.slane %v5063_v36, %v6782_v17 }
 0x9b5   :  { %2962 = vmax.xlane.f32.xlu1 %v2961_v56  ;;  %2965 = vmax.xlane.f32.xlu0 %v2964_v33  ;;  %v4991_v45 = vsel %vm233_vm8, %v4990_v43, %v4986_v19  ;;  %v2994_v33 = vsel %vm2936_vm10, %v9445_v39, -inf }
 0x9b6   :  { %v5066_v4 = vpop.xlane.xlu1 %5065  ;;  %v5123_v49 = vpop.xlane.xlu0 %5122  ;;  %v9487_v28 = vsel %vm406_vm4, %v4991_v45, %v4982_v23 }
 0x9b7   :  { %v5246_v47 = vrot.slane %v5066_v4, %v6793_v13  ;;  %v5332_v36 = vrot.slane %v5123_v49, %v6782_v17 }
 0x9b9   :  { %v5247_v57 = vsel %vm233_vm8, %v5246_v47, %v5242_v63  ;;  %2977 = vmax.xlane.f32.xlu1 %v2976_v38  ;;  %2992 = vmax.xlane.f32.xlu0 %v2991_v37  ;;  %v3349_v38 = vsel %vm3324_vm14, %v9404_v34, -inf  ;;  %v3352_v37 = vsel %vm3324_vm14, %v9411_v53, -inf }
 0x9ba   :  { %v5126_v19 = vpop.xlane.xlu1 %5125  ;;  %v5069_v56 = vpop.xlane.xlu0 %5068  ;;  %v5370_v23 = vsel %vm10530_vm3, %v5247_v57, %v9396_v30 }
 0x9bb   :  { %v5336_v43 = vrot.slane %v5126_v19, %v6793_v13  ;;  %v5251_v63 = vrot.slane %v5069_v56, %v6782_v17 }
 0x9bd   :  { %v5337_v45 = vsel %vm233_vm8, %v5336_v43, %v5332_v36  ;;  %2995 = vmax.xlane.f32.xlu1 %v2994_v33  ;;  %3347 = vmax.xlane.f32.xlu0 %v3346_v55  ;;  %v3376_v33 = vsel %vm3324_vm14, %v9425_v35, -inf  ;;  %v3379_v55 = vsel %vm3324_vm14, %v9432_v26, -inf }
 0x9be   :  { %v5072_v4 = vpop.xlane.xlu1 %5071  ;;  %v5075_v49 = vpop.xlane.xlu0 %5074  ;;  %v5378_v47 = vsel %vm10533_vm11, %v5337_v45, %v9417_v32  ;;  %vm10537_vm11 = vmmov %vm10525_vm1 }
 0x9bf   :  { %v5255_v30 = vrot.slane %v5072_v4, %v6793_v13  ;;  %v5260_v57 = vrot.slane %v5075_v49, %v6782_v17 }
 0x9c1   :  { %3350 = vmax.xlane.f32.xlu1 %v3349_v38  ;;  %3353 = vmax.xlane.f32.xlu0 %v3352_v37  ;;  %v5256_v36 = vsel %vm233_vm8, %v5255_v30, %v5251_v63  ;;  %v3382_v38 = vsel %vm3324_vm14, %v9445_v39, -inf  ;;  %v3536_v37 = vsel %vm3517_vm13, %v9343_v51, -inf  ;;  %vm10534_vm14 = vmmov %vm10525_vm1 }
 0x9c2   :  { %v5078_v19 = vpop.xlane.xlu1 %5077  ;;  %v5081_v56 = vpop.xlane.xlu0 %5080  ;;  %v9515_v43 = vsel %vm10525_vm1, %v5256_v36, %v5370_v23 }
 0x9c3   :  { %v5264_v32 = vrot.slane %v5078_v19, %v6793_v13  ;;  %v5269_v45 = vrot.slane %v5081_v56, %v6782_v17 }
 0x9c5   :  { %3377 = vmax.xlane.f32.xlu1 %v3376_v33  ;;  %3380 = vmax.xlane.f32.xlu0 %v3379_v55  ;;  %v5265_v4 = vsel %vm233_vm8, %v5264_v32, %v5260_v57  ;;  %v3566_v57 = vsel %vm3517_vm13, %v9353_v44, -inf  ;;  %v2949_v33 = vsel %vm2936_vm10, %v9249_v6, -inf }
 0x9c6   :  { %v5084_v63 = vpop.xlane.xlu1 %5083  ;;  %v5129_v49 = vpop.xlane.xlu0 %5128 }
 0x9c7   :  { %v5273_v30 = vrot.slane %v5084_v63, %v6793_v13  ;;  %v5341_v23 = vrot.slane %v5129_v49, %v6782_v17 }
 0x9c9   :  { %3383 = vmax.xlane.f32.xlu1 %v3382_v38  ;;  %3537 = vmax.xlane.f32.xlu0 %v3536_v37  ;;  %v5274_v36 = vsel %vm233_vm8, %v5273_v30, %v5269_v45  ;;  %v2979_v38 = vsel %vm2936_vm10, %v9261_v5, -inf  ;;  %v3539_v37 = vsel %vm3517_vm13, %v9390_v25, -inf }
 0x9ca   :  { %v5132_v19 = vpop.xlane.xlu1 %5131  ;;  %v9527_v56 = vpop.xlane.xlu0 %5134  ;;  %v9534_v55 = vsel %vm406_vm4, %v5274_v36, %v5265_v4  ;;  %v3545_v36 = vsel %vm3517_vm13, %v9411_v53, -inf }
 0x9cb   :  { %v5345_v32 = vrot.slane %v5132_v19, %v6793_v13 }
 0x9cd   :  { %3567 = vmax.xlane.f32.xlu1 %v3566_v57  ;;  %2950 = vmax.xlane.f32.xlu0 %v2949_v33  ;;  %v5346_v63 = vsel %vm233_vm8, %v5345_v32, %v5341_v23  ;;  %v3542_v23 = vsel %vm3517_vm13, %v9404_v34, -inf  ;;  %v3572_v33 = vsel %vm3517_vm13, %v9432_v26, -inf }
 0x9ce   :  { %v9538_v49 = vpop.xlane.xlu1 %5137  ;;  %v9540_v45 = vpop.xlane.xlu0 %5140  ;;  %v9547_v6 = vsel %vm10534_vm14, %v5346_v63, %v5378_v47  ;;  %v3569_v47 = vsel %vm3517_vm13, %v9425_v35, -inf }
 0x9d1   :  { %2980 = vmax.xlane.f32.xlu1 %v2979_v38  ;;  %3540 = vmax.xlane.f32.xlu0 %v3539_v37  ;;  %v3575_v38 = vsel %vm3517_vm13, %v9445_v39, -inf  ;;  %v2952_v37 = vsel %vm2936_vm10, %v9287_v12, -inf  ;;  %v2985_v12 = vsel %vm2936_vm10, %v9353_v44, -inf  ;;  %vm3310_vm13 = vcmask 64552  }
 0x9d2   :  { %v9549_v4 = vpop.xlane.xlu1 %5143  ;;  %v3132_v30 = vpop.xlane.xlu0 %3131 }
 0x9d3   :  { %v3213_v19 = vrot.slane %v3132_v30, %v6782_v17 }
 0x9d5   :  { %3543 = vmax.xlane.f32.xlu1 %v3542_v23  ;;  %3546 = vmax.xlane.f32.xlu0 %v3545_v36  ;;  %v2982_v23 = vsel %vm2936_vm10, %v9297_v9, -inf  ;;  %v2955_v36 = vsel %vm2936_vm10, %v9343_v51, -inf  ;;  %v2988_v51 = vsel %vm2936_vm10, %v9425_v35, -inf }
 0x9d6   :  { %v3135_v5 = vpop.xlane.xlu1 %3134  ;;  %v9556_v57 = vpop.xlane.xlu0 %3161 }
 0x9d7   :  { %v3217_v32 = vrot.slane %v3135_v5, %v6782_v17  ;;  %v2958_v5 = vsel %vm2936_vm10, %v9390_v25, -inf  ;;  %v3894_v25 = vsel %vm3314_vm0, %v9256_v29, -inf  ;;  %vm10536_vm10 = vmmov %vm10525_vm1 }
 0x9d8   :  { %vm10538_vm1 = vmmov %vm10530_vm3 }
 0x9d9   :  { %v9564_v34 = vsel %vm406_vm4, %v3217_v32, %v3213_v19  ;;  %3570 = vmax.xlane.f32.xlu1 %v3569_v47  ;;  %3573 = vmax.xlane.f32.xlu0 %v3572_v33  ;;  %v3891_v33 = vsel %vm3310_vm13, %v9238_v62, -inf  ;;  %v3900_v62 = vsel %vm3314_vm0, %v9280_v24, -inf  ;;  %v4275_v24 = vsel %vm4268_vm15, %v9166_v60, -inf  ;;  %vm10539_vm14 = vmmov %vm10536_vm10 }
 0x9da   :  { %v9566_v53 = vpop.xlane.xlu1 %3164  ;;  %v9568_v63 = vpop.xlane.xlu0 %3137 }
 0x9dd   :  { %3576 = vmax.xlane.f32.xlu1 %v3575_v38  ;;  %2953 = vmax.xlane.f32.xlu0 %v2952_v37  ;;  %v3897_v38 = vsel %vm3310_vm13, %v9271_v40, -inf  ;;  %v4269_v40 = vsel %vm4268_vm15, %v9113_v46, -inf  ;;  %v4642_v46 = vsel %vm4268_vm15, %v9322_v3, -inf  ;;  %v5015_v3 = vsel %vm4268_vm15, %v9459_v52, -inf }
 0x9de   :  { %v9574_v26 = vpop.xlane.xlu1 %3167  ;;  %v9576_v30 = vpop.xlane.xlu0 %3326  ;;  %v5354_v52 = vrot.slane %v9538_v49, %v6793_v13 }
 0x9e1   :  { %2983 = vmax.xlane.f32.xlu1 %v2982_v23  ;;  %2956 = vmax.xlane.f32.xlu0 %v2955_v36  ;;  %v4265_v23 = vsel %vm4264_vm2, %v9091_v1, -inf  ;;  %v4639_v1 = vsel %vm4264_vm2, %v9305_v27, -inf  ;;  %v4648_v27 = vsel %vm4268_vm15, %v9360_v22, -inf  ;;  %v5363_v22 = vrot.slane %v9549_v4, %v6793_v13 }
 0x9e2   :  { %v9582_v19 = vpop.xlane.xlu1 %3329  ;;  %v9584_v39 = vpop.xlane.xlu0 %3356 }
 0x9e5   :  { %2986 = vmax.xlane.f32.xlu1 %v2985_v12  ;;  %2959 = vmax.xlane.f32.xlu0 %v2958_v5  ;;  %v4272_v12 = vsel %vm4264_vm2, %v9134_v42, -inf  ;;  %v4645_v42 = vsel %vm4264_vm2, %v9333_v14, -inf  ;;  %v5018_v14 = vsel %vm4264_vm2, %v9470_v48, -inf  ;;  %v5021_v48 = vsel %vm4268_vm15, %v9487_v28, -inf }
 0x9e6   :  { %v9590_v47 = vpop.xlane.xlu1 %3359  ;;  %v9592_v9 = vpop.xlane.xlu0 %3140  ;;  %v5388_v28 = vsel %vm4268_vm15, %v9534_v55, -inf }
 0x9e9   :  { %2989 = vmax.xlane.f32.xlu1 %v2988_v51  ;;  %3892 = vmax.xlane.f32.xlu0 %v3891_v33 }
 0x9ea   :  { %v9598_v32 = vpop.xlane.xlu1 %3170  ;;  %v9600_v44 = vpop.xlane.xlu0 %3332 }
 0x9ed   :  { %3895 = vmax.xlane.f32.xlu1 %v3894_v25  ;;  %3898 = vmax.xlane.f32.xlu0 %v3897_v38 }
 0x9ee   :  { %v9606_v37 = vpop.xlane.xlu1 %3362  ;;  %v9608_v35 = vpop.xlane.xlu0 %3519 }
 0x9f1   :  { %3901 = vmax.xlane.f32.xlu1 %v3900_v62  ;;  %4266 = vmax.xlane.f32.xlu0 %v4265_v23  ;;  %v5012_v62 = vsel %vm4264_vm2, %v9437_v61, -inf }
 0x9f2   :  { %v9614_v36 = vpop.xlane.xlu1 %3522  ;;  %v3550_v29 = vpop.xlane.xlu0 %3549 }
 0x9f5   :  { %4270 = vmax.xlane.f32.xlu1 %v4269_v40  ;;  %4273 = vmax.xlane.f32.xlu0 %v4272_v12  ;;  %v5359_v12 = vrot.slane %v9540_v45, %v6782_v17 }
 0x9f6   :  { %v3553_v5 = vpop.xlane.xlu1 %3552  ;;  %v9620_v51 = vpop.xlane.xlu0 %3143 }
 0x9f9   :  { %4276 = vmax.xlane.f32.xlu1 %v4275_v24  ;;  %4640 = vmax.xlane.f32.xlu0 %v4639_v1  ;;  %v5350_v1 = vrot.slane %v9527_v56, %v6782_v17  ;;  %v3645_v56 = vrot.slane %v3553_v5, %v6782_v17 }
 0x9fa   :  { %v9626_v33 = vpop.xlane.xlu1 %3173  ;;  %v9628_v25 = vpop.xlane.xlu0 %3335 }
 0x9fd   :  { %4643 = vmax.xlane.f32.xlu1 %v4642_v46  ;;  %4646 = vmax.xlane.f32.xlu0 %v4645_v42  ;;  %v5385_v46 = vsel %vm4264_vm2, %v9515_v43, -inf  ;;  %v5364_v42 = vsel %vm233_vm8, %v5363_v22, %v5359_v12  ;;  %v5391_v43 = vsel %vm4264_vm2, %v9547_v6, -inf  ;;  %vm10540_vm2 = vmmov %vm10538_vm1 }
 0x9fe   :  { %v9634_v38 = vpop.xlane.xlu1 %3365  ;;  %v9636_v60 = vpop.xlane.xlu0 %3525 }
 0xa01   :  { %4649 = vmax.xlane.f32.xlu1 %v4648_v27  ;;  %5013 = vmax.xlane.f32.xlu0 %v5012_v62  ;;  %v3641_v27 = vrot.slane %v3550_v29, %v6782_v17  ;;  %v5355_v62 = vsel %vm233_vm8, %v5354_v52, %v5350_v1 }
 0xa02   :  { %v3556_v23 = vpop.xlane.xlu1 %3555  ;;  %v9642_v40 = vpop.xlane.xlu0 %3146 }
 0xa03   :  { %v3649_v49 = vrot.slane %v3556_v23, %v6782_v17  ;;  %v3686_v29 = vsel %vm406_vm4, %v3645_v56, %v3641_v27 }
 0xa05   :  { %5016 = vmax.xlane.f32.xlu1 %v5015_v3  ;;  %5019 = vmax.xlane.f32.xlu0 %v5018_v14  ;;  %v5380_v3 = vsel %vm406_vm4, %v5364_v42, %v5355_v62  ;;  %v3687_v23 = vsel %vm408_vm5, %v3649_v49, %v3686_v29  ;;  %v3225_v29 = vrot.slane %v9592_v9, %v6782_v17 }
 0xa06   :  { %v9652_v61 = vpop.xlane.xlu1 %3176  ;;  %v9654_v24 = vpop.xlane.xlu0 %3338  ;;  %v5394_v22 = vsel %vm4268_vm15, %v5380_v3, -inf  ;;  %vm10535_vm15 = vmmov %vm10530_vm3 }
 0xa09   :  { %5022 = vmax.xlane.f32.xlu1 %v5021_v48  ;;  %5386 = vmax.xlane.f32.xlu0 %v5385_v46 }
 0xa0a   :  { %v9664_v45 = vpop.xlane.xlu1 %3368  ;;  %v9666_v4 = vpop.xlane.xlu0 %3528 }
 0xa0d   :  { %5389 = vmax.xlane.f32.xlu1 %v5388_v28  ;;  %5392 = vmax.xlane.f32.xlu0 %v5391_v43 }
 0xa0e   :  { %v3559_v14 = vpop.xlane.xlu1 %3558  ;;  %v2939_v12 = vpop.xlane.xlu0 %2938 }
 0xa0f   :  { %v3653_v5 = vrot.slane %v3559_v14, %v6782_v17  ;;  %v3020_v6 = vrot.slane %v2939_v12, %v6782_v17  ;;  %v3221_v12 = vrot.slane %v9568_v63, %v6782_v17 }
 0xa11   :  { %v9683_v55 = vsel %vm410_vm6, %v3653_v5, %v3687_v23  ;;  %5395 = vmax.xlane.f32.xlu1 %v5394_v22  ;;  %v3229_v5 = vrot.slane %v9620_v51, %v6782_v17  ;;  %v3253_v51 = vrot.slane %v9556_v57, %v6782_v17  ;;  %v3265_v57 = vrot.slane %v9598_v32, %v6782_v17 }
 0xa12   :  { %v2942_v1 = vpop.xlane.xlu1 %2941  ;;  %v2969_v52 = vpop.xlane.xlu0 %2968 }
 0xa13   :  { %v3024_v48 = vrot.slane %v2942_v1, %v6782_v17  ;;  %v3060_v42 = vrot.slane %v2969_v52, %v6782_v17  ;;  %v3291_v52 = vsel %vm408_vm5, %v3221_v12, %v9564_v34 }
 0xa14   :  { %v3292_v63 = vsel %vm410_vm6, %v3225_v29, %v3291_v52 }
 0xa15   :  { %v3097_v46 = vsel %vm406_vm4, %v3024_v48, %v3020_v6  ;;  %v3233_v6 = vrot.slane %v9642_v40, %v6782_v17  ;;  %v3257_v40 = vrot.slane %v9566_v53, %v6782_v17  ;;  %v3269_v53 = vrot.slane %v9626_v33, %v6782_v17 }
 0xa16   :  { %v2972_v27 = vpop.xlane.xlu1 %2971  ;;  %v3150_v56 = vpop.xlane.xlu0 %3149 }
 0xa17   :  { %v3064_v49 = vrot.slane %v2972_v27, %v6782_v17  ;;  %v3237_v48 = vrot.slane %v3150_v56, %v6782_v17 }
 0xa19   :  { %v3105_v28 = vsel %vm406_vm4, %v3064_v49, %v3060_v42  ;;  %v3293_v42 = vsel %vm412_vm7, %v3229_v5, %v3292_v63  ;;  %v3298_v63 = vsel %vm406_vm4, %v3257_v40, %v3253_v51 }
 0xa1a   :  { %v3180_v43 = vpop.xlane.xlu1 %3179  ;;  %v9691_v62 = vpop.xlane.xlu0 %3341 }
 0xa1e   :  { %v9693_v3 = vpop.xlane.xlu1 %3371  ;;  %v9695_v14 = vpop.xlane.xlu0 %3531 }
 0xa22   :  { %v9703_v23 = vpop.xlane.xlu1 %3561  ;;  %v2945_v22 = vpop.xlane.xlu0 %2944 }
 0xa23   :  { %v3028_v1 = vrot.slane %v2945_v22, %v6782_v17  ;;  %v3294_v22 = vsel %vm414_vm9, %v3233_v6, %v3293_v42  ;;  %v3277_v42 = vrot.slane %v3180_v43, %v6782_v17 }
 0xa24   :  { %v3295_v12 = vsel %vm10535_vm15, %v3237_v48, %v3294_v22  ;;  %vm10541_vm15 = vmmov %vm10536_vm10 }
 0xa25   :  { %v9713_v9 = vsel %vm408_vm5, %v3028_v1, %v3097_v46  ;;  %v3261_v46 = vrot.slane %v9574_v26, %v6782_v17  ;;  %v3273_v26 = vrot.slane %v9652_v61, %v6782_v17 }
 0xa26   :  { %v2975_v27 = vpop.xlane.xlu1 %2974  ;;  %v3153_v49 = vpop.xlane.xlu0 %3152 }
 0xa27   :  { %v3068_v34 = vrot.slane %v2975_v27, %v6782_v17  ;;  %v3241_v56 = vrot.slane %v3153_v49, %v6782_v17 }
 0xa29   :  { %v9729_v29 = vsel %vm408_vm5, %v3068_v34, %v3105_v28  ;;  %v3296_v5 = vsel %vm10536_vm10, %v3241_v56, %v3295_v12  ;;  %v3299_v28 = vsel %vm408_vm5, %v3261_v46, %v3298_v63  ;;  %vm10542_vm10 = vmmov %vm10538_vm1 }
 0xa2a   :  { %v3156_v6 = vpop.xlane.xlu1 %3155  ;;  %v3159_v1 = vpop.xlane.xlu0 %3158  ;;  %v3311_v52 = vsel %vm3310_vm13, %v3296_v5, -inf  ;;  %v3300_v33 = vsel %vm410_vm6, %v3265_v57, %v3299_v28 }
 0xa2b   :  { %v3245_v48 = vrot.slane %v3156_v6, %v6782_v17  ;;  %v3249_v32 = vrot.slane %v3159_v1, %v6782_v17  ;;  %3312 = vmax.xlane.f32.xlu0 %v3311_v52  ;;  %v3301_v49 = vsel %vm412_vm7, %v3269_v53, %v3300_v33  ;;  %v3412_v33 = vrot.slane %v9582_v19, %v6782_v17 }
 0xa2c   :  { %v3302_v61 = vsel %vm414_vm9, %v3273_v26, %v3301_v49 }
 0xa2d   :  { %v3297_v27 = vsel %vm406_vm4, %v3249_v32, %v3245_v48  ;;  %v3303_v56 = vsel %vm10530_vm3, %v3277_v42, %v3302_v61  ;;  %v3408_v42 = vrot.slane %v9576_v30, %v6782_v17  ;;  %v3424_v61 = vrot.slane %v9654_v24, %v6782_v17  ;;  %vm10543_vm3 = vmmov %vm10537_vm11 }
 0xa2e   :  { %v3183_v22 = vpop.xlane.xlu1 %3182  ;;  %v3186_v51 = vpop.xlane.xlu0 %3185  ;;  %v3315_v40 = vsel %vm3314_vm0, %v3297_v27, -inf  ;;  %v3448_v24 = vrot.slane %v9584_v39, %v6782_v17  ;;  %v3460_v39 = vrot.slane %v9634_v38, %v6782_v17 }
 0xa2f   :  { %v3281_v34 = vrot.slane %v3183_v22, %v6782_v17  ;;  %3316 = vmax.xlane.f32.xlu1 %v3315_v40  ;;  %v3285_v46 = vrot.slane %v3186_v51, %v6782_v17  ;;  %v3416_v22 = vrot.slane %v9600_v44, %v6782_v17  ;;  %v3420_v51 = vrot.slane %v9628_v25, %v6782_v17 }
 0xa31   :  { %v3304_v43 = vsel %vm10537_vm11, %v3281_v34, %v3303_v56  ;;  %v3485_v56 = vsel %vm406_vm4, %v3412_v33, %v3408_v42  ;;  %vm10545_vm11 = vmmov %vm10543_vm3 }
 0xa32   :  { %v3189_v12 = vpop.xlane.xlu1 %3188  ;;  %v3345_v57 = vpop.xlane.xlu0 %3344  ;;  %v3318_v5 = vsel %vm3310_vm13, %v3304_v43, -inf  ;;  %v3486_v44 = vsel %vm408_vm5, %v3416_v22, %v3485_v56 }
 0xa33   :  { %v3289_v53 = vrot.slane %v3189_v12, %v6782_v17  ;;  %3319 = vmax.xlane.f32.xlu0 %v3318_v5  ;;  %v3432_v25 = vrot.slane %v3345_v57, %v6782_v17  ;;  %v3487_v43 = vsel %vm410_vm6, %v3420_v51, %v3486_v44  ;;  %v3452_v5 = vrot.slane %v9590_v47, %v6782_v17 }
 0xa35   :  { %v3305_v6 = vsel %vm406_vm4, %v3289_v53, %v3285_v46  ;;  %v3428_v46 = vrot.slane %v9691_v62, %v6782_v17  ;;  %v3488_v53 = vsel %vm412_vm7, %v3424_v61, %v3487_v43  ;;  %v3468_v61 = vrot.slane %v9693_v3, %v6782_v17 }
 0xa36   :  { %v9754_v1 = vpop.xlane.xlu1 %3374  ;;  %v9756_v52 = vpop.xlane.xlu0 %3534  ;;  %v3321_v63 = vsel %vm3314_vm0, %v3305_v6, -inf }
 0xa37   :  { %3322 = vmax.xlane.f32.xlu1 %v3321_v63  ;;  %v3489_v62 = vsel %vm414_vm9, %v3428_v46, %v3488_v53 }
 0xa38   :  { %v3490_v42 = vsel %vm10538_vm1, %v3432_v25, %v3489_v62 }
 0xa3a   :  { %v9759_v26 = vpop.xlane.xlu1 %3564  ;;  %v9761_v48 = vpop.xlane.xlu0 %2947 }
 0xa3e   :  { %v2963_v32 = vpop.xlane.xlu1 %2962  ;;  %v2966_v28 = vpop.xlane.xlu0 %2965 }
 0xa3f   :  { %v3052_v27 = vrot.slane %v2963_v32, %v6782_v17  ;;  %v3056_v49 = vrot.slane %v2966_v28, %v6782_v17  ;;  %v3456_v28 = vrot.slane %v9606_v37, %v6782_v17 }
 0xa41   :  { %v3104_v40 = vsel %vm406_vm4, %v3056_v49, %v3052_v27  ;;  %v3493_v27 = vsel %vm406_vm4, %v3452_v5, %v3448_v24  ;;  %v3464_v49 = vrot.slane %v9664_v45, %v6782_v17  ;;  %v3472_v45 = vrot.slane %v9754_v1, %v6782_v17 }
 0xa42   :  { %v9776_v34 = vpop.xlane.xlu1 %2977  ;;  %v2993_v30 = vpop.xlane.xlu0 %2992  ;;  %v3120_v19 = vsel %vm2540_vm12, %v3104_v40, -inf }
 0xa43   :  { %3121 = vmax.xlane.f32.xlu0 %v3120_v19  ;;  %v3092_v12 = vrot.slane %v2993_v30, %v6782_v17  ;;  %v3494_v19 = vsel %vm408_vm5, %v3456_v28, %v3493_v27 }
 0xa44   :  { %v3495_v56 = vsel %vm410_vm6, %v3460_v39, %v3494_v19  ;;  %v3613_v39 = vrot.slane %v9666_v4, %v6782_v17  ;;  %v3657_v19 = vrot.slane %v9703_v23, %v6782_v17 }
 0xa45   :  { %v3496_v44 = vsel %vm412_vm7, %v3464_v49, %v3495_v56 }
 0xa46   :  { %v2996_v6 = vpop.xlane.xlu1 %2995  ;;  %v3348_v63 = vpop.xlane.xlu0 %3347 }
 0xa47   :  { %v3096_v32 = vrot.slane %v2996_v6, %v6782_v17  ;;  %v3436_v57 = vrot.slane %v3348_v63, %v6782_v17 }
 0xa49   :  { %v3112_v47 = vsel %vm406_vm4, %v3096_v32, %v3092_v12  ;;  %v3491_v33 = vsel %vm10539_vm14, %v3436_v57, %v3490_v42  ;;  %v3497_v12 = vsel %vm414_vm9, %v3468_v61, %v3496_v44  ;;  %v3601_v32 = vrot.slane %v9608_v35, %v6782_v17  ;;  %vm10548_vm14 = vmmov %vm10543_vm3 }
 0xa4a   :  { %v3351_v22 = vpop.xlane.xlu1 %3350  ;;  %v3354_v51 = vpop.xlane.xlu0 %3353  ;;  %v3126_v40 = vsel %vm2540_vm12, %v3112_v47, -inf  ;;  %v3505_v37 = vsel %vm3310_vm13, %v3491_v33, -inf  ;;  %v3498_v5 = vsel %vm10540_vm2, %v3472_v45, %v3497_v12  ;;  %v3605_v57 = vrot.slane %v9614_v36, %v6782_v17 }
 0xa4b   :  { %v3440_v38 = vrot.slane %v3351_v22, %v6782_v17  ;;  %v3444_v30 = vrot.slane %v3354_v51, %v6782_v17  ;;  %3127 = vmax.xlane.f32.xlu1 %v3126_v40  ;;  %3506 = vmax.xlane.f32.xlu0 %v3505_v37  ;;  %v3609_v42 = vrot.slane %v9636_v60, %v6782_v17  ;;  %v6327_v44 = vmov 0.0  }
 0xa4c   :  { %v3617_v33 = vrot.slane %v9695_v14, %v6782_v17  ;;  %v3678_v36 = vsel %vm406_vm4, %v3605_v57, %v3601_v32  ;;  %v3621_v22 = vrot.slane %v9756_v52, %v6782_v17  ;;  %6022 = vmatprep.subr.mxu0 %v6327_v44  ;;  %6193 = vmatprep.subr.mxu1 %v6327_v44  ;;  %v5993_v32 = vld [vmem:[%s10356_s1 + $0x68] sm:$0xff] }
 0xa4d   :  { %v3492_v46 = vsel %vm406_vm4, %v3444_v30, %v3440_v38  ;;  %v3679_v60 = vsel %vm408_vm5, %v3609_v42, %v3678_v36  ;;  %vm10544_vm5 = vmmov %vm10538_vm1  ;;  %v3032_v36 = vrot.slane %v9761_v48, %v6782_v17  ;;  %v5989_v48 = vld [vmem:[%s10356_s1 + $0x48] sm:$0xff] }
 0xa4e   :  { %v3378_v25 = vpop.xlane.xlu1 %3377  ;;  %v3381_v43 = vpop.xlane.xlu0 %3380  ;;  %v3508_v3 = vsel %vm3314_vm0, %v3492_v46, -inf  ;;  %v3680_v51 = vsel %vm410_vm6, %v3613_v39, %v3679_v60  ;;  %v5991_v39 = vld [vmem:[%s10356_s1 + $0x58] sm:$0xff]  ;;  %v5990_v60 = vld [vmem:[%s10356_s1 + $0x50] sm:$0xff] }
 0xa4f   :  { %v3476_v24 = vrot.slane %v3378_v25, %v6782_v17  ;;  %3509 = vmax.xlane.f32.xlu1 %v3508_v3  ;;  %v3480_v53 = vrot.slane %v3381_v43, %v6782_v17  ;;  %v3681_v40 = vsel %vm412_vm7, %v3617_v33, %v3680_v51  ;;  %v5995_v25 = vld [vmem:[%s10356_s1 + $0x78] sm:$0xff]  ;;  %v3661_v43 = vrot.slane %v9759_v26, %v6782_v17 }
 0xa50   :  { %v3682_v61 = vsel %vm414_vm9, %v3621_v22, %v3681_v40  ;;  %6023 = vmatpush1.msra.mxu0 %v5995_v25 }
 0xa51   :  { %v3499_v1 = vsel %vm10541_vm15, %v3476_v24, %v3498_v5  ;;  %6024 = vmatprep.subr.mxu0 %v6327_v44  ;;  %v5994_v5 = vld [vmem:[%s10356_s1 + $0x70] sm:$0xff]  ;;  %vm5435_vm15 = vcmask 212112  }
 0xa52   :  { %v3384_v6 = vpop.xlane.xlu1 %3383  ;;  %v3538_v63 = vpop.xlane.xlu0 %3537  ;;  %v3511_v62 = vsel %vm3310_vm13, %v3499_v1, -inf  ;;  %6025 = vmatpush1.msra.mxu0 %v5994_v5 }
 0xa53   :  { %v3484_v28 = vrot.slane %v3384_v6, %v6782_v17  ;;  %3512 = vmax.xlane.f32.xlu0 %v3511_v62  ;;  %v3625_v4 = vrot.slane %v3538_v63, %v6782_v17  ;;  %6026 = vmatprep.subr.mxu0 %v6327_v44 }
 0xa54   :  { %6027 = vmatpush1.msra.mxu0 %v5993_v32 }
 0xa55   :  { %v3500_v47 = vsel %vm406_vm4, %v3484_v28, %v3480_v53  ;;  %v3683_v30 = vsel %vm10542_vm10, %v3625_v4, %v3682_v61  ;;  %v3689_v53 = vsel %vm412_vm7, %v3657_v19, %v9683_v55  ;;  %v5992_v55 = vld [vmem:[%s10356_s1 + $0x60] sm:$0xff]  ;;  %6028 = vmatprep.subr.mxu0 %v6327_v44  ;;  %vm5462_vm10 = vcmask 294112  }
 0xa56   :  { %v3568_v27 = vpop.xlane.xlu1 %3567  ;;  %v9835_v49 = vpop.xlane.xlu0 %2950  ;;  %v3514_v35 = vsel %vm3314_vm0, %v3500_v47, -inf  ;;  %v3690_v63 = vsel %vm414_vm9, %v3661_v43, %v3689_v53  ;;  %6029 = vmatpush1.msra.mxu0 %v5992_v55 }
 0xa57   :  { %3515 = vmax.xlane.f32.xlu1 %v3514_v35  ;;  %v3665_v12 = vrot.slane %v3568_v27, %v6782_v17  ;;  %6030 = vmatprep.subr.mxu0 %v6327_v44  ;;  %v3036_v4 = vrot.slane %v9835_v49, %v6782_v17  ;;  %v3099_v49 = vsel %vm410_vm6, %v3032_v36, %v9713_v9  ;;  %v2927_v9 = vsel %vm2540_vm12, %v8388_v50, -inf }
 0xa58   :  { %6031 = vmatpush1.msra.mxu0 %v5991_v39  ;;  %v5983_v39 = vld [vmem:[%s10356_s1 + $0x18] sm:$0xff] }
 0xa59   :  { %v3691_v57 = vsel %vm10544_vm5, %v3665_v12, %v3690_v63  ;;  %6032 = vmatprep.subr.mxu0 %v6327_v44  ;;  %v3100_v19 = vsel %vm412_vm7, %v3036_v4, %v3099_v49  ;;  %v6006_v4 = vld [vmem:[%s10356_s1 + $0xd0] sm:$0x3]  ;;  %vm5516_vm5 = vcmask 458112  }
 0xa5a   :  { %v9845_v14 = vpop.xlane.xlu1 %2980  ;;  %v3541_v37 = vpop.xlane.xlu0 %3540  ;;  %6033 = vmatpush1.msra.mxu0 %v5990_v60  ;;  %v5980_v60 = vld [vmem:[%s10356_s1] sm:$0xff]  ;;  %v6002_v49 = vld [vmem:[%s10356_s1 + $0xb0] sm:$0xff] }
 0xa5b   :  { %v3629_v38 = vrot.slane %v3541_v37, %v6782_v17  ;;  %6034 = vmatprep.subr.mxu0 %v6327_v44 }
 0xa5c   :  { %6035 = vmatpush1.msra.mxu0 %v5989_v48 }
 0xa5d   :  { %v3684_v52 = vsel %vm10543_vm3, %v3629_v38, %v3683_v30  ;;  %6036 = vmatprep.subr.mxu0 %v6327_v44 }
 0xa5e   :  { %v3544_v45 = vpop.xlane.xlu1 %3543  ;;  %v3547_v56 = vpop.xlane.xlu0 %3546  ;;  %v3698_v46 = vsel %vm3310_vm13, %v3684_v52, -inf  ;;  %v5988_v52 = vld [vmem:[%s10356_s1 + $0x40] sm:$0xff] }
 0xa5f   :  { %v3633_v3 = vrot.slane %v3544_v45, %v6782_v17  ;;  %v3637_v23 = vrot.slane %v3547_v56, %v6782_v17  ;;  %3699 = vmax.xlane.f32.xlu0 %v3698_v46  ;;  %v3076_v45 = vrot.slane %v9845_v14, %v6782_v17  ;;  %v5987_v14 = vld [vmem:[%s10356_s1 + $0x38] sm:$0xff]  ;;  %6037 = vmatpush1.msra.mxu0 %v5988_v52 }
 0xa60   :  { %6038 = vmatprep.subr.mxu0 %v6327_v44 }
 0xa61   :  { %v3685_v24 = vsel %vm406_vm4, %v3637_v23, %v3633_v3  ;;  %6039 = vmatpush1.msra.mxu0 %v5987_v14 }
 0xa62   :  { %v3571_v26 = vpop.xlane.xlu1 %3570  ;;  %v3574_v1 = vpop.xlane.xlu0 %3573  ;;  %v3701_v6 = vsel %vm3314_vm0, %v3685_v24, -inf  ;;  %6040 = vmatprep.subr.mxu0 %v6327_v44 }
 0xa63   :  { %v3669_v62 = vrot.slane %v3571_v26, %v6782_v17  ;;  %3702 = vmax.xlane.f32.xlu1 %v3701_v6  ;;  %v3673_v28 = vrot.slane %v3574_v1, %v6782_v17  ;;  %v2933_v26 = vsel %vm2540_vm12, %v8457_v41, -inf  ;;  %v5986_v6 = vld [vmem:[%s10356_s1 + $0x30] sm:$0xff]  ;;  %v5985_v41 = vld [vmem:[%s10356_s1 + $0x28] sm:$0xff]  ;;  %vm6018_vm12 = vcmask 1041408  }
 0xa64   :  { %6041 = vmatpush1.msra.mxu0 %v5986_v6 }
 0xa65   :  { %v3692_v42 = vsel %vm10545_vm11, %v3669_v62, %v3691_v57  ;;  %6042 = vmatprep.subr.mxu0 %v6327_v44  ;;  %vm10553_vm11 = vcmask 80896  }
 0xa66   :  { %v3577_v47 = vpop.xlane.xlu1 %3576  ;;  %v2954_v33 = vpop.xlane.xlu0 %2953  ;;  %v3704_v27 = vsel %vm3310_vm13, %v3692_v42, -inf  ;;  %vm10546_vm13 = vcmask 39952   ;;  %v5984_v42 = vld [vmem:[%s10356_s1 + $0x20] sm:$0xff]  ;;  %6043 = vmatpush1.msra.mxu0 %v5985_v41  ;;  %v5997_v41 = vld [vmem:[%s10356_s1 + $0x88] sm:$0xff] }
 0xa67   :  { %v3677_v35 = vrot.slane %v3577_v47, %v6782_v17  ;;  %3705 = vmax.xlane.f32.xlu0 %v3704_v27  ;;  %v2924_v37 = vsel %vm10546_vm13, %v8377_v18, -inf  ;;  %v3040_v38 = vrot.slane %v2954_v33, %v6782_v17  ;;  %v3072_v18 = vrot.slane %v9776_v34, %v6782_v17  ;;  %6044 = vmatprep.subr.mxu0 %v6327_v44  ;;  %v5982_v27 = vld [vmem:[%s10356_s1 + $0x10] sm:$0xff] }
 0xa68   :  { %6045 = vmatpush1.msra.mxu0 %v5984_v42 }
 0xa69   :  { %v3693_v22 = vsel %vm406_vm4, %v3677_v35, %v3673_v28  ;;  %v3101_v34 = vsel %vm414_vm9, %v3040_v38, %v3100_v19  ;;  %v3107_v50 = vsel %vm410_vm6, %v3072_v18, %v9729_v29  ;;  %vm10550_vm6 = vmmov %vm10538_vm1  ;;  %6046 = vmatprep.subr.mxu0 %v6327_v44  ;;  %v5981_v35 = vld [vmem:[%s10356_s1 + $0x8] sm:$0xff] }
 0xa6a   :  { %v2984_v51 = vpop.xlane.xlu1 %2983  ;;  %v2957_v40 = vpop.xlane.xlu0 %2956  ;;  %v3707_v61 = vsel %vm3314_vm0, %v3693_v22, -inf  ;;  %vm10547_vm0 = vmmov %vm10546_vm13  ;;  %v3108_v24 = vsel %vm412_vm7, %v3076_v45, %v3107_v50  ;;  %6047 = vmatpush1.msra.mxu0 %v5983_v39  ;;  %v6001_v19 = vld [vmem:[%s10356_s1 + $0xa8] sm:$0xff]  ;;  %v5430_v45 = vadd.s32 4294967278, %v10506_v16  ;;  %vm5822_vm13 = vcmask 162816  }
 0xa6b   :  { %2925 = vmax.xlane.f32.xlu0 %v2924_v37  ;;  %3708 = vmax.xlane.f32.xlu1 %v3707_v61  ;;  %v3044_v30 = vrot.slane %v2957_v40, %v6782_v17  ;;  %v2930_v25 = vsel %vm10547_vm0, %v8443_v31, -inf  ;;  %v3080_v43 = vrot.slane %v2984_v51, %v6782_v17  ;;  %vm10549_vm2 = vmmov %vm10547_vm0  ;;  %v6005_v37 = vld [vmem:[%s10356_s1 + $0xc8] sm:$0xff]  ;;  %v6004_v61 = vld [vmem:[%s10356_s1 + $0xc0] sm:$0xff] }
 0xa6c   :  { %vm10551_vm7 = vmmov %vm10543_vm3  ;;  %6048 = vmatprep.subr.mxu0 %v6327_v44  ;;  %v10040_v50 = vsub.s32 %v5430_v45, %v6774_v20  ;;  %vm5489_vm3 = vcmask 376112  }
 0xa6d   :  { %v3102_v31 = vsel %vm10538_vm1, %v3044_v30, %v3101_v34  ;;  %v3109_v29 = vsel %vm414_vm9, %v3080_v43, %v3108_v24  ;;  %vm10552_vm9 = vmmov %vm10547_vm0  ;;  %6049 = vmatpush1.msra.mxu0 %v5982_v27  ;;  %v6003_v30 = vld [vmem:[%s10356_s1 + $0xb8] sm:$0xff]  ;;  %v5479_v34 = vadd.s32 4294967266, %v10506_v16  ;;  %v5484_v43 = vadd.s32 4294967258, %v10506_v16 }
 0xa6e   :  { %v2987_v56 = vpop.xlane.xlu1 %2986  ;;  %v2960_v46 = vpop.xlane.xlu0 %2959  ;;  %6050 = vmatprep.subr.mxu0 %v6327_v44  ;;  %vm5824_vm0 = vcmask 244736   ;;  %vm5826_vm1 = vcmask 326656  }
 0xa6f   :  { %v3048_v3 = vrot.slane %v2960_v46, %v6782_v17  ;;  %2931 = vmax.xlane.f32.xlu0 %v2930_v25  ;;  %2928 = vmax.xlane.f32.xlu1 %v2927_v9  ;;  %v3084_v23 = vrot.slane %v2987_v56, %v6782_v17  ;;  %v6000_v56 = vld [vmem:[%s10356_s1 + $0xa0] sm:$0xff]  ;;  %v5425_v46 = vadd.s32 4294967286, %v10506_v16  ;;  %v5452_v25 = vadd.s32 4294967276, %v10506_v16 }
 0xa70   :  { %6051 = vmatpush1.msra.mxu0 %v5981_v35  ;;  %v5457_v9 = vadd.s32 4294967268, %v10506_v16  ;;  %v10059_v6 = vsub.s32 %v5484_v43, %v6774_v20 }
 0xa71   :  { %v3103_v12 = vsel %vm10548_vm14, %v3048_v3, %v3102_v31  ;;  %v3110_v62 = vsel %vm10550_vm6, %v3084_v23, %v3109_v29  ;;  %6052 = vmatprep.subr.mxu0 %v6327_v44  ;;  %v5999_v23 = vld [vmem:[%s10356_s1 + $0x98] sm:$0xff]  ;;  %v5511_v31 = vadd.s32 4294967248, %v10506_v16  ;;  %v10047_v24 = vsub.s32 %v5425_v46, %v6774_v20 }
 0xa72   :  { %v2990_v5 = vpop.xlane.xlu1 %2989  ;;  %v9937_v53 = vpop.xlane.xlu0 %3892  ;;  %v3117_v1 = vsel %vm10549_vm2, %v3103_v12, -inf  ;;  %6053 = vmatpush1.msra.mxu0 %v5980_v60  ;;  %v5998_v12 = vld [vmem:[%s10356_s1 + $0x90] sm:$0xff]  ;;  %vm5543_vm14 = vcmask 540112   ;;  %vm5570_vm2 = vcmask 622112   ;;  %vm5828_vm6 = vcmask 408576  }
 0xa73   :  { %v3088_v63 = vrot.slane %v2990_v5, %v6782_v17  ;;  %2934 = vmax.xlane.f32.xlu1 %v2933_v26  ;;  %3118 = vmax.xlane.f32.xlu0 %v3117_v1  ;;  %v10050_v5 = vsub.s32 %v5452_v25, %v6774_v20  ;;  %v10053_v26 = vsub.s32 %v5457_v9, %v6774_v20 }
 0xa74   :  { %6064 = vmatprep.subr.mxu0 %v6327_v44  ;;  %v10056_v1 = vsub.s32 %v5479_v34, %v6774_v20  ;;  %v5857_v27 = vrot.slane %v9937_v53, %v6782_v17 }
 0xa75   :  { %v3111_v32 = vsel %vm10551_vm7, %v3088_v63, %v3110_v62  ;;  %6184 = vmatpush2.msk.msra.mxu0 %vm6018_vm12, %v6006_v4  ;;  %vm5830_vm7 = vcmask 490496   ;;  %vm5624_vm12 = vcmask 786112  }
 0xa76   :  { %v9953_v55 = vpop.xlane.xlu1 %3895  ;;  %v9955_v57 = vpop.xlane.xlu0 %3898  ;;  %v3123_v28 = vsel %vm10552_vm9, %v3111_v32, -inf  ;;  %6066 = vmatprep.subr.mxu0 %v6327_v44  ;;  %v5506_v32 = vadd.s32 4294967256, %v10506_v16  ;;  %vm5597_vm9 = vcmask 704112  }
 0xa77   :  { %3124 = vmax.xlane.f32.xlu1 %v3123_v28  ;;  %6067 = vmatpush2.msra.mxu0 %v6005_v37  ;;  %v10069_v28 = vsub.s32 %v5511_v31, %v6774_v20  ;;  %v5866_v53 = vrot.slane %v9955_v57, %v6782_v17  ;;  %v6096_v57 = vld [vmem:[%s10357_s3 + $0x18] sm:$0xff] }
 0xa78   :  { %6068 = vmatprep.subr.mxu0 %v6327_v44  ;;  %6194 = vmatpush3.msra.mxu1 %v6096_v57 }
 0xa79   :  { %6069 = vmatpush2.msra.mxu0 %v6004_v61  ;;  %6195 = vmatprep.subr.mxu1 %v6327_v44 }
 0xa7a   :  { %v9966_v47 = vpop.xlane.xlu1 %3901  ;;  %v9968_v33 = vpop.xlane.xlu0 %4266  ;;  %6070 = vmatprep.subr.mxu0 %v6327_v44 }
 0xa7b   :  { %6071 = vmatpush2.msra.mxu0 %v6003_v30  ;;  %v5870_v42 = vrot.slane %v9966_v47, %v6793_v13  ;;  %v5996_v47 = vld [vmem:[%s10356_s1 + $0x80] sm:$0xff]  ;;  %v5881_v37 = vrot.slane %v9968_v33, %v10047_v24 }
 0xa7c   :  { %6072 = vmatprep.subr.mxu0 %v6327_v44 }
 0xa7d   :  { %6073 = vmatpush2.msra.mxu0 %v6002_v49 }
 0xa7e   :  { %v9978_v36 = vpop.xlane.xlu1 %4270  ;;  %v9980_v22 = vpop.xlane.xlu0 %4273  ;;  %6074 = vmatprep.subr.mxu0 %v6327_v44 }
 0xa7f   :  { %6075 = vmatpush2.msra.mxu0 %v6001_v19  ;;  %v5885_v35 = vrot.slane %v9978_v36, %v10040_v50  ;;  %v5890_v60 = vrot.slane %v9980_v22, %v10047_v24 }
 0xa80   :  { %6076 = vmatprep.subr.mxu0 %v6327_v44 }
 0xa81   :  { %6077 = vmatpush2.msra.mxu0 %v6000_v56  ;;  %v5886_v19 = vsel %vm5435_vm15, %v5885_v35, %v5881_v37  ;;  %v5471_v37 = vrot.slane %v7114_v7, %v10053_v26  ;;  %v10554_v7 = vld [vmem:[#allocation32_spill] sm:$0xff] }
 0xa82   :  { %v9990_v51 = vpop.xlane.xlu1 %4276  ;;  %v9992_v40 = vpop.xlane.xlu0 %4640  ;;  %6078 = vmatprep.subr.mxu0 %v6327_v44 }
 0xa83   :  { %6079 = vmatpush2.msra.mxu0 %v5999_v23  ;;  %v5894_v29 = vrot.slane %v9990_v51, %v10040_v50  ;;  %v5861_v51 = vrot.slane %v9953_v55, %v6793_v13  ;;  %v5905_v33 = vrot.slane %v9992_v40, %v10050_v5 }
 0xa84   :  { %6080 = vmatprep.subr.mxu0 %v6327_v44 }
 0xa85   :  { %6081 = vmatpush2.msra.mxu0 %v5998_v12  ;;  %v5895_v61 = vsel %vm5435_vm15, %v5894_v29, %v5890_v60  ;;  %v5862_v25 = vsel %vm233_vm8, %v5861_v51, %v5857_v27  ;;  %v5444_v51 = vrot.slane %v6982_v54, %v10040_v50  ;;  %v5440_v54 = vrot.slane %v6978_v2, %v10047_v24 }
 0xa86   :  { %v10002_v48 = vpop.xlane.xlu1 %4643  ;;  %v10004_v38 = vpop.xlane.xlu0 %4646  ;;  %6082 = vmatprep.subr.mxu0 %v6327_v44  ;;  %v5896_v40 = vsel %vm406_vm4, %v5895_v61, %v5886_v19 }
 0xa87   :  { %v5909_v36 = vrot.slane %v10002_v48, %v10053_v26  ;;  %v5914_v22 = vrot.slane %v10004_v38, %v10050_v5  ;;  %6083 = vmatpush2.msra.mxu0 %v5997_v41  ;;  %v5871_v48 = vsel %vm233_vm8, %v5870_v42, %v5866_v53  ;;  %v5408_v53 = vrot.slane %v6989_v59, %v6793_v13 }
 0xa88   :  { %6084 = vmatprep.subr.mxu0 %v6327_v44  ;;  %v5872_v43 = vsel %vm406_vm4, %v5871_v48, %v5862_v25 }
 0xa89   :  { %6085 = vmatpush2.msra.mxu0 %v5996_v47  ;;  %v5910_v9 = vsel %vm5462_vm10, %v5909_v36, %v5905_v33  ;;  %v5417_v47 = vrot.slane %v6995_v21, %v6793_v13  ;;  %v5429_v36 = vrot.slane %v6972_v15, %v10047_v24  ;;  %v5434_v21 = vrot.slane %v6976_v8, %v10040_v50  ;;  %v10558_v33 = vld [vmem:[#allocation24_spill] sm:$0xff] }
 0xa8a   :  { %v10014_v18 = vpop.xlane.xlu1 %4649  ;;  %v10016_v52 = vpop.xlane.xlu0 %5013  ;;  %v5404_v13 = vrot.slane %v6985_v58, %v6782_v17  ;;  %v5498_v15 = vrot.slane %v7422_v11, %v10059_v6  ;;  %v5445_v50 = vsel %vm5435_vm15, %v5444_v51, %v5440_v54  ;;  %v10556_v58 = vld [vmem:[#allocation34_spill] sm:$0xff] }
 0xa8b   :  { %v5918_v39 = vrot.slane %v10014_v18, %v10053_v26  ;;  %v10109_v18 = vsub.s32 %v5506_v32, %v6774_v20  ;;  %v5929_v45 = vrot.slane %v10016_v52, %v10056_v1  ;;  %v5488_v57 = vrot.slane %v10556_v58, %v10059_v6  ;;  %v10557_v11 = vld [vmem:[#allocation30_spill] sm:$0xff] }
 0xa8c   :  { %v5409_v2 = vsel %vm233_vm8, %v5408_v53, %v5404_v13  ;;  %v5494_v48 = vrot.slane %v10557_v11, %v10056_v1  ;;  %v5587_v58 = vadd.s32 4294967226, %v10506_v16  ;;  %v10568_v11 = vld [vmem:[#allocation10_spill] sm:$0xff] }
 0xa8d   :  { %v5919_v38 = vsel %vm5462_vm10, %v5918_v39, %v5914_v22  ;;  %v5413_v22 = vrot.slane %v6992_v0, %v6782_v17  ;;  %v5461_v0 = vrot.slane %v7110_v10, %v10053_v26  ;;  %v10559_v26 = vld [vmem:[#allocation2_spill] sm:$0xff] }
 0xa8e   :  { %v10032_v3 = vpop.xlane.xlu1 %5016  ;;  %v5020_v14 = vpop.xlane.xlu0 %5019  ;;  %v5515_v19 = vrot.slane %v10559_v26, %v10069_v28 }
 0xa8f   :  { %v5933_v30 = vrot.slane %v10032_v3, %v10059_v6  ;;  %v5938_v55 = vrot.slane %v5020_v14, %v10056_v1  ;;  %v5920_v3 = vsel %vm406_vm4, %v5919_v38, %v5910_v9  ;;  %v5418_v59 = vsel %vm233_vm8, %v5417_v47, %v5413_v22  ;;  %vm10563_vm8 = vmmov %vm10553_vm11 }
 0xa90   :  { %v5456_v38 = vrot.slane %v10558_v33, %v10050_v5  ;;  %v5419_v25 = vsel %vm406_vm4, %v5418_v59, %v5409_v2  ;;  %v5499_v9 = vsel %vm5489_vm3, %v5498_v15, %v5494_v48  ;;  %v10565_v15 = vld [vmem:[#allocation12_spill] sm:$0xff]  ;;  %v10569_v33 = vld [vmem:[#allocation13_spill] sm:$0xff] }
 0xa91   :  { %v5934_v14 = vsel %vm5489_vm3, %v5933_v30, %v5929_v45  ;;  %v10560_v45 = vld [vmem:[#allocation5_spill] sm:$0xff] }
 0xa92   :  { %v5023_v63 = vpop.xlane.xlu1 %5022  ;;  %v5387_v62 = vpop.xlane.xlu0 %5386 }
 0xa93   :  { %v5942_v4 = vrot.slane %v5023_v63, %v10059_v6  ;;  %v5953_v31 = vrot.slane %v5387_v62, %v10109_v18  ;;  %v5970_v63 = vsel %vm10553_vm11, %v5872_v43, %v5896_v40  ;;  %v10561_v6 = vld [vmem:[#allocation27_spill] sm:$0xff]  ;;  %v5463_v43 = vsel %vm5462_vm10, %v5461_v0, %v5456_v38 }
 0xa94   :  { %v5971_v42 = vsel %vm5822_vm13, %v5970_v63, %v5920_v3  ;;  %v5483_v40 = vrot.slane %v10561_v6, %v10056_v1  ;;  %v10562_v3 = vld [vmem:[#allocation3_spill] sm:$0xff]  ;;  %v5533_v63 = vadd.s32 4294967246, %v10506_v16  ;;  %v5592_v0 = vadd.s32 4294967218, %v10506_v16 }
 0xa95   :  { %v5943_v56 = vsel %vm5489_vm3, %v5942_v4, %v5938_v55  ;;  %v5467_v55 = vrot.slane %v10554_v7, %v10050_v5  ;;  %v10571_v6 = vld [vmem:[#allocation11_spill] sm:$0xff]  ;;  %vm10588_vm11 = vcmask 950112  }
 0xa96   :  { %v5390_v49 = vpop.xlane.xlu1 %5389  ;;  %v5393_v46 = vpop.xlane.xlu0 %5392  ;;  %v5944_v23 = vsel %vm406_vm4, %v5943_v56, %v5934_v14  ;;  %v5521_v56 = vrot.slane %v10560_v45, %v10109_v18  ;;  %v5510_v14 = vrot.slane %v10562_v3, %v10109_v18  ;;  %v5536_v22 = vsub.s32 %v5533_v63, %v6774_v20 }
 0xa97   :  { %v5957_v34 = vrot.slane %v5390_v49, %v10069_v28  ;;  %v5962_v12 = vrot.slane %v5393_v46, %v10109_v18  ;;  %v5972_v62 = vsel %vm5824_vm0, %v5971_v42, %v5944_v23  ;;  %v10555_v49 = vld [vmem:[#allocation4_spill] sm:$0xff]  ;;  %v5472_v10 = vsel %vm5462_vm10, %v5471_v37, %v5467_v55 }
 0xa98   :  { %v5525_v8 = vrot.slane %v10555_v49, %v10069_v28  ;;  %v5517_v18 = vsel %vm5516_vm5, %v5515_v19, %v5510_v14  ;;  %v5560_v42 = vadd.s32 4294967236, %v10506_v16  ;;  %v10564_v37 = vld [vmem:[#allocation8_spill] sm:$0xff]  ;;  %v10566_v49 = vld [vmem:[#allocation6_spill] sm:$0xff]  ;;  %v10570_v19 = vld [vmem:[#allocation7_spill] sm:$0xff]  ;;  %vm5832_vm10 = vcmask 572416  }
 0xa99   :  { %v5958_v41 = vsel %vm5516_vm5, %v5957_v34, %v5953_v31  ;;  %v5538_v34 = vadd.s32 4294967238, %v10506_v16  ;;  %v5436_v31 = vsel %vm5435_vm15, %v5434_v21, %v5429_v36  ;;  %v5537_v45 = vrot.slane %v10570_v19, %v5536_v22 }
 0xa9a   :  { %v5396_v52 = vpop.xlane.xlu1 %5395  ;;  %v5563_v13 = vsub.s32 %v5560_v42, %v6774_v20  ;;  %vm5651_vm15 = vcmask 868112  }
 0xa9b   :  { %v5966_v29 = vrot.slane %v5396_v52, %v10069_v28  ;;  %v5526_v28 = vsel %vm5516_vm5, %v5525_v8, %v5521_v56  ;;  %v5565_v52 = vadd.s32 4294967228, %v10506_v16  ;;  %v5541_v47 = vsub.s32 %v5538_v34, %v6774_v20 }
 0xa9c   :  { %v5575_v38 = vrot.slane %v10569_v33, %v5563_v13  ;;  %v5595_v34 = vsub.s32 %v5592_v0, %v6774_v20  ;;  %v10578_v0 = vld [vmem:[#allocation19_spill] sm:$0xff]  ;;  %v10582_v33 = vld [vmem:[#allocation17_spill] sm:$0xff] }
 0xa9d   :  { %v5967_v32 = vsel %vm5516_vm5, %v5966_v29, %v5962_v12  ;;  %v5473_v12 = vsel %vm406_vm4, %v5472_v10, %v5463_v43  ;;  %v5490_v29 = vsel %vm5489_vm3, %v5488_v57, %v5483_v40  ;;  %v5568_v51 = vsub.s32 %v5565_v52, %v6774_v20 }
 0xa9e   :  { %v5968_v39 = vsel %vm406_vm4, %v5967_v32, %v5958_v41  ;;  %v5446_v41 = vsel %vm406_vm4, %v5445_v50, %v5436_v31  ;;  %v5500_v32 = vsel %vm406_vm4, %v5499_v9, %v5490_v29  ;;  %v5552_v21 = vrot.slane %v10564_v37, %v5541_v47  ;;  %v10567_v50 = vld [vmem:[#allocation9_spill] sm:$0xff]  ;;  %v10572_v29 = vld [vmem:[#allocation18_spill] sm:$0xff] }
 0xa9f   :  { %v5973_v27 = vsel %vm5826_vm1, %v5972_v62, %v5968_v39  ;;  %v5821_v62 = vsel %vm10563_vm8, %v5419_v25, %v5446_v41  ;;  %v5579_v59 = vrot.slane %v10565_v15, %v5568_v51  ;;  %v5542_v8 = vrot.slane %v10566_v49, %v5541_v47  ;;  %v10574_v47 = vld [vmem:[#allocation14_spill] sm:$0xff]  ;;  %v10577_v15 = vld [vmem:[#allocation15_spill] sm:$0xff] }
 0xaa0   :  { %5975 = vrot.lane.b32.xlu0 %v5973_v27, %s6328_s15  ;;  %v5527_v27 = vsel %vm406_vm4, %v5526_v28, %v5517_v18  ;;  %v5823_v53 = vsel %vm5822_vm13, %v5821_v62, %v5473_v12  ;;  %v5548_v2 = vrot.slane %v10567_v50, %v5536_v22  ;;  %v5619_v57 = vadd.s32 4294967208, %v10506_v16  ;;  %v10573_v62 = vld [vmem:[#allocation21_spill] sm:$0xff] }
 0xaa1   :  { %v5825_v54 = vsel %vm5824_vm0, %v5823_v53, %v5500_v32  ;;  %v5569_v48 = vrot.slane %v10568_v11, %v5568_v51  ;;  %v5646_v10 = vadd.s32 4294967198, %v10506_v16  ;;  %v5614_v25 = vadd.s32 4294967216, %v10506_v16  ;;  %v10575_v53 = vld [vmem:[#allocation16_spill] sm:$0xff]  ;;  %v10581_v11 = vld [vmem:[#allocation25_spill] sm:$0xff] }
 0xaa2   :  { %v5827_v7 = vsel %vm5826_vm1, %v5825_v54, %v5527_v27  ;;  %v5553_v56 = vsel %vm5543_vm14, %v5552_v21, %v5548_v2  ;;  %v5564_v40 = vrot.slane %v10571_v6, %v5563_v13  ;;  %v5580_v9 = vsel %vm5570_vm2, %v5579_v59, %v5575_v38  ;;  %v10576_v21 = vld [vmem:[#allocation26_spill] sm:$0xff] }
 0xaa3   :  { %v5641_v43 = vadd.s32 4294967206, %v10506_v16  ;;  %v5544_v14 = vsel %vm5543_vm14, %v5542_v8, %v5537_v45  ;;  %v5590_v28 = vsub.s32 %v5587_v58, %v6774_v20  ;;  %v5622_v52 = vsub.s32 %v5619_v57, %v6774_v20  ;;  %v10579_v8 = vld [vmem:[#allocation20_spill] sm:$0xff]  ;;  %v10580_v58 = vld [vmem:[#allocation23_spill] sm:$0xff] }
 0xaa4   :  { %v5554_v31 = vsel %vm406_vm4, %v5553_v56, %v5544_v14  ;;  %v5571_v12 = vsel %vm5570_vm2, %v5569_v48, %v5564_v40  ;;  %v5606_v63 = vrot.slane %v10572_v29, %v5595_v34  ;;  %v5649_v41 = vsub.s32 %v5646_v10, %v6774_v20  ;;  %v10583_v56 = vld [vmem:[#allocation22_spill] sm:$0xff]  ;;  %v10584_v14 = vld [vmem:[#allocation33_spill] sm:$0xff] }
 0xaa5   :  { %v5581_v18 = vsel %vm406_vm4, %v5580_v9, %v5571_v12  ;;  %v5617_v42 = vsub.s32 %v5614_v25, %v6774_v20  ;;  %v5633_v27 = vrot.slane %v10573_v62, %v5622_v52  ;;  %v5596_v51 = vrot.slane %v10574_v47, %v5595_v34 }
 0xaa6   :  { %v5602_v22 = vrot.slane %v10575_v53, %v5590_v28  ;;  %v5644_v37 = vsub.s32 %v5641_v43, %v6774_v20  ;;  %v5660_v54 = vrot.slane %v10576_v21, %v5649_v41  ;;  %v5591_v59 = vrot.slane %v10577_v15, %v5590_v28  ;;  %v10585_v28 = vld [vmem:[#allocation29_spill] sm:$0xff] }
 0xaa7   :  { %v5623_v49 = vrot.slane %v10578_v0, %v5622_v52  ;;  %v5629_v50 = vrot.slane %v10579_v8, %v5617_v42  ;;  %v5650_v57 = vrot.slane %v10580_v58, %v5649_v41  ;;  %v5618_v38 = vrot.slane %v10582_v33, %v5617_v42  ;;  %v10586_v41 = vld [vmem:[#allocation31_spill] sm:$0xff] }
 0xaa8   :  { %v5607_v2 = vsel %vm5597_vm9, %v5606_v63, %v5602_v22  ;;  %v5656_v48 = vrot.slane %v10581_v11, %v5644_v37  ;;  %v5829_v19 = vsel %vm5828_vm6, %v5827_v7, %v5554_v31  ;;  %v5598_v45 = vsel %vm5597_vm9, %v5596_v51, %v5591_v59  ;;  %v10589_v59 = vld [vmem:[#allocation35_spill] sm:$0xff] }
 0xaa9   :  { %v5634_v10 = vsel %vm5624_vm12, %v5633_v27, %v5629_v50  ;;  %v5645_v25 = vrot.slane %v10583_v56, %v5644_v37  ;;  %v5831_v40 = vsel %vm5830_vm7, %v5829_v19, %v5581_v18  ;;  %v5608_v34 = vsel %vm406_vm4, %v5607_v2, %v5598_v45  ;;  %v10587_v18 = vld [vmem:[#allocation28_spill] sm:$0xff] }
 0xaaa   :  { %v5661_v6 = vsel %vm5651_vm15, %v5660_v54, %v5656_v48  ;;  %v5625_v43 = vsel %vm5624_vm12, %v5623_v49, %v5618_v38  ;;  %v5677_v52 = vrot.slane %v10585_v28, %v10584_v14  ;;  %v5747_v7 = vadd.s32 4294967294, %v10506_v16 }
 0xaab   :  { %v5635_v12 = vsel %vm406_vm4, %v5634_v10, %v5625_v43  ;;  %v5652_v29 = vsel %vm5651_vm15, %v5650_v57, %v5645_v25  ;;  %vm5834_vm3 = vcmask 654336   ;;  %v5672_v42 = vrot.slane %v10587_v18, %v10586_v41 }
 0xaac   :  { %v5662_v63 = vsel %vm406_vm4, %v5661_v6, %v5652_v29  ;;  %v5773_v62 = vadd.s32 4294967284, %v10506_v16  ;;  %vm5836_vm5 = vcmask 736256   ;;  %v5799_v27 = vadd.s32 4294967274, %v10506_v16 }
 0xaad   :  { %v5695_v47 = vadd.s32 4294967186, %v10506_v16  ;;  %v5833_v51 = vsel %vm5832_vm10, %v5831_v40, %v5608_v34  ;;  %v5679_v53 = vsel %vm10588_vm11, %v5677_v52, %v5672_v42  ;;  %v5700_v22 = vadd.s32 4294967178, %v10506_v16 }
 0xaae   :  { %v5722_v37 = vadd.s32 4294967176, %v10506_v16  ;;  %v5835_v21 = vsel %vm5834_vm3, %v5833_v51, %v5635_v12  ;;  %v5750_v54 = vsub.s32 %v5747_v7, %v6774_v20  ;;  %v5689_v0 = vsel %vm406_vm4, %v10589_v59, %v5679_v53  ;;  %v6183_v51 = vld [vmem:[%s10358_s2] ss:$0 sm:$0xff] }
 0xaaf   :  { %v5837_v49 = vsel %vm5836_vm5, %v5835_v21, %v5662_v63  ;;  %vm5756_vm13 = vcmask 146512   ;;  %v5776_v8 = vsub.s32 %v5773_v62, %v6774_v20  ;;  %vm5782_vm0 = vcmask 228512   ;;  %v6095_v62 = vld [vmem:[%s10357_s3 + $0x10] sm:$0xff] }
 0xab0   :  { %vm5844_vm1 = vcmask 15360   ;;  %v5802_v50 = vsub.s32 %v5799_v27, %v6774_v20  ;;  %vm5808_vm8 = vcmask 310512   ;;  %v5698_v2 = vsub.s32 %v5695_v47, %v6774_v20  ;;  %6196 = vmatpush3.msra.mxu1 %v6095_v62  ;;  %v6094_v27 = vld [vmem:[%s10357_s3 + $0x8] sm:$0xff]  ;;  %v6093_v47 = vld [vmem:[%s10357_s3] sm:$0xff] }
 0xab1   :  { %vm5846_vm14 = vcmask 97280   ;;  %v5703_v57 = vsub.s32 %v5700_v22, %v6774_v20  ;;  %vm5705_vm2 = vcmask 1032112   ;;  %v5725_v11 = vsub.s32 %v5722_v37, %v6774_v20  ;;  %6197 = vmatprep.subr.mxu1 %v6327_v44 }
 0xab2   :  { %vm5838_vm6 = vcmask 818176   ;;  %vm5848_vm7 = vcmask 179200   ;;  %vm5978_vm9 = vcmask 261120   ;;  %vm5840_vm12 = vcmask 900096   ;;  %6198 = vmatpush3.msra.mxu1 %v6094_v27 }
 0xab3   :  { %vm6014_vm15 = vcmask 670720   ;;  %vm5842_vm10 = vcmask 982016   ;;  %v5839_v63 = vsel %vm5838_vm6, %v5837_v49, %v5689_v0  ;;  %6199 = vmatprep.subr.mxu1 %v6327_v44  ;;  %vm6177_vm3 = vcmask 41984  }
 0xab4   :  { %v10136_v60 = vpop.xlane.xlu0 %3312  ;;  %6200 = vmatpush3.msra.mxu1 %v6093_v47 }
 0xab5   :  { %v5751_v48 = vrot.slane %v10136_v60, %v5750_v54 }
 0xab8   :  { %v10134_v35 = vpop.xlane.xlu1 %3316 }
 0xabc   :  { %v10152_v61 = vpop.xlane.xlu0 %3319 }
 0xabd   :  { %v5761_v60 = vrot.slane %v10152_v61, %v5750_v54  ;;  %v6186_v54 = vld [vmem:[%s10359_s4] ss:$0 sm:$0xff] }
 0xac0   :  { %v10138_v4 = vpop.xlane.xlu1 %3322 }
 0xac1   :  { %v5765_v33 = vrot.slane %v10138_v4, %v10047_v24 }
 0xacc   :  { %v10184_v46 = vpop.xlane.xlu0 %3121 }
 0xacd   :  { %v5730_v4 = vrot.slane %v10184_v46, %v6782_v17 }
 0xad4   :  { %v10154_v30 = vpop.xlane.xlu1 %3127  ;;  %v10206_v39 = vpop.xlane.xlu0 %3506 }
 0xad5   :  { %v5738_v38 = vrot.slane %v10154_v30, %v6782_v17  ;;  %v5777_v25 = vrot.slane %v10206_v39, %v5776_v8 }
 0xad7   :  { %v5740_v61 = vsel %vm406_vm4, %v5738_v38, %v5730_v4 }
 0xad8   :  { %v10196_v23 = vpop.xlane.xlu1 %3509 }
 0xad9   :  { %v5781_v19 = vrot.slane %v10196_v23, %v10050_v5  ;;  %v5766_v23 = vsel %vm5756_vm13, %v5765_v33, %v5761_v60 }
 0xadc   :  { %v10222_v55 = vpop.xlane.xlu0 %3512 }
 0xadd   :  { %v5787_v20 = vrot.slane %v10222_v55, %v5776_v8 }
 0xae0   :  { %v10213_v36 = vpop.xlane.xlu1 %3515 }
 0xae1   :  { %v5791_v16 = vrot.slane %v10213_v36, %v10050_v5  ;;  %v5755_v36 = vrot.slane %v10134_v35, %v10047_v24 }
 0xae3   :  { %v5792_v24 = vsel %vm5782_vm0, %v5791_v16, %v5787_v20  ;;  %v5757_v6 = vsel %vm5756_vm13, %v5755_v36, %v5751_v48 }
 0xae4   :  { %v5767_v34 = vsel %vm406_vm4, %v5766_v23, %v5757_v6 }
 0xae5   :  { %v5845_v28 = vsel %vm5844_vm1, %v5740_v61, %v5767_v34 }
 0xae8   :  { %v10238_v3 = vpop.xlane.xlu0 %3699 }
 0xae9   :  { %v5803_v55 = vrot.slane %v10238_v3, %v5802_v50 }
 0xaec   :  { %v10231_v26 = vpop.xlane.xlu1 %3702 }
 0xaed   :  { %v5807_v30 = vrot.slane %v10231_v26, %v10056_v1 }
 0xaef   :  { %v5809_v40 = vsel %vm5808_vm8, %v5807_v30, %v5803_v55 }
 0xaf0   :  { %v10254_v13 = vpop.xlane.xlu0 %3705 }
 0xaf1   :  { %v5813_v56 = vrot.slane %v10254_v13, %v5802_v50 }
 0xaf4   :  { %v10245_v32 = vpop.xlane.xlu1 %3708  ;;  %v10272_v31 = vpop.xlane.xlu0 %2925 }
 0xaf5   :  { %v5817_v10 = vrot.slane %v10245_v32, %v10056_v1  ;;  %v5783_v1 = vsel %vm5782_vm0, %v5781_v19, %v5777_v25  ;;  %v5699_v26 = vrot.slane %v10272_v31, %v5698_v2 }
 0xaf7   :  { %v5818_v17 = vsel %vm5808_vm8, %v5817_v10, %v5813_v56 }
 0xaf8   :  { %v10265_v9 = vpop.xlane.xlu1 %2928  ;;  %v2932_v58 = vpop.xlane.xlu0 %2931  ;;  %v5819_v14 = vsel %vm406_vm4, %v5818_v17, %v5809_v40 }
 0xaf9   :  { %v5704_v5 = vrot.slane %v10265_v9, %v5703_v57  ;;  %v5710_v35 = vrot.slane %v2932_v58, %v5698_v2  ;;  %v5793_v9 = vsel %vm406_vm4, %v5792_v24, %v5783_v1 }
 0xafa   :  { %v5847_v12 = vsel %vm5846_vm14, %v5845_v28, %v5793_v9 }
 0xafb   :  { %v5706_v3 = vsel %vm5705_vm2, %v5704_v5, %v5699_v26  ;;  %v5849_v31 = vsel %vm5848_vm7, %v5847_v12, %v5819_v14 }
 0xafc   :  { %v2935_v15 = vpop.xlane.xlu1 %2934  ;;  %v3119_v46 = vpop.xlane.xlu0 %3118 }
 0xafd   :  { %v5714_v45 = vrot.slane %v2935_v15, %v5703_v57  ;;  %v5726_v43 = vrot.slane %v3119_v46, %v5725_v11 }
 0xaff   :  { %v5715_v39 = vsel %vm5705_vm2, %v5714_v45, %v5710_v35 }
 0xb00   :  { %v3125_v32 = vpop.xlane.xlu1 %3124  ;;  %v5716_v52 = vsel %vm406_vm4, %v5715_v39, %v5706_v3 }
 0xb01   :  { %v5734_v13 = vrot.slane %v3125_v32, %v5725_v11  ;;  %v5841_v18 = vsel %vm5840_vm12, %v5839_v63, %v5716_v52 }
 0xb03   :  { %v5739_v29 = vsel %vm406_vm4, %v5734_v13, %v5726_v43  ;;  %vm6329_vm4 = vmmov 0  }
 0xb04   :  { %v5843_v42 = vsel %vm5842_vm10, %v5841_v18, %v5739_v29  ;;  %6201 = vmatprep.mubr.msk.f32.mxu1 %vm6329_vm4, %v6327_v44 }
 0xb12   :  { %v5976_v7 = vpop.permute.xlu0 %5975 }
 0xb13   :  { %v5979_v41 = vsel %vm5978_vm9, %v5849_v31, %v5976_v7 }
 0xb14   :  { %6185 = vmatprep.mubr.msk.f32.mxu0 %vm6014_vm15, %v5979_v41 }
 0xb15   :  { %6087 = vmatmul.mubr.f32.vlgmr.msra.gmra.mxu0 %v5843_v42 }
 0xbd5   :  { %v6088_v53 = vpop.f32.mrf.mxu0 }
 0xbd6   :  { %v6089_v22 = vadd.f32 %v6183_v51, %v6088_v53 }
 0xbd7   :  { %v6090_v37 = vpop.f32.mrf.mxu0 }
 0xbd8   :  { %v6092_v21 = vmax.f32 %v6089_v22, 0.0 }
 0xbda   :  { %6202 = vmatmul.mubr.msk.f32.vlgmr.msra.gmra.mxu1 %vm5978_vm9, %v6092_v21 }
 0xc9a   :  { %v6173_v15 = vpop.f32.mrf.mxu1 }
 0xc9b   :  { %v6174_v59 = vadd.f32 %v6186_v54, %v6173_v15 }
 0xc9c   :  { %v6203_v0 = vpop.f32.mrf.mxu1 }
 0xc9d   :  { %6178 = vst.msk [vmem:[%s10360_s5] sm:$0x3] %vm6177_vm3, %v6174_v59 }

// kernel: stn_forward.9
= control target key start
LH: loop header
LB: loop body
LE: loop exit
PB: predicated region body
PF: predicated region fallthrough
CT: control target
= control target key end

     0   :  { %s595_s9 = smov 0   ;;  %s597_s10 = smov 0   ;;  %s676_s0 = inlined_call_operand.vmem [shape: f32[4,2,3,256], index: 0, kind: input, shape index: {}]   ;;  %s677_s1 = inlined_call_operand.vmem [shape: f32[4,2,1,256], index: 1, kind: input, shape index: {}]   ;;  %s678_s2 = inlined_call_operand.vmem [shape: f32[2,3,256], index: 2, kind: output, shape index: {}]  }
   0x1   :  { %s599_s11 = smov 0   ;;  %s601_s12 = smov 0  }
   0x2   :  { %s603_s13 = smov 0  }
   0x3 LB: > { %s24_s14 = sadd.s32 1, %s574_s12  ;;  %p40_p1 = scmp.ne.s32.totalorder %s566_s10, %s562_s9  ;;  %s578_s13 = sphi %s603_s13, %s12_s13   ;;  %s574_s12 = sphi %s601_s12, %s683_s12   ;;  %s570_s11 = sphi %s599_s11, %s682_s11   ;;  %s566_s10 = sphi %s597_s10, %s681_s10   ;;  %s562_s9 = sphi %s595_s9, %s680_s9  }
   0x4   : > { %p26_p0 = scmp.ge.s32.totalorder %s24_s14, 2  ;;  %p41_p2 = scmp.eq.s32.totalorder %s578_s13, 0 }
   0x5   : > { %s33_s17 = sadd.s32 1, %s566_s10  ;;  %p479_p5 = scmp.ge.s32.totalorder %s578_s13, 2 }
   0x6   : > { %s685_s14 = smov (%p26_p0, %s24_s14), 0  ;;  %p626_p3 = por %p41_p2, %p40_p1 }
   0x7   : > { %s28_s16 = ssub.s32 %s574_s12, %s685_s14  ;;  %122 = sbr.rel (%p479_p5) target bundleno = 24 (0x18), region = 16 }
   0x8   : > { %p31_p4 = scmp.eq.s32.totalorder %s28_s16, 0 }
   0xa   : > { %s634_s18 = scalar_select %p31_p4, %s566_s10, %s33_s17  }
   0xc   : > { %125 = sbr.rel (!%p626_p3) target bundleno = 18 (0x12), region = 20  ;;  %s127_s19 = sand.u32 (%p626_p3), 1, %s566_s10  }
   0xd   : > { %s498_s20 = sshll.u32 (%p626_p3), %s574_s12, 3  ;;  %s480_s21 = sshll.u32 (%p626_p3), %s127_s19, 5 }
   0xe   : > { %s134_s24 = scalar_lea.vmem (%p626_p3), %s676_s0, %s498_s20  ;;  %s129_s25 = scalar_lea.vmem (%p626_p3), [#allocation2], %s480_s21 }
   0xf   : > { %v169_v0 = vld [vmem:[%s134_s24] sm:$0xff] (%p626_p3)  ;;  %v171_v1 = vld [vmem:[%s134_s24 + $0x10] sm:$0xff] (%p626_p3) }
  0x10   : > { %v173_v2 = vld [vmem:[%s134_s24 + $0x20] sm:$0xff] (%p626_p3)  ;;  %170 = vst [vmem:[%s129_s25] sm:$0xff] (%p626_p3), %v169_v0  ;;  %172 = vst [vmem:[%s129_s25 + $0x8] sm:$0xff] (%p626_p3), %v171_v1  ;;  %v175_v3 = vld [vmem:[%s134_s24 + $0x30] sm:$0xff] (%p626_p3) }
  0x11   : > { %174 = vst [vmem:[%s129_s25 + $0x10] sm:$0xff] %v173_v2  ;;  %176 = vst [vmem:[%s129_s25 + $0x18] sm:$0xff] %v175_v3 }
  0x12 PF: > { %182 = sbr.rel (!%p626_p3) target bundleno = 24 (0x18), region = 58  ;;  %s184_s26 = sand.u32 (%p626_p3), 1, %s566_s10  }
  0x13   : > { %s484_s27 = sshll.u32 (%p626_p3), %s574_s12, 1  ;;  %s483_s28 = sshll.u32 (%p626_p3), %s184_s26, 3 }
  0x14   : > { %s190_s3 = scalar_lea.vmem (%p626_p3), %s677_s1, %s484_s27  ;;  %s186_s4 = scalar_lea.vmem (%p626_p3), [#allocation3], %s483_s28 }
  0x15   : > { %v207_v4 = vld [vmem:[%s190_s3] sm:$0x3] (%p626_p3)  ;;  %v209_v5 = vld [vmem:[%s190_s3 + $0x4] sm:$0x3] (%p626_p3)  ;;  %v211_v6 = vld [vmem:[%s190_s3 + $0x8] sm:$0x3] (%p626_p3) }
  0x16   : > { %208 = vst [vmem:[%s186_s4] sm:$0x3] (%p626_p3), %v207_v4  ;;  %210 = vst [vmem:[%s186_s4 + $0x2] sm:$0x3] (%p626_p3), %v209_v5  ;;  %v213_v7 = vld [vmem:[%s190_s3 + $0xc] sm:$0x3] (%p626_p3) }
  0x17   : > { %212 = vst [vmem:[%s186_s4 + $0x4] sm:$0x3] %v211_v6  ;;  %214 = vst [vmem:[%s186_s4 + $0x6] sm:$0x3] %v213_v7 }
  0x18 PF: > { %p485_p6 = scmp.ge.s32.totalorder %s578_s13, 1  ;;  %p245_p7 = scmp.lt.s32.totalorder %s578_s13, 3 }
  0x1a   : > { %p246_p8 = pnand %p485_p6, %p245_p7 }
  0x1b   : > { %s252_s5 = sand.u32 (!%p246_p8), 1, %s562_s9   ;;  %p291_p9 = scmp.lt.s32.totalorder (!%p246_p8), %s570_s11, 1 }
  0x1c   : > { %249 = sbr.rel (%p246_p8) target bundleno = 52 (0x34), region = 99  ;;  %s486_s6 = sshll.u32 (!%p246_p8), %s252_s5, 5 }
  0x1d   : > { %s487_s7 = sshll.u32 (!%p246_p8), %s252_s5, 3  ;;  %s254_s15 = scalar_lea.vmem (!%p246_p8), [#allocation2], %s486_s6 }
  0x1e   : > { %s261_s8 = scalar_lea.vmem (!%p246_p8), [#allocation3], %s487_s7 }
  0x21   : > { %v303_v8 = vlaneseq  ;;  %v301_v10 = vld [vmem:[%s261_s8] sm:$0x3]  ;;  %v491_v13 = vld [vmem:[%s261_s8 + $0x2] sm:$0x3]  ;;  %v493_v14 = vld [vmem:[%s261_s8 + $0x4] sm:$0x3] }
  0x22   : > { %v495_v19 = vld [vmem:[%s261_s8 + $0x6] sm:$0x3]  ;;  %s687_s11 = smov (!%p291_p9, %s570_s11), 1  ;;  %v492_v28 = vld [vmem:[%s254_s15 + $0x10] sm:$0x77] }
  0x23   : > { %v304_v9 = vshrl.u32 %v303_v8, 7  ;;  %v300_v20 = vld [vmem:[%s254_s15] sm:$0x77]  ;;  %v490_v21 = vld [vmem:[%s254_s15 + $0x8] sm:$0x77]  ;;  %s499_s9 = sshll.u32 %s687_s11, 3 }
  0x24   : > { %v494_v30 = vld [vmem:[%s254_s15 + $0x18] sm:$0x77]  ;;  %s298_s19 = scalar_lea.vmem %s678_s2, %s499_s9 }
  0x25   : > { %v305_v11 = vsub.s32 0, %v304_v9  ;;  %v309_v12 = vsub.s32 1, %v304_v9 }
  0x27   : > { %v306_v15 = vrot.slane %v301_v10, %v305_v11  ;;  %v310_v16 = vrot.slane %v301_v10, %v309_v12  ;;  %v322_v17 = vrot.slane %v491_v13, %v305_v11  ;;  %v326_v18 = vrot.slane %v491_v13, %v309_v12 }
  0x28   : > { %v339_v22 = vrot.slane %v493_v14, %v305_v11  ;;  %v343_v23 = vrot.slane %v493_v14, %v309_v12  ;;  %v356_v24 = vrot.slane %v495_v19, %v305_v11  ;;  %v360_v25 = vrot.slane %v495_v19, %v309_v12 }
  0x29   : > { %v311_v26 = vcombine.low %v306_v15, %v310_v16  ;;  %v327_v27 = vcombine.low %v322_v17, %v326_v18 }
  0x2a   : > { %v344_v29 = vcombine.low %v339_v22, %v343_v23  ;;  %v361_v31 = vcombine.low %v356_v24, %v360_v25 }
  0x2b   : > { %v313_v32 = vmul.f32 %v311_v26, %v300_v20  ;;  %v329_v33 = vmul.f32 %v490_v21, %v327_v27 }
  0x2c   : > { %v346_v34 = vmul.f32 %v492_v28, %v344_v29  ;;  %v363_v36 = vmul.f32 %v494_v30, %v361_v31 }
  0x2d   : > { %v330_v35 = vadd.f32 %v329_v33, %v313_v32 }
  0x2f   : > { %v347_v37 = vadd.f32 %v346_v34, %v330_v35 }
  0x31   : > { %v364_v38 = vadd.f32 %v363_v36, %v347_v37 }
  0x33   : > { %365 = vst [vmem:[%s298_s19] sm:$0x77] %v364_v38 }
  0x34 PF: > { %s12_s13 = sadd.s32 1, %s578_s13   ;;  %s680_s9 = smov %s566_s10 }
  0x35   : > { %p9_p10 = scmp.ge.s32.totalorder %s12_s13, 4   ;;  %s681_s10 = smov %s634_s18 }
  0x36   : > { %s682_s11 = smov %s574_s12  ;;  %s683_s12 = smov %s685_s14 }
  0x37   :  { %11 = sbr.rel (!%p9_p10) target bundleno = 3 (0x3), region = 156 }

</bundles_post_ra>
